<compile_context>
chip_gen: v7x
topology: tpu7x:2x2x1
jax: 0.10.0
libtpu: 0.0.40
codegen_flags: <defaults>
</compile_context>

<pallas_src>
import jax
import jax.numpy as jnp
from jax import lax
from jax.experimental import pallas as pl
from jax.experimental.pallas import tpu as pltpu


def _conv_out_size(n, k, s, p):
    return (n + 2 * p - k) // s + 1


# ---------------------------------------------------------------------------
# Fused kernel: the whole TemporalDiscriminator forward for ONE batch element.
# ---------------------------------------------------------------------------
def _fused_net_kernel(x_ref, *refs):
    # refs = (B_0, Csel_0, shift_0, ..., B_3, Csel_3, shift_3, w_final, o_ref)
    o_ref = refs[-1]
    w_final_ref = refs[-2]
    num_layers = (len(refs) - 2) // 3

    a = x_ref[0]                                            # (C0*H0, W0) bf16
    for l in range(num_layers):                             # static unroll (4 layers)
        b_ref = refs[3 * l]                                 # (k, Cout*Hout, Cin*Hin) bf16
        c_ref = refs[3 * l + 1]                             # (k, Win, Wout) bf16 0/1
        sh_ref = refs[3 * l + 2]                            # (Cout*Hout, 1) f32
        k = c_ref.shape[0]
        acc = None
        for kx in range(k):                                 # static unroll (k = 4)
            # column tap + stride + zero-pad semantics: exact gather as a matmul
            y = jnp.dot(a, c_ref[kx], preferred_element_type=jnp.float32)
            # row taps + conv weights + channel contraction (BN scale pre-folded)
            z = jnp.dot(b_ref[kx], y.astype(jnp.bfloat16),
                        preferred_element_type=jnp.float32)
            acc = z if acc is None else acc + z
        acc = acc + sh_ref[...]                             # BatchNorm (eval) shift
        acc = jnp.maximum(acc, 0.2 * acc)                   # LeakyReLU(0.2)
        a = acc.astype(jnp.bfloat16)                        # (Cout*Hout, Wout)

    # Final ConvBlock: 4x4 / stride-4 / valid conv over the remaining 4x4 map
    # -> one logit.  VPU multiply + reduce, exact sigmoid.
    prod = a.astype(jnp.float32) * w_final_ref[...]         # (C4*H4, W4) f32
    v = jnp.sum(prod, axis=1, keepdims=True)                # cross-lane reduce
    v = jnp.sum(v, axis=0, keepdims=True)                   # cross-sublane reduce -> (1, 1)
    sig = 1.0 / (1.0 + jnp.exp(-v))                         # exact sigmoid
    o_ref[...] = jnp.reshape(sig, (1, 1, 1)).astype(o_ref.dtype)


# ---------------------------------------------------------------------------
# Parameters (mirrors TemporalDiscriminator.__init__: five ConvBlocks, bias=False)
# ---------------------------------------------------------------------------
def init_params(key, nc, ndf):
    cfgs = [
        # (cin,    cout,    k, s, pad, batchnorm, act)
        (2 * nc,   ndf,     4, 2, 1,   False, "leaky_relu"),
        (ndf,      2 * ndf, 4, 2, 1,   True,  "leaky_relu"),
        (2 * ndf,  4 * ndf, 4, 2, 1,   True,  "leaky_relu"),
        (4 * ndf,  8 * ndf, 4, 2, 1,   True,  "leaky_relu"),
        (8 * ndf,  1,       4, 4, 0,   False, "sigmoid"),
    ]
    params = []
    for (cin, cout, k, s, p, bn, act) in cfgs:
        key, wk = jax.random.split(key)
        fan_in = cin * k * k
        w = jax.random.normal(wk, (cout, cin, k, k), jnp.float32) / jnp.sqrt(fan_in)
        if bn:
            # BatchNorm2d default init, inference mode: gamma=1, beta=0, mean=0, var=1
            gamma = jnp.ones((cout,), jnp.float32)
            beta = jnp.zeros((cout,), jnp.float32)
            rmean = jnp.zeros((cout,), jnp.float32)
            rvar = jnp.ones((cout,), jnp.float32)
            eps = 1e-5
            scale = gamma / jnp.sqrt(rvar + eps)
            shift = beta - rmean * scale
        else:
            scale = jnp.ones((cout,), jnp.float32)
            shift = jnp.zeros((cout,), jnp.float32)
        params.append(dict(w_oihw=w, scale=scale, shift=shift,
                           k=k, s=s, p=p, act=act))
    return params


def build_fused_params(params, h, w):
    """Precompute the matmul operands of the fused kernel.

    For each stride-2 layer (BN scale already folded into the weights w'):
      Csel[kx, c, ox]             = [c == s*ox + kx - p]
      B[kx, co*Hout+oy, ci*Hin+r] = sum_ky w'[co,ci,ky,kx] * [r == s*oy + ky - p]
      shift_col[co*Hout+oy, 0]    = BN shift[co]
    so that  out_mat = sum_kx B[kx] @ (in_mat @ Csel[kx]) + shift_col  is exactly
    conv + BatchNorm(eval) in (C*H, W) activation layout (out-of-range taps drop
    out, which reproduces zero padding).  The final 4x4/stride-4/valid conv is
    returned as a (C4*H4, W4) weight map for an elementwise multiply + reduce.
    """
    b_mats, c_mats, shift_cols = [], [], []
    hin, win = h, w
    for lp in params[:-1]:
        wgt = lp["w_oihw"] * lp["scale"][:, None, None, None]        # (Cout,Cin,k,k)
        cout, cin, k, _ = wgt.shape
        s, p = lp["s"], lp["p"]
        hout = _conv_out_size(hin, k, s, p)
        wout = _conv_out_size(win, k, s, p)

        src_c = s * jnp.arange(wout)[None, :] + jnp.arange(k)[:, None] - p   # (k, Wout)
        csel = (jnp.arange(win)[None, :, None] == src_c[:, None, :])
        c_mats.append(csel.astype(jnp.bfloat16))                      # (k, Win, Wout)

        src_r = s * jnp.arange(hout)[:, None] + jnp.arange(k)[None, :] - p   # (Hout, k)
        rsel = (src_r[:, :, None] == jnp.arange(hin)[None, None, :]).astype(jnp.float32)
        b = jnp.einsum("abyx,oyr->xaobr", wgt, rsel)                  # (k,Cout,Hout,Cin,Hin)
        b_mats.append(b.reshape(k, cout * hout, cin * hin).astype(jnp.bfloat16))

        shift_cols.append(jnp.repeat(lp["shift"], hout)[:, None].astype(jnp.float32))
        hin, win = hout, wout

    lp = params[-1]
    wgt5 = (lp["w_oihw"] * lp["scale"][:, None, None, None])[0]       # (Cin, k, k)
    cin5, k5, _ = wgt5.shape
    assert lp["s"] == k5 and lp["p"] == 0 and hin == k5 and win == k5, (
        "final ConvBlock must reduce the remaining map to 1x1")
    w_final = wgt5.reshape(cin5 * k5, k5).astype(jnp.float32)         # (C4*H4, W4)

    return tuple(b_mats), tuple(c_mats), tuple(shift_cols), w_final


# ---------------------------------------------------------------------------
# Forward: ONE pallas_call for the whole network, grid over batch.
# ---------------------------------------------------------------------------
def fused_forward(x_nchw, b_mats, c_mats, shift_cols, w_final):
    # TODO(synk): Dropout2d(0.01) is identity in eval mode; training-mode
    # channel dropout is intentionally not implemented.
    n, c, h, w = x_nchw.shape
    x2 = x_nchw.reshape(n, c * h, w).astype(jnp.bfloat16)   # (N, C*H, W), free reshape

    operands = [x2]
    in_specs = [pl.BlockSpec((1, c * h, w), lambda i: (i, 0, 0))]
    for bm, cm, sh in zip(b_mats, c_mats, shift_cols):
        operands += [bm, cm, sh]
        in_specs += [
            pl.BlockSpec(bm.shape, lambda i: (0, 0, 0)),    # weights resident across grid
            pl.BlockSpec(cm.shape, lambda i: (0, 0, 0)),
            pl.BlockSpec(sh.shape, lambda i: (0, 0)),
        ]
    operands.append(w_final)
    in_specs.append(pl.BlockSpec(w_final.shape, lambda i: (0, 0)))

    out = pl.pallas_call(
        _fused_net_kernel,
        out_shape=jax.ShapeDtypeStruct((n, 1, 1), jnp.float32),
        grid_spec=pltpu.PrefetchScalarGridSpec(
            num_scalar_prefetch=0,
            grid=(n,),
            in_specs=in_specs,
            out_specs=pl.BlockSpec((1, 1, 1), lambda i: (i, 0, 0)),
        ),
        compiler_params=pltpu.CompilerParams(
            dimension_semantics=("parallel",)),
    )(*operands)
    # (N, 1, 1) -> squeeze, matching torch's x.squeeze() on (N, 1, 1, 1)
    return jnp.squeeze(out)


forward = jax.jit(fused_forward)


def reference_forward(x_nchw, params):
    """Pure-XLA f32 reference (lax.conv) used only for a correctness cross-check."""
    y = x_nchw
    for lp in params:
        y = lax.conv_general_dilated(
            y, lp["w_oihw"], window_strides=(lp["s"], lp["s"]),
            padding=[(lp["p"], lp["p"]), (lp["p"], lp["p"])],
            dimension_numbers=("NCHW", "OIHW", "NCHW"))
        y = y * lp["scale"][None, :, None, None] + lp["shift"][None, :, None, None]
        if lp["act"] == "leaky_relu":
            y = jnp.where(y > 0, y, 0.2 * y)
        else:
            y = jax.nn.sigmoid(y)
    return jnp.squeeze(y)


if __name__ == "__main__":
    key = jax.random.PRNGKey(0)
    nc, ndf = 2, 8
    N, H, W = 2, 64, 64                       # 64 -> 32 -> 16 -> 8 -> 4 -> 1
    kdata, kparam = jax.random.split(key)

    # PyTorch-style NCHW input with 2*nc channels (two concatenated frames)
    x = jax.random.normal(kdata, (N, 2 * nc, H, W), jnp.float32)
    params = init_params(kparam, nc, ndf)
    b_mats, c_mats, shift_cols, w_final = build_fused_params(params, H, W)

    out = jax.block_until_ready(forward(x, b_mats, c_mats, shift_cols, w_final))
    ref = jax.block_until_ready(reference_forward(x, params))

    assert out.shape == (N,), out.shape
    assert bool(jnp.all((out >= 0.0) & (out <= 1.0)))             # sigmoid range
    assert bool(jnp.allclose(out, ref, atol=5e-2)), (out, ref)    # bf16 weight/act tolerance
    print("KERNEL_OK")
</pallas_src>

<mosaic_0001>
module attributes {stable_mosaic.version = 11 : i64} {
  func.func @_fused_net_kernel(%arg0: i32, %arg1: memref<1x256x64xbf16, #tpu.memory_space<vmem>>, %arg2: memref<4x256x256xbf16, #tpu.memory_space<vmem>>, %arg3: memref<4x64x32xbf16, #tpu.memory_space<vmem>>, %arg4: memref<256x1xf32, #tpu.memory_space<vmem>>, %arg5: memref<4x256x256xbf16, #tpu.memory_space<vmem>>, %arg6: memref<4x32x16xbf16, #tpu.memory_space<vmem>>, %arg7: memref<256x1xf32, #tpu.memory_space<vmem>>, %arg8: memref<4x256x256xbf16, #tpu.memory_space<vmem>>, %arg9: memref<4x16x8xbf16, #tpu.memory_space<vmem>>, %arg10: memref<256x1xf32, #tpu.memory_space<vmem>>, %arg11: memref<4x256x256xbf16, #tpu.memory_space<vmem>>, %arg12: memref<4x8x4xbf16, #tpu.memory_space<vmem>>, %arg13: memref<256x1xf32, #tpu.memory_space<vmem>>, %arg14: memref<256x4xf32, #tpu.memory_space<vmem>>, %arg15: memref<1x1x1xf32, #tpu.memory_space<vmem>>) attributes {dimension_semantics = [#tpu.dimension_semantics<parallel>], iteration_bounds = array<i64: 2>, scalar_prefetch = 0 : i64, scratch_operands = 0 : i64, tpu.core_type = #tpu.core_type<tc>, window_params = [{transform_indices = @transform_0, window_bounds = array<i64: 1, 256, 64>}, {pipeline_mode = #tpu.pipeline_mode<synchronous>, transform_indices = @transform_1, window_bounds = array<i64: 4, 256, 256>}, {pipeline_mode = #tpu.pipeline_mode<synchronous>, transform_indices = @transform_2, window_bounds = array<i64: 4, 64, 32>}, {pipeline_mode = #tpu.pipeline_mode<synchronous>, transform_indices = @transform_3, window_bounds = array<i64: 256, 1>}, {pipeline_mode = #tpu.pipeline_mode<synchronous>, transform_indices = @transform_4, window_bounds = array<i64: 4, 256, 256>}, {pipeline_mode = #tpu.pipeline_mode<synchronous>, transform_indices = @transform_5, window_bounds = array<i64: 4, 32, 16>}, {pipeline_mode = #tpu.pipeline_mode<synchronous>, transform_indices = @transform_6, window_bounds = array<i64: 256, 1>}, {pipeline_mode = #tpu.pipeline_mode<synchronous>, transform_indices = @transform_7, window_bounds = array<i64: 4, 256, 256>}, {pipeline_mode = #tpu.pipeline_mode<synchronous>, transform_indices = @transform_8, window_bounds = array<i64: 4, 16, 8>}, {pipeline_mode = #tpu.pipeline_mode<synchronous>, transform_indices = @transform_9, window_bounds = array<i64: 256, 1>}, {pipeline_mode = #tpu.pipeline_mode<synchronous>, transform_indices = @transform_10, window_bounds = array<i64: 4, 256, 256>}, {pipeline_mode = #tpu.pipeline_mode<synchronous>, transform_indices = @transform_11, window_bounds = array<i64: 4, 8, 4>}, {pipeline_mode = #tpu.pipeline_mode<synchronous>, transform_indices = @transform_12, window_bounds = array<i64: 256, 1>}, {pipeline_mode = #tpu.pipeline_mode<synchronous>, transform_indices = @transform_13, window_bounds = array<i64: 256, 4>}, {transform_indices = @transform_14, window_bounds = array<i64: 1, 1, 1>}]} {
    %c0 = arith.constant 0 : index
    %c0_0 = arith.constant 0 : index
    %c0_1 = arith.constant 0 : index
    %0 = vector.load %arg1[%c0, %c0_0, %c0_1] : memref<1x256x64xbf16, #tpu.memory_space<vmem>>, vector<1x256x64xbf16>
    %1 = vector.shape_cast %0 : vector<1x256x64xbf16> to vector<256x64xbf16>
    %c0_2 = arith.constant 0 : index
    %c0_3 = arith.constant 0 : index
    %c0_4 = arith.constant 0 : index
    %2 = vector.load %arg3[%c0_2, %c0_3, %c0_4] : memref<4x64x32xbf16, #tpu.memory_space<vmem>>, vector<1x64x32xbf16>
    %3 = vector.shape_cast %2 : vector<1x64x32xbf16> to vector<64x32xbf16>
    %cst = arith.constant dense<0.000000e+00> : vector<256x32xf32>
    %4 = tpu.matmul %1, %3, %cst {dimension_numbers = #tpu.dot_dimension_numbers<[1], [0], [0], [1], [0, 0, 1, 1], [], []>} : vector<256x64xbf16>, vector<64x32xbf16>, vector<256x32xf32> -> vector<256x32xf32>
    %c0_5 = arith.constant 0 : index
    %c0_6 = arith.constant 0 : index
    %c0_7 = arith.constant 0 : index
    %5 = vector.load %arg2[%c0_5, %c0_6, %c0_7] : memref<4x256x256xbf16, #tpu.memory_space<vmem>>, vector<1x256x256xbf16>
    %6 = vector.shape_cast %5 : vector<1x256x256xbf16> to vector<256x256xbf16>
    %7 = arith.truncf %4 : vector<256x32xf32> to vector<256x32xbf16>
    %cst_8 = arith.constant dense<0.000000e+00> : vector<256x32xf32>
    %8 = tpu.matmul %6, %7, %cst_8 {dimension_numbers = #tpu.dot_dimension_numbers<[1], [0], [0], [1], [0, 0, 1, 1], [], []>} : vector<256x256xbf16>, vector<256x32xbf16>, vector<256x32xf32> -> vector<256x32xf32>
    %c1 = arith.constant 1 : index
    %c0_9 = arith.constant 0 : index
    %c0_10 = arith.constant 0 : index
    %9 = vector.load %arg3[%c1, %c0_9, %c0_10] : memref<4x64x32xbf16, #tpu.memory_space<vmem>>, vector<1x64x32xbf16>
    %10 = vector.shape_cast %9 : vector<1x64x32xbf16> to vector<64x32xbf16>
    %cst_11 = arith.constant dense<0.000000e+00> : vector<256x32xf32>
    %11 = tpu.matmul %1, %10, %cst_11 {dimension_numbers = #tpu.dot_dimension_numbers<[1], [0], [0], [1], [0, 0, 1, 1], [], []>} : vector<256x64xbf16>, vector<64x32xbf16>, vector<256x32xf32> -> vector<256x32xf32>
    %c1_12 = arith.constant 1 : index
    %c0_13 = arith.constant 0 : index
    %c0_14 = arith.constant 0 : index
    %12 = vector.load %arg2[%c1_12, %c0_13, %c0_14] : memref<4x256x256xbf16, #tpu.memory_space<vmem>>, vector<1x256x256xbf16>
    %13 = vector.shape_cast %12 : vector<1x256x256xbf16> to vector<256x256xbf16>
    %14 = arith.truncf %11 : vector<256x32xf32> to vector<256x32xbf16>
    %cst_15 = arith.constant dense<0.000000e+00> : vector<256x32xf32>
    %15 = tpu.matmul %13, %14, %cst_15 {dimension_numbers = #tpu.dot_dimension_numbers<[1], [0], [0], [1], [0, 0, 1, 1], [], []>} : vector<256x256xbf16>, vector<256x32xbf16>, vector<256x32xf32> -> vector<256x32xf32>
    %16 = arith.addf %8, %15 : vector<256x32xf32>
    %c2 = arith.constant 2 : index
    %c0_16 = arith.constant 0 : index
    %c0_17 = arith.constant 0 : index
    %17 = vector.load %arg3[%c2, %c0_16, %c0_17] : memref<4x64x32xbf16, #tpu.memory_space<vmem>>, vector<1x64x32xbf16>
    %18 = vector.shape_cast %17 : vector<1x64x32xbf16> to vector<64x32xbf16>
    %cst_18 = arith.constant dense<0.000000e+00> : vector<256x32xf32>
    %19 = tpu.matmul %1, %18, %cst_18 {dimension_numbers = #tpu.dot_dimension_numbers<[1], [0], [0], [1], [0, 0, 1, 1], [], []>} : vector<256x64xbf16>, vector<64x32xbf16>, vector<256x32xf32> -> vector<256x32xf32>
    %c2_19 = arith.constant 2 : index
    %c0_20 = arith.constant 0 : index
    %c0_21 = arith.constant 0 : index
    %20 = vector.load %arg2[%c2_19, %c0_20, %c0_21] : memref<4x256x256xbf16, #tpu.memory_space<vmem>>, vector<1x256x256xbf16>
    %21 = vector.shape_cast %20 : vector<1x256x256xbf16> to vector<256x256xbf16>
    %22 = arith.truncf %19 : vector<256x32xf32> to vector<256x32xbf16>
    %cst_22 = arith.constant dense<0.000000e+00> : vector<256x32xf32>
    %23 = tpu.matmul %21, %22, %cst_22 {dimension_numbers = #tpu.dot_dimension_numbers<[1], [0], [0], [1], [0, 0, 1, 1], [], []>} : vector<256x256xbf16>, vector<256x32xbf16>, vector<256x32xf32> -> vector<256x32xf32>
    %24 = arith.addf %16, %23 : vector<256x32xf32>
    %c3 = arith.constant 3 : index
    %c0_23 = arith.constant 0 : index
    %c0_24 = arith.constant 0 : index
    %25 = vector.load %arg3[%c3, %c0_23, %c0_24] : memref<4x64x32xbf16, #tpu.memory_space<vmem>>, vector<1x64x32xbf16>
    %26 = vector.shape_cast %25 : vector<1x64x32xbf16> to vector<64x32xbf16>
    %cst_25 = arith.constant dense<0.000000e+00> : vector<256x32xf32>
    %27 = tpu.matmul %1, %26, %cst_25 {dimension_numbers = #tpu.dot_dimension_numbers<[1], [0], [0], [1], [0, 0, 1, 1], [], []>} : vector<256x64xbf16>, vector<64x32xbf16>, vector<256x32xf32> -> vector<256x32xf32>
    %c3_26 = arith.constant 3 : index
    %c0_27 = arith.constant 0 : index
    %c0_28 = arith.constant 0 : index
    %28 = vector.load %arg2[%c3_26, %c0_27, %c0_28] : memref<4x256x256xbf16, #tpu.memory_space<vmem>>, vector<1x256x256xbf16>
    %29 = vector.shape_cast %28 : vector<1x256x256xbf16> to vector<256x256xbf16>
    %30 = arith.truncf %27 : vector<256x32xf32> to vector<256x32xbf16>
    %cst_29 = arith.constant dense<0.000000e+00> : vector<256x32xf32>
    %31 = tpu.matmul %29, %30, %cst_29 {dimension_numbers = #tpu.dot_dimension_numbers<[1], [0], [0], [1], [0, 0, 1, 1], [], []>} : vector<256x256xbf16>, vector<256x32xbf16>, vector<256x32xf32> -> vector<256x32xf32>
    %32 = arith.addf %24, %31 : vector<256x32xf32>
    %c0_30 = arith.constant 0 : index
    %c0_31 = arith.constant 0 : index
    %33 = vector.load %arg4[%c0_30, %c0_31] : memref<256x1xf32, #tpu.memory_space<vmem>>, vector<256x1xf32>
    %34 = vector.broadcast %33 : vector<256x1xf32> to vector<256x32xf32>
    %35 = arith.addf %32, %34 : vector<256x32xf32>
    %cst_32 = arith.constant 2.000000e-01 : f32
    %36 = vector.broadcast %cst_32 : f32 to vector<256x32xf32>
    %37 = arith.mulf %36, %35 : vector<256x32xf32>
    %38 = arith.maximumf %35, %37 : vector<256x32xf32>
    %39 = arith.truncf %38 : vector<256x32xf32> to vector<256x32xbf16>
    %c0_33 = arith.constant 0 : index
    %c0_34 = arith.constant 0 : index
    %c0_35 = arith.constant 0 : index
    %40 = vector.load %arg6[%c0_33, %c0_34, %c0_35] : memref<4x32x16xbf16, #tpu.memory_space<vmem>>, vector<1x32x16xbf16>
    %41 = vector.shape_cast %40 : vector<1x32x16xbf16> to vector<32x16xbf16>
    %cst_36 = arith.constant dense<0.000000e+00> : vector<256x16xf32>
    %42 = tpu.matmul %39, %41, %cst_36 {dimension_numbers = #tpu.dot_dimension_numbers<[1], [0], [0], [1], [0, 0, 1, 1], [], []>} : vector<256x32xbf16>, vector<32x16xbf16>, vector<256x16xf32> -> vector<256x16xf32>
    %c0_37 = arith.constant 0 : index
    %c0_38 = arith.constant 0 : index
    %c0_39 = arith.constant 0 : index
    %43 = vector.load %arg5[%c0_37, %c0_38, %c0_39] : memref<4x256x256xbf16, #tpu.memory_space<vmem>>, vector<1x256x256xbf16>
    %44 = vector.shape_cast %43 : vector<1x256x256xbf16> to vector<256x256xbf16>
    %45 = arith.truncf %42 : vector<256x16xf32> to vector<256x16xbf16>
    %cst_40 = arith.constant dense<0.000000e+00> : vector<256x16xf32>
    %46 = tpu.matmul %44, %45, %cst_40 {dimension_numbers = #tpu.dot_dimension_numbers<[1], [0], [0], [1], [0, 0, 1, 1], [], []>} : vector<256x256xbf16>, vector<256x16xbf16>, vector<256x16xf32> -> vector<256x16xf32>
    %c1_41 = arith.constant 1 : index
    %c0_42 = arith.constant 0 : index
    %c0_43 = arith.constant 0 : index
    %47 = vector.load %arg6[%c1_41, %c0_42, %c0_43] : memref<4x32x16xbf16, #tpu.memory_space<vmem>>, vector<1x32x16xbf16>
    %48 = vector.shape_cast %47 : vector<1x32x16xbf16> to vector<32x16xbf16>
    %cst_44 = arith.constant dense<0.000000e+00> : vector<256x16xf32>
    %49 = tpu.matmul %39, %48, %cst_44 {dimension_numbers = #tpu.dot_dimension_numbers<[1], [0], [0], [1], [0, 0, 1, 1], [], []>} : vector<256x32xbf16>, vector<32x16xbf16>, vector<256x16xf32> -> vector<256x16xf32>
    %c1_45 = arith.constant 1 : index
    %c0_46 = arith.constant 0 : index
    %c0_47 = arith.constant 0 : index
    %50 = vector.load %arg5[%c1_45, %c0_46, %c0_47] : memref<4x256x256xbf16, #tpu.memory_space<vmem>>, vector<1x256x256xbf16>
    %51 = vector.shape_cast %50 : vector<1x256x256xbf16> to vector<256x256xbf16>
    %52 = arith.truncf %49 : vector<256x16xf32> to vector<256x16xbf16>
    %cst_48 = arith.constant dense<0.000000e+00> : vector<256x16xf32>
    %53 = tpu.matmul %51, %52, %cst_48 {dimension_numbers = #tpu.dot_dimension_numbers<[1], [0], [0], [1], [0, 0, 1, 1], [], []>} : vector<256x256xbf16>, vector<256x16xbf16>, vector<256x16xf32> -> vector<256x16xf32>
    %54 = arith.addf %46, %53 : vector<256x16xf32>
    %c2_49 = arith.constant 2 : index
    %c0_50 = arith.constant 0 : index
    %c0_51 = arith.constant 0 : index
    %55 = vector.load %arg6[%c2_49, %c0_50, %c0_51] : memref<4x32x16xbf16, #tpu.memory_space<vmem>>, vector<1x32x16xbf16>
    %56 = vector.shape_cast %55 : vector<1x32x16xbf16> to vector<32x16xbf16>
    %cst_52 = arith.constant dense<0.000000e+00> : vector<256x16xf32>
    %57 = tpu.matmul %39, %56, %cst_52 {dimension_numbers = #tpu.dot_dimension_numbers<[1], [0], [0], [1], [0, 0, 1, 1], [], []>} : vector<256x32xbf16>, vector<32x16xbf16>, vector<256x16xf32> -> vector<256x16xf32>
    %c2_53 = arith.constant 2 : index
    %c0_54 = arith.constant 0 : index
    %c0_55 = arith.constant 0 : index
    %58 = vector.load %arg5[%c2_53, %c0_54, %c0_55] : memref<4x256x256xbf16, #tpu.memory_space<vmem>>, vector<1x256x256xbf16>
    %59 = vector.shape_cast %58 : vector<1x256x256xbf16> to vector<256x256xbf16>
    %60 = arith.truncf %57 : vector<256x16xf32> to vector<256x16xbf16>
    %cst_56 = arith.constant dense<0.000000e+00> : vector<256x16xf32>
    %61 = tpu.matmul %59, %60, %cst_56 {dimension_numbers = #tpu.dot_dimension_numbers<[1], [0], [0], [1], [0, 0, 1, 1], [], []>} : vector<256x256xbf16>, vector<256x16xbf16>, vector<256x16xf32> -> vector<256x16xf32>
    %62 = arith.addf %54, %61 : vector<256x16xf32>
    %c3_57 = arith.constant 3 : index
    %c0_58 = arith.constant 0 : index
    %c0_59 = arith.constant 0 : index
    %63 = vector.load %arg6[%c3_57, %c0_58, %c0_59] : memref<4x32x16xbf16, #tpu.memory_space<vmem>>, vector<1x32x16xbf16>
    %64 = vector.shape_cast %63 : vector<1x32x16xbf16> to vector<32x16xbf16>
    %cst_60 = arith.constant dense<0.000000e+00> : vector<256x16xf32>
    %65 = tpu.matmul %39, %64, %cst_60 {dimension_numbers = #tpu.dot_dimension_numbers<[1], [0], [0], [1], [0, 0, 1, 1], [], []>} : vector<256x32xbf16>, vector<32x16xbf16>, vector<256x16xf32> -> vector<256x16xf32>
    %c3_61 = arith.constant 3 : index
    %c0_62 = arith.constant 0 : index
    %c0_63 = arith.constant 0 : index
    %66 = vector.load %arg5[%c3_61, %c0_62, %c0_63] : memref<4x256x256xbf16, #tpu.memory_space<vmem>>, vector<1x256x256xbf16>
    %67 = vector.shape_cast %66 : vector<1x256x256xbf16> to vector<256x256xbf16>
    %68 = arith.truncf %65 : vector<256x16xf32> to vector<256x16xbf16>
    %cst_64 = arith.constant dense<0.000000e+00> : vector<256x16xf32>
    %69 = tpu.matmul %67, %68, %cst_64 {dimension_numbers = #tpu.dot_dimension_numbers<[1], [0], [0], [1], [0, 0, 1, 1], [], []>} : vector<256x256xbf16>, vector<256x16xbf16>, vector<256x16xf32> -> vector<256x16xf32>
    %70 = arith.addf %62, %69 : vector<256x16xf32>
    %c0_65 = arith.constant 0 : index
    %c0_66 = arith.constant 0 : index
    %71 = vector.load %arg7[%c0_65, %c0_66] : memref<256x1xf32, #tpu.memory_space<vmem>>, vector<256x1xf32>
    %72 = vector.broadcast %71 : vector<256x1xf32> to vector<256x16xf32>
    %73 = arith.addf %70, %72 : vector<256x16xf32>
    %cst_67 = arith.constant 2.000000e-01 : f32
    %74 = vector.broadcast %cst_67 : f32 to vector<256x16xf32>
    %75 = arith.mulf %74, %73 : vector<256x16xf32>
    %76 = arith.maximumf %73, %75 : vector<256x16xf32>
    %77 = arith.truncf %76 : vector<256x16xf32> to vector<256x16xbf16>
    %c0_68 = arith.constant 0 : index
    %c0_69 = arith.constant 0 : index
    %c0_70 = arith.constant 0 : index
    %78 = vector.load %arg9[%c0_68, %c0_69, %c0_70] : memref<4x16x8xbf16, #tpu.memory_space<vmem>>, vector<1x16x8xbf16>
    %79 = vector.shape_cast %78 : vector<1x16x8xbf16> to vector<16x8xbf16>
    %cst_71 = arith.constant dense<0.000000e+00> : vector<256x8xf32>
    %80 = tpu.matmul %77, %79, %cst_71 {dimension_numbers = #tpu.dot_dimension_numbers<[1], [0], [0], [1], [0, 0, 1, 1], [], []>} : vector<256x16xbf16>, vector<16x8xbf16>, vector<256x8xf32> -> vector<256x8xf32>
    %c0_72 = arith.constant 0 : index
    %c0_73 = arith.constant 0 : index
    %c0_74 = arith.constant 0 : index
    %81 = vector.load %arg8[%c0_72, %c0_73, %c0_74] : memref<4x256x256xbf16, #tpu.memory_space<vmem>>, vector<1x256x256xbf16>
    %82 = vector.shape_cast %81 : vector<1x256x256xbf16> to vector<256x256xbf16>
    %83 = arith.truncf %80 : vector<256x8xf32> to vector<256x8xbf16>
    %cst_75 = arith.constant dense<0.000000e+00> : vector<256x8xf32>
    %84 = tpu.matmul %82, %83, %cst_75 {dimension_numbers = #tpu.dot_dimension_numbers<[1], [0], [0], [1], [0, 0, 1, 1], [], []>} : vector<256x256xbf16>, vector<256x8xbf16>, vector<256x8xf32> -> vector<256x8xf32>
    %c1_76 = arith.constant 1 : index
    %c0_77 = arith.constant 0 : index
    %c0_78 = arith.constant 0 : index
    %85 = vector.load %arg9[%c1_76, %c0_77, %c0_78] : memref<4x16x8xbf16, #tpu.memory_space<vmem>>, vector<1x16x8xbf16>
    %86 = vector.shape_cast %85 : vector<1x16x8xbf16> to vector<16x8xbf16>
    %cst_79 = arith.constant dense<0.000000e+00> : vector<256x8xf32>
    %87 = tpu.matmul %77, %86, %cst_79 {dimension_numbers = #tpu.dot_dimension_numbers<[1], [0], [0], [1], [0, 0, 1, 1], [], []>} : vector<256x16xbf16>, vector<16x8xbf16>, vector<256x8xf32> -> vector<256x8xf32>
    %c1_80 = arith.constant 1 : index
    %c0_81 = arith.constant 0 : index
    %c0_82 = arith.constant 0 : index
    %88 = vector.load %arg8[%c1_80, %c0_81, %c0_82] : memref<4x256x256xbf16, #tpu.memory_space<vmem>>, vector<1x256x256xbf16>
    %89 = vector.shape_cast %88 : vector<1x256x256xbf16> to vector<256x256xbf16>
    %90 = arith.truncf %87 : vector<256x8xf32> to vector<256x8xbf16>
    %cst_83 = arith.constant dense<0.000000e+00> : vector<256x8xf32>
    %91 = tpu.matmul %89, %90, %cst_83 {dimension_numbers = #tpu.dot_dimension_numbers<[1], [0], [0], [1], [0, 0, 1, 1], [], []>} : vector<256x256xbf16>, vector<256x8xbf16>, vector<256x8xf32> -> vector<256x8xf32>
    %92 = arith.addf %84, %91 : vector<256x8xf32>
    %c2_84 = arith.constant 2 : index
    %c0_85 = arith.constant 0 : index
    %c0_86 = arith.constant 0 : index
    %93 = vector.load %arg9[%c2_84, %c0_85, %c0_86] : memref<4x16x8xbf16, #tpu.memory_space<vmem>>, vector<1x16x8xbf16>
    %94 = vector.shape_cast %93 : vector<1x16x8xbf16> to vector<16x8xbf16>
    %cst_87 = arith.constant dense<0.000000e+00> : vector<256x8xf32>
    %95 = tpu.matmul %77, %94, %cst_87 {dimension_numbers = #tpu.dot_dimension_numbers<[1], [0], [0], [1], [0, 0, 1, 1], [], []>} : vector<256x16xbf16>, vector<16x8xbf16>, vector<256x8xf32> -> vector<256x8xf32>
    %c2_88 = arith.constant 2 : index
    %c0_89 = arith.constant 0 : index
    %c0_90 = arith.constant 0 : index
    %96 = vector.load %arg8[%c2_88, %c0_89, %c0_90] : memref<4x256x256xbf16, #tpu.memory_space<vmem>>, vector<1x256x256xbf16>
    %97 = vector.shape_cast %96 : vector<1x256x256xbf16> to vector<256x256xbf16>
    %98 = arith.truncf %95 : vector<256x8xf32> to vector<256x8xbf16>
    %cst_91 = arith.constant dense<0.000000e+00> : vector<256x8xf32>
    %99 = tpu.matmul %97, %98, %cst_91 {dimension_numbers = #tpu.dot_dimension_numbers<[1], [0], [0], [1], [0, 0, 1, 1], [], []>} : vector<256x256xbf16>, vector<256x8xbf16>, vector<256x8xf32> -> vector<256x8xf32>
    %100 = arith.addf %92, %99 : vector<256x8xf32>
    %c3_92 = arith.constant 3 : index
    %c0_93 = arith.constant 0 : index
    %c0_94 = arith.constant 0 : index
    %101 = vector.load %arg9[%c3_92, %c0_93, %c0_94] : memref<4x16x8xbf16, #tpu.memory_space<vmem>>, vector<1x16x8xbf16>
    %102 = vector.shape_cast %101 : vector<1x16x8xbf16> to vector<16x8xbf16>
    %cst_95 = arith.constant dense<0.000000e+00> : vector<256x8xf32>
    %103 = tpu.matmul %77, %102, %cst_95 {dimension_numbers = #tpu.dot_dimension_numbers<[1], [0], [0], [1], [0, 0, 1, 1], [], []>} : vector<256x16xbf16>, vector<16x8xbf16>, vector<256x8xf32> -> vector<256x8xf32>
    %c3_96 = arith.constant 3 : index
    %c0_97 = arith.constant 0 : index
    %c0_98 = arith.constant 0 : index
    %104 = vector.load %arg8[%c3_96, %c0_97, %c0_98] : memref<4x256x256xbf16, #tpu.memory_space<vmem>>, vector<1x256x256xbf16>
    %105 = vector.shape_cast %104 : vector<1x256x256xbf16> to vector<256x256xbf16>
    %106 = arith.truncf %103 : vector<256x8xf32> to vector<256x8xbf16>
    %cst_99 = arith.constant dense<0.000000e+00> : vector<256x8xf32>
    %107 = tpu.matmul %105, %106, %cst_99 {dimension_numbers = #tpu.dot_dimension_numbers<[1], [0], [0], [1], [0, 0, 1, 1], [], []>} : vector<256x256xbf16>, vector<256x8xbf16>, vector<256x8xf32> -> vector<256x8xf32>
    %108 = arith.addf %100, %107 : vector<256x8xf32>
    %c0_100 = arith.constant 0 : index
    %c0_101 = arith.constant 0 : index
    %109 = vector.load %arg10[%c0_100, %c0_101] : memref<256x1xf32, #tpu.memory_space<vmem>>, vector<256x1xf32>
    %110 = vector.broadcast %109 : vector<256x1xf32> to vector<256x8xf32>
    %111 = arith.addf %108, %110 : vector<256x8xf32>
    %cst_102 = arith.constant 2.000000e-01 : f32
    %112 = vector.broadcast %cst_102 : f32 to vector<256x8xf32>
    %113 = arith.mulf %112, %111 : vector<256x8xf32>
    %114 = arith.maximumf %111, %113 : vector<256x8xf32>
    %115 = arith.truncf %114 : vector<256x8xf32> to vector<256x8xbf16>
    %c0_103 = arith.constant 0 : index
    %c0_104 = arith.constant 0 : index
    %c0_105 = arith.constant 0 : index
    %116 = vector.load %arg12[%c0_103, %c0_104, %c0_105] : memref<4x8x4xbf16, #tpu.memory_space<vmem>>, vector<1x8x4xbf16>
    %117 = vector.shape_cast %116 : vector<1x8x4xbf16> to vector<8x4xbf16>
    %cst_106 = arith.constant dense<0.000000e+00> : vector<256x4xf32>
    %118 = tpu.matmul %115, %117, %cst_106 {dimension_numbers = #tpu.dot_dimension_numbers<[1], [0], [0], [1], [0, 0, 1, 1], [], []>} : vector<256x8xbf16>, vector<8x4xbf16>, vector<256x4xf32> -> vector<256x4xf32>
    %c0_107 = arith.constant 0 : index
    %c0_108 = arith.constant 0 : index
    %c0_109 = arith.constant 0 : index
    %119 = vector.load %arg11[%c0_107, %c0_108, %c0_109] : memref<4x256x256xbf16, #tpu.memory_space<vmem>>, vector<1x256x256xbf16>
    %120 = vector.shape_cast %119 : vector<1x256x256xbf16> to vector<256x256xbf16>
    %121 = arith.truncf %118 : vector<256x4xf32> to vector<256x4xbf16>
    %cst_110 = arith.constant dense<0.000000e+00> : vector<256x4xf32>
    %122 = tpu.matmul %120, %121, %cst_110 {dimension_numbers = #tpu.dot_dimension_numbers<[1], [0], [0], [1], [0, 0, 1, 1], [], []>} : vector<256x256xbf16>, vector<256x4xbf16>, vector<256x4xf32> -> vector<256x4xf32>
    %c1_111 = arith.constant 1 : index
    %c0_112 = arith.constant 0 : index
    %c0_113 = arith.constant 0 : index
    %123 = vector.load %arg12[%c1_111, %c0_112, %c0_113] : memref<4x8x4xbf16, #tpu.memory_space<vmem>>, vector<1x8x4xbf16>
    %124 = vector.shape_cast %123 : vector<1x8x4xbf16> to vector<8x4xbf16>
    %cst_114 = arith.constant dense<0.000000e+00> : vector<256x4xf32>
    %125 = tpu.matmul %115, %124, %cst_114 {dimension_numbers = #tpu.dot_dimension_numbers<[1], [0], [0], [1], [0, 0, 1, 1], [], []>} : vector<256x8xbf16>, vector<8x4xbf16>, vector<256x4xf32> -> vector<256x4xf32>
    %c1_115 = arith.constant 1 : index
    %c0_116 = arith.constant 0 : index
    %c0_117 = arith.constant 0 : index
    %126 = vector.load %arg11[%c1_115, %c0_116, %c0_117] : memref<4x256x256xbf16, #tpu.memory_space<vmem>>, vector<1x256x256xbf16>
    %127 = vector.shape_cast %126 : vector<1x256x256xbf16> to vector<256x256xbf16>
    %128 = arith.truncf %125 : vector<256x4xf32> to vector<256x4xbf16>
    %cst_118 = arith.constant dense<0.000000e+00> : vector<256x4xf32>
    %129 = tpu.matmul %127, %128, %cst_118 {dimension_numbers = #tpu.dot_dimension_numbers<[1], [0], [0], [1], [0, 0, 1, 1], [], []>} : vector<256x256xbf16>, vector<256x4xbf16>, vector<256x4xf32> -> vector<256x4xf32>
    %130 = arith.addf %122, %129 : vector<256x4xf32>
    %c2_119 = arith.constant 2 : index
    %c0_120 = arith.constant 0 : index
    %c0_121 = arith.constant 0 : index
    %131 = vector.load %arg12[%c2_119, %c0_120, %c0_121] : memref<4x8x4xbf16, #tpu.memory_space<vmem>>, vector<1x8x4xbf16>
    %132 = vector.shape_cast %131 : vector<1x8x4xbf16> to vector<8x4xbf16>
    %cst_122 = arith.constant dense<0.000000e+00> : vector<256x4xf32>
    %133 = tpu.matmul %115, %132, %cst_122 {dimension_numbers = #tpu.dot_dimension_numbers<[1], [0], [0], [1], [0, 0, 1, 1], [], []>} : vector<256x8xbf16>, vector<8x4xbf16>, vector<256x4xf32> -> vector<256x4xf32>
    %c2_123 = arith.constant 2 : index
    %c0_124 = arith.constant 0 : index
    %c0_125 = arith.constant 0 : index
    %134 = vector.load %arg11[%c2_123, %c0_124, %c0_125] : memref<4x256x256xbf16, #tpu.memory_space<vmem>>, vector<1x256x256xbf16>
    %135 = vector.shape_cast %134 : vector<1x256x256xbf16> to vector<256x256xbf16>
    %136 = arith.truncf %133 : vector<256x4xf32> to vector<256x4xbf16>
    %cst_126 = arith.constant dense<0.000000e+00> : vector<256x4xf32>
    %137 = tpu.matmul %135, %136, %cst_126 {dimension_numbers = #tpu.dot_dimension_numbers<[1], [0], [0], [1], [0, 0, 1, 1], [], []>} : vector<256x256xbf16>, vector<256x4xbf16>, vector<256x4xf32> -> vector<256x4xf32>
    %138 = arith.addf %130, %137 : vector<256x4xf32>
    %c3_127 = arith.constant 3 : index
    %c0_128 = arith.constant 0 : index
    %c0_129 = arith.constant 0 : index
    %139 = vector.load %arg12[%c3_127, %c0_128, %c0_129] : memref<4x8x4xbf16, #tpu.memory_space<vmem>>, vector<1x8x4xbf16>
    %140 = vector.shape_cast %139 : vector<1x8x4xbf16> to vector<8x4xbf16>
    %cst_130 = arith.constant dense<0.000000e+00> : vector<256x4xf32>
    %141 = tpu.matmul %115, %140, %cst_130 {dimension_numbers = #tpu.dot_dimension_numbers<[1], [0], [0], [1], [0, 0, 1, 1], [], []>} : vector<256x8xbf16>, vector<8x4xbf16>, vector<256x4xf32> -> vector<256x4xf32>
    %c3_131 = arith.constant 3 : index
    %c0_132 = arith.constant 0 : index
    %c0_133 = arith.constant 0 : index
    %142 = vector.load %arg11[%c3_131, %c0_132, %c0_133] : memref<4x256x256xbf16, #tpu.memory_space<vmem>>, vector<1x256x256xbf16>
    %143 = vector.shape_cast %142 : vector<1x256x256xbf16> to vector<256x256xbf16>
    %144 = arith.truncf %141 : vector<256x4xf32> to vector<256x4xbf16>
    %cst_134 = arith.constant dense<0.000000e+00> : vector<256x4xf32>
    %145 = tpu.matmul %143, %144, %cst_134 {dimension_numbers = #tpu.dot_dimension_numbers<[1], [0], [0], [1], [0, 0, 1, 1], [], []>} : vector<256x256xbf16>, vector<256x4xbf16>, vector<256x4xf32> -> vector<256x4xf32>
    %146 = arith.addf %138, %145 : vector<256x4xf32>
    %c0_135 = arith.constant 0 : index
    %c0_136 = arith.constant 0 : index
    %147 = vector.load %arg13[%c0_135, %c0_136] : memref<256x1xf32, #tpu.memory_space<vmem>>, vector<256x1xf32>
    %148 = vector.broadcast %147 : vector<256x1xf32> to vector<256x4xf32>
    %149 = arith.addf %146, %148 : vector<256x4xf32>
    %cst_137 = arith.constant 2.000000e-01 : f32
    %150 = vector.broadcast %cst_137 : f32 to vector<256x4xf32>
    %151 = arith.mulf %150, %149 : vector<256x4xf32>
    %152 = arith.maximumf %149, %151 : vector<256x4xf32>
    %153 = arith.truncf %152 : vector<256x4xf32> to vector<256x4xbf16>
    %154 = arith.extf %153 : vector<256x4xbf16> to vector<256x4xf32>
    %c0_138 = arith.constant 0 : index
    %c0_139 = arith.constant 0 : index
    %155 = vector.load %arg14[%c0_138, %c0_139] : memref<256x4xf32, #tpu.memory_space<vmem>>, vector<256x4xf32>
    %156 = arith.mulf %154, %155 : vector<256x4xf32>
    %cst_140 = arith.constant dense<0.000000e+00> : vector<256xf32>
    %157 = vector.multi_reduction <add>, %156, %cst_140 [1] : vector<256x4xf32> to vector<256xf32>
    %158 = vector.shape_cast %157 : vector<256xf32> to vector<256x1xf32>
    %cst_141 = arith.constant dense<0.000000e+00> : vector<1xf32>
    %159 = vector.multi_reduction <add>, %158, %cst_141 [0] : vector<256x1xf32> to vector<1xf32>
    %160 = vector.shape_cast %159 : vector<1xf32> to vector<1x1xf32>
    %cst_142 = arith.constant 0.000000e+00 : f32
    %161 = vector.broadcast %cst_142 : f32 to vector<1x1xf32>
    %162 = arith.subf %161, %160 : vector<1x1xf32>
    %163 = math.exp %162 : vector<1x1xf32>
    %cst_143 = arith.constant 1.000000e+00 : f32
    %164 = vector.broadcast %cst_143 : f32 to vector<1x1xf32>
    %165 = arith.addf %164, %163 : vector<1x1xf32>
    %cst_144 = arith.constant 1.000000e+00 : f32
    %166 = vector.broadcast %cst_144 : f32 to vector<1x1xf32>
    %167 = arith.divf %166, %165 : vector<1x1xf32>
    %168 = vector.shape_cast %167 : vector<1x1xf32> to vector<1x1x1xf32>
    %c0_145 = arith.constant 0 : index
    %c0_146 = arith.constant 0 : index
    %c0_147 = arith.constant 0 : index
    %169 = vector.load %arg15[%c0_145, %c0_146, %c0_147] : memref<1x1x1xf32, #tpu.memory_space<vmem>>, vector<1x1x1xf32>
    tpu.vector_store %arg15[%c0_145, %c0_146, %c0_147], %168 {strides = array<i32>} : memref<1x1x1xf32, #tpu.memory_space<vmem>>, vector<1x1x1xf32>,
    return
  }
  func.func @transform_0(%arg0: i32) -> (i32, i32, i32) {
    %c0_i32 = arith.constant 0 : i32
    %c0_i32_0 = arith.constant 0 : i32
    %c0_i32_1 = arith.constant 0 : i32
    return %arg0, %c0_i32, %c0_i32_0 : i32, i32, i32
  }
  func.func @transform_1(%arg0: i32) -> (i32, i32, i32) {
    %c0_i32 = arith.constant 0 : i32
    %c0_i32_0 = arith.constant 0 : i32
    %c0_i32_1 = arith.constant 0 : i32
    %c0_i32_2 = arith.constant 0 : i32
    return %c0_i32, %c0_i32_0, %c0_i32_1 : i32, i32, i32
  }
  func.func @transform_2(%arg0: i32) -> (i32, i32, i32) {
    %c0_i32 = arith.constant 0 : i32
    %c0_i32_0 = arith.constant 0 : i32
    %c0_i32_1 = arith.constant 0 : i32
    %c0_i32_2 = arith.constant 0 : i32
    return %c0_i32, %c0_i32_0, %c0_i32_1 : i32, i32, i32
  }
  func.func @transform_3(%arg0: i32) -> (i32, i32) {
    %c0_i32 = arith.constant 0 : i32
    %c0_i32_0 = arith.constant 0 : i32
    %c0_i32_1 = arith.constant 0 : i32
    return %c0_i32, %c0_i32_0 : i32, i32
  }
  func.func @transform_4(%arg0: i32) -> (i32, i32, i32) {
    %c0_i32 = arith.constant 0 : i32
    %c0_i32_0 = arith.constant 0 : i32
    %c0_i32_1 = arith.constant 0 : i32
    %c0_i32_2 = arith.constant 0 : i32
    return %c0_i32, %c0_i32_0, %c0_i32_1 : i32, i32, i32
  }
  func.func @transform_5(%arg0: i32) -> (i32, i32, i32) {
    %c0_i32 = arith.constant 0 : i32
    %c0_i32_0 = arith.constant 0 : i32
    %c0_i32_1 = arith.constant 0 : i32
    %c0_i32_2 = arith.constant 0 : i32
    return %c0_i32, %c0_i32_0, %c0_i32_1 : i32, i32, i32
  }
  func.func @transform_6(%arg0: i32) -> (i32, i32) {
    %c0_i32 = arith.constant 0 : i32
    %c0_i32_0 = arith.constant 0 : i32
    %c0_i32_1 = arith.constant 0 : i32
    return %c0_i32, %c0_i32_0 : i32, i32
  }
  func.func @transform_7(%arg0: i32) -> (i32, i32, i32) {
    %c0_i32 = arith.constant 0 : i32
    %c0_i32_0 = arith.constant 0 : i32
    %c0_i32_1 = arith.constant 0 : i32
    %c0_i32_2 = arith.constant 0 : i32
    return %c0_i32, %c0_i32_0, %c0_i32_1 : i32, i32, i32
  }
  func.func @transform_8(%arg0: i32) -> (i32, i32, i32) {
    %c0_i32 = arith.constant 0 : i32
    %c0_i32_0 = arith.constant 0 : i32
    %c0_i32_1 = arith.constant 0 : i32
    %c0_i32_2 = arith.constant 0 : i32
    return %c0_i32, %c0_i32_0, %c0_i32_1 : i32, i32, i32
  }
  func.func @transform_9(%arg0: i32) -> (i32, i32) {
    %c0_i32 = arith.constant 0 : i32
    %c0_i32_0 = arith.constant 0 : i32
    %c0_i32_1 = arith.constant 0 : i32
    return %c0_i32, %c0_i32_0 : i32, i32
  }
  func.func @transform_10(%arg0: i32) -> (i32, i32, i32) {
    %c0_i32 = arith.constant 0 : i32
    %c0_i32_0 = arith.constant 0 : i32
    %c0_i32_1 = arith.constant 0 : i32
    %c0_i32_2 = arith.constant 0 : i32
    return %c0_i32, %c0_i32_0, %c0_i32_1 : i32, i32, i32
  }
  func.func @transform_11(%arg0: i32) -> (i32, i32, i32) {
    %c0_i32 = arith.constant 0 : i32
    %c0_i32_0 = arith.constant 0 : i32
    %c0_i32_1 = arith.constant 0 : i32
    %c0_i32_2 = arith.constant 0 : i32
    return %c0_i32, %c0_i32_0, %c0_i32_1 : i32, i32, i32
  }
  func.func @transform_12(%arg0: i32) -> (i32, i32) {
    %c0_i32 = arith.constant 0 : i32
    %c0_i32_0 = arith.constant 0 : i32
    %c0_i32_1 = arith.constant 0 : i32
    return %c0_i32, %c0_i32_0 : i32, i32
  }
  func.func @transform_13(%arg0: i32) -> (i32, i32) {
    %c0_i32 = arith.constant 0 : i32
    %c0_i32_0 = arith.constant 0 : i32
    %c0_i32_1 = arith.constant 0 : i32
    return %c0_i32, %c0_i32_0 : i32, i32
  }
  func.func @transform_14(%arg0: i32) -> (i32, i32, i32) {
    %c0_i32 = arith.constant 0 : i32
    %c0_i32_0 = arith.constant 0 : i32
    %c0_i32_1 = arith.constant 0 : i32
    return %arg0, %c0_i32, %c0_i32_0 : i32, i32, i32
  }
}

</mosaic_0001>

<bundles_post_ra>
// kernel: fused_forward.1
= control target key start
LH: loop header
LB: loop body
LE: loop exit
PB: predicated region body
PF: predicated region fallthrough
CT: control target
= control target key end

     0   :  { %19 = vsyncpa [#allocation3], 0  ;;  %s19743_s0 = inlined_call_operand.vmem [shape: bf16[2,256,64], index: 0, kind: input, shape index: {}]   ;;  %s19744_s1 = inlined_call_operand.vmem [shape: bf16[4,256,256], index: 1, kind: input, shape index: {}]   ;;  %s19745_s2 = inlined_call_operand.vmem [shape: bf16[4,64,32], index: 2, kind: input, shape index: {}]   ;;  %s19746_s3 = inlined_call_operand.vmem [shape: f32[256,1], index: 3, kind: input, shape index: {}]   ;;  %s19747_s4 = inlined_call_operand.vmem [shape: bf16[4,256,256], index: 4, kind: input, shape index: {}]   ;;  %s19748_s5 = inlined_call_operand.vmem [shape: bf16[4,32,16], index: 5, kind: input, shape index: {}]   ;;  %s19749_s6 = inlined_call_operand.vmem [shape: f32[256,1], index: 6, kind: input, shape index: {}]   ;;  %s19750_s7 = inlined_call_operand.hbm [shape: bf16[4,256,256], index: 7, kind: input, shape index: {}]   ;;  %s19751_s8 = inlined_call_operand.vmem [shape: bf16[4,16,8], index: 8, kind: input, shape index: {}]   ;;  %s19752_s9 = inlined_call_operand.vmem [shape: f32[256,1], index: 9, kind: input, shape index: {}]   ;;  %s19753_s10 = inlined_call_operand.hbm [shape: bf16[4,256,256], index: 10, kind: input, shape index: {}]   ;;  %s19754_s11 = inlined_call_operand.vmem [shape: bf16[4,8,4], index: 11, kind: input, shape index: {}]   ;;  %s19755_s12 = inlined_call_operand.vmem [shape: f32[256,1], index: 12, kind: input, shape index: {}]   ;;  %s19756_s13 = inlined_call_operand.vmem [shape: f32[256,4], index: 13, kind: input, shape index: {}]   ;;  %s19757_s14 = inlined_call_operand.vmem [shape: f32[2,1,1], index: 14, kind: output, shape index: {}]  }
   0x1   :  { %20 = vsyncpa [#allocation5], 0  ;;  %s16084_s29 = smov 0  }
   0x2 LB: > { %19765 = sst [smem:[#allocation8_spill]] %s16002_s29  ;;  %s16090_s30 = sadd.s32 4294967295, %s16002_s29   ;;  %s16002_s29 = sphi %s16084_s29, %s26_s29  }
   0x3   : > { %p11329_p0 = scmp.ge.s32.totalorder %s16002_s29, 1  ;;  %p356_p1 = scmp.lt.s32.totalorder %s16002_s29, 3 }
   0x4   : > { %s16004_s15 = smov [#allocation2]   ;;  %p19758_p3 = scmp.eq.s32.totalorder %s16090_s30, 0 }
   0x5   : > { %s386_s16 = sshll.u32 %s16004_s15, 4  ;;  %p16094_p2 = pnand %p11329_p0, %p356_p1  ;;  %s387_s16 = int_to_ptr.vmem [resolvable:$true] %s386_s16 }
   0x6   : > { %s16005_s18 = smov [#allocation4]   ;;  %s15932_s23 = scalar_lea.hbm %s19750_s7, 16384 }
   0x7   : > { %s19766_s17 = scalar_select %p16094_p2, 1, 0 }
   0x8   : > { %p15074_p4 = pneg %p16094_p2  ;;  %s405_s19 = sshll.u32 %s16005_s18, 4  ;;  %s16107_s19 = int_to_ptr.vmem [resolvable:$true] %s405_s19 }
   0x9   : > { %p15933_p6 = scmp.ne.s32.totalorder %s19750_s7, %s15932_s23  ;;  %p15939_p10 = scmp.lt.u32.totalorder %s15932_s23, %s19750_s7 }
   0xa   : > { %p16103_p5 = pnand %p19758_p3, %p15074_p4 }
   0xc   : > { %p15934_p7 = pneg %p16103_p5 }
   0xe   : > { %p15935_p8 = pnand %p15934_p7, %p15933_p6 }
  0x10   : > { %p15936_p9 = pneg %p15935_p8 }
  0x12   : > { %p15941_p11 = pnand %p15939_p10, %p15936_p9 }
  0x14   : > { %15944 = shalt.err (!%p15941_p11)
}
  0x15   : > { %s15945_s28 = scalar_lea.vmem %s387_s16, 16384  ;;  %p15953_p1 = scmp.lt.s32.totalorder %s387_s16, %s387_s16 }
  0x16   : > { %p15946_p12 = scmp.ne.s32.totalorder %s387_s16, %s15945_s28  ;;  %p15954_p4 = scmp.lt.s32.totalorder %s15945_s28, %s15945_s28 }
  0x18   : > { %p15948_p13 = pnand %p15946_p12, %p15934_p7  ;;  %p15955_p3 = por %p15954_p4, %p15953_p1 }
  0x1a   : > { %p15949_p0 = pneg %p15948_p13 }
  0x1c   : > { %p15956_p2 = pnand %p15955_p3, %p15949_p0 }
  0x1e   : > { %15959 = shalt.err (!%p15956_p2)
}
  0x1f   : > { %s16006_s15 = smov 128   ;;  %s16007_s18 = smov 8  }
  0x20   : > { %15077 = dma.hbm_to_vmem [thread:$0]  (!%p16103_p5), %s19750_s7, 16384, %s387_s16, [#allocation3], %s16006_s15, %s16006_s15, %s16007_s18  }
  0x21   : > { %s15960_s25 = scalar_lea.hbm %s19753_s10, 16384 }
  0x22   : > { %p15961_p6 = scmp.ne.s32.totalorder %s19753_s10, %s15960_s25  ;;  %p15967_p8 = scmp.lt.u32.totalorder %s15960_s25, %s19753_s10 }
  0x24   : > { %p15963_p2 = pnand %p15961_p6, %p15934_p7 }
  0x26   : > { %p15964_p3 = pneg %p15963_p2 }
  0x28   : > { %p15969_p9 = pnand %p15967_p8, %p15964_p3 }
  0x2a   : > { %15972 = shalt.err (!%p15969_p9)
}
  0x2b   : > { %s15973_s16 = scalar_lea.vmem %s16107_s19, 16384  ;;  %p15981_p13 = scmp.lt.s32.totalorder %s16107_s19, %s16107_s19 }
  0x2c   : > { %p15974_p10 = scmp.ne.s32.totalorder %s16107_s19, %s15973_s16  ;;  %p15982_p0 = scmp.lt.s32.totalorder %s15973_s16, %s15973_s16 }
  0x2e   : > { %p15976_p11 = pnand %p15974_p10, %p15934_p7  ;;  %p15983_p1 = por %p15982_p0, %p15981_p13 }
  0x30   : > { %p15977_p12 = pneg %p15976_p11 }
  0x32   : > { %p15984_p4 = pnand %p15983_p1, %p15977_p12 }
  0x34   : > { %15987 = shalt.err (!%p15984_p4)
}
  0x35   : > { %15080 = dma.hbm_to_vmem [thread:$0]  (!%p16103_p5), %s19753_s10, 16384, %s16107_s19, [#allocation5], %s16006_s15, %s16006_s15, %s16007_s18  }
  0x36   : > { %p19768_p6 = scmp.ne.s32.totalorder %s19766_s17, 0 }
  0x38   : > { %438 = sbr.rel (%p19768_p6) target bundleno = 4643 (0x1223), region = 76 }
  0x3f   : > { %p19769_p2 = scmp.eq.s32.totalorder %s16090_s30, 0 }
  0x41   : > { %15993 = dma.done.wait (%p19769_p2), [#allocation3], 16384   ;;  %p19770_p7 = pmov %p19769_p2 }
  0x42   : > { %p19771_p3 = pmov %p19769_p2 }
  0x43   : > { %15995 = vsyncadd (%p19770_p7), [#allocation3], 4294950912 }
  0x44   : > { %15997 = dma.done.wait (%p19771_p3), [#allocation5], 16384   ;;  %p19772_p8 = pmov %p19769_p2 }
  0x45   : > { %p486_p9 = scmp.lt.s32.totalorder %s16090_s30, 1  ;;  %v15100_v0 = vld [vmem:[%s19745_s2 + $0x20] sm:$0xff]   ;;  %v15101_v1 = vld [vmem:[%s19745_s2 + $0x28] sm:$0xff]   ;;  %v15102_v2 = vld [vmem:[%s19745_s2 + $0x30] sm:$0xff]   ;;  %vm639_vm0 = vcmask 523264   ;;  %vm3294_vm1 = vcmask 261120  }
  0x46   : > { %15999 = vsyncadd (%p19772_p8), [#allocation5], 4294950912  ;;  %14510 = vmatprep.subr.bf16.mxu1 %v15100_v0  ;;  %v15103_v4 = vld [vmem:[%s19745_s2 + $0x38] sm:$0xff]   ;;  %v15117_v7 = vld [vmem:[%s19745_s2] sm:$0xff]   ;;  %vm5893_vm2 = vcmask 130048   ;;  %vm8510_vm3 = vcmask 1043456  }
  0x47   : > { %s19833_s30 = smov (!%p486_p9, %s16090_s30), 1  ;;  %14511 = vmatpush3.bf16.msra.mxu1 %v15100_v0  ;;  %14470 = vmatprep.subr.bf16.mxu0 %v15117_v7  ;;  %v15119_v8 = vld [vmem:[%s19745_s2 + $0x8] sm:$0xff]   ;;  %v15121_v10 = vld [vmem:[%s19745_s2 + $0x10] sm:$0xff]   ;;  %v15123_v12 = vld [vmem:[%s19745_s2 + $0x18] sm:$0xff]   ;;  %vm8461_vm4 = vcmask 64512   ;;  %vm11116_vm5 = vcmask 31744  }
  0x48   : > { %s12389_s17 = sshll.u32 %s19833_s30, 7  ;;  %14512 = vmatprep.subr.bf16.mxu1 %v15101_v1  ;;  %14471 = vmatpush3.bf16.msra.mxu0 %v15117_v7  ;;  %v15126_v24 = vld [vmem:[%s19744_s1 + $0x104] ss:$8 sps:$4 sm:$0xff]   ;;  %s493_s28 = scalar_lea.vmem %s19757_s14, %s19833_s30  ;;  %vm11256_vm6 = vcmask 0  }
  0x49   : > { %s16180_s24 = scalar_lea.vmem %s19743_s0, %s12389_s17  ;;  %14472 = vmatprep.subr.bf16.mxu0 %v15119_v8  ;;  %v15129_v25 = vld [vmem:[%s19744_s1 + $0x184] ss:$8 sps:$4 sm:$0xff]  }
  0x4a   : > { %v15104_v3 = vld [vmem:[%s16180_s24] sm:$0xff]   ;;  %v15105_v5 = vld [vmem:[%s16180_s24 + $0x8] sm:$0xff]   ;;  %v15106_v6 = vld [vmem:[%s16180_s24 + $0x10] sm:$0xff]  }
  0x4b   : > { %14518 = vmatprep.mubr.msk.bf16.mxu1 %vm639_vm0, %v15104_v3  ;;  %14478 = vmatprep.mubr.msk.bf16.mxu0 %vm639_vm0, %v15104_v3  ;;  %v15107_v9 = vld [vmem:[%s16180_s24 + $0x18] sm:$0xff]   ;;  %v15108_v11 = vld [vmem:[%s16180_s24 + $0x20] sm:$0xff]   ;;  %v15109_v13 = vld [vmem:[%s16180_s24 + $0x28] sm:$0xff]  }
  0x4c   : > { %14513 = vmatpush3.bf16.msra.mxu1 %v15101_v1  ;;  %14473 = vmatpush3.bf16.msra.mxu0 %v15119_v8  ;;  %v15110_v14 = vld [vmem:[%s16180_s24 + $0x30] sm:$0xff]   ;;  %v15111_v15 = vld [vmem:[%s16180_s24 + $0x38] sm:$0xff]   ;;  %v15112_v16 = vld [vmem:[%s16180_s24 + $0x40] sm:$0xff]  }
  0x4d   : > { %14514 = vmatprep.subr.bf16.mxu1 %v15102_v2  ;;  %14474 = vmatprep.subr.bf16.mxu0 %v15121_v10  ;;  %v15113_v17 = vld [vmem:[%s16180_s24 + $0x48] sm:$0xff]   ;;  %v15114_v18 = vld [vmem:[%s16180_s24 + $0x50] sm:$0xff]   ;;  %v15115_v19 = vld [vmem:[%s16180_s24 + $0x58] sm:$0xff]  }
  0x4e   : > { %v15116_v20 = vld [vmem:[%s16180_s24 + $0x60] sm:$0xff]   ;;  %v15118_v21 = vld [vmem:[%s16180_s24 + $0x68] sm:$0xff]   ;;  %v15120_v22 = vld [vmem:[%s16180_s24 + $0x70] sm:$0xff]  }
  0x4f   : > { %v15122_v23 = vld [vmem:[%s16180_s24 + $0x78] sm:$0xff]  }
  0x50   : > { %14515 = vmatpush3.bf16.msra.mxu1 %v15102_v2  ;;  %14475 = vmatpush3.bf16.msra.mxu0 %v15121_v10 }
  0x51   : > { %14516 = vmatprep.subr.bf16.mxu1 %v15103_v4  ;;  %14476 = vmatprep.subr.bf16.mxu0 %v15123_v12 }
  0x54   : > { %14517 = vmatpush3.bf16.msra.mxu1 %v15103_v4  ;;  %14477 = vmatpush3.bf16.msra.mxu0 %v15123_v12 }
  0x57   : > { %14519 = vmatmul.mubr.msk.bf16.vlgmr.msra.gmra.mrb[0].mxu1 %vm639_vm0, %v15105_v5  ;;  %14479 = vmatmul.mubr.msk.bf16.vlgmr.msra.gmra.mrb[0].mxu0 %vm639_vm0, %v15105_v5 }
  0x58   : > { %14522 = vmatprep.mubr.msk.bf16.mxu1 %vm639_vm0, %v15106_v6  ;;  %14482 = vmatprep.mubr.msk.bf16.mxu0 %vm639_vm0, %v15106_v6 }
  0x5f   : > { %14523 = vmatmul.mubr.msk.bf16.gmra.mrb[4].mxu1 %vm639_vm0, %v15107_v9  ;;  %14483 = vmatmul.mubr.msk.bf16.gmra.mrb[4].mxu0 %vm639_vm0, %v15107_v9 }
  0x60   : > { %14526 = vmatprep.mubr.msk.bf16.mxu1 %vm639_vm0, %v15108_v11  ;;  %14486 = vmatprep.mubr.msk.bf16.mxu0 %vm639_vm0, %v15108_v11 }
  0x67   : > { %14527 = vmatmul.mubr.msk.bf16.gmra.mrb[8].mxu1 %vm639_vm0, %v15109_v13  ;;  %14487 = vmatmul.mubr.msk.bf16.gmra.mrb[8].mxu0 %vm639_vm0, %v15109_v13 }
  0x68   : > { %14530 = vmatprep.mubr.msk.bf16.mxu1 %vm639_vm0, %v15110_v14  ;;  %14490 = vmatprep.mubr.msk.bf16.mxu0 %vm639_vm0, %v15110_v14 }
  0x6f   : > { %14531 = vmatmul.mubr.msk.bf16.gmra.mrb[12].mxu1 %vm639_vm0, %v15111_v15  ;;  %14491 = vmatmul.mubr.msk.bf16.gmra.mrb[12].mxu0 %vm639_vm0, %v15111_v15 }
  0x70   : > { %14534 = vmatprep.mubr.msk.bf16.mxu1 %vm639_vm0, %v15112_v16  ;;  %14494 = vmatprep.mubr.msk.bf16.mxu0 %vm639_vm0, %v15112_v16 }
  0x77   : > { %14535 = vmatmul.mubr.msk.bf16.gmra.mrb[16].mxu1 %vm639_vm0, %v15113_v17  ;;  %14495 = vmatmul.mubr.msk.bf16.gmra.mrb[16].mxu0 %vm639_vm0, %v15113_v17 }
  0x78   : > { %14538 = vmatprep.mubr.msk.bf16.mxu1 %vm639_vm0, %v15114_v18  ;;  %14498 = vmatprep.mubr.msk.bf16.mxu0 %vm639_vm0, %v15114_v18 }
  0x7f   : > { %14539 = vmatmul.mubr.msk.bf16.gmra.mrb[20].mxu1 %vm639_vm0, %v15115_v19  ;;  %14499 = vmatmul.mubr.msk.bf16.gmra.mrb[20].mxu0 %vm639_vm0, %v15115_v19 }
  0x80   : > { %14542 = vmatprep.mubr.msk.bf16.mxu1 %vm639_vm0, %v15116_v20  ;;  %14502 = vmatprep.mubr.msk.bf16.mxu0 %vm639_vm0, %v15116_v20 }
  0x87   : > { %14543 = vmatmul.mubr.msk.bf16.gmra.mrb[24].mxu1 %vm639_vm0, %v15118_v21  ;;  %14503 = vmatmul.mubr.msk.bf16.gmra.mrb[24].mxu0 %vm639_vm0, %v15118_v21 }
  0x88   : > { %14546 = vmatprep.mubr.msk.bf16.mxu1 %vm639_vm0, %v15120_v22  ;;  %14506 = vmatprep.mubr.msk.bf16.mxu0 %vm639_vm0, %v15120_v22 }
  0x8f   : > { %14547 = vmatmul.mubr.msk.bf16.gmra.mrb[28].mxu1 %vm639_vm0, %v15122_v23  ;;  %14507 = vmatmul.mubr.msk.bf16.gmra.mrb[28].mxu0 %vm639_vm0, %v15122_v23 }
  0x90   : > { %1332 = vmatprep.mubr.bf16.mxu0 %v15126_v24  ;;  %1396 = vmatprep.mubr.bf16.mxu1 %v15129_v25 }
 0x12a   : > { %v14520_v26 = vpop.f32.mrb[0].mxu1  ;;  %v16256_v40 = vpop.f32.mrb[0].mxu0 }
 0x12b   : > { %v964_v27 = vpop.f32.mrb[1].mxu1  ;;  %v16258_v42 = vpop.f32.mrb[1].mxu0 }
 0x12c   : > { %v14521_v28 = vpop.f32.mrb[2].mxu1  ;;  %v16262_v45 = vpop.f32.mrb[2].mxu0 }
 0x12d   : > { %v1125_v29 = vpack.c.bf16 %v14521_v28, %v14520_v26  ;;  %v967_v30 = vpop.f32.mrb[3].mxu1  ;;  %v882_v47 = vpack.c.bf16 %v16262_v45, %v16256_v40  ;;  %v16268_v48 = vpop.f32.mrb[3].mxu0  ;;  %v16373_v40 = vld [vmem:[%s19745_s2 + $0x60] sm:$0xff]  }
 0x12e   : > { %v1124_v31 = vpack.c.bf16 %v967_v30, %v964_v27  ;;  %v881_v49 = vpack.c.bf16 %v16268_v48, %v16258_v42  ;;  %v15136_v42 = vld [vmem:[%s19744_s1 + $0x124] ss:$8 sps:$4 sm:$0xff]   ;;  %v15140_v45 = vld [vmem:[%s19744_s1 + $0x120] ss:$8 sps:$4 sm:$0xff]  }
 0x12f   : > { %v15138_v48 = vld [vmem:[%s19744_s1 + $0x1a4] ss:$8 sps:$4 sm:$0xff]  }
 0x132   : > { %v14524_v32 = vpop.f32.mrb[4].mxu1  ;;  %v16272_v52 = vpop.f32.mrb[4].mxu0 }
 0x133   : > { %v980_v33 = vpop.f32.mrb[5].mxu1  ;;  %v16274_v54 = vpop.f32.mrb[5].mxu0 }
 0x134   : > { %v14525_v34 = vpop.f32.mrb[6].mxu1  ;;  %v16278_v57 = vpop.f32.mrb[6].mxu0 }
 0x135   : > { %v16254_v35 = vpack.c.bf16 %v14525_v34, %v14524_v32  ;;  %v983_v36 = vpop.f32.mrb[7].mxu1  ;;  %v884_v59 = vpack.c.bf16 %v16278_v57, %v16272_v52  ;;  %v16284_v60 = vpop.f32.mrb[7].mxu0  ;;  %v15147_v52 = vld [vmem:[%s19744_s1 + $0x1b0] ss:$8 sps:$4 sm:$0xff]   ;;  %v15148_v57 = vld [vmem:[%s19744_s1 + $0x144] ss:$8 sps:$4 sm:$0xff]  }
 0x136   : > { %v1126_v37 = vpack.c.bf16 %v983_v36, %v980_v33  ;;  %v883_v61 = vpack.c.bf16 %v16284_v60, %v16274_v54  ;;  %v15142_v54 = vld [vmem:[%s19744_s1 + $0x134] ss:$8 sps:$4 sm:$0xff]  }
 0x137   : > { %v15144_v60 = vld [vmem:[%s19744_s1 + $0x1b4] ss:$8 sps:$4 sm:$0xff]  }
 0x13a   : > { %v14528_v38 = vpop.f32.mrb[8].mxu1  ;;  %v16288_v0 = vpop.f32.mrb[8].mxu0 }
 0x13b   : > { %v996_v39 = vpop.f32.mrb[9].mxu1  ;;  %v16290_v2 = vpop.f32.mrb[9].mxu0 }
 0x13c   : > { %v14529_v41 = vpop.f32.mrb[10].mxu1  ;;  %v16292_v5 = vpop.f32.mrb[10].mxu0 }
 0x13d   : > { %v16260_v43 = vpack.c.bf16 %v14529_v41, %v14528_v38  ;;  %v999_v44 = vpop.f32.mrb[11].mxu1  ;;  %v886_v7 = vpack.c.bf16 %v16292_v5, %v16288_v0  ;;  %v16296_v8 = vpop.f32.mrb[11].mxu0  ;;  %v15154_v0 = vld [vmem:[%s19744_s1 + $0x154] ss:$8 sps:$4 sm:$0xff]  }
 0x13e   : > { %v16264_v46 = vpack.c.bf16 %v999_v44, %v996_v39  ;;  %v885_v9 = vpack.c.bf16 %v16296_v8, %v16290_v2  ;;  %v15152_v2 = vld [vmem:[%s19744_s1 + $0x140] ss:$8 sps:$4 sm:$0xff]   ;;  %v15156_v5 = vld [vmem:[%s19744_s1 + $0x1d4] ss:$8 sps:$4 sm:$0xff]  }
 0x13f   : > { %v15153_v8 = vld [vmem:[%s19744_s1 + $0x1c0] ss:$8 sps:$4 sm:$0xff]  }
 0x142   : > { %v14532_v50 = vpop.f32.mrb[12].mxu1  ;;  %v16300_v12 = vpop.f32.mrb[12].mxu0 }
 0x143   : > { %v1012_v51 = vpop.f32.mrb[13].mxu1  ;;  %v16302_v14 = vpop.f32.mrb[13].mxu0 }
 0x144   : > { %v14533_v53 = vpop.f32.mrb[14].mxu1  ;;  %v16304_v17 = vpop.f32.mrb[14].mxu0 }
 0x145   : > { %v16276_v55 = vpack.c.bf16 %v14533_v53, %v14532_v50  ;;  %v1015_v56 = vpop.f32.mrb[15].mxu1  ;;  %v888_v19 = vpack.c.bf16 %v16304_v17, %v16300_v12  ;;  %v16308_v20 = vpop.f32.mrb[15].mxu0  ;;  %v15162_v12 = vld [vmem:[%s19744_s1 + $0x1e4] ss:$8 sps:$4 sm:$0xff]   ;;  %v15164_v17 = vld [vmem:[%s19744_s1 + $0x160] ss:$8 sps:$4 sm:$0xff]  }
 0x146   : > { %v16280_v58 = vpack.c.bf16 %v1015_v56, %v1012_v51  ;;  %v887_v21 = vpack.c.bf16 %v16308_v20, %v16302_v14  ;;  %v15166_v56 = vld [vmem:[%s19745_s2 + $0x40] sm:$0xff]   ;;  %v15168_v20 = vld [vmem:[%s19744_s1 + $0x174] ss:$8 sps:$4 sm:$0xff]  }
 0x147   : > { %v15160_v14 = vld [vmem:[%s19744_s1 + $0x164] ss:$8 sps:$4 sm:$0xff]  }
 0x14a   : > { %v14536_v62 = vpop.f32.mrb[16].mxu1  ;;  %v14496_v24 = vpop.f32.mrb[16].mxu0 }
 0x14b   : > { %v1028_v63 = vpop.f32.mrb[17].mxu1  ;;  %v786_v26 = vpop.f32.mrb[17].mxu0 }
 0x14c   : > { %v14537_v1 = vpop.f32.mrb[18].mxu1 }
 0x14d   : > { %v1133_v3 = vpack.c.bf16 %v14537_v1, %v14536_v62  ;;  %v1031_v4 = vpop.f32.mrb[19].mxu1 }
 0x14e   : > { %v1132_v6 = vpack.c.bf16 %v1031_v4, %v1028_v63  ;;  %v15127_v63 = vld [vmem:[%s19744_s1 + $0x180] ss:$8 sps:$4 sm:$0xff]  }
 0x150   : > { %12430 = vmatprep.subr.bf16.mxu0 %v1132_v6  ;;  %15046 = vmatprep.subr.bf16.mxu1 %v1132_v6 }
 0x151   : > { %12431 = vmatpush3.bf16.msra.mxu0 %v1124_v31  ;;  %15054 = vmatpush3.bf16.msra.mxu1 %v1124_v31 }
 0x152   : > { %v14540_v10 = vpop.f32.mrb[20].mxu1  ;;  %12432 = vmatprep.subr.bf16.mxu0 %v1133_v3  ;;  %15047 = vmatprep.subr.bf16.mxu1 %v1133_v3  ;;  %v15132_v3 = vld [vmem:[%s19744_s1 + $0x194] ss:$8 sps:$4 sm:$0xff]  }
 0x153   : > { %v1044_v11 = vpop.f32.mrb[21].mxu1 }
 0x154   : > { %v14541_v13 = vpop.f32.mrb[22].mxu1 }
 0x155   : > { %v1135_v15 = vpack.c.bf16 %v14541_v13, %v14540_v10  ;;  %v1047_v16 = vpop.f32.mrb[23].mxu1  ;;  %12433 = vmatpush3.bf16.msra.mxu0 %v1125_v29  ;;  %15055 = vmatpush3.bf16.msra.mxu1 %v1125_v29  ;;  %v14497_v29 = vpop.f32.mrb[18].mxu0  ;;  %v15167_v13 = vld [vmem:[%s19745_s2 + $0x48] sm:$0xff]  }
 0x156   : > { %v1134_v18 = vpack.c.bf16 %v1047_v16, %v1044_v11  ;;  %v890_v31 = vpack.c.bf16 %v14497_v29, %v14496_v24  ;;  %v789_v32 = vpop.f32.mrb[19].mxu0  ;;  %v15134_v16 = vld [vmem:[%s19744_s1 + $0x110] ss:$8 sps:$4 sm:$0xff]   ;;  %v15178_v29 = vld [vmem:[%s19744_s1 + $0x4] ss:$8 sps:$4 sm:$0xff]  }
 0x157   : > { %v889_v33 = vpack.c.bf16 %v789_v32, %v786_v26  ;;  %v15175_v26 = vld [vmem:[%s19745_s2 + $0x58] sm:$0xff]  }
 0x158   : > { %12434 = vmatprep.subr.bf16.mxu0 %v1134_v18  ;;  %15048 = vmatprep.subr.bf16.mxu1 %v1134_v18  ;;  %v15135_v18 = vld [vmem:[%s19744_s1 + $0x190] ss:$8 sps:$4 sm:$0xff]   ;;  %v15179_v32 = vld [vmem:[%s19744_s1 + $0x14] ss:$8 sps:$4 sm:$0xff]  }
 0x159   : > { %12435 = vmatpush3.bf16.msra.mxu0 %v1126_v37  ;;  %15056 = vmatpush3.bf16.msra.mxu1 %v1126_v37  ;;  %v16316_v37 = vpop.f32.mrb[20].mxu0 }
 0x15a   : > { %v14544_v22 = vpop.f32.mrb[24].mxu1  ;;  %12436 = vmatprep.subr.bf16.mxu0 %v1135_v15  ;;  %15049 = vmatprep.subr.bf16.mxu1 %v1135_v15  ;;  %v802_v39 = vpop.f32.mrb[21].mxu0  ;;  %v15174_v15 = vld [vmem:[%s19745_s2 + $0x50] sm:$0xff]  }
 0x15b   : > { %v1060_v23 = vpop.f32.mrb[25].mxu1  ;;  %v14501_v44 = vpop.f32.mrb[22].mxu0 }
 0x15c   : > { %v14545_v25 = vpop.f32.mrb[26].mxu1  ;;  %v892_v51 = vpack.c.bf16 %v14501_v44, %v16316_v37  ;;  %v805_v53 = vpop.f32.mrb[23].mxu0  ;;  %v15202_v37 = vld [vmem:[%s19745_s2 + $0x70] sm:$0xff]   ;;  %v15920_v44 = vld [vmem:[%s16180_s24 + $0x20] sm:$0xff]  }
 0x15d   : > { %v1137_v27 = vpack.c.bf16 %v14545_v25, %v14544_v22  ;;  %v1063_v28 = vpop.f32.mrb[27].mxu1  ;;  %12437 = vmatpush3.bf16.msra.mxu0 %v16254_v35  ;;  %15057 = vmatpush3.bf16.msra.mxu1 %v16254_v35  ;;  %v14504_v62 = vpop.f32.mrb[24].mxu0 }
 0x15e   : > { %v1136_v30 = vpack.c.bf16 %v1063_v28, %v1060_v23  ;;  %v818_v1 = vpop.f32.mrb[25].mxu0  ;;  %v15173_v28 = vld [vmem:[%s19744_s1 + $0x1f0] ss:$8 sps:$4 sm:$0xff]  }
 0x15f   : > { %v14505_v4 = vpop.f32.mrb[26].mxu0 }
 0x160   : > { %12438 = vmatprep.subr.bf16.mxu0 %v1136_v30  ;;  %15050 = vmatprep.subr.bf16.mxu1 %v1136_v30  ;;  %v894_v6 = vpack.c.bf16 %v14505_v4, %v14504_v62  ;;  %v821_v10 = vpop.f32.mrb[27].mxu0  ;;  %v16461_v30 = vld [vmem:[%s16180_s24] sm:$0xff]   ;;  %v15926_v4 = vld [vmem:[%s16180_s24 + $0x50] sm:$0xff]  }
 0x161   : > { %12439 = vmatpush3.bf16.msra.mxu0 %v16264_v46  ;;  %15058 = vmatpush3.bf16.msra.mxu1 %v16264_v46  ;;  %v891_v46 = vpack.c.bf16 %v805_v53, %v802_v39  ;;  %v893_v11 = vpack.c.bf16 %v821_v10, %v818_v1  ;;  %v15182_v39 = vld [vmem:[%s19744_s1 + $0x24] ss:$8 sps:$4 sm:$0xff]   ;;  %v15190_v1 = vld [vmem:[%s19744_s1 + $0x40] ss:$8 sps:$4 sm:$0xff]  }
 0x162   : > { %v14548_v34 = vpop.f32.mrb[28].mxu1  ;;  %12440 = vmatprep.subr.bf16.mxu0 %v1137_v27  ;;  %15051 = vmatprep.subr.bf16.mxu1 %v1137_v27  ;;  %v15172_v27 = vld [vmem:[%s19744_s1 + $0x170] ss:$8 sps:$4 sm:$0xff]   ;;  %v15921_v53 = vld [vmem:[%s16180_s24 + $0x28] sm:$0xff]  }
 0x163   : > { %v1076_v36 = vpop.f32.mrb[29].mxu1  ;;  %v15188_v62 = vld [vmem:[%s19744_s1 + $0x44] ss:$8 sps:$4 sm:$0xff]  }
 0x164   : > { %v14549_v38 = vpop.f32.mrb[30].mxu1  ;;  %v15194_v10 = vld [vmem:[%s19744_s1 + $0x64] ss:$8 sps:$4 sm:$0xff]  }
 0x165   : > { %v1139_v35 = vpack.c.bf16 %v14549_v38, %v14548_v34  ;;  %v1079_v41 = vpop.f32.mrb[31].mxu1  ;;  %12441 = vmatpush3.bf16.msra.mxu0 %v16260_v43  ;;  %15059 = vmatpush3.bf16.msra.mxu1 %v16260_v43  ;;  %v15124_v43 = vld [vmem:[%s19744_s1 + $0x100] ss:$8 sps:$4 sm:$0xff]   ;;  %v15181_v38 = vld [vmem:[%s19744_s1 + $0x10] ss:$8 sps:$4 sm:$0xff]  }
 0x166   : > { %v1138_v50 = vpack.c.bf16 %v1079_v41, %v1076_v36  ;;  %v16475_v34 = vld [vmem:[%s16180_s24 + $0x8] sm:$0xff]   ;;  %v16480_v36 = vld [vmem:[%s16180_s24 + $0x10] sm:$0xff]   ;;  %v16498_v41 = vld [vmem:[%s16180_s24 + $0x18] sm:$0xff]  }
 0x168   : > { %12442 = vmatprep.subr.bf16.mxu0 %v1138_v50  ;;  %15052 = vmatprep.subr.bf16.mxu1 %v1138_v50  ;;  %v15184_v50 = vld [vmem:[%s19744_s1 + $0x20] ss:$8 sps:$4 sm:$0xff]  }
 0x169   : > { %12443 = vmatpush3.bf16.msra.mxu0 %v16280_v58  ;;  %15060 = vmatpush3.bf16.msra.mxu1 %v16280_v58  ;;  %v15130_v58 = vld [vmem:[%s19744_s1 + $0x114] ss:$8 sps:$4 sm:$0xff]  }
 0x16a   : > { %12444 = vmatprep.subr.bf16.mxu0 %v1139_v35  ;;  %15053 = vmatprep.subr.bf16.mxu1 %v1139_v35  ;;  %v15203_v35 = vld [vmem:[%s19745_s2 + $0x78] sm:$0xff]  }
 0x16d   : > { %12445 = vmatpush3.bf16.msra.mxu0 %v16276_v55  ;;  %15061 = vmatpush3.bf16.msra.mxu1 %v16276_v55  ;;  %v14508_v55 = vpop.f32.mrb[28].mxu0 }
 0x16e   : > { %12542 = vmatprep.subr.bf16.mxu1 %v889_v33  ;;  %14550 = vmatprep.subr.bf16.mxu0 %v15166_v56  ;;  %v834_v22 = vpop.f32.mrb[29].mxu0  ;;  %v15198_v33 = vld [vmem:[%s19745_s2 + $0x68] sm:$0xff]  }
 0x170   : > { %1333 = vmatmul.mubr.bf16.vlgmr.msra.gmra.mrb[32].mxu0 %v15124_v43  ;;  %1397 = vmatmul.mubr.bf16.vlgmr.msra.gmra.mrb[32].mxu1 %v15127_v63  ;;  %v15923_v43 = vld [vmem:[%s16180_s24 + $0x38] sm:$0xff]   ;;  %v15924_v63 = vld [vmem:[%s16180_s24 + $0x40] sm:$0xff]  }
 0x171   : > { %1340 = vmatprep.mubr.bf16.mxu0 %v15130_v58  ;;  %1404 = vmatprep.mubr.bf16.mxu1 %v15132_v3  ;;  %v15191_v58 = vld [vmem:[%s19744_s1 + $0x54] ss:$8 sps:$4 sm:$0xff]   ;;  %v15925_v3 = vld [vmem:[%s16180_s24 + $0x48] sm:$0xff]  }
 0x172   : > { %12543 = vmatpush3.bf16.msra.mxu1 %v881_v49  ;;  %14551 = vmatpush3.bf16.msra.mxu0 %v15166_v56  ;;  %v14509_v49 = vpop.f32.mrb[30].mxu0  ;;  %v15187_v56 = vld [vmem:[%s19744_s1 + $0x30] ss:$8 sps:$4 sm:$0xff]  }
 0x173   : > { %12544 = vmatprep.subr.bf16.mxu1 %v890_v31  ;;  %14552 = vmatprep.subr.bf16.mxu0 %v15167_v13  ;;  %v896_v23 = vpack.c.bf16 %v14509_v49, %v14508_v55  ;;  %v837_v24 = vpop.f32.mrb[31].mxu0  ;;  %v15176_v31 = vld [vmem:[%s19744_s1] ss:$8 sps:$4 sm:$0xff]  }
 0x174   : > { %v895_v25 = vpack.c.bf16 %v837_v24, %v834_v22  ;;  %v15196_v55 = vld [vmem:[%s19744_s1 + $0x60] ss:$8 sps:$4 sm:$0xff]   ;;  %v15201_v22 = vld [vmem:[%s19744_s1 + $0x70] ss:$8 sps:$4 sm:$0xff]  }
 0x175   : > { %v15206_v49 = vld [vmem:[%s19744_s1 + $0x80] ss:$8 sps:$4 sm:$0xff]   ;;  %v15209_v24 = vld [vmem:[%s19744_s1 + $0x90] ss:$8 sps:$4 sm:$0xff]  }
 0x176   : > { %12545 = vmatpush3.bf16.msra.mxu1 %v882_v47  ;;  %14553 = vmatpush3.bf16.msra.mxu0 %v15167_v13  ;;  %v15141_v47 = vld [vmem:[%s19744_s1 + $0x1a0] ss:$8 sps:$4 sm:$0xff]  }
 0x177   : > { %12546 = vmatprep.subr.bf16.mxu1 %v891_v46  ;;  %14554 = vmatprep.subr.bf16.mxu0 %v15174_v15  ;;  %v15922_v46 = vld [vmem:[%s16180_s24 + $0x30] sm:$0xff]   ;;  %v15928_v13 = vld [vmem:[%s16180_s24 + $0x60] sm:$0xff]  }
 0x178   : > { %1341 = vmatmul.mubr.bf16.gmra.mrb[36].mxu0 %v15134_v16  ;;  %1405 = vmatmul.mubr.bf16.gmra.mrb[36].mxu1 %v15135_v18  ;;  %v15929_v16 = vld [vmem:[%s16180_s24 + $0x68] sm:$0xff]   ;;  %v15930_v18 = vld [vmem:[%s16180_s24 + $0x70] sm:$0xff]  }
 0x179   : > { %1348 = vmatprep.mubr.bf16.mxu0 %v15136_v42  ;;  %1412 = vmatprep.mubr.bf16.mxu1 %v15138_v48  ;;  %v15204_v42 = vld [vmem:[%s19744_s1 + $0x84] ss:$8 sps:$4 sm:$0xff]   ;;  %v15931_v48 = vld [vmem:[%s16180_s24 + $0x78] sm:$0xff]  }
 0x17a   : > { %12547 = vmatpush3.bf16.msra.mxu1 %v883_v61  ;;  %14555 = vmatpush3.bf16.msra.mxu0 %v15174_v15  ;;  %v15146_v61 = vld [vmem:[%s19744_s1 + $0x130] ss:$8 sps:$4 sm:$0xff]   ;;  %v15199_v15 = vld [vmem:[%s19744_s1 + $0x74] ss:$8 sps:$4 sm:$0xff]  }
 0x17b   : > { %12548 = vmatprep.subr.bf16.mxu1 %v892_v51  ;;  %14556 = vmatprep.subr.bf16.mxu0 %v15175_v26  ;;  %v15185_v51 = vld [vmem:[%s19744_s1 + $0x34] ss:$8 sps:$4 sm:$0xff]  }
 0x17e   : > { %12549 = vmatpush3.bf16.msra.mxu1 %v884_v59  ;;  %14557 = vmatpush3.bf16.msra.mxu0 %v15175_v26  ;;  %v15150_v59 = vld [vmem:[%s19744_s1 + $0x1c4] ss:$8 sps:$4 sm:$0xff]   ;;  %v15212_v26 = vld [vmem:[%s19744_s1 + $0xa0] ss:$8 sps:$4 sm:$0xff]  }
 0x17f   : > { %12550 = vmatprep.subr.bf16.mxu1 %v893_v11  ;;  %14590 = vmatprep.subr.bf16.mxu0 %v16373_v40  ;;  %v15927_v11 = vld [vmem:[%s16180_s24 + $0x58] sm:$0xff]  }
 0x180   : > { %1349 = vmatmul.mubr.bf16.gmra.mrb[40].mxu0 %v15140_v45  ;;  %1413 = vmatmul.mubr.bf16.gmra.mrb[40].mxu1 %v15141_v47  ;;  %v15215_v45 = vld [vmem:[%s19744_s1 + $0xb0] ss:$8 sps:$4 sm:$0xff]   ;;  %v15216_v47 = vld [vmem:[%s19744_s1 + $0xc4] ss:$8 sps:$4 sm:$0xff]  }
 0x181   : > { %1356 = vmatprep.mubr.bf16.mxu0 %v15142_v54  ;;  %1420 = vmatprep.mubr.bf16.mxu1 %v15144_v60  ;;  %v15218_v54 = vld [vmem:[%s19744_s1 + $0xc0] ss:$8 sps:$4 sm:$0xff]   ;;  %v15219_v60 = vld [vmem:[%s19744_s1 + $0xd4] ss:$8 sps:$4 sm:$0xff]  }
 0x182   : > { %12551 = vmatpush3.bf16.msra.mxu1 %v885_v9  ;;  %v15159_v9 = vld [vmem:[%s19744_s1 + $0x1d0] ss:$8 sps:$4 sm:$0xff]  }
 0x183   : > { %12552 = vmatprep.subr.bf16.mxu1 %v894_v6  ;;  %v15193_v6 = vld [vmem:[%s19744_s1 + $0x50] ss:$8 sps:$4 sm:$0xff]  }
 0x186   : > { %12553 = vmatpush3.bf16.msra.mxu1 %v886_v7  ;;  %v15158_v7 = vld [vmem:[%s19744_s1 + $0x150] ss:$8 sps:$4 sm:$0xff]  }
 0x187   : > { %12554 = vmatprep.subr.bf16.mxu1 %v895_v25  ;;  %v15210_v25 = vld [vmem:[%s19744_s1 + $0xa4] ss:$8 sps:$4 sm:$0xff]  }
 0x188   : > { %1357 = vmatmul.mubr.bf16.gmra.mrb[44].mxu0 %v15146_v61  ;;  %1421 = vmatmul.mubr.bf16.gmra.mrb[44].mxu1 %v15147_v52  ;;  %v15221_v61 = vld [vmem:[%s19744_s1 + $0xd0] ss:$8 sps:$4 sm:$0xff]   ;;  %v15222_v52 = vld [vmem:[%s19744_s1 + $0xe4] ss:$8 sps:$4 sm:$0xff]  }
 0x189   : > { %1364 = vmatprep.mubr.bf16.mxu0 %v15148_v57  ;;  %1428 = vmatprep.mubr.bf16.mxu1 %v15150_v59  ;;  %v15224_v57 = vld [vmem:[%s19744_s1 + $0xe0] ss:$8 sps:$4 sm:$0xff]   ;;  %v15225_v59 = vld [vmem:[%s19744_s1 + $0xf4] ss:$8 sps:$4 sm:$0xff]  }
 0x18a   : > { %12555 = vmatpush3.bf16.msra.mxu1 %v887_v21  ;;  %v15170_v21 = vld [vmem:[%s19744_s1 + $0x1f4] ss:$8 sps:$4 sm:$0xff]  }
 0x18b   : > { %12556 = vmatprep.subr.bf16.mxu1 %v896_v23  ;;  %v15207_v23 = vld [vmem:[%s19744_s1 + $0x94] ss:$8 sps:$4 sm:$0xff]  }
 0x18e   : > { %12557 = vmatpush3.bf16.msra.mxu1 %v888_v19  ;;  %v15165_v19 = vld [vmem:[%s19744_s1 + $0x1e0] ss:$8 sps:$4 sm:$0xff]  }
 0x190   : > { %1365 = vmatmul.mubr.bf16.gmra.mrb[48].mxu0 %v15152_v2  ;;  %1429 = vmatmul.mubr.bf16.gmra.mrb[48].mxu1 %v15153_v8  ;;  %v2974_v2 = vld [vmem:[%s19746_s3] sm:$0xff]  ;;  %v16008_v8 = vmov 0  }
 0x191   : > { %1372 = vmatprep.mubr.bf16.mxu0 %v15154_v0  ;;  %1436 = vmatprep.mubr.bf16.mxu1 %v15156_v5  ;;  %v2976_v0 = vld [vmem:[%s19746_s3 + $0x10] sm:$0xff] }
 0x192   : > { %15098 = vset.pattern.permute.xlu0 %v16008_v8  ;;  %15099 = vset.pattern.permute.xlu1 %v16008_v8  ;;  %v15227_v5 = vld [vmem:[%s19744_s1 + $0xf0] ss:$8 sps:$4 sm:$0xff]  }
 0x193   : > { %3008 = vperm.xlu0 %15098, %v2974_v2   ;;  %3018 = vperm.xlu1 %15099, %v2976_v0   ;;  %v3001_v0 = vld [vmem:[%s19746_s3 + $0xd8] sm:$0xff] }
 0x198   : > { %1373 = vmatmul.mubr.bf16.gmra.mrb[52].mxu0 %v15158_v7  ;;  %1437 = vmatmul.mubr.bf16.gmra.mrb[52].mxu1 %v15159_v9  ;;  %v2975_v7 = vld [vmem:[%s19746_s3 + $0x8] sm:$0xff]  ;;  %v2977_v9 = vld [vmem:[%s19746_s3 + $0x18] sm:$0xff] }
 0x199   : > { %1380 = vmatprep.mubr.bf16.mxu0 %v15160_v14  ;;  %1444 = vmatprep.mubr.bf16.mxu1 %v15162_v12  ;;  %v2978_v14 = vld [vmem:[%s19746_s3 + $0x20] sm:$0xff]  ;;  %v2979_v12 = vld [vmem:[%s19746_s3 + $0x28] sm:$0xff] }
 0x19a   : > { %3013 = vperm.xlu0 %15098, %v2975_v7   ;;  %3023 = vperm.xlu1 %15099, %v2977_v9  }
 0x19e   : > { %3028 = vperm.xlu0 %15098, %v2978_v14   ;;  %3033 = vperm.xlu1 %15099, %v2979_v12   ;;  %v3003_v14 = vld [vmem:[%s19746_s3 + $0xe8] sm:$0xff] }
 0x1a0   : > { %1381 = vmatmul.mubr.bf16.gmra.mrb[56].mxu0 %v15164_v17  ;;  %1445 = vmatmul.mubr.bf16.gmra.mrb[56].mxu1 %v15165_v19  ;;  %v2980_v17 = vld [vmem:[%s19746_s3 + $0x30] sm:$0xff]  ;;  %v2981_v19 = vld [vmem:[%s19746_s3 + $0x38] sm:$0xff] }
 0x1a1   : > { %1388 = vmatprep.mubr.bf16.mxu0 %v15168_v20  ;;  %1452 = vmatprep.mubr.bf16.mxu1 %v15170_v21  ;;  %v2982_v20 = vld [vmem:[%s19746_s3 + $0x40] sm:$0xff]  ;;  %v2983_v21 = vld [vmem:[%s19746_s3 + $0x48] sm:$0xff] }
 0x1a2   : > { %3038 = vperm.xlu0 %15098, %v2980_v17   ;;  %3043 = vperm.xlu1 %15099, %v2981_v19  }
 0x1a6   : > { %3048 = vperm.xlu0 %15098, %v2982_v20   ;;  %3053 = vperm.xlu1 %15099, %v2983_v21  }
 0x1a8   : > { %1389 = vmatmul.mubr.bf16.gmra.mrb[60].mxu0 %v15172_v27  ;;  %1453 = vmatmul.mubr.bf16.gmra.mrb[60].mxu1 %v15173_v28  ;;  %v2984_v27 = vld [vmem:[%s19746_s3 + $0x50] sm:$0xff]  ;;  %v2985_v28 = vld [vmem:[%s19746_s3 + $0x58] sm:$0xff] }
 0x1a9   : > { %1653 = vmatprep.mubr.bf16.mxu1 %v15178_v29  ;;  %14558 = vmatprep.mubr.msk.bf16.mxu0 %vm639_vm0, %v16461_v30  ;;  %v2986_v29 = vld [vmem:[%s19746_s3 + $0x60] sm:$0xff] }
 0x1aa   : > { %3058 = vperm.xlu0 %15098, %v2984_v27   ;;  %3063 = vperm.xlu1 %15099, %v2985_v28  }
 0x1ae   : > { %3068 = vperm.xlu0 %15098, %v2986_v29  }
 0x1b0   : > { %1654 = vmatmul.mubr.bf16.vlgmr.msra.gmra.mrb[64].mxu1 %v15176_v31  ;;  %14559 = vmatmul.mubr.msk.bf16.vlgmr.msra.gmra.mrb[64].mxu0 %vm639_vm0, %v16475_v34  ;;  %v2988_v31 = vld [vmem:[%s19746_s3 + $0x70] sm:$0xff] }
 0x1b1   : > { %1661 = vmatprep.mubr.bf16.mxu1 %v15179_v32  ;;  %14562 = vmatprep.mubr.msk.bf16.mxu0 %vm639_vm0, %v16480_v36  ;;  %v2989_v32 = vld [vmem:[%s19746_s3 + $0x78] sm:$0xff] }
 0x1b2   : > { %14591 = vmatpush3.bf16.msra.mxu0 %v16373_v40  ;;  %v15213_v40 = vld [vmem:[%s19744_s1 + $0xb4] ss:$8 sps:$4 sm:$0xff]   ;;  %3078 = vperm.xlu0 %15098, %v2988_v31  }
 0x1b3   : > { %14592 = vmatprep.subr.bf16.mxu0 %v15198_v33 }
 0x1b6   : > { %14593 = vmatpush3.bf16.msra.mxu0 %v15198_v33  ;;  %v2990_v33 = vld [vmem:[%s19746_s3 + $0x80] sm:$0xff] }
 0x1b7   : > { %14594 = vmatprep.subr.bf16.mxu0 %v15202_v37  ;;  %3088 = vperm.xlu0 %15098, %v2990_v33   ;;  %v3005_v33 = vld [vmem:[%s19746_s3 + $0xf8] sm:$0xff] }
 0x1b8   : > { %1662 = vmatmul.mubr.bf16.gmra.mrb[68].mxu1 %v15181_v38  ;;  %14563 = vmatmul.mubr.msk.bf16.gmra.mrb[68].mxu0 %vm639_vm0, %v16498_v41 }
 0x1b9   : > { %1669 = vmatprep.mubr.bf16.mxu1 %v15182_v39  ;;  %14566 = vmatprep.mubr.msk.bf16.mxu0 %vm639_vm0, %v15920_v44 }
 0x1ba   : > { %14595 = vmatpush3.bf16.msra.mxu0 %v15202_v37  ;;  %v2991_v37 = vld [vmem:[%s19746_s3 + $0x88] sm:$0xff] }
 0x1bb   : > { %14596 = vmatprep.subr.bf16.mxu0 %v15203_v35 }
 0x1be   : > { %14597 = vmatpush3.bf16.msra.mxu0 %v15203_v35 }
 0x1c0   : > { %1670 = vmatmul.mubr.bf16.gmra.mrb[72].mxu1 %v15184_v50  ;;  %14567 = vmatmul.mubr.msk.bf16.gmra.mrb[72].mxu0 %vm639_vm0, %v15921_v53 }
 0x1c1   : > { %1677 = vmatprep.mubr.bf16.mxu1 %v15185_v51  ;;  %14570 = vmatprep.mubr.msk.bf16.mxu0 %vm639_vm0, %v15922_v46 }
 0x1c8   : > { %1678 = vmatmul.mubr.bf16.gmra.mrb[76].mxu1 %v15187_v56  ;;  %14571 = vmatmul.mubr.msk.bf16.gmra.mrb[76].mxu0 %vm639_vm0, %v15923_v43  ;;  %v15230_v56 = vld [vmem:[%s19744_s1 + $0x204] ss:$8 sps:$4 sm:$0xff]  }
 0x1c9   : > { %1685 = vmatprep.mubr.bf16.mxu1 %v15188_v62  ;;  %14574 = vmatprep.mubr.msk.bf16.mxu0 %vm639_vm0, %v15924_v63 }
 0x1d0   : > { %1686 = vmatmul.mubr.bf16.gmra.mrb[80].mxu1 %v15190_v1  ;;  %14575 = vmatmul.mubr.msk.bf16.gmra.mrb[80].mxu0 %vm639_vm0, %v15925_v3  ;;  %v2994_v1 = vld [vmem:[%s19746_s3 + $0xa0] sm:$0xff] }
 0x1d1   : > { %1693 = vmatprep.mubr.bf16.mxu1 %v15191_v58  ;;  %14578 = vmatprep.mubr.msk.bf16.mxu0 %vm639_vm0, %v15926_v4 }
 0x1d8   : > { %1694 = vmatmul.mubr.bf16.gmra.mrb[84].mxu1 %v15193_v6  ;;  %14579 = vmatmul.mubr.msk.bf16.gmra.mrb[84].mxu0 %vm639_vm0, %v15927_v11 }
 0x1d9   : > { %1701 = vmatprep.mubr.bf16.mxu1 %v15194_v10  ;;  %14582 = vmatprep.mubr.msk.bf16.mxu0 %vm639_vm0, %v15928_v13 }
 0x1e0   : > { %1702 = vmatmul.mubr.bf16.gmra.mrb[88].mxu1 %v15196_v55  ;;  %14583 = vmatmul.mubr.msk.bf16.gmra.mrb[88].mxu0 %vm639_vm0, %v15929_v16 }
 0x1e1   : > { %1709 = vmatprep.mubr.bf16.mxu1 %v15199_v15  ;;  %14586 = vmatprep.mubr.msk.bf16.mxu0 %vm639_vm0, %v15930_v18 }
 0x1e8   : > { %1710 = vmatmul.mubr.bf16.gmra.mrb[92].mxu1 %v15201_v22  ;;  %14587 = vmatmul.mubr.msk.bf16.gmra.mrb[92].mxu0 %vm639_vm0, %v15931_v48  ;;  %v2996_v22 = vld [vmem:[%s19746_s3 + $0xb0] sm:$0xff] }
 0x1e9   : > { %14598 = vmatprep.mubr.msk.bf16.mxu0 %vm639_vm0, %v16461_v30  ;;  %1717 = vmatprep.mubr.bf16.mxu1 %v15204_v42  ;;  %v2987_v30 = vld [vmem:[%s19746_s3 + $0x68] sm:$0xff] }
 0x1ea   : > { %3073 = vperm.xlu1 %15099, %v2987_v30   ;;  %v3004_v30 = vld [vmem:[%s19746_s3 + $0xf0] sm:$0xff] }
 0x1ee   : > { %3083 = vperm.xlu1 %15099, %v2989_v32  }
 0x1f0   : > { %14599 = vmatmul.mubr.msk.bf16.vlgmr.msra.gmra.mrb[96].mxu0 %vm639_vm0, %v16475_v34  ;;  %1718 = vmatmul.mubr.bf16.gmra.mrb[96].mxu1 %v15206_v49  ;;  %v2997_v49 = vld [vmem:[%s19746_s3 + $0xb8] sm:$0xff] }
 0x1f1   : > { %14602 = vmatprep.mubr.msk.bf16.mxu0 %vm639_vm0, %v16480_v36  ;;  %1725 = vmatprep.mubr.bf16.mxu1 %v15207_v23  ;;  %v2998_v23 = vld [vmem:[%s19746_s3 + $0xc0] sm:$0xff] }
 0x1f2   : > { %3093 = vperm.xlu1 %15099, %v2991_v37  }
 0x1f8   : > { %14603 = vmatmul.mubr.msk.bf16.gmra.mrb[100].mxu0 %vm639_vm0, %v16498_v41  ;;  %1726 = vmatmul.mubr.bf16.gmra.mrb[100].mxu1 %v15209_v24 }
 0x1f9   : > { %14606 = vmatprep.mubr.msk.bf16.mxu0 %vm639_vm0, %v15920_v44  ;;  %1733 = vmatprep.mubr.bf16.mxu1 %v15210_v25 }
 0x200   : > { %14607 = vmatmul.mubr.msk.bf16.gmra.mrb[104].mxu0 %vm639_vm0, %v15921_v53  ;;  %1734 = vmatmul.mubr.bf16.gmra.mrb[104].mxu1 %v15212_v26  ;;  %v2999_v26 = vld [vmem:[%s19746_s3 + $0xc8] sm:$0xff] }
 0x201   : > { %14610 = vmatprep.mubr.msk.bf16.mxu0 %vm639_vm0, %v15922_v46  ;;  %1741 = vmatprep.mubr.bf16.mxu1 %v15213_v40  ;;  %v2992_v46 = vld [vmem:[%s19746_s3 + $0x90] sm:$0xff] }
 0x202   : > { %3098 = vperm.xlu0 %15098, %v2992_v46  }
 0x206   : > { %3108 = vperm.xlu0 %15098, %v2994_v1   ;;  %v5583_v1 = vld [vmem:[%s19749_s6 + $0x10] sm:$0xff] }
 0x208   : > { %14611 = vmatmul.mubr.msk.bf16.gmra.mrb[108].mxu0 %vm639_vm0, %v15923_v43  ;;  %1742 = vmatmul.mubr.bf16.gmra.mrb[108].mxu1 %v15215_v45 }
 0x209   : > { %14614 = vmatprep.mubr.msk.bf16.mxu0 %vm639_vm0, %v15924_v63  ;;  %1749 = vmatprep.mubr.bf16.mxu1 %v15216_v47  ;;  %v2993_v63 = vld [vmem:[%s19746_s3 + $0x98] sm:$0xff] }
 0x20a   : > { %3103 = vperm.xlu1 %15099, %v2993_v63   ;;  %3118 = vperm.xlu0 %15098, %v2996_v22  }
 0x20e   : > { %3128 = vperm.xlu0 %15098, %v2998_v23  }
 0x210   : > { %14615 = vmatmul.mubr.msk.bf16.gmra.mrb[112].mxu0 %vm639_vm0, %v15925_v3  ;;  %1750 = vmatmul.mubr.bf16.gmra.mrb[112].mxu1 %v15218_v54 }
 0x211   : > { %14618 = vmatprep.mubr.msk.bf16.mxu0 %vm639_vm0, %v15926_v4  ;;  %1757 = vmatprep.mubr.bf16.mxu1 %v15219_v60  ;;  %v2995_v4 = vld [vmem:[%s19746_s3 + $0xa8] sm:$0xff] }
 0x212   : > { %3113 = vperm.xlu1 %15099, %v2995_v4   ;;  %v5584_v4 = vld [vmem:[%s19749_s6 + $0x18] sm:$0xff] }
 0x216   : > { %3123 = vperm.xlu1 %15099, %v2997_v49  }
 0x218   : > { %14619 = vmatmul.mubr.msk.bf16.gmra.mrb[116].mxu0 %vm639_vm0, %v15927_v11  ;;  %1758 = vmatmul.mubr.bf16.gmra.mrb[116].mxu1 %v15221_v61 }
 0x219   : > { %14622 = vmatprep.mubr.msk.bf16.mxu0 %vm639_vm0, %v15928_v13  ;;  %1765 = vmatprep.mubr.bf16.mxu1 %v15222_v52 }
 0x21a   : > { %3133 = vperm.xlu1 %15099, %v2999_v26  }
 0x21e   : > { %3143 = vperm.xlu1 %15099, %v3001_v0   ;;  %v5590_v0 = vld [vmem:[%s19749_s6 + $0x48] sm:$0xff] }
 0x220   : > { %14623 = vmatmul.mubr.msk.bf16.gmra.mrb[120].mxu0 %vm639_vm0, %v15929_v16  ;;  %1766 = vmatmul.mubr.bf16.gmra.mrb[120].mxu1 %v15224_v57 }
 0x221   : > { %14626 = vmatprep.mubr.msk.bf16.mxu0 %vm639_vm0, %v15930_v18  ;;  %1773 = vmatprep.mubr.bf16.mxu1 %v15225_v59  ;;  %v3000_v59 = vld [vmem:[%s19746_s3 + $0xd0] sm:$0xff] }
 0x222   : > { %3138 = vperm.xlu0 %15098, %v3000_v59   ;;  %3153 = vperm.xlu1 %15099, %v3003_v14  }
 0x226   : > { %3163 = vperm.xlu1 %15099, %v3005_v33   ;;  %v5592_v33 = vld [vmem:[%s19749_s6 + $0x58] sm:$0xff] }
 0x228   : > { %14627 = vmatmul.mubr.msk.bf16.gmra.mrb[124].mxu0 %vm639_vm0, %v15931_v48  ;;  %1774 = vmatmul.mubr.bf16.gmra.mrb[124].mxu1 %v15227_v5  ;;  %v3002_v5 = vld [vmem:[%s19746_s3 + $0xe0] sm:$0xff] }
 0x229   : > { %2217 = vmatprep.mubr.bf16.mxu1 %v15230_v56  ;;  %3148 = vperm.xlu0 %15098, %v3002_v5  }
 0x22d   : > { %3158 = vperm.xlu0 %15098, %v3004_v30  }
 0x243   : > { %v12446_v34 = vpop.f32.mrb[32].mxu0  ;;  %v12494_v36 = vpop.f32.mrb[32].mxu1 }
 0x244   : > { %v12447_v38 = vpop.f32.mrb[33].mxu0  ;;  %v12495_v39 = vpop.f32.mrb[33].mxu1 }
 0x245   : > { %v16681_v35 = vadd.f32 %v12447_v38, %v12446_v34  ;;  %v12449_v41 = vpop.f32.mrb[34].mxu0  ;;  %v16683_v44 = vadd.f32 %v12495_v39, %v12494_v36  ;;  %v12497_v50 = vpop.f32.mrb[34].mxu1  ;;  %v5581_v34 = vld [vmem:[%s19749_s6] sm:$0xff]  ;;  %v5582_v38 = vld [vmem:[%s19749_s6 + $0x8] sm:$0xff] }
 0x246   : > { %v12450_v51 = vpop.f32.mrb[35].mxu0  ;;  %v12498_v53 = vpop.f32.mrb[35].mxu1  ;;  %5615 = vperm.xlu0 %15098, %v5581_v34   ;;  %5620 = vperm.xlu1 %15099, %v5582_v38   ;;  %v5593_v34 = vld [vmem:[%s19749_s6 + $0x60] sm:$0xff]  ;;  %v5594_v38 = vld [vmem:[%s19749_s6 + $0x68] sm:$0xff] }
 0x247   : > { %v16691_v62 = vadd.f32 %v12450_v51, %v12449_v41  ;;  %v16693_v43 = vadd.f32 %v12498_v53, %v12497_v50 }
 0x24a   : > { %5625 = vperm.xlu0 %15098, %v5583_v1   ;;  %5630 = vperm.xlu1 %15099, %v5584_v4  }
 0x24b   : > { %v12452_v58 = vpop.f32.mrb[36].mxu0  ;;  %v12500_v3 = vpop.f32.mrb[36].mxu1 }
 0x24c   : > { %v12453_v6 = vpop.f32.mrb[37].mxu0  ;;  %v12501_v10 = vpop.f32.mrb[37].mxu1 }
 0x24d   : > { %v16704_v11 = vadd.f32 %v12453_v6, %v12452_v58  ;;  %v12455_v13 = vpop.f32.mrb[38].mxu0  ;;  %v16706_v55 = vadd.f32 %v12501_v10, %v12500_v3  ;;  %v12503_v15 = vpop.f32.mrb[38].mxu1  ;;  %v5585_v6 = vld [vmem:[%s19749_s6 + $0x20] sm:$0xff] }
 0x24e   : > { %v12456_v16 = vpop.f32.mrb[39].mxu0  ;;  %v12504_v18 = vpop.f32.mrb[39].mxu1  ;;  %5635 = vperm.xlu0 %15098, %v5585_v6   ;;  %v5595_v6 = vld [vmem:[%s19749_s6 + $0x70] sm:$0xff] }
 0x24f   : > { %v16711_v42 = vadd.f32 %v12456_v16, %v12455_v13  ;;  %v16713_v48 = vadd.f32 %v12504_v18, %v12503_v15  ;;  %v5586_v15 = vld [vmem:[%s19749_s6 + $0x28] sm:$0xff] }
 0x250   : > { %5640 = vperm.xlu1 %15099, %v5586_v15   ;;  %v5596_v15 = vld [vmem:[%s19749_s6 + $0x78] sm:$0xff] }
 0x253   : > { %v12458_v24 = vpop.f32.mrb[40].mxu0  ;;  %v12506_v25 = vpop.f32.mrb[40].mxu1 }
 0x254   : > { %v12459_v40 = vpop.f32.mrb[41].mxu0  ;;  %v12507_v45 = vpop.f32.mrb[41].mxu1 }
 0x255   : > { %v16724_v47 = vadd.f32 %v12459_v40, %v12458_v24  ;;  %v12461_v54 = vpop.f32.mrb[42].mxu0  ;;  %v16726_v60 = vadd.f32 %v12507_v45, %v12506_v25  ;;  %v12509_v61 = vpop.f32.mrb[42].mxu1  ;;  %v5587_v40 = vld [vmem:[%s19749_s6 + $0x30] sm:$0xff] }
 0x256   : > { %v12462_v52 = vpop.f32.mrb[43].mxu0  ;;  %v12510_v57 = vpop.f32.mrb[43].mxu1  ;;  %5645 = vperm.xlu0 %15098, %v5587_v40  }
 0x257   : > { %v16731_v2 = vadd.f32 %v12462_v52, %v12461_v54  ;;  %v16733_v8 = vadd.f32 %v12510_v57, %v12509_v61  ;;  %v5588_v61 = vld [vmem:[%s19749_s6 + $0x38] sm:$0xff]  ;;  %v5589_v52 = vld [vmem:[%s19749_s6 + $0x40] sm:$0xff] }
 0x258   : > { %5650 = vperm.xlu1 %15099, %v5588_v61  }
 0x25a   : > { %5655 = vperm.xlu0 %15098, %v5589_v52  }
 0x25b   : > { %v12464_v7 = vpop.f32.mrb[44].mxu0  ;;  %v12512_v9 = vpop.f32.mrb[44].mxu1 }
 0x25c   : > { %v12465_v12 = vpop.f32.mrb[45].mxu0  ;;  %v12513_v17 = vpop.f32.mrb[45].mxu1  ;;  %5660 = vperm.xlu1 %15099, %v5590_v0  }
 0x25d   : > { %v16744_v19 = vadd.f32 %v12465_v12, %v12464_v7  ;;  %v12467_v20 = vpop.f32.mrb[46].mxu0  ;;  %v16746_v21 = vadd.f32 %v12513_v17, %v12512_v9  ;;  %v12515_v27 = vpop.f32.mrb[46].mxu1 }
 0x25e   : > { %v12468_v28 = vpop.f32.mrb[47].mxu0  ;;  %v12516_v29 = vpop.f32.mrb[47].mxu1 }
 0x25f   : > { %v16751_v31 = vadd.f32 %v12468_v28, %v12467_v20  ;;  %v16753_v32 = vadd.f32 %v12516_v29, %v12515_v27  ;;  %v5591_v28 = vld [vmem:[%s19749_s6 + $0x50] sm:$0xff] }
 0x260   : > { %5665 = vperm.xlu0 %15098, %v5591_v28   ;;  %5670 = vperm.xlu1 %15099, %v5592_v33   ;;  %v5601_v33 = vld [vmem:[%s19749_s6 + $0xa0] sm:$0xff] }
 0x263   : > { %v12470_v36 = vpop.f32.mrb[48].mxu0  ;;  %v12518_v37 = vpop.f32.mrb[48].mxu1 }
 0x264   : > { %v12471_v39 = vpop.f32.mrb[49].mxu0  ;;  %v12519_v41 = vpop.f32.mrb[49].mxu1  ;;  %5675 = vperm.xlu0 %15098, %v5593_v34   ;;  %5680 = vperm.xlu1 %15099, %v5594_v38  }
 0x265   : > { %v16764_v50 = vadd.f32 %v12471_v39, %v12470_v36  ;;  %v12473_v51 = vpop.f32.mrb[50].mxu0  ;;  %v16766_v53 = vadd.f32 %v12519_v41, %v12518_v37  ;;  %v12521_v46 = vpop.f32.mrb[50].mxu1 }
 0x266   : > { %v12474_v56 = vpop.f32.mrb[51].mxu0  ;;  %v12522_v63 = vpop.f32.mrb[51].mxu1 }
 0x267   : > { %v16771_v58 = vadd.f32 %v12474_v56, %v12473_v51  ;;  %v16773_v3 = vadd.f32 %v12522_v63, %v12521_v46 }
 0x268   : > { %5685 = vperm.xlu0 %15098, %v5595_v6   ;;  %5690 = vperm.xlu1 %15099, %v5596_v15   ;;  %v5604_v6 = vld [vmem:[%s19749_s6 + $0xb8] sm:$0xff] }
 0x26b   : > { %v12476_v10 = vpop.f32.mrb[52].mxu0  ;;  %v12524_v13 = vpop.f32.mrb[52].mxu1 }
 0x26c   : > { %v12477_v16 = vpop.f32.mrb[53].mxu0  ;;  %v12525_v18 = vpop.f32.mrb[53].mxu1 }
 0x26d   : > { %v16784_v22 = vadd.f32 %v12477_v16, %v12476_v10  ;;  %v12479_v49 = vpop.f32.mrb[54].mxu0  ;;  %v16786_v23 = vadd.f32 %v12525_v18, %v12524_v13  ;;  %v12527_v24 = vpop.f32.mrb[54].mxu1  ;;  %v5597_v16 = vld [vmem:[%s19749_s6 + $0x80] sm:$0xff] }
 0x26e   : > { %v12480_v25 = vpop.f32.mrb[55].mxu0  ;;  %v12528_v26 = vpop.f32.mrb[55].mxu1  ;;  %5695 = vperm.xlu0 %15098, %v5597_v16  }
 0x26f   : > { %v16791_v45 = vadd.f32 %v12480_v25, %v12479_v49  ;;  %v16793_v54 = vadd.f32 %v12528_v26, %v12527_v24  ;;  %v5598_v24 = vld [vmem:[%s19749_s6 + $0x88] sm:$0xff] }
 0x270   : > { %5700 = vperm.xlu1 %15099, %v5598_v24  }
 0x273   : > { %v12482_v57 = vpop.f32.mrb[56].mxu0  ;;  %v12530_v59 = vpop.f32.mrb[56].mxu1 }
 0x274   : > { %v12483_v5 = vpop.f32.mrb[57].mxu0  ;;  %v12531_v7 = vpop.f32.mrb[57].mxu1 }
 0x275   : > { %v16804_v9 = vadd.f32 %v12483_v5, %v12482_v57  ;;  %v12485_v14 = vpop.f32.mrb[58].mxu0  ;;  %v16806_v12 = vadd.f32 %v12531_v7, %v12530_v59  ;;  %v12533_v17 = vpop.f32.mrb[58].mxu1  ;;  %v5599_v5 = vld [vmem:[%s19749_s6 + $0x90] sm:$0xff]  ;;  %v5600_v7 = vld [vmem:[%s19749_s6 + $0x98] sm:$0xff] }
 0x276   : > { %v12486_v20 = vpop.f32.mrb[59].mxu0  ;;  %v12534_v27 = vpop.f32.mrb[59].mxu1  ;;  %5705 = vperm.xlu0 %15098, %v5599_v5   ;;  %5710 = vperm.xlu1 %15099, %v5600_v7  }
 0x277   : > { %v16811_v29 = vadd.f32 %v12486_v20, %v12485_v14  ;;  %v16813_v30 = vadd.f32 %v12534_v27, %v12533_v17  ;;  %v15256_v27 = vld [vmem:[%s19744_s1 + $0x304] ss:$8 sps:$4 sm:$0xff]  }
 0x278   : > { %2813 = vmatprep.mubr.bf16.mxu0 %v15256_v27 }
 0x27a   : > { %5715 = vperm.xlu0 %15098, %v5601_v33  }
 0x27b   : > { %v12488_v36 = vpop.f32.mrb[60].mxu0  ;;  %v12536_v37 = vpop.f32.mrb[60].mxu1 }
 0x27c   : > { %v12489_v39 = vpop.f32.mrb[61].mxu0  ;;  %v12537_v41 = vpop.f32.mrb[61].mxu1 }
 0x27d   : > { %v16824_v51 = vadd.f32 %v12489_v39, %v12488_v36  ;;  %v12491_v46 = vpop.f32.mrb[62].mxu0  ;;  %v16826_v56 = vadd.f32 %v12537_v41, %v12536_v37  ;;  %v12539_v63 = vpop.f32.mrb[62].mxu1 }
 0x27e   : > { %v12492_v1 = vpop.f32.mrb[63].mxu0  ;;  %v12540_v4 = vpop.f32.mrb[63].mxu1 }
 0x27f   : > { %v16831_v10 = vadd.f32 %v12492_v1, %v12491_v46  ;;  %v16833_v13 = vadd.f32 %v12540_v4, %v12539_v63 }
 0x283   : > { %v12558_v18 = vpop.f32.mrb[64].mxu1  ;;  %v16841_v49 = vpop.f32.mrb[64].mxu0 }
 0x284   : > { %v12559_v25 = vpop.f32.mrb[65].mxu1  ;;  %v16846_v26 = vpop.f32.mrb[65].mxu0 }
 0x285   : > { %v12560_v40 = vadd.f32 %v12559_v25, %v12558_v18  ;;  %v12561_v61 = vpop.f32.mrb[66].mxu1  ;;  %v16848_v52 = vpop.f32.mrb[66].mxu0  ;;  %v5605_v25 = vld [vmem:[%s19749_s6 + $0xc0] sm:$0xff]  ;;  %v8159_v18 = vld [vmem:[%s19752_s9 + $0x18] sm:$0xff] }
 0x286   : > { %v12562_v59 = vpop.f32.mrb[67].mxu1  ;;  %v16852_v0 = vpop.f32.mrb[67].mxu0 }
 0x287   : > { %v16861_v14 = vadd.f32 %v12560_v40, %v16681_v35  ;;  %v12563_v17 = vadd.f32 %v12562_v59, %v12561_v61  ;;  %v5602_v35 = vld [vmem:[%s19749_s6 + $0xa8] sm:$0xff] }
 0x288   : > { %5720 = vperm.xlu1 %15099, %v5602_v35   ;;  %v5606_v40 = vld [vmem:[%s19749_s6 + $0xc8] sm:$0xff] }
 0x289   : > { %v16869_v28 = vadd.f32 %v12563_v17, %v16691_v62  ;;  %v5603_v62 = vld [vmem:[%s19749_s6 + $0xb0] sm:$0xff] }
 0x28a   : > { %5725 = vperm.xlu0 %15098, %v5603_v62  }
 0x28b   : > { %v12564_v34 = vpop.f32.mrb[68].mxu1  ;;  %v16877_v36 = vpop.f32.mrb[68].mxu0 }
 0x28c   : > { %v12565_v37 = vpop.f32.mrb[69].mxu1  ;;  %v16879_v38 = vpop.f32.mrb[69].mxu0  ;;  %5730 = vperm.xlu1 %15099, %v5604_v6   ;;  %v5609_v6 = vld [vmem:[%s19749_s6 + $0xe0] sm:$0xff] }
 0x28d   : > { %v12566_v39 = vadd.f32 %v12565_v37, %v12564_v34  ;;  %v12567_v41 = vpop.f32.mrb[70].mxu1  ;;  %v16884_v46 = vpop.f32.mrb[70].mxu0  ;;  %v5608_v37 = vld [vmem:[%s19749_s6 + $0xd8] sm:$0xff] }
 0x28e   : > { %v12568_v1 = vpop.f32.mrb[71].mxu1  ;;  %v16888_v4 = vpop.f32.mrb[71].mxu0  ;;  %5735 = vperm.xlu0 %15098, %v5605_v25  }
 0x28f   : > { %v16894_v15 = vadd.f32 %v12566_v39, %v16704_v11  ;;  %v12569_v16 = vadd.f32 %v12568_v1, %v12567_v41 }
 0x290   : > { %5740 = vperm.xlu1 %15099, %v5606_v40  }
 0x291   : > { %v16899_v24 = vadd.f32 %v12569_v16, %v16711_v42  ;;  %v5607_v42 = vld [vmem:[%s19749_s6 + $0xd0] sm:$0xff]  ;;  %v5610_v16 = vld [vmem:[%s19749_s6 + $0xe8] sm:$0xff] }
 0x292   : > { %5745 = vperm.xlu0 %15098, %v5607_v42  }
 0x293   : > { %v12570_v61 = vpop.f32.mrb[72].mxu1  ;;  %v16907_v11 = vpop.f32.mrb[72].mxu0 }
 0x294   : > { %v12571_v59 = vpop.f32.mrb[73].mxu1  ;;  %v16909_v5 = vpop.f32.mrb[73].mxu0  ;;  %5750 = vperm.xlu1 %15099, %v5608_v37  }
 0x295   : > { %v12572_v7 = vadd.f32 %v12571_v59, %v12570_v61  ;;  %v12573_v17 = vpop.f32.mrb[74].mxu1  ;;  %v16914_v27 = vpop.f32.mrb[74].mxu0 }
 0x296   : > { %v12574_v35 = vpop.f32.mrb[75].mxu1  ;;  %v16918_v34 = vpop.f32.mrb[75].mxu0  ;;  %5755 = vperm.xlu0 %15098, %v5609_v6  }
 0x297   : > { %v16924_v62 = vadd.f32 %v12572_v7, %v16724_v47  ;;  %v12575_v39 = vadd.f32 %v12574_v35, %v12573_v17  ;;  %v8157_v17 = vld [vmem:[%s19752_s9 + $0x8] sm:$0xff] }
 0x298   : > { %5760 = vperm.xlu1 %15099, %v5610_v16  }
 0x299   : > { %v16929_v1 = vadd.f32 %v12575_v39, %v16731_v2  ;;  %v5611_v2 = vld [vmem:[%s19749_s6 + $0xf0] sm:$0xff]  ;;  %v5612_v39 = vld [vmem:[%s19749_s6 + $0xf8] sm:$0xff] }
 0x29a   : > { %5765 = vperm.xlu0 %15098, %v5611_v2   ;;  %v8158_v2 = vld [vmem:[%s19752_s9 + $0x10] sm:$0xff] }
 0x29b   : > { %v12576_v25 = vpop.f32.mrb[76].mxu1  ;;  %v16937_v47 = vpop.f32.mrb[76].mxu0 }
 0x29c   : > { %v12577_v40 = vpop.f32.mrb[77].mxu1  ;;  %v16939_v61 = vpop.f32.mrb[77].mxu0  ;;  %5770 = vperm.xlu1 %15099, %v5612_v39  }
 0x29d   : > { %v12578_v59 = vadd.f32 %v12577_v40, %v12576_v25  ;;  %v12579_v42 = vpop.f32.mrb[78].mxu1  ;;  %v16944_v7 = vpop.f32.mrb[78].mxu0  ;;  %v8156_v40 = vld [vmem:[%s19752_s9] sm:$0xff] }
 0x29e   : > { %v12580_v35 = vpop.f32.mrb[79].mxu1  ;;  %v16948_v37 = vpop.f32.mrb[79].mxu0  ;;  %8190 = vperm.xlu0 %15098, %v8156_v40  }
 0x29f   : > { %v16954_v6 = vadd.f32 %v12578_v59, %v16744_v19  ;;  %v12581_v33 = vadd.f32 %v12580_v35, %v12579_v42 }
 0x2a0   : > { %8195 = vperm.xlu1 %15099, %v8157_v17   ;;  %v19774_v17 = vpack.c.bf16 %v16852_v0, %v16846_v26 }
 0x2a1   : > { %v16959_v16 = vadd.f32 %v12581_v33, %v16751_v31 }
 0x2a2   : > { %8200 = vperm.xlu0 %15098, %v8158_v2  }
 0x2a3   : > { %19773 = vst [vmem:[#allocation9_spill] sm:$0xff] %v16959_v16  ;;  %v12582_v41 = vpop.f32.mrb[80].mxu1  ;;  %v14576_v19 = vpop.f32.mrb[80].mxu0 }
 0x2a4   : > { %v12583_v59 = vpop.f32.mrb[81].mxu1  ;;  %v1913_v42 = vpop.f32.mrb[81].mxu0  ;;  %8205 = vperm.xlu1 %15099, %v8159_v18  }
 0x2a5   : > { %v12584_v31 = vadd.f32 %v12583_v59, %v12582_v41  ;;  %v12585_v33 = vpop.f32.mrb[82].mxu1  ;;  %v14577_v35 = vpop.f32.mrb[82].mxu0  ;;  %v8160_v41 = vld [vmem:[%s19752_s9 + $0x20] sm:$0xff] }
 0x2a6   : > { %v2018_v39 = vpack.c.bf16 %v14577_v35, %v14576_v19  ;;  %v12586_v25 = vpop.f32.mrb[83].mxu1  ;;  %v1916_v63 = vpop.f32.mrb[83].mxu0  ;;  %8210 = vperm.xlu0 %15098, %v8160_v41  }
 0x2a7   : > { %v16974_v57 = vadd.f32 %v12584_v31, %v16764_v50  ;;  %v12587_v40 = vadd.f32 %v12586_v25, %v12585_v33  ;;  %v2017_v20 = vpack.c.bf16 %v1916_v63, %v1913_v42  ;;  %v8161_v50 = vld [vmem:[%s19752_s9 + $0x28] sm:$0xff]  ;;  %v19775_v31 = vpack.c.bf16 %v16848_v52, %v16841_v49  ;;  %v8163_v33 = vld [vmem:[%s19752_s9 + $0x38] sm:$0xff]  ;;  %v8164_v49 = vld [vmem:[%s19752_s9 + $0x40] sm:$0xff] }
 0x2a8   : > { %8215 = vperm.xlu1 %15099, %v8161_v50   ;;  %v19776_v52 = vpack.c.bf16 %v16888_v4, %v16879_v38 }
 0x2a9   : > { %v16977_v16 = vadd.f32 %v12587_v40, %v16771_v58  ;;  %12674 = vmatprep.subr.bf16.mxu1 %v2017_v20  ;;  %v8162_v20 = vld [vmem:[%s19752_s9 + $0x30] sm:$0xff] }
 0x2aa   : > { %12675 = vmatpush3.bf16.msra.mxu1 %v19774_v17  ;;  %8220 = vperm.xlu0 %15098, %v8162_v20  }
 0x2ab   : > { %v12588_v25 = vpop.f32.mrb[84].mxu1  ;;  %v14580_v63 = vpop.f32.mrb[84].mxu0  ;;  %12676 = vmatprep.subr.bf16.mxu1 %v2018_v39 }
 0x2ac   : > { %v12589_v58 = vpop.f32.mrb[85].mxu1  ;;  %v1929_v19 = vpop.f32.mrb[85].mxu0  ;;  %8225 = vperm.xlu1 %15099, %v8163_v33  }
 0x2ad   : > { %v12590_v18 = vadd.f32 %v12589_v58, %v12588_v25  ;;  %v12591_v59 = vpop.f32.mrb[86].mxu1  ;;  %v14581_v42 = vpop.f32.mrb[86].mxu0 }
 0x2ae   : > { %v2020_v26 = vpack.c.bf16 %v14581_v42, %v14580_v63  ;;  %v12592_v0 = vpop.f32.mrb[87].mxu1  ;;  %v1932_v2 = vpop.f32.mrb[87].mxu0  ;;  %12677 = vmatpush3.bf16.msra.mxu1 %v19775_v31  ;;  %8230 = vperm.xlu0 %15098, %v8164_v49   ;;  %v8166_v63 = vld [vmem:[%s19752_s9 + $0x50] sm:$0xff]  ;;  %v8167_v42 = vld [vmem:[%s19752_s9 + $0x58] sm:$0xff] }
 0x2af   : > { %v16998_v35 = vadd.f32 %v12590_v18, %v16784_v22  ;;  %v12593_v39 = vadd.f32 %v12592_v0, %v12591_v59  ;;  %v2019_v40 = vpack.c.bf16 %v1932_v2, %v1929_v19  ;;  %v8165_v22 = vld [vmem:[%s19752_s9 + $0x48] sm:$0xff]  ;;  %v19777_v59 = vpack.c.bf16 %v16884_v46, %v16877_v36  ;;  %v8168_v36 = vld [vmem:[%s19752_s9 + $0x60] sm:$0xff]  ;;  %v17033_v33 = vpop.permute.xlu0 %3008 }
 0x2b0   : > { %8235 = vperm.xlu1 %15099, %v8165_v22   ;;  %v19778_v46 = vpack.c.bf16 %v16918_v34, %v16909_v5 }
 0x2b1   : > { %v17001_v41 = vadd.f32 %v12593_v39, %v16791_v45  ;;  %12678 = vmatprep.subr.bf16.mxu1 %v2019_v40 }
 0x2b2   : > { %12679 = vmatpush3.bf16.msra.mxu1 %v19776_v52  ;;  %8240 = vperm.xlu0 %15098, %v8166_v63   ;;  %v8170_v52 = vld [vmem:[%s19752_s9 + $0x70] sm:$0xff]  ;;  %v8171_v63 = vld [vmem:[%s19752_s9 + $0x78] sm:$0xff] }
 0x2b3   : > { %v12594_v17 = vpop.f32.mrb[88].mxu1  ;;  %v14584_v50 = vpop.f32.mrb[88].mxu0  ;;  %12680 = vmatprep.subr.bf16.mxu1 %v2020_v26 }
 0x2b4   : > { %v12595_v45 = vpop.f32.mrb[89].mxu1  ;;  %v1945_v25 = vpop.f32.mrb[89].mxu0  ;;  %8245 = vperm.xlu1 %15099, %v8167_v42  }
 0x2b5   : > { %v12596_v58 = vadd.f32 %v12595_v45, %v12594_v17  ;;  %v12597_v19 = vpop.f32.mrb[90].mxu1  ;;  %v14585_v20 = vpop.f32.mrb[90].mxu0 }
 0x2b6   : > { %v2022_v38 = vpack.c.bf16 %v14585_v20, %v14584_v50  ;;  %v12598_v4 = vpop.f32.mrb[91].mxu1  ;;  %v1948_v18 = vpop.f32.mrb[91].mxu0  ;;  %12681 = vmatpush3.bf16.msra.mxu1 %v19777_v59  ;;  %8250 = vperm.xlu0 %15098, %v8168_v36  }
 0x2b7   : > { %v17022_v26 = vadd.f32 %v12596_v58, %v16804_v9  ;;  %v12599_v0 = vadd.f32 %v12598_v4, %v12597_v19  ;;  %v2021_v2 = vpack.c.bf16 %v1948_v18, %v1945_v25  ;;  %v8169_v9 = vld [vmem:[%s19752_s9 + $0x68] sm:$0xff]  ;;  %v19779_v25 = vpack.c.bf16 %v16914_v27, %v16907_v11  ;;  %v8172_v11 = vld [vmem:[%s19752_s9 + $0x80] sm:$0xff]  ;;  %v17059_v4 = vpop.permute.xlu1 %3018 }
 0x2b8   : > { %8255 = vperm.xlu1 %15099, %v8169_v9   ;;  %v19780_v27 = vpack.c.bf16 %v16948_v37, %v16939_v61  ;;  %v8173_v18 = vld [vmem:[%s19752_s9 + $0x88] sm:$0xff]  ;;  %v8174_v61 = vld [vmem:[%s19752_s9 + $0x90] sm:$0xff] }
 0x2b9   : > { %v17025_v31 = vadd.f32 %v12599_v0, %v16811_v29  ;;  %12682 = vmatprep.subr.bf16.mxu1 %v2021_v2  ;;  %v15228_v2 = vld [vmem:[%s19744_s1 + $0x200] ss:$8 sps:$4 sm:$0xff]  }
 0x2ba   : > { %12683 = vmatpush3.bf16.msra.mxu1 %v19778_v46  ;;  %8260 = vperm.xlu0 %15098, %v8170_v52   ;;  %v8175_v52 = vld [vmem:[%s19752_s9 + $0x98] sm:$0xff] }
 0x2bb   : > { %v12600_v39 = vpop.f32.mrb[92].mxu1  ;;  %v14588_v40 = vpop.f32.mrb[92].mxu0  ;;  %12684 = vmatprep.subr.bf16.mxu1 %v2022_v38 }
 0x2bc   : > { %v12601_v29 = vpop.f32.mrb[93].mxu1  ;;  %v1961_v49 = vpop.f32.mrb[93].mxu0  ;;  %8265 = vperm.xlu1 %15099, %v8171_v63  }
 0x2bd   : > { %v12602_v22 = vadd.f32 %v12601_v29, %v12600_v39  ;;  %v12603_v17 = vpop.f32.mrb[94].mxu1  ;;  %v14589_v5 = vpop.f32.mrb[94].mxu0  ;;  %v19781_v39 = vpack.c.bf16 %v16944_v7, %v16937_v47  ;;  %v15231_v29 = vld [vmem:[%s19744_s1 + $0x214] ss:$8 sps:$4 sm:$0xff]   ;;  %v8176_v7 = vld [vmem:[%s19752_s9 + $0xa0] sm:$0xff] }
 0x2be   : > { %v2024_v34 = vpack.c.bf16 %v14589_v5, %v14588_v40  ;;  %v12604_v50 = vpop.f32.mrb[95].mxu1  ;;  %v1964_v45 = vpop.f32.mrb[95].mxu0  ;;  %12685 = vmatpush3.bf16.msra.mxu1 %v19779_v25  ;;  %8270 = vperm.xlu0 %15098, %v8172_v11   ;;  %v15233_v11 = vld [vmem:[%s19744_s1 + $0x210] ss:$8 sps:$4 sm:$0xff]  }
 0x2bf   : > { %v17048_v58 = vadd.f32 %v12602_v22, %v16824_v51  ;;  %v12605_v19 = vadd.f32 %v12604_v50, %v12603_v17  ;;  %v2023_v20 = vpack.c.bf16 %v1964_v45, %v1961_v49  ;;  %v17061_v51 = vpop.permute.xlu0 %3013 }
 0x2c0   : > { %8275 = vperm.xlu1 %15099, %v8173_v18  }
 0x2c1   : > { %v17051_v38 = vadd.f32 %v12605_v19, %v16831_v10  ;;  %12686 = vmatprep.subr.bf16.mxu1 %v2023_v20  ;;  %v8178_v19 = vld [vmem:[%s19752_s9 + $0xb0] sm:$0xff] }
 0x2c2   : > { %12687 = vmatpush3.bf16.msra.mxu1 %v19780_v27  ;;  %8280 = vperm.xlu0 %15098, %v8174_v61   ;;  %v15234_v61 = vld [vmem:[%s19744_s1 + $0x224] ss:$8 sps:$4 sm:$0xff]  }
 0x2c3   : > { %12688 = vmatprep.subr.bf16.mxu1 %v2024_v34  ;;  %v17066_v10 = vpop.f32.mrb[96].mxu0  ;;  %v12606_v59 = vpop.f32.mrb[96].mxu1 }
 0x2c4   : > { %v17068_v42 = vpop.f32.mrb[97].mxu0  ;;  %v12607_v0 = vpop.f32.mrb[97].mxu1  ;;  %8285 = vperm.xlu1 %15099, %v8175_v52   ;;  %v8180_v52 = vld [vmem:[%s19752_s9 + $0xc0] sm:$0xff] }
 0x2c5   : > { %v17073_v37 = vpop.f32.mrb[98].mxu0  ;;  %v12608_v36 = vadd.f32 %v12607_v0, %v12606_v59  ;;  %v12609_v46 = vpop.f32.mrb[98].mxu1  ;;  %v8183_v59 = vld [vmem:[%s19752_s9 + $0xd8] sm:$0xff] }
 0x2c6   : > { %12689 = vmatpush3.bf16.msra.mxu1 %v19781_v39  ;;  %v17083_v40 = vpop.f32.mrb[99].mxu0  ;;  %v12610_v49 = vpop.f32.mrb[99].mxu1  ;;  %8290 = vperm.xlu0 %15098, %v8176_v7  }
 0x2c7   : > { %v17094_v17 = vadd.f32 %v12608_v36, %v16683_v44  ;;  %v12611_v5 = vadd.f32 %v12610_v49, %v12609_v46  ;;  %v17102_v34 = vpop.permute.xlu1 %3023  ;;  %v17104_v50 = vpop.permute.xlu0 %3028  ;;  %v8177_v44 = vld [vmem:[%s19752_s9 + $0xa8] sm:$0xff]  ;;  %v8179_v36 = vld [vmem:[%s19752_s9 + $0xb8] sm:$0xff]  ;;  %v10716_v46 = vld [vmem:[%s19755_s12] sm:$0xff] }
 0x2c8   : > { %19782 = vst [vmem:[#allocation10_spill] sm:$0xff] %v17102_v34  ;;  %19783 = vst [vmem:[#allocation11_spill] sm:$0xff] %v17104_v50  ;;  %8295 = vperm.xlu1 %15099, %v8177_v44   ;;  %v10719_v34 = vld [vmem:[%s19755_s12 + $0x18] sm:$0xff] }
 0x2c9   : > { %2218 = vmatmul.mubr.bf16.vlgmr.msra.gmra.mrb[128].mxu1 %v15228_v2  ;;  %v17097_v47 = vadd.f32 %v12611_v5, %v16693_v43 }
 0x2ca   : > { %2225 = vmatprep.mubr.bf16.mxu1 %v15231_v29  ;;  %8300 = vperm.xlu0 %15098, %v8178_v19   ;;  %v8182_v19 = vld [vmem:[%s19752_s9 + $0xd0] sm:$0xff] }
 0x2cb   : > { %v17109_v45 = vpop.f32.mrb[100].mxu0  ;;  %v12612_v25 = vpop.f32.mrb[100].mxu1 }
 0x2cc   : > { %v17111_v43 = vpop.f32.mrb[101].mxu0  ;;  %v12613_v63 = vpop.f32.mrb[101].mxu1  ;;  %8305 = vperm.xlu1 %15099, %v8179_v36  }
 0x2cd   : > { %v17116_v20 = vpop.f32.mrb[102].mxu0  ;;  %v12614_v27 = vadd.f32 %v12613_v63, %v12612_v25  ;;  %v12615_v18 = vpop.f32.mrb[102].mxu1 }
 0x2ce   : > { %v17123_v0 = vpop.f32.mrb[103].mxu0  ;;  %v12616_v2 = vpop.f32.mrb[103].mxu1  ;;  %8310 = vperm.xlu0 %15098, %v8180_v52  }
 0x2cf   : > { %v17134_v39 = vadd.f32 %v12614_v27, %v16706_v55  ;;  %v12617_v29 = vadd.f32 %v12616_v2, %v12615_v18  ;;  %v17142_v5 = vpop.permute.xlu1 %3033  ;;  %v17144_v7 = vpop.permute.xlu0 %3038  ;;  %v8181_v55 = vld [vmem:[%s19752_s9 + $0xc8] sm:$0xff]  ;;  %v8184_v2 = vld [vmem:[%s19752_s9 + $0xe0] sm:$0xff] }
 0x2d0   : > { %19784 = vst [vmem:[#allocation12_spill] sm:$0xff] %v17142_v5  ;;  %19785 = vst [vmem:[#allocation13_spill] sm:$0xff] %v17144_v7  ;;  %v15236_v27 = vld [vmem:[%s19744_s1 + $0x220] ss:$8 sps:$4 sm:$0xff]   ;;  %8315 = vperm.xlu1 %15099, %v8181_v55   ;;  %v8187_v7 = vld [vmem:[%s19752_s9 + $0xf8] sm:$0xff] }
 0x2d1   : > { %2226 = vmatmul.mubr.bf16.gmra.mrb[132].mxu1 %v15233_v11  ;;  %v17137_v49 = vadd.f32 %v12617_v29, %v16713_v48  ;;  %v15237_v29 = vld [vmem:[%s19744_s1 + $0x234] ss:$8 sps:$4 sm:$0xff]  }
 0x2d2   : > { %2233 = vmatprep.mubr.bf16.mxu1 %v15234_v61  ;;  %8320 = vperm.xlu0 %15098, %v8182_v19  }
 0x2d3   : > { %v17149_v44 = vpop.f32.mrb[104].mxu0  ;;  %v12618_v25 = vpop.f32.mrb[104].mxu1 }
 0x2d4   : > { %v17151_v48 = vpop.f32.mrb[105].mxu0  ;;  %v12619_v63 = vpop.f32.mrb[105].mxu1  ;;  %8325 = vperm.xlu1 %15099, %v8183_v59  }
 0x2d5   : > { %v17156_v11 = vpop.f32.mrb[106].mxu0  ;;  %v12620_v18 = vadd.f32 %v12619_v63, %v12618_v25  ;;  %v12621_v61 = vpop.f32.mrb[106].mxu1 }
 0x2d6   : > { %v17163_v36 = vpop.f32.mrb[107].mxu0  ;;  %v12622_v52 = vpop.f32.mrb[107].mxu1  ;;  %8330 = vperm.xlu0 %15098, %v8184_v2  }
 0x2d7   : > { %v17174_v25 = vadd.f32 %v12620_v18, %v16726_v60  ;;  %v12623_v55 = vadd.f32 %v12622_v52, %v12621_v61  ;;  %v17182_v9 = vpop.permute.xlu1 %3043  ;;  %v17184_v22 = vpop.permute.xlu0 %3048  ;;  %v8185_v60 = vld [vmem:[%s19752_s9 + $0xe8] sm:$0xff] }
 0x2d8   : > { %19788 = vst [vmem:[#allocation16_spill] sm:$0xff] %v17182_v9  ;;  %19789 = vst [vmem:[#allocation17_spill] sm:$0xff] %v17184_v22  ;;  %8335 = vperm.xlu1 %15099, %v8185_v60   ;;  %v15240_v22 = vld [vmem:[%s19744_s1 + $0x244] ss:$8 sps:$4 sm:$0xff]  }
 0x2d9   : > { %19786 = vst [vmem:[#allocation14_spill] sm:$0xff] %v17174_v25  ;;  %2234 = vmatmul.mubr.bf16.gmra.mrb[136].mxu1 %v15236_v27  ;;  %v17177_v63 = vadd.f32 %v12623_v55, %v16733_v8  ;;  %v8186_v27 = vld [vmem:[%s19752_s9 + $0xf0] sm:$0xff] }
 0x2da   : > { %2241 = vmatprep.mubr.bf16.mxu1 %v15237_v29  ;;  %v15239_v29 = vld [vmem:[%s19744_s1 + $0x230] ss:$8 sps:$4 sm:$0xff]   ;;  %8340 = vperm.xlu0 %15098, %v8186_v27  }
 0x2db   : > { %19787 = vst [vmem:[#allocation15_spill] sm:$0xff] %v17177_v63  ;;  %v17189_v18 = vpop.f32.mrb[108].mxu0  ;;  %v12624_v19 = vpop.f32.mrb[108].mxu1 }
 0x2dc   : > { %v17191_v8 = vpop.f32.mrb[109].mxu0  ;;  %v12625_v59 = vpop.f32.mrb[109].mxu1  ;;  %8345 = vperm.xlu1 %15099, %v8187_v7   ;;  %v10718_v7 = vld [vmem:[%s19755_s12 + $0x10] sm:$0xff] }
 0x2dd   : > { %v17196_v61 = vpop.f32.mrb[110].mxu0  ;;  %v12626_v52 = vadd.f32 %v12625_v59, %v12624_v19  ;;  %v12627_v55 = vpop.f32.mrb[110].mxu1 }
 0x2de   : > { %v17203_v2 = vpop.f32.mrb[111].mxu0  ;;  %v12628_v9 = vpop.f32.mrb[111].mxu1  ;;  %10750 = vperm.xlu0 %15098, %v10716_v46   ;;  %v15243_v46 = vld [vmem:[%s19744_s1 + $0x254] ss:$8 sps:$4 sm:$0xff]  }
 0x2df   : > { %v17214_v19 = vadd.f32 %v12626_v52, %v16746_v21  ;;  %v12629_v60 = vadd.f32 %v12628_v9, %v12627_v55  ;;  %v17222_v63 = vpop.permute.xlu1 %3053  ;;  %v17224_v50 = vpop.permute.xlu0 %3058  ;;  %v10717_v21 = vld [vmem:[%s19755_s12 + $0x8] sm:$0xff] }
 0x2e0   : > { %19792 = vst [vmem:[#allocation20_spill] sm:$0xff] %v17222_v63  ;;  %19793 = vst [vmem:[#allocation21_spill] sm:$0xff] %v17224_v50  ;;  %10755 = vperm.xlu1 %15099, %v10717_v21  }
 0x2e1   : > { %19790 = vst [vmem:[#allocation18_spill] sm:$0xff] %v17214_v19  ;;  %2242 = vmatmul.mubr.bf16.gmra.mrb[140].mxu1 %v15239_v29  ;;  %v17217_v59 = vadd.f32 %v12629_v60, %v16753_v32 }
 0x2e2   : > { %2249 = vmatprep.mubr.bf16.mxu1 %v15240_v22  ;;  %v15242_v22 = vld [vmem:[%s19744_s1 + $0x240] ss:$8 sps:$4 sm:$0xff]   ;;  %10760 = vperm.xlu0 %15098, %v10718_v7  }
 0x2e3   : > { %19791 = vst [vmem:[#allocation19_spill] sm:$0xff] %v17217_v59  ;;  %v14616_v9 = vpop.f32.mrb[112].mxu0  ;;  %v12630_v27 = vpop.f32.mrb[112].mxu1 }
 0x2e4   : > { %v2509_v29 = vpop.f32.mrb[113].mxu0  ;;  %v12631_v32 = vpop.f32.mrb[113].mxu1  ;;  %10765 = vperm.xlu1 %15099, %v10719_v34  }
 0x2e5   : > { %v14617_v52 = vpop.f32.mrb[114].mxu0  ;;  %v12632_v55 = vadd.f32 %v12631_v32, %v12630_v27  ;;  %v12633_v60 = vpop.f32.mrb[114].mxu1 }
 0x2e6   : > { %v2614_v5 = vpack.c.bf16 %v14617_v52, %v14616_v9  ;;  %v2512_v50 = vpop.f32.mrb[115].mxu0  ;;  %v12634_v63 = vpop.f32.mrb[115].mxu1  ;;  %v10720_v9 = vld [vmem:[%s19755_s12 + $0x20] sm:$0xff] }
 0x2e7   : > { %v2613_v59 = vpack.c.bf16 %v2512_v50, %v2509_v29  ;;  %v17239_v19 = vadd.f32 %v12632_v55, %v16766_v53  ;;  %v12635_v25 = vadd.f32 %v12634_v63, %v12633_v60  ;;  %v19794_v50 = vpack.c.bf16 %v17083_v40, %v17068_v42  ;;  %v17253_v53 = vpop.permute.xlu1 %3063  ;;  %v17255_v63 = vpop.permute.xlu0 %3068  ;;  %10770 = vperm.xlu0 %15098, %v10720_v9   ;;  %v15245_v42 = vld [vmem:[%s19744_s1 + $0x250] ss:$8 sps:$4 sm:$0xff]   ;;  %v15246_v55 = vld [vmem:[%s19744_s1 + $0x264] ss:$8 sps:$4 sm:$0xff]  }
 0x2e9   : > { %2250 = vmatmul.mubr.bf16.gmra.mrb[144].mxu1 %v15242_v22  ;;  %12806 = vmatprep.subr.bf16.mxu0 %v2613_v59  ;;  %v17245_v21 = vadd.f32 %v12635_v25, %v16773_v3  ;;  %v10721_v25 = vld [vmem:[%s19755_s12 + $0x28] sm:$0xff]  ;;  %v19795_v22 = vpack.c.bf16 %v17073_v37, %v17066_v10  ;;  %v10724_v37 = vld [vmem:[%s19755_s12 + $0x40] sm:$0xff] }
 0x2ea   : > { %12807 = vmatpush3.bf16.msra.mxu0 %v19794_v50  ;;  %2257 = vmatprep.mubr.bf16.mxu1 %v15243_v46 }
 0x2eb   : > { %v14620_v27 = vpop.f32.mrb[116].mxu0  ;;  %12808 = vmatprep.subr.bf16.mxu0 %v2614_v5  ;;  %v12636_v29 = vpop.f32.mrb[116].mxu1  ;;  %v10722_v5 = vld [vmem:[%s19755_s12 + $0x30] sm:$0xff]  ;;  %10775 = vperm.xlu1 %15099, %v10721_v25  }
 0x2ec   : > { %v2525_v59 = vpop.f32.mrb[117].mxu0  ;;  %v12637_v3 = vpop.f32.mrb[117].mxu1  ;;  %10780 = vperm.xlu0 %15098, %v10722_v5   ;;  %v10726_v5 = vld [vmem:[%s19755_s12 + $0x50] sm:$0xff] }
 0x2ed   : > { %v14621_v32 = vpop.f32.mrb[118].mxu0  ;;  %v12638_v40 = vadd.f32 %v12637_v3, %v12636_v29  ;;  %v12639_v7 = vpop.f32.mrb[118].mxu1 }
 0x2ee   : > { %v2616_v52 = vpack.c.bf16 %v14621_v32, %v14620_v27  ;;  %v2528_v34 = vpop.f32.mrb[119].mxu0  ;;  %12809 = vmatpush3.bf16.msra.mxu0 %v19795_v22  ;;  %v12640_v60 = vpop.f32.mrb[119].mxu1  ;;  %v10723_v27 = vld [vmem:[%s19755_s12 + $0x38] sm:$0xff]  ;;  %v19797_v22 = vpack.c.bf16 %v17116_v20, %v17109_v45 }
 0x2ef   : > { %v2615_v46 = vpack.c.bf16 %v2528_v34, %v2525_v59  ;;  %v17273_v9 = vadd.f32 %v12638_v40, %v16786_v23  ;;  %v12641_v50 = vadd.f32 %v12640_v60, %v12639_v7  ;;  %v19796_v23 = vpack.c.bf16 %v17123_v0, %v17111_v43  ;;  %v17287_v29 = vpop.permute.xlu1 %3073  ;;  %v17289_v59 = vpop.permute.xlu0 %3078  ;;  %10785 = vperm.xlu1 %15099, %v10723_v27   ;;  %v15248_v43 = vld [vmem:[%s19744_s1 + $0x260] ss:$8 sps:$4 sm:$0xff]  }
 0x2f0   : > { %10790 = vperm.xlu0 %15098, %v10724_v37   ;;  %v10727_v37 = vld [vmem:[%s19755_s12 + $0x58] sm:$0xff] }
 0x2f1   : > { %2258 = vmatmul.mubr.bf16.gmra.mrb[148].mxu1 %v15245_v42  ;;  %12810 = vmatprep.subr.bf16.mxu0 %v2615_v46  ;;  %v17279_v10 = vadd.f32 %v12641_v50, %v16793_v54  ;;  %v10725_v42 = vld [vmem:[%s19755_s12 + $0x48] sm:$0xff] }
 0x2f2   : > { %12811 = vmatpush3.bf16.msra.mxu0 %v19796_v23  ;;  %2265 = vmatprep.mubr.bf16.mxu1 %v15246_v55  ;;  %v15249_v55 = vld [vmem:[%s19744_s1 + $0x274] ss:$8 sps:$4 sm:$0xff]   ;;  %v10728_v23 = vld [vmem:[%s19755_s12 + $0x60] sm:$0xff] }
 0x2f3   : > { %v14624_v3 = vpop.f32.mrb[120].mxu0  ;;  %12812 = vmatprep.subr.bf16.mxu0 %v2616_v52  ;;  %v12642_v25 = vpop.f32.mrb[120].mxu1  ;;  %10795 = vperm.xlu1 %15099, %v10725_v42  }
 0x2f4   : > { %v2541_v32 = vpop.f32.mrb[121].mxu0  ;;  %v12643_v54 = vpop.f32.mrb[121].mxu1  ;;  %10800 = vperm.xlu0 %15098, %v10726_v5   ;;  %v15252_v5 = vld [vmem:[%s19744_s1 + $0x284] ss:$8 sps:$4 sm:$0xff]  }
 0x2f5   : > { %v14625_v40 = vpop.f32.mrb[122].mxu0  ;;  %v12644_v0 = vadd.f32 %v12643_v54, %v12642_v25  ;;  %v12645_v7 = vpop.f32.mrb[122].mxu1 }
 0x2f6   : > { %v2618_v52 = vpack.c.bf16 %v14625_v40, %v14624_v3  ;;  %v2544_v34 = vpop.f32.mrb[123].mxu0  ;;  %12813 = vmatpush3.bf16.msra.mxu0 %v19797_v22  ;;  %v12646_v60 = vpop.f32.mrb[123].mxu1  ;;  %v15251_v40 = vld [vmem:[%s19744_s1 + $0x270] ss:$8 sps:$4 sm:$0xff]  }
 0x2f7   : > { %v2617_v46 = vpack.c.bf16 %v2544_v34, %v2541_v32  ;;  %v17307_v50 = vadd.f32 %v12644_v0, %v16806_v12  ;;  %v12647_v27 = vadd.f32 %v12646_v60, %v12645_v7  ;;  %v17312_v45 = vpop.permute.xlu1 %3083  ;;  %v19798_v12 = vpack.c.bf16 %v17163_v36, %v17151_v48  ;;  %v17323_v25 = vpop.permute.xlu0 %3088  ;;  %10805 = vperm.xlu1 %15099, %v10727_v37   ;;  %v10730_v36 = vld [vmem:[%s19755_s12 + $0x70] sm:$0xff] }
 0x2f8   : > { %10810 = vperm.xlu0 %15098, %v10728_v23   ;;  %v19799_v7 = vpack.c.bf16 %v17156_v11, %v17149_v44  ;;  %v10731_v44 = vld [vmem:[%s19755_s12 + $0x78] sm:$0xff]  ;;  %v10732_v11 = vld [vmem:[%s19755_s12 + $0x80] sm:$0xff]  ;;  %v19800_v37 = vpack.c.bf16 %v17203_v2, %v17191_v8 }
 0x2f9   : > { %2266 = vmatmul.mubr.bf16.gmra.mrb[152].mxu1 %v15248_v43  ;;  %12814 = vmatprep.subr.bf16.mxu0 %v2617_v46  ;;  %v17315_v20 = vadd.f32 %v12647_v27, %v16813_v30  ;;  %v10729_v30 = vld [vmem:[%s19755_s12 + $0x68] sm:$0xff] }
 0x2fa   : > { %12815 = vmatpush3.bf16.msra.mxu0 %v19798_v12  ;;  %2273 = vmatprep.mubr.bf16.mxu1 %v15249_v55  ;;  %v10733_v12 = vld [vmem:[%s19755_s12 + $0x88] sm:$0xff] }
 0x2fb   : > { %v14628_v3 = vpop.f32.mrb[124].mxu0  ;;  %12816 = vmatprep.subr.bf16.mxu0 %v2618_v52  ;;  %v12648_v54 = vpop.f32.mrb[124].mxu1  ;;  %10815 = vperm.xlu1 %15099, %v10729_v30   ;;  %v15257_v8 = vld [vmem:[%s19744_s1 + $0x280] ss:$8 sps:$4 sm:$0xff]   ;;  %v15260_v30 = vld [vmem:[%s19744_s1 + $0x314] ss:$8 sps:$4 sm:$0xff]  }
 0x2fc   : > { %v2557_v32 = vpop.f32.mrb[125].mxu0  ;;  %v12649_v48 = vpop.f32.mrb[125].mxu1  ;;  %10820 = vperm.xlu0 %15098, %v10730_v36   ;;  %v15262_v36 = vld [vmem:[%s19744_s1 + $0x290] ss:$8 sps:$4 sm:$0xff]  }
 0x2fd   : > { %v14629_v42 = vpop.f32.mrb[126].mxu0  ;;  %v12650_v52 = vadd.f32 %v12649_v48, %v12648_v54  ;;  %v12651_v34 = vpop.f32.mrb[126].mxu1  ;;  %v15258_v54 = vld [vmem:[%s19744_s1 + $0x294] ss:$8 sps:$4 sm:$0xff]   ;;  %v10737_v48 = vld [vmem:[%s19755_s12 + $0xa8] sm:$0xff] }
 0x2fe   : > { %v2620_v43 = vpack.c.bf16 %v14629_v42, %v14628_v3  ;;  %v2560_v0 = vpop.f32.mrb[127].mxu0  ;;  %12817 = vmatpush3.bf16.msra.mxu0 %v19799_v7  ;;  %v17340_v55 = vpop.permute.xlu1 %3093  ;;  %v15254_v3 = vld [vmem:[%s19744_s1 + $0x300] ss:$8 sps:$4 sm:$0xff]   ;;  %v15264_v7 = vld [vmem:[%s19744_s1 + $0x2a4] ss:$8 sps:$4 sm:$0xff]  }
 0x2ff   : > { %v2619_v22 = vpack.c.bf16 %v2560_v0, %v2557_v32  ;;  %v12652_v60 = vpop.f32.mrb[127].mxu1  ;;  %v17343_v46 = vadd.f32 %v12650_v52, %v16826_v56  ;;  %v17354_v23 = vpop.permute.xlu0 %3098  ;;  %10825 = vperm.xlu1 %15099, %v10731_v44   ;;  %v19801_v32 = vpack.c.bf16 %v17196_v61, %v17189_v18  ;;  %v10736_v18 = vld [vmem:[%s19755_s12 + $0xa0] sm:$0xff]  ;;  %v10738_v0 = vld [vmem:[%s19755_s12 + $0xb0] sm:$0xff]  ;;  %v10741_v44 = vld [vmem:[%s19755_s12 + $0xc8] sm:$0xff] }
 0x300   : > { %v12653_v27 = vadd.f32 %v12652_v60, %v12651_v34  ;;  %10830 = vperm.xlu0 %15098, %v10732_v11   ;;  %v10739_v34 = vld [vmem:[%s19755_s12 + $0xb8] sm:$0xff]  ;;  %v10740_v60 = vld [vmem:[%s19755_s12 + $0xc0] sm:$0xff] }
 0x301   : > { %2274 = vmatmul.mubr.bf16.gmra.mrb[156].mxu1 %v15251_v40  ;;  %12818 = vmatprep.subr.bf16.mxu0 %v2619_v22  ;;  %v10735_v40 = vld [vmem:[%s19755_s12 + $0x98] sm:$0xff]  ;;  %v15268_v11 = vld [vmem:[%s19744_s1 + $0x2a0] ss:$8 sps:$4 sm:$0xff]  }
 0x302   : > { %12819 = vmatpush3.bf16.msra.mxu0 %v19800_v37  ;;  %2281 = vmatprep.mubr.bf16.mxu1 %v15252_v5  ;;  %v17357_v56 = vadd.f32 %v12653_v27, %v16833_v13  ;;  %v17368_v2 = vpop.permute.xlu1 %3103  ;;  %v10734_v13 = vld [vmem:[%s19755_s12 + $0x90] sm:$0xff]  ;;  %v15266_v5 = vld [vmem:[%s19744_s1 + $0x324] ss:$8 sps:$4 sm:$0xff]   ;;  %v15269_v37 = vld [vmem:[%s19744_s1 + $0x320] ss:$8 sps:$4 sm:$0xff]  }
 0x303   : > { %12820 = vmatprep.subr.bf16.mxu0 %v2620_v43  ;;  %10835 = vperm.xlu1 %15099, %v10733_v12   ;;  %v17382_v42 = vpop.permute.xlu0 %3108  ;;  %v15263_v43 = vld [vmem:[%s19744_s1 + $0x310] ss:$8 sps:$4 sm:$0xff]  }
 0x304   : > { %10840 = vperm.xlu0 %15098, %v10734_v13   ;;  %v10742_v12 = vld [vmem:[%s19755_s12 + $0xd0] sm:$0xff] }
 0x306   : > { %12821 = vmatpush3.bf16.msra.mxu0 %v19801_v32  ;;  %v17390_v61 = vpop.permute.xlu1 %3113  ;;  %v10743_v32 = vld [vmem:[%s19755_s12 + $0xd8] sm:$0xff] }
 0x307   : > { %10845 = vperm.xlu1 %15099, %v10735_v40   ;;  %v17410_v52 = vpop.permute.xlu0 %3118  ;;  %v10745_v40 = vld [vmem:[%s19755_s12 + $0xe8] sm:$0xff] }
 0x308   : > { %10850 = vperm.xlu0 %15098, %v10736_v18   ;;  %v15274_v18 = vld [vmem:[%s19744_s1 + $0x2b0] ss:$8 sps:$4 sm:$0xff]  }
 0x309   : > { %2282 = vmatmul.mubr.bf16.gmra.mrb[160].mxu1 %v15257_v8  ;;  %2814 = vmatmul.mubr.bf16.vlgmr.msra.gmra.mrb[128].mxu0 %v15254_v3  ;;  %v15270_v3 = vld [vmem:[%s19744_s1 + $0x2b4] ss:$8 sps:$4 sm:$0xff]  }
 0x30a   : > { %2289 = vmatprep.mubr.bf16.mxu1 %v15258_v54  ;;  %2821 = vmatprep.mubr.bf16.mxu0 %v15260_v30  ;;  %v17415_v22 = vpop.permute.xlu1 %3123  ;;  %v15272_v8 = vld [vmem:[%s19744_s1 + $0x334] ss:$8 sps:$4 sm:$0xff]   ;;  %v10744_v54 = vld [vmem:[%s19755_s12 + $0xe0] sm:$0xff] }
 0x30b   : > { %10855 = vperm.xlu1 %15099, %v10737_v48   ;;  %v17420_v27 = vpop.permute.xlu0 %3128  ;;  %v15275_v48 = vld [vmem:[%s19744_s1 + $0x330] ss:$8 sps:$4 sm:$0xff]  }
 0x30c   : > { %10860 = vperm.xlu0 %15098, %v10738_v0   ;;  %19802 = vst [vmem:[#allocation22_spill] sm:$0xff] %v17420_v27  ;;  %v15278_v0 = vld [vmem:[%s19744_s1 + $0x344] ss:$8 sps:$4 sm:$0xff]  }
 0x30e   : > { %v17440_v13 = vpop.permute.xlu1 %3133 }
 0x30f   : > { %10865 = vperm.xlu1 %15099, %v10739_v34   ;;  %19803 = vst [vmem:[#allocation23_spill] sm:$0xff] %v17440_v13  ;;  %v17448_v30 = vpop.permute.xlu0 %3138  ;;  %v10747_v34 = vld [vmem:[%s19755_s12 + $0xf8] sm:$0xff] }
 0x310   : > { %10870 = vperm.xlu0 %15098, %v10740_v60   ;;  %19804 = vst [vmem:[#allocation24_spill] sm:$0xff] %v17448_v30 }
 0x311   : > { %2290 = vmatmul.mubr.bf16.gmra.mrb[164].mxu1 %v15262_v36  ;;  %2822 = vmatmul.mubr.bf16.gmra.mrb[132].mxu0 %v15263_v43  ;;  %v15276_v43 = vld [vmem:[%s19744_s1 + $0x2c4] ss:$8 sps:$4 sm:$0xff]  }
 0x312   : > { %2297 = vmatprep.mubr.bf16.mxu1 %v15264_v7  ;;  %2829 = vmatprep.mubr.bf16.mxu0 %v15266_v5  ;;  %v17459_v36 = vpop.permute.xlu1 %3143  ;;  %v10746_v7 = vld [vmem:[%s19755_s12 + $0xf0] sm:$0xff] }
 0x313   : > { %10875 = vperm.xlu1 %15099, %v10741_v44   ;;  %19805 = vst [vmem:[#allocation25_spill] sm:$0xff] %v17459_v36  ;;  %v17470_v5 = vpop.permute.xlu0 %3148  ;;  %v15280_v44 = vld [vmem:[%s19744_s1 + $0x2c0] ss:$8 sps:$4 sm:$0xff]  }
 0x314   : > { %10880 = vperm.xlu0 %15098, %v10742_v12   ;;  %19806 = vst [vmem:[#allocation26_spill] sm:$0xff] %v17470_v5  ;;  %v15284_v12 = vld [vmem:[%s19744_s1 + $0x354] ss:$8 sps:$4 sm:$0xff]  }
 0x316   : > { %v17475_v60 = vpop.permute.xlu1 %3153 }
 0x317   : > { %10885 = vperm.xlu1 %15099, %v10743_v32   ;;  %19807 = vst [vmem:[#allocation27_spill] sm:$0xff] %v17475_v60  ;;  %v15288_v32 = vld [vmem:[%s19744_s1 + $0x2e4] ss:$8 sps:$4 sm:$0xff]  }
 0x318   : > { %10890 = vperm.xlu0 %15098, %v10744_v54   ;;  %v15290_v54 = vld [vmem:[%s19744_s1 + $0x364] ss:$8 sps:$4 sm:$0xff]  }
 0x319   : > { %2298 = vmatmul.mubr.bf16.gmra.mrb[168].mxu1 %v15268_v11  ;;  %2830 = vmatmul.mubr.bf16.gmra.mrb[136].mxu0 %v15269_v37  ;;  %v15281_v11 = vld [vmem:[%s19744_s1 + $0x340] ss:$8 sps:$4 sm:$0xff]   ;;  %v15282_v37 = vld [vmem:[%s19744_s1 + $0x2d4] ss:$8 sps:$4 sm:$0xff]  }
 0x31a   : > { %2305 = vmatprep.mubr.bf16.mxu1 %v15270_v3  ;;  %2837 = vmatprep.mubr.bf16.mxu0 %v15272_v8  ;;  %v15286_v3 = vld [vmem:[%s19744_s1 + $0x2d0] ss:$8 sps:$4 sm:$0xff]  }
 0x31b   : > { %10895 = vperm.xlu1 %15099, %v10745_v40   ;;  %v15287_v8 = vld [vmem:[%s19744_s1 + $0x350] ss:$8 sps:$4 sm:$0xff]   ;;  %v15292_v40 = vld [vmem:[%s19744_s1 + $0x2e0] ss:$8 sps:$4 sm:$0xff]  }
 0x31c   : > { %10900 = vperm.xlu0 %15098, %v10746_v7   ;;  %v15299_v7 = vld [vmem:[%s19744_s1 + $0x370] ss:$8 sps:$4 sm:$0xff]  }
 0x31f   : > { %10905 = vperm.xlu1 %15099, %v10747_v34   ;;  %v15300_v34 = vld [vmem:[%s19744_s1 + $0x384] ss:$8 sps:$4 sm:$0xff]  }
 0x321   : > { %2306 = vmatmul.mubr.bf16.gmra.mrb[172].mxu1 %v15274_v18  ;;  %2838 = vmatmul.mubr.bf16.gmra.mrb[140].mxu0 %v15275_v48  ;;  %v15293_v18 = vld [vmem:[%s19744_s1 + $0x360] ss:$8 sps:$4 sm:$0xff]   ;;  %v15294_v48 = vld [vmem:[%s19744_s1 + $0x2f4] ss:$8 sps:$4 sm:$0xff]  }
 0x322   : > { %2313 = vmatprep.mubr.bf16.mxu1 %v15276_v43  ;;  %2845 = vmatprep.mubr.bf16.mxu0 %v15278_v0  ;;  %v15296_v43 = vld [vmem:[%s19744_s1 + $0x374] ss:$8 sps:$4 sm:$0xff]   ;;  %v15298_v0 = vld [vmem:[%s19744_s1 + $0x2f0] ss:$8 sps:$4 sm:$0xff]  }
 0x329   : > { %2314 = vmatmul.mubr.bf16.gmra.mrb[176].mxu1 %v15280_v44  ;;  %2846 = vmatmul.mubr.bf16.gmra.mrb[144].mxu0 %v15281_v11  ;;  %v15302_v44 = vld [vmem:[%s19744_s1 + $0x380] ss:$8 sps:$4 sm:$0xff]   ;;  %v15303_v11 = vld [vmem:[%s19744_s1 + $0x394] ss:$8 sps:$4 sm:$0xff]  }
 0x32a   : > { %2321 = vmatprep.mubr.bf16.mxu1 %v15282_v37  ;;  %2853 = vmatprep.mubr.bf16.mxu0 %v15284_v12  ;;  %v15305_v37 = vld [vmem:[%s19744_s1 + $0x390] ss:$8 sps:$4 sm:$0xff]   ;;  %v15306_v12 = vld [vmem:[%s19744_s1 + $0x3a4] ss:$8 sps:$4 sm:$0xff]  }
 0x331   : > { %2322 = vmatmul.mubr.bf16.gmra.mrb[180].mxu1 %v15286_v3  ;;  %2854 = vmatmul.mubr.bf16.gmra.mrb[148].mxu0 %v15287_v8  ;;  %v15308_v3 = vld [vmem:[%s19744_s1 + $0x3a0] ss:$8 sps:$4 sm:$0xff]   ;;  %v15309_v8 = vld [vmem:[%s19744_s1 + $0x3b4] ss:$8 sps:$4 sm:$0xff]  }
 0x332   : > { %2329 = vmatprep.mubr.bf16.mxu1 %v15288_v32  ;;  %2861 = vmatprep.mubr.bf16.mxu0 %v15290_v54  ;;  %v15311_v32 = vld [vmem:[%s19744_s1 + $0x3b0] ss:$8 sps:$4 sm:$0xff]   ;;  %v15312_v54 = vld [vmem:[%s19744_s1 + $0x3c4] ss:$8 sps:$4 sm:$0xff]  }
 0x339   : > { %2330 = vmatmul.mubr.bf16.gmra.mrb[184].mxu1 %v15292_v40  ;;  %2862 = vmatmul.mubr.bf16.gmra.mrb[152].mxu0 %v15293_v18  ;;  %v15314_v40 = vld [vmem:[%s19744_s1 + $0x3c0] ss:$8 sps:$4 sm:$0xff]   ;;  %v15315_v18 = vld [vmem:[%s19744_s1 + $0x3d4] ss:$8 sps:$4 sm:$0xff]  }
 0x33a   : > { %2337 = vmatprep.mubr.bf16.mxu1 %v15294_v48  ;;  %2869 = vmatprep.mubr.bf16.mxu0 %v15296_v43  ;;  %v15324_v48 = vld [vmem:[%s19748_s5] sm:$0xff]   ;;  %v15317_v43 = vld [vmem:[%s19744_s1 + $0x3d0] ss:$8 sps:$4 sm:$0xff]  }
 0x33b   : > { %14630 = vmatprep.subr.bf16.mxu1 %v15324_v48 }
 0x33c   : > { %14631 = vmatpush3.bf16.msra.mxu1 %v15324_v48 }
 0x341   : > { %2338 = vmatmul.mubr.bf16.gmra.mrb[188].mxu1 %v15298_v0  ;;  %2870 = vmatmul.mubr.bf16.gmra.mrb[156].mxu0 %v15299_v7  ;;  %v15318_v0 = vld [vmem:[%s19744_s1 + $0x3e4] ss:$8 sps:$4 sm:$0xff]  }
 0x342   : > { %2877 = vmatprep.mubr.bf16.mxu0 %v15300_v34  ;;  %v15325_v7 = vld [vmem:[%s19748_s5 + $0x8] sm:$0xff]  }
 0x343   : > { %14632 = vmatprep.subr.bf16.mxu1 %v15325_v7  ;;  %v15320_v34 = vld [vmem:[%s19744_s1 + $0x3e0] ss:$8 sps:$4 sm:$0xff]  }
 0x344   : > { %14633 = vmatpush3.bf16.msra.mxu1 %v15325_v7 }
 0x349   : > { %2878 = vmatmul.mubr.bf16.gmra.mrb[160].mxu0 %v15302_v44  ;;  %v15321_v44 = vld [vmem:[%s19744_s1 + $0x3f4] ss:$8 sps:$4 sm:$0xff]  }
 0x34a   : > { %2885 = vmatprep.mubr.bf16.mxu0 %v15303_v11  ;;  %v15323_v11 = vld [vmem:[%s19744_s1 + $0x3f0] ss:$8 sps:$4 sm:$0xff]  }
 0x351   : > { %2886 = vmatmul.mubr.bf16.gmra.mrb[164].mxu0 %v15305_v37 }
 0x352   : > { %2893 = vmatprep.mubr.bf16.mxu0 %v15306_v12 }
 0x359   : > { %2894 = vmatmul.mubr.bf16.gmra.mrb[168].mxu0 %v15308_v3 }
 0x35a   : > { %2901 = vmatprep.mubr.bf16.mxu0 %v15309_v8 }
 0x361   : > { %2902 = vmatmul.mubr.bf16.gmra.mrb[172].mxu0 %v15311_v32 }
 0x362   : > { %2909 = vmatprep.mubr.bf16.mxu0 %v15312_v54 }
 0x369   : > { %2910 = vmatmul.mubr.bf16.gmra.mrb[176].mxu0 %v15314_v40 }
 0x36a   : > { %2917 = vmatprep.mubr.bf16.mxu0 %v15315_v18 }
 0x371   : > { %2918 = vmatmul.mubr.bf16.gmra.mrb[180].mxu0 %v15317_v43 }
 0x372   : > { %2925 = vmatprep.mubr.bf16.mxu0 %v15318_v0 }
 0x379   : > { %2926 = vmatmul.mubr.bf16.gmra.mrb[184].mxu0 %v15320_v34 }
 0x37a   : > { %2933 = vmatprep.mubr.bf16.mxu0 %v15321_v44 }
 0x381   : > { %2934 = vmatmul.mubr.bf16.gmra.mrb[188].mxu0 %v15323_v11 }
 0x39c   : > { %v12690_v37 = vpop.f32.mrb[128].mxu1 }
 0x39d   : > { %v12691_v12 = vpop.f32.mrb[129].mxu1 }
 0x39e   : > { %v12692_v3 = vadd.f32 %v12691_v12, %v12690_v37  ;;  %v12693_v8 = vpop.f32.mrb[130].mxu1 }
 0x39f   : > { %v12694_v32 = vpop.f32.mrb[131].mxu1 }
 0x3a0   : > { %v17574_v54 = vadd.f32 %v12692_v3, %v16861_v14  ;;  %v12695_v40 = vadd.f32 %v12694_v32, %v12693_v8 }
 0x3a2   : > { %v17577_v18 = vadd.f32 %v12695_v40, %v16869_v28 }
 0x3a4   : > { %v12696_v48 = vpop.f32.mrb[132].mxu1 }
 0x3a5   : > { %v12697_v43 = vpop.f32.mrb[133].mxu1 }
 0x3a6   : > { %v12698_v0 = vadd.f32 %v12697_v43, %v12696_v48  ;;  %v12699_v7 = vpop.f32.mrb[134].mxu1 }
 0x3a7   : > { %v12700_v34 = vpop.f32.mrb[135].mxu1 }
 0x3a8   : > { %v17580_v44 = vadd.f32 %v12698_v0, %v16894_v15  ;;  %v12701_v11 = vadd.f32 %v12700_v34, %v12699_v7 }
 0x3aa   : > { %v17583_v37 = vadd.f32 %v12701_v11, %v16899_v24  ;;  %v19808_v11 = vld [vmem:[#allocation9_spill] sm:$0xff] }
 0x3ac   : > { %v12702_v12 = vpop.f32.mrb[136].mxu1 }
 0x3ad   : > { %v12703_v60 = vpop.f32.mrb[137].mxu1 }
 0x3ae   : > { %v12704_v14 = vadd.f32 %v12703_v60, %v12702_v12  ;;  %v12705_v3 = vpop.f32.mrb[138].mxu1 }
 0x3af   : > { %v12706_v8 = vpop.f32.mrb[139].mxu1 }
 0x3b0   : > { %v17586_v28 = vadd.f32 %v12704_v14, %v16924_v62  ;;  %v12707_v32 = vadd.f32 %v12706_v8, %v12705_v3 }
 0x3b2   : > { %v17589_v40 = vadd.f32 %v12707_v32, %v16929_v1 }
 0x3b4   : > { %v12708_v48 = vpop.f32.mrb[140].mxu1 }
 0x3b5   : > { %v12709_v43 = vpop.f32.mrb[141].mxu1 }
 0x3b6   : > { %v12710_v15 = vadd.f32 %v12709_v43, %v12708_v48  ;;  %v12711_v0 = vpop.f32.mrb[142].mxu1 }
 0x3b7   : > { %v12712_v7 = vpop.f32.mrb[143].mxu1 }
 0x3b8   : > { %v17592_v24 = vadd.f32 %v12710_v15, %v16954_v6  ;;  %v12713_v34 = vadd.f32 %v12712_v7, %v12711_v0 }
 0x3ba   : > { %v17595_v60 = vadd.f32 %v12713_v34, %v19808_v11 }
 0x3bc   : > { %v12714_v12 = vpop.f32.mrb[144].mxu1 }
 0x3bd   : > { %v12715_v5 = vpop.f32.mrb[145].mxu1 }
 0x3be   : > { %v12716_v62 = vadd.f32 %v12715_v5, %v12714_v12  ;;  %v12717_v14 = vpop.f32.mrb[146].mxu1 }
 0x3bf   : > { %v12718_v3 = vpop.f32.mrb[147].mxu1 }
 0x3c0   : > { %v17598_v1 = vadd.f32 %v12716_v62, %v16974_v57  ;;  %v12719_v8 = vadd.f32 %v12718_v3, %v12717_v14 }
 0x3c2   : > { %v17601_v32 = vadd.f32 %v12719_v8, %v16977_v16 }
 0x3c4   : > { %v12720_v48 = vpop.f32.mrb[148].mxu1 }
 0x3c5   : > { %v12721_v43 = vpop.f32.mrb[149].mxu1 }
 0x3c6   : > { %v12722_v6 = vadd.f32 %v12721_v43, %v12720_v48  ;;  %v12723_v15 = vpop.f32.mrb[150].mxu1 }
 0x3c7   : > { %v12724_v0 = vpop.f32.mrb[151].mxu1 }
 0x3c8   : > { %v17604_v7 = vadd.f32 %v12722_v6, %v16998_v35  ;;  %v12725_v34 = vadd.f32 %v12724_v0, %v12723_v15 }
 0x3ca   : > { %v17607_v5 = vadd.f32 %v12725_v34, %v17001_v41 }
 0x3cc   : > { %v12726_v11 = vpop.f32.mrb[152].mxu1 }
 0x3cd   : > { %v12727_v12 = vpop.f32.mrb[153].mxu1 }
 0x3ce   : > { %v12728_v57 = vadd.f32 %v12727_v12, %v12726_v11  ;;  %v12729_v62 = vpop.f32.mrb[154].mxu1 }
 0x3cf   : > { %v12730_v14 = vpop.f32.mrb[155].mxu1 }
 0x3d0   : > { %v17610_v16 = vadd.f32 %v12728_v57, %v17022_v26  ;;  %v12731_v3 = vadd.f32 %v12730_v14, %v12729_v62 }
 0x3d2   : > { %v17613_v8 = vadd.f32 %v12731_v3, %v17025_v31 }
 0x3d4   : > { %v12732_v48 = vpop.f32.mrb[156].mxu1 }
 0x3d5   : > { %v12733_v43 = vpop.f32.mrb[157].mxu1 }
 0x3d6   : > { %v12734_v35 = vadd.f32 %v12733_v43, %v12732_v48  ;;  %v12735_v6 = vpop.f32.mrb[158].mxu1 }
 0x3d7   : > { %v12736_v15 = vpop.f32.mrb[159].mxu1 }
 0x3d8   : > { %v17616_v41 = vadd.f32 %v12734_v35, %v17048_v58  ;;  %v12737_v0 = vadd.f32 %v12736_v15, %v12735_v6 }
 0x3da   : > { %v17619_v34 = vadd.f32 %v12737_v0, %v17051_v38  ;;  %v15326_v0 = vld [vmem:[%s19748_s5 + $0x10] sm:$0xff]  }
 0x3db   : > { %14666 = vmatprep.subr.bf16.mxu1 %v15326_v0 }
 0x3dc   : > { %v12738_v11 = vpop.f32.mrb[160].mxu1  ;;  %v12822_v12 = vpop.f32.mrb[128].mxu0 }
 0x3dd   : > { %v12739_v26 = vpop.f32.mrb[161].mxu1  ;;  %v12823_v57 = vpop.f32.mrb[129].mxu0 }
 0x3de   : > { %v12740_v62 = vadd.f32 %v12739_v26, %v12738_v11  ;;  %v12824_v14 = vadd.f32 %v12823_v57, %v12822_v12  ;;  %v12741_v31 = vpop.f32.mrb[162].mxu1  ;;  %v12825_v3 = vpop.f32.mrb[130].mxu0 }
 0x3df   : > { %v12742_v36 = vpop.f32.mrb[163].mxu1  ;;  %v12826_v30 = vpop.f32.mrb[131].mxu0 }
 0x3e0   : > { %v17622_v48 = vadd.f32 %v12740_v62, %v17094_v17  ;;  %v2942_v58 = vadd.f32 %v12824_v14, %v17574_v54  ;;  %v12743_v43 = vadd.f32 %v12742_v36, %v12741_v31  ;;  %v12827_v35 = vadd.f32 %v12826_v30, %v12825_v3 }
 0x3e2   : > { %v3166_v38 = vadd.f32 %v17033_v33, %v2942_v58  ;;  %v17627_v6 = vadd.f32 %v12743_v43, %v17097_v47  ;;  %v2943_v15 = vadd.f32 %v12827_v35, %v17577_v18 }
 0x3e4   : > { %v3167_v11 = vadd.f32 %v17061_v51, %v2943_v15  ;;  %v12744_v12 = vpop.f32.mrb[164].mxu1  ;;  %v12828_v17 = vpop.f32.mrb[132].mxu0  ;;  %v3198_v26 = vmul.f32 0.2, %v3166_v38 }
 0x3e5   : > { %v12745_v57 = vpop.f32.mrb[165].mxu1  ;;  %v12829_v54 = vpop.f32.mrb[133].mxu0 }
 0x3e6   : > { %v3199_v30 = vmul.f32 0.2, %v3167_v11  ;;  %v12746_v36 = vadd.f32 %v12745_v57, %v12744_v12  ;;  %v12830_v33 = vadd.f32 %v12829_v54, %v12828_v17  ;;  %v12747_v62 = vpop.f32.mrb[166].mxu1  ;;  %v12831_v47 = vpop.f32.mrb[134].mxu0  ;;  %v3230_v43 = vmax.f32 %v3166_v38, %v3198_v26  ;;  %v19810_v54 = vld [vmem:[#allocation10_spill] sm:$0xff] }
 0x3e7   : > { %v12748_v14 = vpop.f32.mrb[167].mxu1  ;;  %v12832_v31 = vpop.f32.mrb[135].mxu0 }
 0x3e8   : > { %v17635_v18 = vadd.f32 %v12746_v36, %v17134_v39  ;;  %v2944_v3 = vadd.f32 %v12830_v33, %v17580_v44  ;;  %v12749_v58 = vadd.f32 %v12748_v14, %v12747_v62  ;;  %v12833_v51 = vadd.f32 %v12832_v31, %v12831_v47  ;;  %v19811_v14 = vld [vmem:[#allocation14_spill] sm:$0xff] }
 0x3e9   : > { %v3231_v35 = vmax.f32 %v3167_v11, %v3199_v30 }
 0x3ea   : > { %v3168_v15 = vadd.f32 %v17059_v4, %v2944_v3  ;;  %v17640_v13 = vadd.f32 %v12749_v58, %v17137_v49  ;;  %v2945_v12 = vadd.f32 %v12833_v51, %v17583_v37 }
 0x3eb   : > { %v17643_v17 = vpack.c.bf16 %v3231_v35, %v3230_v43  ;;  %v19813_v35 = vld [vmem:[#allocation11_spill] sm:$0xff] }
 0x3ec   : > { %v3200_v57 = vmul.f32 0.2, %v3168_v15  ;;  %v3169_v39 = vadd.f32 %v19810_v54, %v2945_v12  ;;  %v12750_v36 = vpop.f32.mrb[168].mxu1  ;;  %v12834_v27 = vpop.f32.mrb[136].mxu0  ;;  %v19814_v54 = vld [vmem:[#allocation15_spill] sm:$0xff] }
 0x3ed   : > { %19809 = vst [vmem:[#allocation9_spill] sm:$0xff] %v17643_v17  ;;  %14634 = vmatprep.mubr.msk.bf16.mxu1 %vm3294_vm1, %v17643_v17  ;;  %v12751_v44 = vpop.f32.mrb[169].mxu1  ;;  %v12835_v38 = vpop.f32.mrb[137].mxu0 }
 0x3ee   : > { %v3201_v11 = vmul.f32 0.2, %v3169_v39  ;;  %v12752_v4 = vadd.f32 %v12751_v44, %v12750_v36  ;;  %v12836_v26 = vadd.f32 %v12835_v38, %v12834_v27  ;;  %v12753_v49 = vpop.f32.mrb[170].mxu1  ;;  %v12837_v30 = vpop.f32.mrb[138].mxu0  ;;  %v3232_v33 = vmax.f32 %v3168_v15, %v3200_v57  ;;  %v15327_v27 = vld [vmem:[%s19748_s5 + $0x18] sm:$0xff]  }
 0x3ef   : > { %v12754_v37 = vpop.f32.mrb[171].mxu1  ;;  %v12838_v62 = vpop.f32.mrb[139].mxu0  ;;  %v19815_v44 = vld [vmem:[#allocation12_spill] sm:$0xff] }
 0x3f0   : > { %v3233_v47 = vmax.f32 %v3169_v39, %v3201_v11  ;;  %v17649_v31 = vadd.f32 %v12752_v4, %v19811_v14  ;;  %v2946_v3 = vadd.f32 %v12836_v26, %v17586_v28  ;;  %v12755_v58 = vadd.f32 %v12754_v37, %v12753_v49 }
 0x3f1   : > { %v12839_v51 = vadd.f32 %v12838_v62, %v12837_v30 }
 0x3f2   : > { %v17652_v43 = vpack.c.bf16 %v3233_v47, %v3232_v33  ;;  %v3170_v12 = vadd.f32 %v19813_v35, %v2946_v3  ;;  %v17656_v36 = vadd.f32 %v12755_v58, %v19814_v54 }
 0x3f3   : > { %v2947_v15 = vadd.f32 %v12839_v51, %v17589_v40  ;;  %v19816_v40 = vld [vmem:[#allocation18_spill] sm:$0xff] }
 0x3f4   : > { %19812 = vst [vmem:[#allocation10_spill] sm:$0xff] %v17652_v43  ;;  %v12756_v57 = vpop.f32.mrb[172].mxu1  ;;  %v12840_v39 = vpop.f32.mrb[140].mxu0  ;;  %14635 = vmatmul.mubr.msk.bf16.vlgmr.msra.gmra.mrb[192].mxu1 %vm3294_vm1, %v17652_v43  ;;  %v3202_v28 = vmul.f32 0.2, %v3170_v12 }
 0x3f5   : > { %v3171_v38 = vadd.f32 %v19815_v44, %v2947_v15  ;;  %v12757_v11 = vpop.f32.mrb[173].mxu1  ;;  %v12841_v4 = vpop.f32.mrb[141].mxu0  ;;  %14667 = vmatpush3.bf16.msra.mxu1 %v15326_v0  ;;  %v19817_v15 = vld [vmem:[#allocation13_spill] sm:$0xff] }
 0x3f6   : > { %v12758_v26 = vadd.f32 %v12757_v11, %v12756_v57  ;;  %v12842_v49 = vadd.f32 %v12841_v4, %v12840_v39  ;;  %v12759_v30 = vpop.f32.mrb[174].mxu1  ;;  %v12843_v33 = vpop.f32.mrb[142].mxu0  ;;  %14668 = vmatprep.subr.bf16.mxu1 %v15327_v27  ;;  %v3234_v35 = vmax.f32 %v3170_v12, %v3202_v28  ;;  %v19818_v57 = vld [vmem:[#allocation19_spill] sm:$0xff]  ;;  %v19819_v4 = vld [vmem:[#allocation16_spill] sm:$0xff] }
 0x3f7   : > { %v3203_v37 = vmul.f32 0.2, %v3171_v38  ;;  %v12760_v62 = vpop.f32.mrb[175].mxu1  ;;  %v12844_v47 = vpop.f32.mrb[143].mxu0 }
 0x3f8   : > { %v17666_v14 = vadd.f32 %v12758_v26, %v19816_v40  ;;  %v2948_v3 = vadd.f32 %v12842_v49, %v17592_v24  ;;  %v12761_v58 = vadd.f32 %v12760_v62, %v12759_v30  ;;  %v12845_v51 = vadd.f32 %v12844_v47, %v12843_v33 }
 0x3f9   : > { %v3235_v54 = vmax.f32 %v3171_v38, %v3203_v37  ;;  %14669 = vmatpush3.bf16.msra.mxu1 %v15327_v27 }
 0x3fa   : > { %v3172_v0 = vadd.f32 %v19817_v15, %v2948_v3  ;;  %v17671_v39 = vadd.f32 %v12761_v58, %v19818_v57  ;;  %v2949_v44 = vadd.f32 %v12845_v51, %v17595_v60 }
 0x3fb   : > { %v17674_v11 = vpack.c.bf16 %v3235_v54, %v3234_v35  ;;  %v19820_v35 = vld [vmem:[#allocation17_spill] sm:$0xff] }
 0x3fc   : > { %v3173_v43 = vadd.f32 %v19819_v4, %v2949_v44  ;;  %v12762_v26 = vpop.f32.mrb[176].mxu1  ;;  %v12846_v40 = vpop.f32.mrb[144].mxu0  ;;  %v3204_v17 = vmul.f32 0.2, %v3172_v0  ;;  %v19821_v4 = vld [vmem:[#allocation20_spill] sm:$0xff] }
 0x3fd   : > { %14638 = vmatprep.mubr.msk.bf16.mxu1 %vm3294_vm1, %v17674_v11  ;;  %v12763_v24 = vpop.f32.mrb[177].mxu1  ;;  %v12847_v12 = vpop.f32.mrb[145].mxu0 }
 0x3fe   : > { %v3205_v27 = vmul.f32 0.2, %v3173_v43  ;;  %v12764_v28 = vadd.f32 %v12763_v24, %v12762_v26  ;;  %v12848_v38 = vadd.f32 %v12847_v12, %v12846_v40  ;;  %v12765_v49 = vpop.f32.mrb[178].mxu1  ;;  %v12849_v30 = vpop.f32.mrb[146].mxu0  ;;  %v3236_v58 = vmax.f32 %v3172_v0, %v3204_v17 }
 0x3ff   : > { %v12766_v33 = vpop.f32.mrb[179].mxu1  ;;  %v12850_v37 = vpop.f32.mrb[147].mxu0 }
 0x400   : > { %v17680_v60 = vadd.f32 %v12764_v28, %v17239_v19  ;;  %v2950_v62 = vadd.f32 %v12848_v38, %v17598_v1  ;;  %v12767_v47 = vadd.f32 %v12766_v33, %v12765_v49  ;;  %v12851_v3 = vadd.f32 %v12850_v37, %v12849_v30 }
 0x401   : > { %v3237_v51 = vmax.f32 %v3173_v43, %v3205_v27 }
 0x402   : > { %v3174_v54 = vadd.f32 %v19820_v35, %v2950_v62  ;;  %v17685_v15 = vadd.f32 %v12767_v47, %v17245_v21  ;;  %v2951_v57 = vadd.f32 %v12851_v3, %v17601_v32  ;;  %v19822_v47 = vld [vmem:[#allocation21_spill] sm:$0xff] }
 0x403   : > { %v17688_v44 = vpack.c.bf16 %v3237_v51, %v3236_v58 }
 0x404   : > { %v3175_v26 = vadd.f32 %v19821_v4, %v2951_v57  ;;  %v12768_v40 = vpop.f32.mrb[180].mxu1  ;;  %v12852_v19 = vpop.f32.mrb[148].mxu0  ;;  %v3206_v24 = vmul.f32 0.2, %v3174_v54 }
 0x405   : > { %14639 = vmatmul.mubr.msk.bf16.gmra.mrb[196].mxu1 %vm3294_vm1, %v17688_v44  ;;  %v12769_v1 = vpop.f32.mrb[181].mxu1  ;;  %v12853_v17 = vpop.f32.mrb[149].mxu0 }
 0x406   : > { %v3207_v43 = vmul.f32 0.2, %v3175_v26  ;;  %v12770_v0 = vadd.f32 %v12769_v1, %v12768_v40  ;;  %v12854_v12 = vadd.f32 %v12853_v17, %v12852_v19  ;;  %v12771_v27 = vpop.f32.mrb[182].mxu1  ;;  %v12855_v21 = vpop.f32.mrb[150].mxu0  ;;  %v3238_v37 = vmax.f32 %v3174_v54, %v3206_v24 }
 0x407   : > { %v12772_v28 = vpop.f32.mrb[183].mxu1  ;;  %v12856_v38 = vpop.f32.mrb[151].mxu0 }
 0x408   : > { %v17694_v32 = vadd.f32 %v12770_v0, %v17273_v9  ;;  %v2952_v49 = vadd.f32 %v12854_v12, %v17604_v7  ;;  %v12773_v30 = vadd.f32 %v12772_v28, %v12771_v27  ;;  %v12857_v33 = vadd.f32 %v12856_v38, %v12855_v21 }
 0x409   : > { %v3239_v62 = vmax.f32 %v3175_v26, %v3207_v43 }
 0x40a   : > { %v3176_v3 = vadd.f32 %v19822_v47, %v2952_v49  ;;  %v17699_v58 = vadd.f32 %v12773_v30, %v17279_v10  ;;  %v2953_v51 = vadd.f32 %v12857_v33, %v17607_v5 }
 0x40b   : > { %v17702_v35 = vpack.c.bf16 %v3239_v62, %v3238_v37 }
 0x40c   : > { %v3177_v57 = vadd.f32 %v17253_v53, %v2953_v51  ;;  %v12774_v4 = vpop.f32.mrb[184].mxu1  ;;  %v12858_v9 = vpop.f32.mrb[152].mxu0  ;;  %v3208_v40 = vmul.f32 0.2, %v3176_v3 }
 0x40d   : > { %14642 = vmatprep.mubr.msk.bf16.mxu1 %vm3294_vm1, %v17702_v35  ;;  %v12775_v7 = vpop.f32.mrb[185].mxu1  ;;  %v12859_v54 = vpop.f32.mrb[153].mxu0 }
 0x40e   : > { %v3209_v26 = vmul.f32 0.2, %v3177_v57  ;;  %v12776_v19 = vadd.f32 %v12775_v7, %v12774_v4  ;;  %v12860_v24 = vadd.f32 %v12859_v54, %v12858_v9  ;;  %v12777_v1 = vpop.f32.mrb[186].mxu1  ;;  %v12861_v10 = vpop.f32.mrb[154].mxu0  ;;  %v3240_v27 = vmax.f32 %v3176_v3, %v3208_v40 }
 0x40f   : > { %v12778_v17 = vpop.f32.mrb[187].mxu1  ;;  %v12862_v43 = vpop.f32.mrb[155].mxu0 }
 0x410   : > { %v17708_v5 = vadd.f32 %v12776_v19, %v17307_v50  ;;  %v2954_v53 = vadd.f32 %v12860_v24, %v17610_v16  ;;  %v12779_v0 = vadd.f32 %v12778_v17, %v12777_v1  ;;  %v12863_v12 = vadd.f32 %v12862_v43, %v12861_v10 }
 0x411   : > { %v3241_v21 = vmax.f32 %v3177_v57, %v3209_v26 }
 0x412   : > { %v3178_v28 = vadd.f32 %v17255_v63, %v2954_v53  ;;  %v17713_v38 = vadd.f32 %v12779_v0, %v17315_v20  ;;  %v2955_v49 = vadd.f32 %v12863_v12, %v17613_v8 }
 0x413   : > { %v17716_v30 = vpack.c.bf16 %v3241_v21, %v3240_v27 }
 0x414   : > { %v3179_v33 = vadd.f32 %v17287_v29, %v2955_v49  ;;  %v12780_v37 = vpop.f32.mrb[188].mxu1  ;;  %v12864_v50 = vpop.f32.mrb[156].mxu0  ;;  %v3210_v62 = vmul.f32 0.2, %v3178_v28 }
 0x415   : > { %14643 = vmatmul.mubr.msk.bf16.gmra.mrb[200].mxu1 %vm3294_vm1, %v17716_v30  ;;  %v12781_v16 = vpop.f32.mrb[189].mxu1  ;;  %v12865_v47 = vpop.f32.mrb[157].mxu0 }
 0x416   : > { %v3211_v3 = vmul.f32 0.2, %v3179_v33  ;;  %v12782_v51 = vadd.f32 %v12781_v16, %v12780_v37  ;;  %v12866_v63 = vadd.f32 %v12865_v47, %v12864_v50  ;;  %v12783_v57 = vpop.f32.mrb[190].mxu1  ;;  %v12867_v20 = vpop.f32.mrb[158].mxu0  ;;  %v3242_v54 = vmax.f32 %v3178_v28, %v3210_v62 }
 0x417   : > { %v12784_v4 = vpop.f32.mrb[191].mxu1  ;;  %v12868_v9 = vpop.f32.mrb[159].mxu0 }
 0x418   : > { %v17722_v8 = vadd.f32 %v12782_v51, %v17343_v46  ;;  %v2956_v29 = vadd.f32 %v12866_v63, %v17616_v41  ;;  %v12785_v40 = vadd.f32 %v12784_v4, %v12783_v57  ;;  %v12869_v7 = vadd.f32 %v12868_v9, %v12867_v20 }
 0x419   : > { %v3243_v26 = vmax.f32 %v3179_v33, %v3211_v3 }
 0x41a   : > { %v3180_v19 = vadd.f32 %v17289_v59, %v2956_v29  ;;  %v17727_v24 = vadd.f32 %v12785_v40, %v17357_v56  ;;  %v2957_v1 = vadd.f32 %v12869_v7, %v17619_v34 }
 0x41b   : > { %v17730_v10 = vpack.c.bf16 %v3243_v26, %v3242_v54 }
 0x41c   : > { %v3212_v17 = vmul.f32 0.2, %v3180_v19  ;;  %v3181_v43 = vadd.f32 %v17312_v45, %v2957_v1  ;;  %v12870_v46 = vpop.f32.mrb[160].mxu0 }
 0x41d   : > { %14646 = vmatprep.mubr.msk.bf16.mxu1 %vm3294_vm1, %v17730_v10  ;;  %v12871_v41 = vpop.f32.mrb[161].mxu0 }
 0x41e   : > { %v3213_v53 = vmul.f32 0.2, %v3181_v43  ;;  %v12872_v0 = vadd.f32 %v12871_v41, %v12870_v46  ;;  %v12873_v12 = vpop.f32.mrb[162].mxu0  ;;  %v3244_v21 = vmax.f32 %v3180_v19, %v3212_v17 }
 0x41f   : > { %v12874_v27 = vpop.f32.mrb[163].mxu0 }
 0x420   : > { %v2958_v59 = vadd.f32 %v12872_v0, %v17622_v48  ;;  %v12875_v56 = vadd.f32 %v12874_v27, %v12873_v12  ;;  %v3245_v28 = vmax.f32 %v3181_v43, %v3213_v53 }
 0x422   : > { %v3182_v34 = vadd.f32 %v17323_v25, %v2958_v59  ;;  %v2959_v49 = vadd.f32 %v12875_v56, %v17627_v6  ;;  %v17738_v33 = vpack.c.bf16 %v3245_v28, %v3244_v21 }
 0x424   : > { %v3214_v45 = vmul.f32 0.2, %v3182_v34  ;;  %v3183_v37 = vadd.f32 %v17340_v55, %v2959_v49  ;;  %v12876_v50 = vpop.f32.mrb[164].mxu0  ;;  %14647 = vmatmul.mubr.msk.bf16.gmra.mrb[204].mxu1 %vm3294_vm1, %v17738_v33 }
 0x425   : > { %v12877_v62 = vpop.f32.mrb[165].mxu0 }
 0x426   : > { %v3215_v16 = vmul.f32 0.2, %v3183_v37  ;;  %v12878_v47 = vadd.f32 %v12877_v62, %v12876_v50  ;;  %v12879_v48 = vpop.f32.mrb[166].mxu0  ;;  %v3246_v25 = vmax.f32 %v3182_v34, %v3214_v45 }
 0x427   : > { %v12880_v3 = vpop.f32.mrb[167].mxu0 }
 0x428   : > { %v2960_v51 = vadd.f32 %v12878_v47, %v17635_v18  ;;  %v12881_v63 = vadd.f32 %v12880_v3, %v12879_v48  ;;  %v3247_v57 = vmax.f32 %v3183_v37, %v3215_v16 }
 0x42a   : > { %v3184_v6 = vadd.f32 %v17354_v23, %v2960_v51  ;;  %v2961_v20 = vadd.f32 %v12881_v63, %v17640_v13  ;;  %v17746_v4 = vpack.c.bf16 %v3247_v57, %v3246_v25 }
 0x42c   : > { %v3216_v55 = vmul.f32 0.2, %v3184_v6  ;;  %v3185_v9 = vadd.f32 %v17368_v2, %v2961_v20  ;;  %v12882_v29 = vpop.f32.mrb[168].mxu0  ;;  %14650 = vmatprep.mubr.msk.bf16.mxu1 %vm3294_vm1, %v17746_v4 }
 0x42d   : > { %v12883_v40 = vpop.f32.mrb[169].mxu0 }
 0x42e   : > { %v3217_v7 = vmul.f32 0.2, %v3185_v9  ;;  %v12884_v54 = vadd.f32 %v12883_v40, %v12882_v29  ;;  %v12885_v18 = vpop.f32.mrb[170].mxu0  ;;  %v3248_v23 = vmax.f32 %v3184_v6, %v3216_v55  ;;  %v19824_v6 = vld [vmem:[#allocation23_spill] sm:$0xff] }
 0x42f   : > { %v12886_v26 = vpop.f32.mrb[171].mxu0 }
 0x430   : > { %v2962_v19 = vadd.f32 %v12884_v54, %v17649_v31  ;;  %v12887_v1 = vadd.f32 %v12886_v26, %v12885_v18  ;;  %v3249_v17 = vmax.f32 %v3185_v9, %v3217_v7 }
 0x432   : > { %v3186_v13 = vadd.f32 %v17382_v42, %v2962_v19  ;;  %v2963_v43 = vadd.f32 %v12887_v1, %v17656_v36  ;;  %v17754_v46 = vpack.c.bf16 %v3249_v17, %v3248_v23 }
 0x434   : > { %v3218_v2 = vmul.f32 0.2, %v3186_v13  ;;  %v3187_v41 = vadd.f32 %v17390_v61, %v2963_v43  ;;  %v12888_v53 = vpop.f32.mrb[172].mxu0  ;;  %14651 = vmatmul.mubr.msk.bf16.gmra.mrb[208].mxu1 %vm3294_vm1, %v17754_v46  ;;  %v19826_v43 = vld [vmem:[#allocation25_spill] sm:$0xff] }
 0x435   : > { %v12889_v0 = vpop.f32.mrb[173].mxu0 }
 0x436   : > { %v3219_v12 = vmul.f32 0.2, %v3187_v41  ;;  %v12890_v27 = vadd.f32 %v12889_v0, %v12888_v53  ;;  %v12891_v31 = vpop.f32.mrb[174].mxu0  ;;  %v3250_v42 = vmax.f32 %v3186_v13, %v3218_v2 }
 0x437   : > { %v12892_v59 = vpop.f32.mrb[175].mxu0 }
 0x438   : > { %v2964_v56 = vadd.f32 %v12890_v27, %v17666_v14  ;;  %v12893_v21 = vadd.f32 %v12892_v59, %v12891_v31  ;;  %v3251_v28 = vmax.f32 %v3187_v41, %v3219_v12 }
 0x43a   : > { %v3188_v36 = vadd.f32 %v17410_v52, %v2964_v56  ;;  %v2965_v34 = vadd.f32 %v12893_v21, %v17671_v39  ;;  %v17762_v49 = vpack.c.bf16 %v3251_v28, %v3250_v42  ;;  %v19823_v39 = vld [vmem:[#allocation22_spill] sm:$0xff] }
 0x43c   : > { %v3220_v61 = vmul.f32 0.2, %v3188_v36  ;;  %v3189_v45 = vadd.f32 %v17415_v22, %v2965_v34  ;;  %v12894_v37 = vpop.f32.mrb[176].mxu0  ;;  %14654 = vmatprep.mubr.msk.bf16.mxu1 %vm3294_vm1, %v17762_v49 }
 0x43d   : > { %v12895_v50 = vpop.f32.mrb[177].mxu0 }
 0x43e   : > { %v3221_v62 = vmul.f32 0.2, %v3189_v45  ;;  %v12896_v16 = vadd.f32 %v12895_v50, %v12894_v37  ;;  %v12897_v14 = vpop.f32.mrb[178].mxu0  ;;  %v3252_v52 = vmax.f32 %v3188_v36, %v3220_v61  ;;  %v19828_v61 = vld [vmem:[#allocation27_spill] sm:$0xff] }
 0x43f   : > { %v12898_v47 = vpop.f32.mrb[179].mxu0 }
 0x440   : > { %v2966_v48 = vadd.f32 %v12896_v16, %v17680_v60  ;;  %v12899_v3 = vadd.f32 %v12898_v47, %v12897_v14  ;;  %v3253_v51 = vmax.f32 %v3189_v45, %v3221_v62 }
 0x442   : > { %v3190_v63 = vadd.f32 %v19823_v39, %v2966_v48  ;;  %v2967_v25 = vadd.f32 %v12899_v3, %v17685_v15  ;;  %v17770_v57 = vpack.c.bf16 %v3253_v51, %v3252_v52  ;;  %v19825_v15 = vld [vmem:[#allocation24_spill] sm:$0xff] }
 0x444   : > { %v3222_v22 = vmul.f32 0.2, %v3190_v63  ;;  %v3191_v20 = vadd.f32 %v19824_v6, %v2967_v25  ;;  %v12900_v55 = vpop.f32.mrb[180].mxu0  ;;  %14655 = vmatmul.mubr.msk.bf16.gmra.mrb[212].mxu1 %vm3294_vm1, %v17770_v57  ;;  %v3164_v25 = vpop.permute.xlu1 %3163 }
 0x445   : > { %v12901_v9 = vpop.f32.mrb[181].mxu0 }
 0x446   : > { %v3223_v29 = vmul.f32 0.2, %v3191_v20  ;;  %v12902_v40 = vadd.f32 %v12901_v9, %v12900_v55  ;;  %v12903_v60 = vpop.f32.mrb[182].mxu0  ;;  %v3254_v26 = vmax.f32 %v3190_v63, %v3222_v22 }
 0x447   : > { %v12904_v7 = vpop.f32.mrb[183].mxu0 }
 0x448   : > { %v2968_v54 = vadd.f32 %v12902_v40, %v17694_v32  ;;  %v12905_v18 = vadd.f32 %v12904_v7, %v12903_v60  ;;  %v3255_v19 = vmax.f32 %v3191_v20, %v3223_v29 }
 0x44a   : > { %v3192_v1 = vadd.f32 %v19825_v15, %v2968_v54  ;;  %v2969_v23 = vadd.f32 %v12905_v18, %v17699_v58  ;;  %v17778_v17 = vpack.c.bf16 %v3255_v19, %v3254_v26  ;;  %v19827_v58 = vld [vmem:[#allocation26_spill] sm:$0xff] }
 0x44c   : > { %v3224_v13 = vmul.f32 0.2, %v3192_v1  ;;  %v3193_v2 = vadd.f32 %v19826_v43, %v2969_v23  ;;  %v12906_v41 = vpop.f32.mrb[184].mxu0  ;;  %14658 = vmatprep.mubr.msk.bf16.mxu1 %vm3294_vm1, %v17778_v17 }
 0x44d   : > { %v12907_v53 = vpop.f32.mrb[185].mxu0 }
 0x44e   : > { %v3225_v0 = vmul.f32 0.2, %v3193_v2  ;;  %v12908_v12 = vadd.f32 %v12907_v53, %v12906_v41  ;;  %v12909_v32 = vpop.f32.mrb[186].mxu0  ;;  %v3256_v56 = vmax.f32 %v3192_v1, %v3224_v13 }
 0x44f   : > { %v12910_v27 = vpop.f32.mrb[187].mxu0 }
 0x450   : > { %v2970_v31 = vadd.f32 %v12908_v12, %v17708_v5  ;;  %v12911_v59 = vadd.f32 %v12910_v27, %v12909_v32  ;;  %v3257_v21 = vmax.f32 %v3193_v2, %v3225_v0 }
 0x452   : > { %v3194_v42 = vadd.f32 %v19827_v58, %v2970_v31  ;;  %v2971_v28 = vadd.f32 %v12911_v59, %v17713_v38  ;;  %v17786_v36 = vpack.c.bf16 %v3257_v21, %v3256_v56  ;;  %v3159_v38 = vpop.permute.xlu0 %3158 }
 0x454   : > { %v3226_v34 = vmul.f32 0.2, %v3194_v42  ;;  %v3195_v45 = vadd.f32 %v19828_v61, %v2971_v28  ;;  %v12912_v37 = vpop.f32.mrb[188].mxu0  ;;  %14659 = vmatmul.mubr.msk.bf16.gmra.mrb[216].mxu1 %vm3294_vm1, %v17786_v36  ;;  %v15333_v28 = vld [vmem:[%s19747_s4 + $0x4] ss:$8 sps:$4 sm:$0xff]  }
 0x455   : > { %v12913_v50 = vpop.f32.mrb[189].mxu0 }
 0x456   : > { %v3227_v62 = vmul.f32 0.2, %v3195_v45  ;;  %v12914_v16 = vadd.f32 %v12913_v50, %v12912_v37  ;;  %v12915_v5 = vpop.f32.mrb[190].mxu0  ;;  %v3258_v3 = vmax.f32 %v3194_v42, %v3226_v34  ;;  %v15330_v42 = vld [vmem:[%s19747_s4 + $0x104] ss:$8 sps:$4 sm:$0xff]  }
 0x457   : > { %v12916_v14 = vpop.f32.mrb[191].mxu0  ;;  %3971 = vmatprep.mubr.bf16.mxu0 %v15330_v42  ;;  %v15350_v42 = vld [vmem:[%s19747_s4 + $0x34] ss:$8 sps:$4 sm:$0xff]  }
 0x458   : > { %v2972_v47 = vadd.f32 %v12914_v16, %v17722_v8  ;;  %v12917_v48 = vadd.f32 %v12916_v14, %v12915_v5  ;;  %v3259_v52 = vmax.f32 %v3195_v45, %v3227_v62  ;;  %v19829_v8 = vld [vmem:[#allocation9_spill] sm:$0xff] }
 0x45a   : > { %v3196_v51 = vadd.f32 %v3159_v38, %v2972_v47  ;;  %v2973_v39 = vadd.f32 %v12917_v48, %v17727_v24  ;;  %v17793_v63 = vpack.c.bf16 %v3259_v52, %v3258_v3  ;;  %v19830_v24 = vld [vmem:[#allocation10_spill] sm:$0xff] }
 0x45c   : > { %v3228_v22 = vmul.f32 0.2, %v3196_v51  ;;  %v3197_v6 = vadd.f32 %v3164_v25, %v2973_v39  ;;  %14662 = vmatprep.mubr.msk.bf16.mxu1 %vm3294_vm1, %v17793_v63 }
 0x45e   : > { %v3229_v20 = vmul.f32 0.2, %v3197_v6  ;;  %v3260_v55 = vmax.f32 %v3196_v51, %v3228_v22 }
 0x460   : > { %v3261_v9 = vmax.f32 %v3197_v6, %v3229_v20 }
 0x462   : > { %v17797_v29 = vpack.c.bf16 %v3261_v9, %v3260_v55 }
 0x464   : > { %14663 = vmatmul.mubr.msk.bf16.gmra.mrb[220].mxu1 %vm3294_vm1, %v17797_v29 }
 0x465   : > { %14670 = vmatprep.mubr.msk.bf16.mxu1 %vm3294_vm1, %v19829_v8 }
 0x46c   : > { %14671 = vmatmul.mubr.msk.bf16.vlgmr.msra.gmra.mrb[224].mxu1 %vm3294_vm1, %v19830_v24 }
 0x46d   : > { %14674 = vmatprep.mubr.msk.bf16.mxu1 %vm3294_vm1, %v17674_v11 }
 0x474   : > { %14675 = vmatmul.mubr.msk.bf16.gmra.mrb[228].mxu1 %vm3294_vm1, %v17688_v44 }
 0x475   : > { %14678 = vmatprep.mubr.msk.bf16.mxu1 %vm3294_vm1, %v17702_v35 }
 0x47c   : > { %14679 = vmatmul.mubr.msk.bf16.gmra.mrb[232].mxu1 %vm3294_vm1, %v17716_v30 }
 0x47d   : > { %14682 = vmatprep.mubr.msk.bf16.mxu1 %vm3294_vm1, %v17730_v10 }
 0x484   : > { %14683 = vmatmul.mubr.msk.bf16.gmra.mrb[236].mxu1 %vm3294_vm1, %v17738_v33 }
 0x485   : > { %14686 = vmatprep.mubr.msk.bf16.mxu1 %vm3294_vm1, %v17746_v4 }
 0x48c   : > { %14687 = vmatmul.mubr.msk.bf16.gmra.mrb[240].mxu1 %vm3294_vm1, %v17754_v46 }
 0x48d   : > { %14690 = vmatprep.mubr.msk.bf16.mxu1 %vm3294_vm1, %v17762_v49 }
 0x494   : > { %14691 = vmatmul.mubr.msk.bf16.gmra.mrb[244].mxu1 %vm3294_vm1, %v17770_v57 }
 0x495   : > { %14694 = vmatprep.mubr.msk.bf16.mxu1 %vm3294_vm1, %v17778_v17 }
 0x49c   : > { %14695 = vmatmul.mubr.msk.bf16.gmra.mrb[248].mxu1 %vm3294_vm1, %v17786_v36 }
 0x49d   : > { %14698 = vmatprep.mubr.msk.bf16.mxu1 %vm3294_vm1, %v17793_v63 }
 0x4a4   : > { %14699 = vmatmul.mubr.msk.bf16.gmra.mrb[252].mxu1 %vm3294_vm1, %v17797_v29 }
 0x4a5   : > { %4292 = vmatprep.mubr.bf16.mxu1 %v15333_v28 }
 0x4c7   : > { %v14636_v40 = vpop.f32.mrb[192].mxu1 }
 0x4c8   : > { %v3377_v60 = vpop.f32.mrb[193].mxu1 }
 0x4c9   : > { %v14637_v7 = vpop.f32.mrb[194].mxu1 }
 0x4ca   : > { %v3537_v54 = vpack.c.bf16 %v14637_v7, %v14636_v40  ;;  %v3380_v18 = vpop.f32.mrb[195].mxu1 }
 0x4cb   : > { %v3536_v26 = vpack.c.bf16 %v3380_v18, %v3377_v60 }
 0x4d8   : > { %v14640_v19 = vpop.f32.mrb[196].mxu1 }
 0x4d9   : > { %v3393_v15 = vpop.f32.mrb[197].mxu1 }
 0x4da   : > { %v14641_v1 = vpop.f32.mrb[198].mxu1 }
 0x4db   : > { %v3539_v23 = vpack.c.bf16 %v14641_v1, %v14640_v19  ;;  %v3396_v13 = vpop.f32.mrb[199].mxu1  ;;  %v15338_v1 = vld [vmem:[%s19747_s4 + $0x14] ss:$8 sps:$4 sm:$0xff]  }
 0x4dc   : > { %v3538_v43 = vpack.c.bf16 %v3396_v13, %v3393_v15 }
 0x4e8   : > { %v14644_v2 = vpop.f32.mrb[200].mxu1 }
 0x4e9   : > { %v3409_v41 = vpop.f32.mrb[201].mxu1 }
 0x4ea   : > { %v14645_v53 = vpop.f32.mrb[202].mxu1 }
 0x4eb   : > { %v3541_v0 = vpack.c.bf16 %v14645_v53, %v14644_v2  ;;  %v3412_v12 = vpop.f32.mrb[203].mxu1 }
 0x4ec   : > { %v3540_v32 = vpack.c.bf16 %v3412_v12, %v3409_v41  ;;  %v15336_v41 = vld [vmem:[%s19747_s4 + $0x10] ss:$8 sps:$4 sm:$0xff]   ;;  %v15344_v12 = vld [vmem:[%s19747_s4 + $0x24] ss:$8 sps:$4 sm:$0xff]  }
 0x4f7   : > { %v14648_v27 = vpop.f32.mrb[204].mxu1 }
 0x4f8   : > { %v3425_v31 = vpop.f32.mrb[205].mxu1 }
 0x4f9   : > { %v14649_v59 = vpop.f32.mrb[206].mxu1 }
 0x4fa   : > { %v3543_v56 = vpack.c.bf16 %v14649_v59, %v14648_v27  ;;  %v3428_v21 = vpop.f32.mrb[207].mxu1 }
 0x4fb   : > { %v3542_v58 = vpack.c.bf16 %v3428_v21, %v3425_v31 }
 0x507   : > { %v14652_v34 = vpop.f32.mrb[208].mxu1 }
 0x508   : > { %v3441_v61 = vpop.f32.mrb[209].mxu1 }
 0x509   : > { %v14653_v45 = vpop.f32.mrb[210].mxu1 }
 0x50a   : > { %v3545_v37 = vpack.c.bf16 %v14653_v45, %v14652_v34  ;;  %v3444_v50 = vpop.f32.mrb[211].mxu1 }
 0x50b   : > { %v3544_v62 = vpack.c.bf16 %v3444_v50, %v3441_v61 }
 0x50d   : > { %13066 = vmatprep.subr.bf16.mxu1 %v3544_v62 }
 0x50e   : > { %13067 = vmatpush3.bf16.msra.mxu1 %v3536_v26  ;;  %v15331_v26 = vld [vmem:[%s19747_s4] ss:$8 sps:$4 sm:$0xff]  }
 0x50f   : > { %13068 = vmatprep.subr.bf16.mxu1 %v3545_v37  ;;  %v15348_v37 = vld [vmem:[%s19747_s4 + $0x30] ss:$8 sps:$4 sm:$0xff]  }
 0x512   : > { %13069 = vmatpush3.bf16.msra.mxu1 %v3537_v54 }
 0x517   : > { %v14656_v16 = vpop.f32.mrb[212].mxu1 }
 0x518   : > { %v3457_v5 = vpop.f32.mrb[213].mxu1 }
 0x519   : > { %v14657_v14 = vpop.f32.mrb[214].mxu1 }
 0x51a   : > { %v3547_v47 = vpack.c.bf16 %v14657_v14, %v14656_v16  ;;  %v3460_v48 = vpop.f32.mrb[215].mxu1  ;;  %v15356_v16 = vld [vmem:[%s19747_s4 + $0x44] ss:$8 sps:$4 sm:$0xff]  }
 0x51b   : > { %v3546_v3 = vpack.c.bf16 %v3460_v48, %v3457_v5 }
 0x51d   : > { %13070 = vmatprep.subr.bf16.mxu1 %v3546_v3  ;;  %v15354_v3 = vld [vmem:[%s19747_s4 + $0x40] ss:$8 sps:$4 sm:$0xff]  }
 0x51e   : > { %13071 = vmatpush3.bf16.msra.mxu1 %v3538_v43 }
 0x51f   : > { %13072 = vmatprep.subr.bf16.mxu1 %v3547_v47 }
 0x522   : > { %13073 = vmatpush3.bf16.msra.mxu1 %v3539_v23 }
 0x527   : > { %v14660_v52 = vpop.f32.mrb[216].mxu1 }
 0x528   : > { %v3473_v38 = vpop.f32.mrb[217].mxu1 }
 0x529   : > { %v14661_v51 = vpop.f32.mrb[218].mxu1 }
 0x52a   : > { %v3549_v39 = vpack.c.bf16 %v14661_v51, %v14660_v52  ;;  %v3476_v25 = vpop.f32.mrb[219].mxu1  ;;  %v15362_v51 = vld [vmem:[%s19747_s4 + $0x54] ss:$8 sps:$4 sm:$0xff]  }
 0x52b   : > { %v3548_v22 = vpack.c.bf16 %v3476_v25, %v3473_v38 }
 0x52d   : > { %13074 = vmatprep.subr.bf16.mxu1 %v3548_v22 }
 0x52e   : > { %13075 = vmatpush3.bf16.msra.mxu1 %v3540_v32 }
 0x52f   : > { %13076 = vmatprep.subr.bf16.mxu1 %v3549_v39 }
 0x532   : > { %13077 = vmatpush3.bf16.msra.mxu1 %v3541_v0 }
 0x537   : > { %v14664_v6 = vpop.f32.mrb[220].mxu1 }
 0x538   : > { %v3489_v20 = vpop.f32.mrb[221].mxu1 }
 0x539   : > { %v14665_v55 = vpop.f32.mrb[222].mxu1 }
 0x53a   : > { %v3551_v9 = vpack.c.bf16 %v14665_v55, %v14664_v6  ;;  %v3492_v40 = vpop.f32.mrb[223].mxu1 }
 0x53b   : > { %v3550_v60 = vpack.c.bf16 %v3492_v40, %v3489_v20  ;;  %v15360_v20 = vld [vmem:[%s19747_s4 + $0x50] ss:$8 sps:$4 sm:$0xff]   ;;  %v15368_v40 = vld [vmem:[%s19747_s4 + $0x64] ss:$8 sps:$4 sm:$0xff]  }
 0x53d   : > { %13078 = vmatprep.subr.bf16.mxu1 %v3550_v60 }
 0x53e   : > { %13079 = vmatpush3.bf16.msra.mxu1 %v3542_v58 }
 0x53f   : > { %v14672_v7 = vpop.f32.mrb[224].mxu1  ;;  %13080 = vmatprep.subr.bf16.mxu1 %v3551_v9 }
 0x540   : > { %v3603_v54 = vpop.f32.mrb[225].mxu1 }
 0x541   : > { %v14673_v18 = vpop.f32.mrb[226].mxu1 }
 0x542   : > { %v3764_v19 = vpack.c.bf16 %v14673_v18, %v14672_v7  ;;  %v3606_v15 = vpop.f32.mrb[227].mxu1  ;;  %13081 = vmatpush3.bf16.msra.mxu1 %v3543_v56  ;;  %v15342_v56 = vld [vmem:[%s19747_s4 + $0x20] ss:$8 sps:$4 sm:$0xff]  }
 0x543   : > { %v3763_v23 = vpack.c.bf16 %v3606_v15, %v3603_v54 }
 0x545   : > { %4293 = vmatmul.mubr.bf16.vlgmr.msra.gmra.mrb[0].mxu1 %v15331_v26  ;;  %v15366_v26 = vld [vmem:[%s19747_s4 + $0x60] ss:$8 sps:$4 sm:$0xff]  }
 0x546   : > { %4300 = vmatprep.mubr.bf16.mxu1 %v15338_v1 }
 0x547   : > { %v17845_v13 = vpop.f32.mrb[228].mxu1 }
 0x548   : > { %v3619_v43 = vpop.f32.mrb[229].mxu1 }
 0x549   : > { %v14677_v2 = vpop.f32.mrb[230].mxu1 }
 0x54a   : > { %v3766_v53 = vpack.c.bf16 %v14677_v2, %v17845_v13  ;;  %v3622_v0 = vpop.f32.mrb[231].mxu1 }
 0x54b   : > { %v3765_v32 = vpack.c.bf16 %v3622_v0, %v3619_v43 }
 0x54d   : > { %4301 = vmatmul.mubr.bf16.gmra.mrb[4].mxu1 %v15336_v41  ;;  %v15372_v41 = vld [vmem:[%s19747_s4 + $0x70] ss:$8 sps:$4 sm:$0xff]  }
 0x54e   : > { %4308 = vmatprep.mubr.bf16.mxu1 %v15344_v12 }
 0x54f   : > { %v17854_v27 = vpop.f32.mrb[232].mxu1 }
 0x550   : > { %v3635_v31 = vpop.f32.mrb[233].mxu1 }
 0x551   : > { %v17856_v59 = vpop.f32.mrb[234].mxu1 }
 0x552   : > { %v3768_v21 = vpack.c.bf16 %v17856_v59, %v17854_v27  ;;  %v3638_v58 = vpop.f32.mrb[235].mxu1  ;;  %v15406_v27 = vld [vmem:[%s19748_s5 + $0x20] sm:$0xff]  }
 0x553   : > { %v3767_v28 = vpack.c.bf16 %v3638_v58, %v3635_v31  ;;  %v15328_v31 = vld [vmem:[%s19747_s4 + $0x100] ss:$8 sps:$4 sm:$0xff]  }
 0x554   : > { %v15378_v59 = vld [vmem:[%s19747_s4 + $0x80] ss:$8 sps:$4 sm:$0xff]  }
 0x555   : > { %4309 = vmatmul.mubr.bf16.gmra.mrb[8].mxu1 %v15342_v56  ;;  %v15334_v56 = vld [vmem:[%s19747_s4 + $0x114] ss:$8 sps:$4 sm:$0xff]   ;;  %v15425_v58 = vld [vmem:[%s19748_s5 + $0x28] sm:$0xff]  }
 0x556   : > { %4316 = vmatprep.mubr.bf16.mxu1 %v15350_v42  ;;  %v15339_v42 = vld [vmem:[%s19747_s4 + $0x110] ss:$8 sps:$4 sm:$0xff]  }
 0x557   : > { %v17866_v34 = vpop.f32.mrb[236].mxu1 }
 0x558   : > { %v3651_v61 = vpop.f32.mrb[237].mxu1 }
 0x559   : > { %v17868_v45 = vpop.f32.mrb[238].mxu1 }
 0x55a   : > { %v3770_v50 = vpack.c.bf16 %v17868_v45, %v17866_v34  ;;  %v3654_v62 = vpop.f32.mrb[239].mxu1  ;;  %v15340_v34 = vld [vmem:[%s19747_s4 + $0x124] ss:$8 sps:$4 sm:$0xff]   ;;  %v15345_v45 = vld [vmem:[%s19747_s4 + $0x120] ss:$8 sps:$4 sm:$0xff]  }
 0x55b   : > { %v3769_v5 = vpack.c.bf16 %v3654_v62, %v3651_v61  ;;  %v15392_v61 = vld [vmem:[%s19747_s4 + $0xa4] ss:$8 sps:$4 sm:$0xff]   ;;  %v15398_v62 = vld [vmem:[%s19747_s4 + $0xb4] ss:$8 sps:$4 sm:$0xff]  }
 0x55d   : > { %4317 = vmatmul.mubr.bf16.gmra.mrb[12].mxu1 %v15348_v37  ;;  %v15390_v37 = vld [vmem:[%s19747_s4 + $0xa0] ss:$8 sps:$4 sm:$0xff]  }
 0x55e   : > { %4324 = vmatprep.mubr.bf16.mxu1 %v15356_v16  ;;  %v15351_v16 = vld [vmem:[%s19747_s4 + $0x130] ss:$8 sps:$4 sm:$0xff]  }
 0x55f   : > { %v14688_v14 = vpop.f32.mrb[240].mxu1 }
 0x560   : > { %v3667_v47 = vpop.f32.mrb[241].mxu1 }
 0x561   : > { %v14689_v48 = vpop.f32.mrb[242].mxu1 }
 0x562   : > { %v3772_v52 = vpack.c.bf16 %v14689_v48, %v14688_v14  ;;  %v3670_v38 = vpop.f32.mrb[243].mxu1  ;;  %v15352_v14 = vld [vmem:[%s19747_s4 + $0x144] ss:$8 sps:$4 sm:$0xff]   ;;  %v15357_v48 = vld [vmem:[%s19747_s4 + $0x140] ss:$8 sps:$4 sm:$0xff]  }
 0x563   : > { %v3771_v39 = vpack.c.bf16 %v3670_v38, %v3667_v47  ;;  %v15404_v47 = vld [vmem:[%s19747_s4 + $0xc4] ss:$8 sps:$4 sm:$0xff]   ;;  %v15411_v38 = vld [vmem:[%s19747_s4 + $0xd4] ss:$8 sps:$4 sm:$0xff]  }
 0x565   : > { %12954 = vmatprep.subr.bf16.mxu0 %v3771_v39  ;;  %4325 = vmatmul.mubr.bf16.gmra.mrb[16].mxu1 %v15354_v3  ;;  %v15402_v3 = vld [vmem:[%s19747_s4 + $0xc0] ss:$8 sps:$4 sm:$0xff]   ;;  %v15409_v39 = vld [vmem:[%s19747_s4 + $0xd0] ss:$8 sps:$4 sm:$0xff]  }
 0x566   : > { %12955 = vmatpush3.bf16.msra.mxu0 %v3763_v23  ;;  %4332 = vmatprep.mubr.bf16.mxu1 %v15362_v51  ;;  %v15363_v51 = vld [vmem:[%s19747_s4 + $0x150] ss:$8 sps:$4 sm:$0xff]  }
 0x567   : > { %v14692_v25 = vpop.f32.mrb[244].mxu1  ;;  %12956 = vmatprep.subr.bf16.mxu0 %v3772_v52  ;;  %v15358_v52 = vld [vmem:[%s19747_s4 + $0x154] ss:$8 sps:$4 sm:$0xff]  }
 0x568   : > { %v3683_v22 = vpop.f32.mrb[245].mxu1 }
 0x569   : > { %v14693_v6 = vpop.f32.mrb[246].mxu1 }
 0x56a   : > { %v3774_v55 = vpack.c.bf16 %v14693_v6, %v14692_v25  ;;  %v3686_v9 = vpop.f32.mrb[247].mxu1  ;;  %12957 = vmatpush3.bf16.msra.mxu0 %v3764_v19  ;;  %v15374_v19 = vld [vmem:[%s19747_s4 + $0x74] ss:$8 sps:$4 sm:$0xff]   ;;  %v15364_v25 = vld [vmem:[%s19747_s4 + $0x164] ss:$8 sps:$4 sm:$0xff]  }
 0x56b   : > { %v3773_v60 = vpack.c.bf16 %v3686_v9, %v3683_v22  ;;  %v15417_v22 = vld [vmem:[%s19747_s4 + $0xe4] ss:$8 sps:$4 sm:$0xff]   ;;  %v15369_v6 = vld [vmem:[%s19747_s4 + $0x160] ss:$8 sps:$4 sm:$0xff]   ;;  %v15423_v9 = vld [vmem:[%s19747_s4 + $0xf4] ss:$8 sps:$4 sm:$0xff]  }
 0x56d   : > { %12958 = vmatprep.subr.bf16.mxu0 %v3773_v60  ;;  %4333 = vmatmul.mubr.bf16.gmra.mrb[20].mxu1 %v15360_v20  ;;  %v15415_v20 = vld [vmem:[%s19747_s4 + $0xe0] ss:$8 sps:$4 sm:$0xff]   ;;  %v15421_v60 = vld [vmem:[%s19747_s4 + $0xf0] ss:$8 sps:$4 sm:$0xff]  }
 0x56e   : > { %12959 = vmatpush3.bf16.msra.mxu0 %v3765_v32  ;;  %4340 = vmatprep.mubr.bf16.mxu1 %v15368_v40  ;;  %v15375_v40 = vld [vmem:[%s19747_s4 + $0x170] ss:$8 sps:$4 sm:$0xff]  }
 0x56f   : > { %v14696_v7 = vpop.f32.mrb[248].mxu1  ;;  %12960 = vmatprep.subr.bf16.mxu0 %v3774_v55  ;;  %v15370_v55 = vld [vmem:[%s19747_s4 + $0x174] ss:$8 sps:$4 sm:$0xff]  }
 0x570   : > { %v3699_v54 = vpop.f32.mrb[249].mxu1 }
 0x571   : > { %v14697_v18 = vpop.f32.mrb[250].mxu1 }
 0x572   : > { %v3776_v15 = vpack.c.bf16 %v14697_v18, %v14696_v7  ;;  %v3702_v1 = vpop.f32.mrb[251].mxu1  ;;  %12961 = vmatpush3.bf16.msra.mxu0 %v3766_v53  ;;  %v15380_v53 = vld [vmem:[%s19747_s4 + $0x84] ss:$8 sps:$4 sm:$0xff]   ;;  %v15381_v18 = vld [vmem:[%s19747_s4 + $0x180] ss:$8 sps:$4 sm:$0xff]  }
 0x573   : > { %v3775_v23 = vpack.c.bf16 %v3702_v1, %v3699_v54  ;;  %v15376_v7 = vld [vmem:[%s19747_s4 + $0x184] ss:$8 sps:$4 sm:$0xff]   ;;  %v15426_v54 = vld [vmem:[%s19748_s5 + $0x30] sm:$0xff]  }
 0x574   : > { %v15388_v1 = vld [vmem:[%s19747_s4 + $0x1a4] ss:$8 sps:$4 sm:$0xff]  }
 0x575   : > { %12962 = vmatprep.subr.bf16.mxu0 %v3775_v23  ;;  %4341 = vmatmul.mubr.bf16.gmra.mrb[24].mxu1 %v15366_v26  ;;  %v15382_v26 = vld [vmem:[%s19747_s4 + $0x194] ss:$8 sps:$4 sm:$0xff]  }
 0x576   : > { %12963 = vmatpush3.bf16.msra.mxu0 %v3767_v28  ;;  %4348 = vmatprep.mubr.bf16.mxu1 %v15374_v19  ;;  %v15384_v28 = vld [vmem:[%s19747_s4 + $0x90] ss:$8 sps:$4 sm:$0xff]   ;;  %v15393_v19 = vld [vmem:[%s19747_s4 + $0x1a0] ss:$8 sps:$4 sm:$0xff]   ;;  %v15394_v23 = vld [vmem:[%s19747_s4 + $0x1b4] ss:$8 sps:$4 sm:$0xff]  }
 0x577   : > { %v14700_v13 = vpop.f32.mrb[252].mxu1  ;;  %12964 = vmatprep.subr.bf16.mxu0 %v3776_v15  ;;  %v15387_v15 = vld [vmem:[%s19747_s4 + $0x190] ss:$8 sps:$4 sm:$0xff]  }
 0x578   : > { %v3715_v43 = vpop.f32.mrb[253].mxu1 }
 0x579   : > { %v14701_v2 = vpop.f32.mrb[254].mxu1 }
 0x57a   : > { %v3778_v0 = vpack.c.bf16 %v14701_v2, %v14700_v13  ;;  %v3718_v12 = vpop.f32.mrb[255].mxu1  ;;  %12965 = vmatpush3.bf16.msra.mxu0 %v3768_v21  ;;  %v15386_v21 = vld [vmem:[%s19747_s4 + $0x94] ss:$8 sps:$4 sm:$0xff]   ;;  %v15399_v13 = vld [vmem:[%s19747_s4 + $0x1b0] ss:$8 sps:$4 sm:$0xff]  }
 0x57b   : > { %v3777_v32 = vpack.c.bf16 %v3718_v12, %v3715_v43  ;;  %v15400_v43 = vld [vmem:[%s19747_s4 + $0x1c4] ss:$8 sps:$4 sm:$0xff]   ;;  %v15405_v2 = vld [vmem:[%s19747_s4 + $0x1c0] ss:$8 sps:$4 sm:$0xff]  }
 0x57c   : > { %v15413_v12 = vld [vmem:[%s19747_s4 + $0x1e4] ss:$8 sps:$4 sm:$0xff]  }
 0x57d   : > { %12966 = vmatprep.subr.bf16.mxu0 %v3777_v32  ;;  %4349 = vmatmul.mubr.bf16.gmra.mrb[28].mxu1 %v15372_v41  ;;  %v15407_v41 = vld [vmem:[%s19747_s4 + $0x1d4] ss:$8 sps:$4 sm:$0xff]  }
 0x57e   : > { %12967 = vmatpush3.bf16.msra.mxu0 %v3769_v5  ;;  %4356 = vmatprep.mubr.bf16.mxu1 %v15380_v53  ;;  %v15396_v5 = vld [vmem:[%s19747_s4 + $0xb0] ss:$8 sps:$4 sm:$0xff]   ;;  %v15418_v53 = vld [vmem:[%s19747_s4 + $0x1e0] ss:$8 sps:$4 sm:$0xff]   ;;  %v15419_v32 = vld [vmem:[%s19747_s4 + $0x1f4] ss:$8 sps:$4 sm:$0xff]  }
 0x57f   : > { %12968 = vmatprep.subr.bf16.mxu0 %v3778_v0  ;;  %v15412_v0 = vld [vmem:[%s19747_s4 + $0x1d0] ss:$8 sps:$4 sm:$0xff]  }
 0x582   : > { %12969 = vmatpush3.bf16.msra.mxu0 %v3770_v50  ;;  %v15346_v50 = vld [vmem:[%s19747_s4 + $0x134] ss:$8 sps:$4 sm:$0xff]  }
 0x583   : > { %14702 = vmatprep.subr.bf16.mxu0 %v15406_v27 }
 0x585   : > { %3972 = vmatmul.mubr.bf16.vlgmr.msra.gmra.mrb[192].mxu0 %v15328_v31  ;;  %4357 = vmatmul.mubr.bf16.gmra.mrb[32].mxu1 %v15378_v59  ;;  %v15427_v31 = vld [vmem:[%s19748_s5 + $0x38] sm:$0xff]  }
 0x586   : > { %3979 = vmatprep.mubr.bf16.mxu0 %v15334_v56  ;;  %4364 = vmatprep.mubr.bf16.mxu1 %v15386_v21 }
 0x587   : > { %14703 = vmatpush3.bf16.msra.mxu0 %v15406_v27  ;;  %v15424_v27 = vld [vmem:[%s19747_s4 + $0x1f0] ss:$8 sps:$4 sm:$0xff]  }
 0x588   : > { %14704 = vmatprep.subr.bf16.mxu0 %v15425_v58 }
 0x58b   : > { %14705 = vmatpush3.bf16.msra.mxu0 %v15425_v58 }
 0x58c   : > { %14738 = vmatprep.subr.bf16.mxu0 %v15426_v54 }
 0x58d   : > { %3980 = vmatmul.mubr.bf16.gmra.mrb[196].mxu0 %v15339_v42  ;;  %4365 = vmatmul.mubr.bf16.gmra.mrb[36].mxu1 %v15384_v28 }
 0x58e   : > { %3987 = vmatprep.mubr.bf16.mxu0 %v15340_v34  ;;  %4372 = vmatprep.mubr.bf16.mxu1 %v15392_v61 }
 0x595   : > { %3988 = vmatmul.mubr.bf16.gmra.mrb[200].mxu0 %v15345_v45  ;;  %4373 = vmatmul.mubr.bf16.gmra.mrb[40].mxu1 %v15390_v37 }
 0x596   : > { %3995 = vmatprep.mubr.bf16.mxu0 %v15346_v50  ;;  %4380 = vmatprep.mubr.bf16.mxu1 %v15398_v62 }
 0x59d   : > { %3996 = vmatmul.mubr.bf16.gmra.mrb[204].mxu0 %v15351_v16  ;;  %4381 = vmatmul.mubr.bf16.gmra.mrb[44].mxu1 %v15396_v5 }
 0x59e   : > { %4003 = vmatprep.mubr.bf16.mxu0 %v15352_v14  ;;  %4388 = vmatprep.mubr.bf16.mxu1 %v15404_v47 }
 0x5a5   : > { %4004 = vmatmul.mubr.bf16.gmra.mrb[208].mxu0 %v15357_v48  ;;  %4389 = vmatmul.mubr.bf16.gmra.mrb[48].mxu1 %v15402_v3 }
 0x5a6   : > { %4011 = vmatprep.mubr.bf16.mxu0 %v15358_v52  ;;  %4396 = vmatprep.mubr.bf16.mxu1 %v15411_v38 }
 0x5ad   : > { %4012 = vmatmul.mubr.bf16.gmra.mrb[212].mxu0 %v15363_v51  ;;  %4397 = vmatmul.mubr.bf16.gmra.mrb[52].mxu1 %v15409_v39 }
 0x5ae   : > { %4019 = vmatprep.mubr.bf16.mxu0 %v15364_v25  ;;  %4404 = vmatprep.mubr.bf16.mxu1 %v15417_v22 }
 0x5b5   : > { %4020 = vmatmul.mubr.bf16.gmra.mrb[216].mxu0 %v15369_v6  ;;  %4405 = vmatmul.mubr.bf16.gmra.mrb[56].mxu1 %v15415_v20 }
 0x5b6   : > { %4027 = vmatprep.mubr.bf16.mxu0 %v15370_v55  ;;  %4412 = vmatprep.mubr.bf16.mxu1 %v15423_v9 }
 0x5bd   : > { %4028 = vmatmul.mubr.bf16.gmra.mrb[220].mxu0 %v15375_v40  ;;  %4413 = vmatmul.mubr.bf16.gmra.mrb[60].mxu1 %v15421_v60 }
 0x5be   : > { %4035 = vmatprep.mubr.bf16.mxu0 %v15376_v7 }
 0x5c5   : > { %4036 = vmatmul.mubr.bf16.gmra.mrb[224].mxu0 %v15381_v18 }
 0x5c6   : > { %4043 = vmatprep.mubr.bf16.mxu0 %v15382_v26 }
 0x5cd   : > { %4044 = vmatmul.mubr.bf16.gmra.mrb[228].mxu0 %v15387_v15 }
 0x5ce   : > { %4051 = vmatprep.mubr.bf16.mxu0 %v15388_v1 }
 0x5d5   : > { %4052 = vmatmul.mubr.bf16.gmra.mrb[232].mxu0 %v15393_v19 }
 0x5d6   : > { %4059 = vmatprep.mubr.bf16.mxu0 %v15394_v23 }
 0x5dd   : > { %4060 = vmatmul.mubr.bf16.gmra.mrb[236].mxu0 %v15399_v13 }
 0x5de   : > { %4067 = vmatprep.mubr.bf16.mxu0 %v15400_v43 }
 0x5e5   : > { %4068 = vmatmul.mubr.bf16.gmra.mrb[240].mxu0 %v15405_v2 }
 0x5e6   : > { %4075 = vmatprep.mubr.bf16.mxu0 %v15407_v41 }
 0x5ed   : > { %4076 = vmatmul.mubr.bf16.gmra.mrb[244].mxu0 %v15412_v0 }
 0x5ee   : > { %4083 = vmatprep.mubr.bf16.mxu0 %v15413_v12 }
 0x5f5   : > { %4084 = vmatmul.mubr.bf16.gmra.mrb[248].mxu0 %v15418_v53 }
 0x5f6   : > { %4091 = vmatprep.mubr.bf16.mxu0 %v15419_v32 }
 0x5fd   : > { %4092 = vmatmul.mubr.bf16.gmra.mrb[252].mxu0 %v15424_v27 }
 0x5fe   : > { %14706 = vmatprep.mubr.msk.bf16.mxu0 %vm3294_vm1, %v19829_v8 }
 0x605   : > { %14707 = vmatmul.mubr.msk.bf16.vlgmr.msra.gmra.mrb[0].mxu0 %vm3294_vm1, %v19830_v24 }
 0x606   : > { %14710 = vmatprep.mubr.msk.bf16.mxu0 %vm3294_vm1, %v17674_v11  ;;  %14739 = vmatpush3.bf16.msra.mxu0 %v15426_v54 }
 0x607   : > { %14740 = vmatprep.subr.bf16.mxu0 %v15427_v31 }
 0x60a   : > { %14741 = vmatpush3.bf16.msra.mxu0 %v15427_v31 }
 0x60d   : > { %14711 = vmatmul.mubr.msk.bf16.gmra.mrb[4].mxu0 %vm3294_vm1, %v17688_v44 }
 0x60e   : > { %14714 = vmatprep.mubr.msk.bf16.mxu0 %vm3294_vm1, %v17702_v35 }
 0x615   : > { %14715 = vmatmul.mubr.msk.bf16.gmra.mrb[8].mxu0 %vm3294_vm1, %v17716_v30 }
 0x616   : > { %14718 = vmatprep.mubr.msk.bf16.mxu0 %vm3294_vm1, %v17730_v10 }
 0x618   : > { %v13082_v59 = vpop.f32.mrb[0].mxu1 }
 0x619   : > { %v13083_v56 = vpop.f32.mrb[1].mxu1 }
 0x61a   : > { %v18069_v21 = vadd.f32 %v13083_v56, %v13082_v59  ;;  %v13085_v58 = vpop.f32.mrb[2].mxu1 }
 0x61b   : > { %v13086_v42 = vpop.f32.mrb[3].mxu1 }
 0x61c   : > { %v18071_v28 = vadd.f32 %v13086_v42, %v13085_v58 }
 0x61d   : > { %14719 = vmatmul.mubr.msk.bf16.gmra.mrb[12].mxu0 %vm3294_vm1, %v17738_v33 }
 0x61e   : > { %14722 = vmatprep.mubr.msk.bf16.mxu0 %vm3294_vm1, %v17746_v4 }
 0x620   : > { %v13088_v34 = vpop.f32.mrb[4].mxu1 }
 0x621   : > { %v13089_v61 = vpop.f32.mrb[5].mxu1 }
 0x622   : > { %v18077_v45 = vadd.f32 %v13089_v61, %v13088_v34  ;;  %v13091_v37 = vpop.f32.mrb[6].mxu1 }
 0x623   : > { %v13092_v50 = vpop.f32.mrb[7].mxu1 }
 0x624   : > { %v18079_v62 = vadd.f32 %v13092_v50, %v13091_v37 }
 0x625   : > { %14723 = vmatmul.mubr.msk.bf16.gmra.mrb[16].mxu0 %vm3294_vm1, %v17754_v46 }
 0x626   : > { %14726 = vmatprep.mubr.msk.bf16.mxu0 %vm3294_vm1, %v17762_v49 }
 0x628   : > { %v13094_v16 = vpop.f32.mrb[8].mxu1 }
 0x629   : > { %v13095_v5 = vpop.f32.mrb[9].mxu1 }
 0x62a   : > { %v18085_v14 = vadd.f32 %v13095_v5, %v13094_v16  ;;  %v13097_v47 = vpop.f32.mrb[10].mxu1 }
 0x62b   : > { %v13098_v48 = vpop.f32.mrb[11].mxu1 }
 0x62c   : > { %v18087_v3 = vadd.f32 %v13098_v48, %v13097_v47 }
 0x62d   : > { %14727 = vmatmul.mubr.msk.bf16.gmra.mrb[20].mxu0 %vm3294_vm1, %v17770_v57 }
 0x62e   : > { %14730 = vmatprep.mubr.msk.bf16.mxu0 %vm3294_vm1, %v17778_v17 }
 0x630   : > { %v13100_v52 = vpop.f32.mrb[12].mxu1 }
 0x631   : > { %v13101_v38 = vpop.f32.mrb[13].mxu1 }
 0x632   : > { %v18093_v51 = vadd.f32 %v13101_v38, %v13100_v52  ;;  %v13103_v39 = vpop.f32.mrb[14].mxu1 }
 0x633   : > { %v13104_v25 = vpop.f32.mrb[15].mxu1 }
 0x634   : > { %v18095_v22 = vadd.f32 %v13104_v25, %v13103_v39 }
 0x635   : > { %14731 = vmatmul.mubr.msk.bf16.gmra.mrb[24].mxu0 %vm3294_vm1, %v17786_v36 }
 0x636   : > { %14734 = vmatprep.mubr.msk.bf16.mxu0 %vm3294_vm1, %v17793_v63 }
 0x638   : > { %v13106_v6 = vpop.f32.mrb[16].mxu1 }
 0x639   : > { %v13107_v20 = vpop.f32.mrb[17].mxu1 }
 0x63a   : > { %v18101_v55 = vadd.f32 %v13107_v20, %v13106_v6  ;;  %v13109_v9 = vpop.f32.mrb[18].mxu1 }
 0x63b   : > { %v13110_v40 = vpop.f32.mrb[19].mxu1 }
 0x63c   : > { %v18103_v60 = vadd.f32 %v13110_v40, %v13109_v9 }
 0x63d   : > { %14735 = vmatmul.mubr.msk.bf16.gmra.mrb[28].mxu0 %vm3294_vm1, %v17797_v29 }
 0x63e   : > { %14742 = vmatprep.mubr.msk.bf16.mxu0 %vm3294_vm1, %v19829_v8 }
 0x640   : > { %v13112_v7 = vpop.f32.mrb[20].mxu1 }
 0x641   : > { %v13113_v54 = vpop.f32.mrb[21].mxu1 }
 0x642   : > { %v18109_v18 = vadd.f32 %v13113_v54, %v13112_v7  ;;  %v13115_v26 = vpop.f32.mrb[22].mxu1 }
 0x643   : > { %v13116_v15 = vpop.f32.mrb[23].mxu1 }
 0x644   : > { %v18111_v1 = vadd.f32 %v13116_v15, %v13115_v26 }
 0x645   : > { %14743 = vmatmul.mubr.msk.bf16.vlgmr.msra.gmra.mrb[32].mxu0 %vm3294_vm1, %v19830_v24 }
 0x646   : > { %14746 = vmatprep.mubr.msk.bf16.mxu0 %vm3294_vm1, %v17674_v11 }
 0x648   : > { %v13118_v19 = vpop.f32.mrb[24].mxu1 }
 0x649   : > { %v13119_v23 = vpop.f32.mrb[25].mxu1 }
 0x64a   : > { %v18117_v13 = vadd.f32 %v13119_v23, %v13118_v19  ;;  %v13121_v43 = vpop.f32.mrb[26].mxu1 }
 0x64b   : > { %v13122_v8 = vpop.f32.mrb[27].mxu1 }
 0x64c   : > { %v18119_v2 = vadd.f32 %v13122_v8, %v13121_v43 }
 0x64d   : > { %14747 = vmatmul.mubr.msk.bf16.gmra.mrb[36].mxu0 %vm3294_vm1, %v17688_v44 }
 0x64e   : > { %14750 = vmatprep.mubr.msk.bf16.mxu0 %vm3294_vm1, %v17702_v35 }
 0x650   : > { %v13124_v41 = vpop.f32.mrb[28].mxu1 }
 0x651   : > { %v13125_v0 = vpop.f32.mrb[29].mxu1 }
 0x652   : > { %v18125_v24 = vadd.f32 %v13125_v0, %v13124_v41  ;;  %v13127_v12 = vpop.f32.mrb[30].mxu1 }
 0x653   : > { %v13128_v11 = vpop.f32.mrb[31].mxu1 }
 0x654   : > { %v18127_v53 = vadd.f32 %v13128_v11, %v13127_v12 }
 0x655   : > { %14751 = vmatmul.mubr.msk.bf16.gmra.mrb[40].mxu0 %vm3294_vm1, %v17716_v30 }
 0x656   : > { %14754 = vmatprep.mubr.msk.bf16.mxu0 %vm3294_vm1, %v17730_v10 }
 0x658   : > { %v12970_v32 = vpop.f32.mrb[192].mxu0  ;;  %v13130_v27 = vpop.f32.mrb[32].mxu1 }
 0x659   : > { %v12971_v44 = vpop.f32.mrb[193].mxu0  ;;  %v13131_v31 = vpop.f32.mrb[33].mxu1 }
 0x65a   : > { %v12972_v59 = vadd.f32 %v12971_v44, %v12970_v32  ;;  %v12973_v35 = vpop.f32.mrb[194].mxu0  ;;  %v18133_v56 = vadd.f32 %v13131_v31, %v13130_v27  ;;  %v13133_v58 = vpop.f32.mrb[34].mxu1 }
 0x65b   : > { %v12974_v42 = vpop.f32.mrb[195].mxu0  ;;  %v13134_v34 = vpop.f32.mrb[35].mxu1 }
 0x65c   : > { %v18136_v61 = vadd.f32 %v18069_v21, %v12972_v59  ;;  %v12975_v37 = vadd.f32 %v12974_v42, %v12973_v35  ;;  %v18138_v50 = vadd.f32 %v13134_v34, %v13133_v58 }
 0x65d   : > { %14755 = vmatmul.mubr.msk.bf16.gmra.mrb[44].mxu0 %vm3294_vm1, %v17738_v33 }
 0x65e   : > { %v18143_v30 = vadd.f32 %v18071_v28, %v12975_v37  ;;  %14758 = vmatprep.mubr.msk.bf16.mxu0 %vm3294_vm1, %v17746_v4 }
 0x660   : > { %v12976_v10 = vpop.f32.mrb[196].mxu0  ;;  %v13136_v16 = vpop.f32.mrb[36].mxu1 }
 0x661   : > { %v12977_v5 = vpop.f32.mrb[197].mxu0  ;;  %v13137_v47 = vpop.f32.mrb[37].mxu1 }
 0x662   : > { %v12978_v48 = vadd.f32 %v12977_v5, %v12976_v10  ;;  %v12979_v52 = vpop.f32.mrb[198].mxu0  ;;  %v18147_v21 = vadd.f32 %v13137_v47, %v13136_v16  ;;  %v13139_v38 = vpop.f32.mrb[38].mxu1 }
 0x663   : > { %v12980_v39 = vpop.f32.mrb[199].mxu0  ;;  %v13140_v25 = vpop.f32.mrb[39].mxu1 }
 0x664   : > { %v18150_v6 = vadd.f32 %v18077_v45, %v12978_v48  ;;  %v12981_v33 = vadd.f32 %v12980_v39, %v12979_v52  ;;  %v18152_v28 = vadd.f32 %v13140_v25, %v13139_v38 }
 0x665   : > { %14759 = vmatmul.mubr.msk.bf16.gmra.mrb[48].mxu0 %vm3294_vm1, %v17754_v46 }
 0x666   : > { %v18157_v4 = vadd.f32 %v18079_v62, %v12981_v33  ;;  %14762 = vmatprep.mubr.msk.bf16.mxu0 %vm3294_vm1, %v17762_v49 }
 0x668   : > { %v12982_v20 = vpop.f32.mrb[200].mxu0  ;;  %v13142_v9 = vpop.f32.mrb[40].mxu1 }
 0x669   : > { %v12983_v40 = vpop.f32.mrb[201].mxu0  ;;  %v13143_v7 = vpop.f32.mrb[41].mxu1 }
 0x66a   : > { %v12984_v54 = vadd.f32 %v12983_v40, %v12982_v20  ;;  %v12985_v26 = vpop.f32.mrb[202].mxu0  ;;  %v18161_v45 = vadd.f32 %v13143_v7, %v13142_v9  ;;  %v13145_v15 = vpop.f32.mrb[42].mxu1 }
 0x66b   : > { %v12986_v19 = vpop.f32.mrb[203].mxu0  ;;  %v13146_v23 = vpop.f32.mrb[43].mxu1 }
 0x66c   : > { %v18164_v43 = vadd.f32 %v18085_v14, %v12984_v54  ;;  %v12987_v46 = vadd.f32 %v12986_v19, %v12985_v26  ;;  %v18166_v62 = vadd.f32 %v13146_v23, %v13145_v15 }
 0x66d   : > { %14763 = vmatmul.mubr.msk.bf16.gmra.mrb[52].mxu0 %vm3294_vm1, %v17770_v57 }
 0x66e   : > { %v18171_v49 = vadd.f32 %v18087_v3, %v12987_v46  ;;  %14766 = vmatprep.mubr.msk.bf16.mxu0 %vm3294_vm1, %v17778_v17 }
 0x670   : > { %v12988_v8 = vpop.f32.mrb[204].mxu0  ;;  %v13148_v41 = vpop.f32.mrb[44].mxu1 }
 0x671   : > { %v12989_v0 = vpop.f32.mrb[205].mxu0  ;;  %v13149_v12 = vpop.f32.mrb[45].mxu1 }
 0x672   : > { %v12990_v11 = vadd.f32 %v12989_v0, %v12988_v8  ;;  %v12991_v32 = vpop.f32.mrb[206].mxu0  ;;  %v18175_v14 = vadd.f32 %v13149_v12, %v13148_v41  ;;  %v13151_v27 = vpop.f32.mrb[46].mxu1 }
 0x673   : > { %v12992_v44 = vpop.f32.mrb[207].mxu0  ;;  %v13152_v31 = vpop.f32.mrb[47].mxu1 }
 0x674   : > { %v18178_v59 = vadd.f32 %v18093_v51, %v12990_v11  ;;  %v12993_v57 = vadd.f32 %v12992_v44, %v12991_v32  ;;  %v18180_v3 = vadd.f32 %v13152_v31, %v13151_v27 }
 0x675   : > { %14767 = vmatmul.mubr.msk.bf16.gmra.mrb[56].mxu0 %vm3294_vm1, %v17786_v36 }
 0x676   : > { %v18185_v17 = vadd.f32 %v18095_v22, %v12993_v57  ;;  %14770 = vmatprep.mubr.msk.bf16.mxu0 %vm3294_vm1, %v17793_v63 }
 0x678   : > { %v12994_v35 = vpop.f32.mrb[208].mxu0  ;;  %v13154_v58 = vpop.f32.mrb[48].mxu1 }
 0x679   : > { %v12995_v42 = vpop.f32.mrb[209].mxu0  ;;  %v13155_v34 = vpop.f32.mrb[49].mxu1 }
 0x67a   : > { %v12996_v37 = vadd.f32 %v12995_v42, %v12994_v35  ;;  %v12997_v10 = vpop.f32.mrb[210].mxu0  ;;  %v18189_v51 = vadd.f32 %v13155_v34, %v13154_v58  ;;  %v13157_v16 = vpop.f32.mrb[50].mxu1 }
 0x67b   : > { %v12998_v5 = vpop.f32.mrb[211].mxu0  ;;  %v13158_v47 = vpop.f32.mrb[51].mxu1 }
 0x67c   : > { %v18192_v48 = vadd.f32 %v18101_v55, %v12996_v37  ;;  %v12999_v36 = vadd.f32 %v12998_v5, %v12997_v10  ;;  %v18194_v22 = vadd.f32 %v13158_v47, %v13157_v16 }
 0x67d   : > { %14771 = vmatmul.mubr.msk.bf16.gmra.mrb[60].mxu0 %vm3294_vm1, %v17797_v29 }
 0x67e   : > { %v18199_v63 = vadd.f32 %v18103_v60, %v12999_v36 }
 0x680   : > { %v13000_v52 = vpop.f32.mrb[212].mxu0  ;;  %v13160_v38 = vpop.f32.mrb[52].mxu1 }
 0x681   : > { %v13001_v39 = vpop.f32.mrb[213].mxu0  ;;  %v13161_v25 = vpop.f32.mrb[53].mxu1 }
 0x682   : > { %v13002_v33 = vadd.f32 %v13001_v39, %v13000_v52  ;;  %v13003_v20 = vpop.f32.mrb[214].mxu0  ;;  %v18201_v9 = vadd.f32 %v13161_v25, %v13160_v38  ;;  %v13163_v40 = vpop.f32.mrb[54].mxu1 }
 0x683   : > { %v13004_v55 = vpop.f32.mrb[215].mxu0  ;;  %v13164_v7 = vpop.f32.mrb[55].mxu1 }
 0x684   : > { %v18204_v54 = vadd.f32 %v18109_v18, %v13002_v33  ;;  %v13005_v26 = vadd.f32 %v13004_v55, %v13003_v20  ;;  %v18206_v15 = vadd.f32 %v13164_v7, %v13163_v40 }
 0x686   : > { %v18209_v29 = vadd.f32 %v18111_v1, %v13005_v26 }
 0x688   : > { %v13006_v60 = vpop.f32.mrb[216].mxu0  ;;  %v13166_v19 = vpop.f32.mrb[56].mxu1 }
 0x689   : > { %v13007_v23 = vpop.f32.mrb[217].mxu0  ;;  %v13167_v46 = vpop.f32.mrb[57].mxu1 }
 0x68a   : > { %v13008_v8 = vadd.f32 %v13007_v23, %v13006_v60  ;;  %v13009_v41 = vpop.f32.mrb[218].mxu0  ;;  %v18211_v0 = vadd.f32 %v13167_v46, %v13166_v19  ;;  %v13169_v12 = vpop.f32.mrb[58].mxu1 }
 0x68b   : > { %v13010_v11 = vpop.f32.mrb[219].mxu0  ;;  %v13170_v32 = vpop.f32.mrb[59].mxu1 }
 0x68c   : > { %v18214_v18 = vadd.f32 %v18117_v13, %v13008_v8  ;;  %v13011_v27 = vadd.f32 %v13010_v11, %v13009_v41  ;;  %v18216_v44 = vadd.f32 %v13170_v32, %v13169_v12 }
 0x68e   : > { %v18219_v1 = vadd.f32 %v18119_v2, %v13011_v27 }
 0x690   : > { %v13012_v31 = vpop.f32.mrb[220].mxu0  ;;  %v13172_v57 = vpop.f32.mrb[60].mxu1 }
 0x691   : > { %v13013_v35 = vpop.f32.mrb[221].mxu0  ;;  %v13173_v58 = vpop.f32.mrb[61].mxu1 }
 0x692   : > { %v13014_v42 = vadd.f32 %v13013_v35, %v13012_v31  ;;  %v13015_v34 = vpop.f32.mrb[222].mxu0  ;;  %v18221_v37 = vadd.f32 %v13173_v58, %v13172_v57  ;;  %v13175_v10 = vpop.f32.mrb[62].mxu1 }
 0x693   : > { %v13016_v16 = vpop.f32.mrb[223].mxu0  ;;  %v13176_v5 = vpop.f32.mrb[63].mxu1 }
 0x694   : > { %v18224_v13 = vadd.f32 %v18125_v24, %v13014_v42  ;;  %v13017_v47 = vadd.f32 %v13016_v16, %v13015_v34  ;;  %v18226_v36 = vadd.f32 %v13176_v5, %v13175_v10  ;;  %v15430_v24 = vld [vmem:[%s19747_s4 + $0x204] ss:$8 sps:$4 sm:$0xff]  }
 0x695   : > { %4840 = vmatprep.mubr.bf16.mxu1 %v15430_v24 }
 0x696   : > { %v18229_v2 = vadd.f32 %v18127_v53, %v13017_v47 }
 0x698   : > { %v13018_v52 = vpop.f32.mrb[224].mxu0 }
 0x699   : > { %v13019_v38 = vpop.f32.mrb[225].mxu0 }
 0x69a   : > { %v13020_v39 = vadd.f32 %v13019_v38, %v13018_v52  ;;  %v13021_v25 = vpop.f32.mrb[226].mxu0 }
 0x69b   : > { %v13022_v33 = vpop.f32.mrb[227].mxu0 }
 0x69c   : > { %v18232_v20 = vadd.f32 %v18133_v56, %v13020_v39  ;;  %v13023_v40 = vadd.f32 %v13022_v33, %v13021_v25 }
 0x69e   : > { %v18238_v55 = vadd.f32 %v18138_v50, %v13023_v40 }
 0x6a0   : > { %v13024_v7 = vpop.f32.mrb[228].mxu0 }
 0x6a1   : > { %v13025_v53 = vpop.f32.mrb[229].mxu0 }
 0x6a2   : > { %v13026_v26 = vadd.f32 %v13025_v53, %v13024_v7  ;;  %v13027_v60 = vpop.f32.mrb[230].mxu0 }
 0x6a3   : > { %v13028_v19 = vpop.f32.mrb[231].mxu0 }
 0x6a4   : > { %v18241_v23 = vadd.f32 %v18147_v21, %v13026_v26  ;;  %v13029_v46 = vadd.f32 %v13028_v19, %v13027_v60 }
 0x6a6   : > { %v18244_v56 = vadd.f32 %v18152_v28, %v13029_v46 }
 0x6a8   : > { %v13030_v8 = vpop.f32.mrb[232].mxu0 }
 0x6a9   : > { %v13031_v41 = vpop.f32.mrb[233].mxu0 }
 0x6aa   : > { %v13032_v12 = vadd.f32 %v13031_v41, %v13030_v8  ;;  %v13033_v11 = vpop.f32.mrb[234].mxu0 }
 0x6ab   : > { %v13034_v32 = vpop.f32.mrb[235].mxu0 }
 0x6ac   : > { %v18247_v50 = vadd.f32 %v18161_v45, %v13032_v12  ;;  %v13035_v27 = vadd.f32 %v13034_v32, %v13033_v11 }
 0x6ae   : > { %v18250_v31 = vadd.f32 %v18166_v62, %v13035_v27 }
 0x6b0   : > { %v13036_v57 = vpop.f32.mrb[236].mxu0 }
 0x6b1   : > { %v13037_v35 = vpop.f32.mrb[237].mxu0 }
 0x6b2   : > { %v13038_v21 = vadd.f32 %v13037_v35, %v13036_v57  ;;  %v13039_v58 = vpop.f32.mrb[238].mxu0 }
 0x6b3   : > { %v13040_v42 = vpop.f32.mrb[239].mxu0 }
 0x6b4   : > { %v18253_v28 = vadd.f32 %v18175_v14, %v13038_v21  ;;  %v13041_v34 = vadd.f32 %v13040_v42, %v13039_v58 }
 0x6b6   : > { %v18256_v10 = vadd.f32 %v18180_v3, %v13041_v34 }
 0x6b8   : > { %v13042_v16 = vpop.f32.mrb[240].mxu0 }
 0x6b9   : > { %v13043_v5 = vpop.f32.mrb[241].mxu0 }
 0x6ba   : > { %v13044_v45 = vadd.f32 %v13043_v5, %v13042_v16  ;;  %v13045_v47 = vpop.f32.mrb[242].mxu0 }
 0x6bb   : > { %v13046_v52 = vpop.f32.mrb[243].mxu0 }
 0x6bc   : > { %v18259_v62 = vadd.f32 %v18189_v51, %v13044_v45  ;;  %v13047_v38 = vadd.f32 %v13046_v52, %v13045_v47 }
 0x6be   : > { %v18262_v39 = vadd.f32 %v18194_v22, %v13047_v38 }
 0x6c0   : > { %v13048_v25 = vpop.f32.mrb[244].mxu0 }
 0x6c1   : > { %v13049_v33 = vpop.f32.mrb[245].mxu0 }
 0x6c2   : > { %v13050_v14 = vadd.f32 %v13049_v33, %v13048_v25  ;;  %v13051_v40 = vpop.f32.mrb[246].mxu0 }
 0x6c3   : > { %v13052_v24 = vpop.f32.mrb[247].mxu0 }
 0x6c4   : > { %v18265_v3 = vadd.f32 %v18201_v9, %v13050_v14  ;;  %v13053_v7 = vadd.f32 %v13052_v24, %v13051_v40 }
 0x6c6   : > { %v18268_v53 = vadd.f32 %v18206_v15, %v13053_v7 }
 0x6c8   : > { %v13054_v26 = vpop.f32.mrb[248].mxu0 }
 0x6c9   : > { %v13055_v60 = vpop.f32.mrb[249].mxu0 }
 0x6ca   : > { %v13056_v51 = vadd.f32 %v13055_v60, %v13054_v26  ;;  %v13057_v19 = vpop.f32.mrb[250].mxu0 }
 0x6cb   : > { %v13058_v46 = vpop.f32.mrb[251].mxu0 }
 0x6cc   : > { %v18271_v22 = vadd.f32 %v18211_v0, %v13056_v51  ;;  %v13059_v8 = vadd.f32 %v13058_v46, %v13057_v19 }
 0x6ce   : > { %v18274_v41 = vadd.f32 %v18216_v44, %v13059_v8  ;;  %v15457_v44 = vld [vmem:[%s19747_s4 + $0x304] ss:$8 sps:$4 sm:$0xff]  }
 0x6cf   : > { %5420 = vmatprep.mubr.bf16.mxu0 %v15457_v44 }
 0x6d0   : > { %v13060_v12 = vpop.f32.mrb[252].mxu0 }
 0x6d1   : > { %v13061_v11 = vpop.f32.mrb[253].mxu0 }
 0x6d2   : > { %v13062_v9 = vadd.f32 %v13061_v11, %v13060_v12  ;;  %v13063_v32 = vpop.f32.mrb[254].mxu0 }
 0x6d3   : > { %v13064_v27 = vpop.f32.mrb[255].mxu0 }
 0x6d4   : > { %v18277_v15 = vadd.f32 %v18221_v37, %v13062_v9  ;;  %v13065_v57 = vadd.f32 %v13064_v27, %v13063_v32 }
 0x6d6   : > { %v18280_v35 = vadd.f32 %v18226_v36, %v13065_v57 }
 0x6d8   : > { %v14708_v21 = vpop.f32.mrb[0].mxu0 }
 0x6d9   : > { %v4472_v58 = vpop.f32.mrb[1].mxu0 }
 0x6da   : > { %v14709_v0 = vpop.f32.mrb[2].mxu0 }
 0x6db   : > { %v4633_v42 = vpack.c.bf16 %v14709_v0, %v14708_v21  ;;  %v4475_v34 = vpop.f32.mrb[3].mxu0 }
 0x6dc   : > { %v4632_v16 = vpack.c.bf16 %v4475_v34, %v4472_v58 }
 0x6e0   : > { %v14712_v5 = vpop.f32.mrb[4].mxu0 }
 0x6e1   : > { %v4488_v45 = vpop.f32.mrb[5].mxu0 }
 0x6e2   : > { %v14713_v47 = vpop.f32.mrb[6].mxu0 }
 0x6e3   : > { %v4635_v37 = vpack.c.bf16 %v14713_v47, %v14712_v5  ;;  %v4491_v52 = vpop.f32.mrb[7].mxu0 }
 0x6e4   : > { %v4634_v38 = vpack.c.bf16 %v4491_v52, %v4488_v45 }
 0x6e8   : > { %v14716_v25 = vpop.f32.mrb[8].mxu0 }
 0x6e9   : > { %v4504_v36 = vpop.f32.mrb[9].mxu0 }
 0x6ea   : > { %v14717_v33 = vpop.f32.mrb[10].mxu0 }
 0x6eb   : > { %v4637_v14 = vpack.c.bf16 %v14717_v33, %v14716_v25  ;;  %v4507_v40 = vpop.f32.mrb[11].mxu0 }
 0x6ec   : > { %v4636_v24 = vpack.c.bf16 %v4507_v40, %v4504_v36 }
 0x6f0   : > { %v14720_v7 = vpop.f32.mrb[12].mxu0 }
 0x6f1   : > { %v4520_v26 = vpop.f32.mrb[13].mxu0 }
 0x6f2   : > { %v14721_v60 = vpop.f32.mrb[14].mxu0 }
 0x6f3   : > { %v4639_v51 = vpack.c.bf16 %v14721_v60, %v14720_v7  ;;  %v4523_v19 = vpop.f32.mrb[15].mxu0 }
 0x6f4   : > { %v4638_v46 = vpack.c.bf16 %v4523_v19, %v4520_v26 }
 0x6f8   : > { %v14724_v8 = vpop.f32.mrb[16].mxu0 }
 0x6f9   : > { %v4536_v12 = vpop.f32.mrb[17].mxu0 }
 0x6fa   : > { %v14725_v11 = vpop.f32.mrb[18].mxu0 }
 0x6fb   : > { %v4641_v9 = vpack.c.bf16 %v14725_v11, %v14724_v8  ;;  %v4539_v32 = vpop.f32.mrb[19].mxu0 }
 0x6fc   : > { %v4640_v27 = vpack.c.bf16 %v4539_v32, %v4536_v12  ;;  %v15433_v12 = vld [vmem:[%s19747_s4 + $0x214] ss:$8 sps:$4 sm:$0xff]   ;;  %v15431_v32 = vld [vmem:[%s19747_s4 + $0x210] ss:$8 sps:$4 sm:$0xff]  }
 0x6fe   : > { %13196 = vmatprep.subr.bf16.mxu1 %v4640_v27 }
 0x6ff   : > { %13197 = vmatpush3.bf16.msra.mxu1 %v4632_v16 }
 0x700   : > { %v14728_v57 = vpop.f32.mrb[20].mxu0  ;;  %13198 = vmatprep.subr.bf16.mxu1 %v4641_v9 }
 0x701   : > { %v4552_v21 = vpop.f32.mrb[21].mxu0 }
 0x702   : > { %v14729_v58 = vpop.f32.mrb[22].mxu0 }
 0x703   : > { %v4643_v0 = vpack.c.bf16 %v14729_v58, %v14728_v57  ;;  %v4555_v34 = vpop.f32.mrb[23].mxu0  ;;  %13199 = vmatpush3.bf16.msra.mxu1 %v4633_v42 }
 0x704   : > { %v4642_v44 = vpack.c.bf16 %v4555_v34, %v4552_v21 }
 0x706   : > { %13200 = vmatprep.subr.bf16.mxu1 %v4642_v44  ;;  %v15434_v44 = vld [vmem:[%s19747_s4 + $0x220] ss:$8 sps:$4 sm:$0xff]  }
 0x707   : > { %13201 = vmatpush3.bf16.msra.mxu1 %v4634_v38 }
 0x708   : > { %v14732_v5 = vpop.f32.mrb[24].mxu0  ;;  %13202 = vmatprep.subr.bf16.mxu1 %v4643_v0 }
 0x709   : > { %v4568_v45 = vpop.f32.mrb[25].mxu0 }
 0x70a   : > { %v14733_v47 = vpop.f32.mrb[26].mxu0 }
 0x70b   : > { %v4645_v52 = vpack.c.bf16 %v14733_v47, %v14732_v5  ;;  %v4571_v25 = vpop.f32.mrb[27].mxu0  ;;  %13203 = vmatpush3.bf16.msra.mxu1 %v4635_v37  ;;  %v15428_v37 = vld [vmem:[%s19747_s4 + $0x200] ss:$8 sps:$4 sm:$0xff]   ;;  %v15439_v47 = vld [vmem:[%s19747_s4 + $0x234] ss:$8 sps:$4 sm:$0xff]  }
 0x70c   : > { %v4644_v36 = vpack.c.bf16 %v4571_v25, %v4568_v45 }
 0x70e   : > { %13204 = vmatprep.subr.bf16.mxu1 %v4644_v36 }
 0x70f   : > { %13205 = vmatpush3.bf16.msra.mxu1 %v4636_v24 }
 0x710   : > { %v14736_v16 = vpop.f32.mrb[28].mxu0  ;;  %13206 = vmatprep.subr.bf16.mxu1 %v4645_v52 }
 0x711   : > { %v4584_v33 = vpop.f32.mrb[29].mxu0 }
 0x712   : > { %v14737_v40 = vpop.f32.mrb[30].mxu0 }
 0x713   : > { %v4647_v7 = vpack.c.bf16 %v14737_v40, %v14736_v16  ;;  %v4587_v26 = vpop.f32.mrb[31].mxu0  ;;  %13207 = vmatpush3.bf16.msra.mxu1 %v4637_v14 }
 0x714   : > { %v4646_v42 = vpack.c.bf16 %v4587_v26, %v4584_v33  ;;  %v15437_v33 = vld [vmem:[%s19747_s4 + $0x230] ss:$8 sps:$4 sm:$0xff]   ;;  %v15442_v26 = vld [vmem:[%s19747_s4 + $0x244] ss:$8 sps:$4 sm:$0xff]  }
 0x716   : > { %13208 = vmatprep.subr.bf16.mxu1 %v4646_v42 }
 0x717   : > { %13209 = vmatpush3.bf16.msra.mxu1 %v4638_v46 }
 0x718   : > { %13210 = vmatprep.subr.bf16.mxu1 %v4647_v7  ;;  %v14744_v38 = vpop.f32.mrb[32].mxu0 }
 0x719   : > { %v5052_v60 = vpop.f32.mrb[33].mxu0 }
 0x71a   : > { %v14745_v19 = vpop.f32.mrb[34].mxu0 }
 0x71b   : > { %v5213_v8 = vpack.c.bf16 %v14745_v19, %v14744_v38  ;;  %13211 = vmatpush3.bf16.msra.mxu1 %v4639_v51  ;;  %v5055_v24 = vpop.f32.mrb[35].mxu0  ;;  %v15436_v51 = vld [vmem:[%s19747_s4 + $0x224] ss:$8 sps:$4 sm:$0xff]  }
 0x71c   : > { %v5212_v11 = vpack.c.bf16 %v5055_v24, %v5052_v60 }
 0x71e   : > { %4841 = vmatmul.mubr.bf16.vlgmr.msra.gmra.mrb[64].mxu1 %v15428_v37  ;;  %v15440_v37 = vld [vmem:[%s19747_s4 + $0x240] ss:$8 sps:$4 sm:$0xff]  }
 0x71f   : > { %4848 = vmatprep.mubr.bf16.mxu1 %v15433_v12 }
 0x720   : > { %v18291_v14 = vpop.f32.mrb[36].mxu0 }
 0x721   : > { %v5068_v46 = vpop.f32.mrb[37].mxu0 }
 0x722   : > { %v14749_v9 = vpop.f32.mrb[38].mxu0 }
 0x723   : > { %v5215_v27 = vpack.c.bf16 %v14749_v9, %v18291_v14  ;;  %v5071_v57 = vpop.f32.mrb[39].mxu0  ;;  %v15445_v14 = vld [vmem:[%s19747_s4 + $0x254] ss:$8 sps:$4 sm:$0xff]  }
 0x724   : > { %v5214_v21 = vpack.c.bf16 %v5071_v57, %v5068_v46 }
 0x726   : > { %4849 = vmatmul.mubr.bf16.gmra.mrb[68].mxu1 %v15431_v32 }
 0x727   : > { %4856 = vmatprep.mubr.bf16.mxu1 %v15436_v51  ;;  %v15443_v51 = vld [vmem:[%s19747_s4 + $0x250] ss:$8 sps:$4 sm:$0xff]  }
 0x728   : > { %v18300_v58 = vpop.f32.mrb[40].mxu0 }
 0x729   : > { %v5084_v0 = vpop.f32.mrb[41].mxu0 }
 0x72a   : > { %v18302_v34 = vpop.f32.mrb[42].mxu0 }
 0x72b   : > { %v5217_v5 = vpack.c.bf16 %v18302_v34, %v18300_v58  ;;  %v5087_v45 = vpop.f32.mrb[43].mxu0  ;;  %v15448_v34 = vld [vmem:[%s19747_s4 + $0x264] ss:$8 sps:$4 sm:$0xff]  }
 0x72c   : > { %v5216_v52 = vpack.c.bf16 %v5087_v45, %v5084_v0 }
 0x72e   : > { %4857 = vmatmul.mubr.bf16.gmra.mrb[72].mxu1 %v15434_v44 }
 0x72f   : > { %4864 = vmatprep.mubr.bf16.mxu1 %v15439_v47 }
 0x730   : > { %v18312_v25 = vpop.f32.mrb[44].mxu0 }
 0x731   : > { %v5100_v36 = vpop.f32.mrb[45].mxu0 }
 0x732   : > { %v18314_v16 = vpop.f32.mrb[46].mxu0 }
 0x733   : > { %v5219_v40 = vpack.c.bf16 %v18314_v16, %v18312_v25  ;;  %v5103_v7 = vpop.f32.mrb[47].mxu0  ;;  %v15446_v25 = vld [vmem:[%s19747_s4 + $0x260] ss:$8 sps:$4 sm:$0xff]  }
 0x734   : > { %v5218_v42 = vpack.c.bf16 %v5103_v7, %v5100_v36 }
 0x736   : > { %4865 = vmatmul.mubr.bf16.gmra.mrb[76].mxu1 %v15437_v33 }
 0x737   : > { %4872 = vmatprep.mubr.bf16.mxu1 %v15442_v26 }
 0x738   : > { %v14760_v38 = vpop.f32.mrb[48].mxu0 }
 0x739   : > { %v5116_v60 = vpop.f32.mrb[49].mxu0 }
 0x73a   : > { %v14761_v19 = vpop.f32.mrb[50].mxu0 }
 0x73b   : > { %v5221_v24 = vpack.c.bf16 %v14761_v19, %v14760_v38  ;;  %v5119_v12 = vpop.f32.mrb[51].mxu0  ;;  %v15449_v38 = vld [vmem:[%s19747_s4 + $0x270] ss:$8 sps:$4 sm:$0xff]  }
 0x73c   : > { %v5220_v46 = vpack.c.bf16 %v5119_v12, %v5116_v60  ;;  %v15463_v12 = vld [vmem:[%s19747_s4 + $0x314] ss:$8 sps:$4 sm:$0xff]  }
 0x73e   : > { %4873 = vmatmul.mubr.bf16.gmra.mrb[80].mxu1 %v15440_v37  ;;  %13326 = vmatprep.subr.bf16.mxu0 %v5220_v46  ;;  %v15469_v46 = vld [vmem:[%s19747_s4 + $0x324] ss:$8 sps:$4 sm:$0xff]  }
 0x73f   : > { %13327 = vmatpush3.bf16.msra.mxu0 %v5212_v11  ;;  %4880 = vmatprep.mubr.bf16.mxu1 %v15445_v14  ;;  %v15466_v14 = vld [vmem:[%s19747_s4 + $0x2a4] ss:$8 sps:$4 sm:$0xff]  }
 0x740   : > { %v14764_v9 = vpop.f32.mrb[52].mxu0  ;;  %13328 = vmatprep.subr.bf16.mxu0 %v5221_v24  ;;  %v15455_v24 = vld [vmem:[%s19747_s4 + $0x300] ss:$8 sps:$4 sm:$0xff]  }
 0x741   : > { %v5132_v32 = vpop.f32.mrb[53].mxu0 }
 0x742   : > { %v14765_v57 = vpop.f32.mrb[54].mxu0 }
 0x743   : > { %v5223_v58 = vpack.c.bf16 %v14765_v57, %v14764_v9  ;;  %v5135_v0 = vpop.f32.mrb[55].mxu0  ;;  %13329 = vmatpush3.bf16.msra.mxu0 %v5213_v8  ;;  %v15451_v8 = vld [vmem:[%s19747_s4 + $0x274] ss:$8 sps:$4 sm:$0xff]   ;;  %v15464_v9 = vld [vmem:[%s19747_s4 + $0x2a0] ss:$8 sps:$4 sm:$0xff]  }
 0x744   : > { %v5222_v44 = vpack.c.bf16 %v5135_v0, %v5132_v32  ;;  %v15467_v32 = vld [vmem:[%s19747_s4 + $0x320] ss:$8 sps:$4 sm:$0xff]   ;;  %v15472_v57 = vld [vmem:[%s19747_s4 + $0x2b4] ss:$8 sps:$4 sm:$0xff]   ;;  %v15473_v0 = vld [vmem:[%s19747_s4 + $0x330] ss:$8 sps:$4 sm:$0xff]  }
 0x746   : > { %4881 = vmatmul.mubr.bf16.gmra.mrb[84].mxu1 %v15443_v51  ;;  %13330 = vmatprep.subr.bf16.mxu0 %v5222_v44  ;;  %v15475_v51 = vld [vmem:[%s19747_s4 + $0x334] ss:$8 sps:$4 sm:$0xff]   ;;  %v15481_v44 = vld [vmem:[%s19747_s4 + $0x344] ss:$8 sps:$4 sm:$0xff]  }
 0x747   : > { %13331 = vmatpush3.bf16.msra.mxu0 %v5214_v21  ;;  %4888 = vmatprep.mubr.bf16.mxu1 %v15448_v34  ;;  %v15478_v34 = vld [vmem:[%s19747_s4 + $0x2c4] ss:$8 sps:$4 sm:$0xff]  }
 0x748   : > { %v14768_v11 = vpop.f32.mrb[56].mxu0  ;;  %13332 = vmatprep.subr.bf16.mxu0 %v5223_v58  ;;  %v15470_v58 = vld [vmem:[%s19747_s4 + $0x2b0] ss:$8 sps:$4 sm:$0xff]  }
 0x749   : > { %v5148_v45 = vpop.f32.mrb[57].mxu0 }
 0x74a   : > { %v14769_v47 = vpop.f32.mrb[58].mxu0 }
 0x74b   : > { %v5225_v36 = vpack.c.bf16 %v14769_v47, %v14768_v11  ;;  %v5151_v16 = vpop.f32.mrb[59].mxu0  ;;  %13333 = vmatpush3.bf16.msra.mxu0 %v5215_v27  ;;  %v15454_v27 = vld [vmem:[%s19747_s4 + $0x284] ss:$8 sps:$4 sm:$0xff]   ;;  %v15476_v11 = vld [vmem:[%s19747_s4 + $0x2c0] ss:$8 sps:$4 sm:$0xff]  }
 0x74c   : > { %v5224_v33 = vpack.c.bf16 %v5151_v16, %v5148_v45  ;;  %v15479_v45 = vld [vmem:[%s19747_s4 + $0x340] ss:$8 sps:$4 sm:$0xff]   ;;  %v15484_v47 = vld [vmem:[%s19747_s4 + $0x2d4] ss:$8 sps:$4 sm:$0xff]   ;;  %v15485_v16 = vld [vmem:[%s19747_s4 + $0x350] ss:$8 sps:$4 sm:$0xff]  }
 0x74e   : > { %4889 = vmatmul.mubr.bf16.gmra.mrb[88].mxu1 %v15446_v25  ;;  %13334 = vmatprep.subr.bf16.mxu0 %v5224_v33  ;;  %v15487_v25 = vld [vmem:[%s19747_s4 + $0x354] ss:$8 sps:$4 sm:$0xff]   ;;  %v15493_v33 = vld [vmem:[%s19747_s4 + $0x364] ss:$8 sps:$4 sm:$0xff]  }
 0x74f   : > { %13335 = vmatpush3.bf16.msra.mxu0 %v5216_v52  ;;  %4896 = vmatprep.mubr.bf16.mxu1 %v15451_v8  ;;  %v15452_v52 = vld [vmem:[%s19747_s4 + $0x280] ss:$8 sps:$4 sm:$0xff]   ;;  %v15490_v8 = vld [vmem:[%s19747_s4 + $0x2e4] ss:$8 sps:$4 sm:$0xff]  }
 0x750   : > { %v14772_v21 = vpop.f32.mrb[60].mxu0  ;;  %13336 = vmatprep.subr.bf16.mxu0 %v5225_v36  ;;  %v15482_v36 = vld [vmem:[%s19747_s4 + $0x2d0] ss:$8 sps:$4 sm:$0xff]  }
 0x751   : > { %v5164_v7 = vpop.f32.mrb[61].mxu0 }
 0x752   : > { %v14773_v26 = vpop.f32.mrb[62].mxu0 }
 0x753   : > { %v5227_v60 = vpack.c.bf16 %v14773_v26, %v14772_v21  ;;  %v5167_v19 = vpop.f32.mrb[63].mxu0  ;;  %13337 = vmatpush3.bf16.msra.mxu0 %v5217_v5  ;;  %v15460_v5 = vld [vmem:[%s19747_s4 + $0x294] ss:$8 sps:$4 sm:$0xff]   ;;  %v15488_v21 = vld [vmem:[%s19747_s4 + $0x2e0] ss:$8 sps:$4 sm:$0xff]  }
 0x754   : > { %v5226_v37 = vpack.c.bf16 %v5167_v19, %v5164_v7  ;;  %v15491_v7 = vld [vmem:[%s19747_s4 + $0x360] ss:$8 sps:$4 sm:$0xff]   ;;  %v15496_v26 = vld [vmem:[%s19747_s4 + $0x2f4] ss:$8 sps:$4 sm:$0xff]   ;;  %v15497_v19 = vld [vmem:[%s19747_s4 + $0x370] ss:$8 sps:$4 sm:$0xff]  }
 0x756   : > { %4897 = vmatmul.mubr.bf16.gmra.mrb[92].mxu1 %v15449_v38  ;;  %13338 = vmatprep.subr.bf16.mxu0 %v5226_v37  ;;  %v15499_v38 = vld [vmem:[%s19747_s4 + $0x374] ss:$8 sps:$4 sm:$0xff]   ;;  %v15500_v37 = vld [vmem:[%s19747_s4 + $0x380] ss:$8 sps:$4 sm:$0xff]  }
 0x757   : > { %13339 = vmatpush3.bf16.msra.mxu0 %v5218_v42  ;;  %4904 = vmatprep.mubr.bf16.mxu1 %v15454_v27  ;;  %v15458_v42 = vld [vmem:[%s19747_s4 + $0x290] ss:$8 sps:$4 sm:$0xff]   ;;  %v15502_v27 = vld [vmem:[%s19747_s4 + $0x384] ss:$8 sps:$4 sm:$0xff]  }
 0x758   : > { %13340 = vmatprep.subr.bf16.mxu0 %v5227_v60  ;;  %v15494_v60 = vld [vmem:[%s19747_s4 + $0x2f0] ss:$8 sps:$4 sm:$0xff]  }
 0x75b   : > { %13341 = vmatpush3.bf16.msra.mxu0 %v5219_v40  ;;  %v15461_v40 = vld [vmem:[%s19747_s4 + $0x310] ss:$8 sps:$4 sm:$0xff]  }
 0x75e   : > { %4905 = vmatmul.mubr.bf16.gmra.mrb[96].mxu1 %v15452_v52  ;;  %5421 = vmatmul.mubr.bf16.vlgmr.msra.gmra.mrb[64].mxu0 %v15455_v24  ;;  %v15505_v52 = vld [vmem:[%s19747_s4 + $0x394] ss:$8 sps:$4 sm:$0xff]   ;;  %v15503_v24 = vld [vmem:[%s19747_s4 + $0x390] ss:$8 sps:$4 sm:$0xff]  }
 0x75f   : > { %4912 = vmatprep.mubr.bf16.mxu1 %v15460_v5  ;;  %5428 = vmatprep.mubr.bf16.mxu0 %v15463_v12  ;;  %v15508_v5 = vld [vmem:[%s19747_s4 + $0x3a4] ss:$8 sps:$4 sm:$0xff]   ;;  %v15506_v12 = vld [vmem:[%s19747_s4 + $0x3a0] ss:$8 sps:$4 sm:$0xff]  }
 0x766   : > { %4913 = vmatmul.mubr.bf16.gmra.mrb[100].mxu1 %v15458_v42  ;;  %5429 = vmatmul.mubr.bf16.gmra.mrb[68].mxu0 %v15461_v40  ;;  %v15511_v42 = vld [vmem:[%s19747_s4 + $0x3b4] ss:$8 sps:$4 sm:$0xff]   ;;  %v15509_v40 = vld [vmem:[%s19747_s4 + $0x3b0] ss:$8 sps:$4 sm:$0xff]  }
 0x767   : > { %4920 = vmatprep.mubr.bf16.mxu1 %v15466_v14  ;;  %5436 = vmatprep.mubr.bf16.mxu0 %v15469_v46  ;;  %v15514_v14 = vld [vmem:[%s19747_s4 + $0x3c4] ss:$8 sps:$4 sm:$0xff]   ;;  %v15512_v46 = vld [vmem:[%s19747_s4 + $0x3c0] ss:$8 sps:$4 sm:$0xff]  }
 0x76e   : > { %4921 = vmatmul.mubr.bf16.gmra.mrb[104].mxu1 %v15464_v9  ;;  %5437 = vmatmul.mubr.bf16.gmra.mrb[72].mxu0 %v15467_v32  ;;  %v15517_v9 = vld [vmem:[%s19747_s4 + $0x3d4] ss:$8 sps:$4 sm:$0xff]   ;;  %v15515_v32 = vld [vmem:[%s19747_s4 + $0x3d0] ss:$8 sps:$4 sm:$0xff]  }
 0x76f   : > { %4928 = vmatprep.mubr.bf16.mxu1 %v15472_v57  ;;  %5444 = vmatprep.mubr.bf16.mxu0 %v15475_v51  ;;  %v15520_v57 = vld [vmem:[%s19747_s4 + $0x3e4] ss:$8 sps:$4 sm:$0xff]  }
 0x770   : > { %v15524_v51 = vld [vmem:[%s19751_s8] sm:$0xff]  }
 0x771   : > { %14774 = vmatprep.subr.bf16.mxu1 %v15524_v51 }
 0x772   : > { %14775 = vmatpush3.bf16.msra.mxu1 %v15524_v51 }
 0x776   : > { %4929 = vmatmul.mubr.bf16.gmra.mrb[108].mxu1 %v15470_v58  ;;  %5445 = vmatmul.mubr.bf16.gmra.mrb[76].mxu0 %v15473_v0  ;;  %v15518_v58 = vld [vmem:[%s19747_s4 + $0x3e0] ss:$8 sps:$4 sm:$0xff]   ;;  %v15523_v0 = vld [vmem:[%s19747_s4 + $0x3f4] ss:$8 sps:$4 sm:$0xff]  }
 0x777   : > { %4936 = vmatprep.mubr.bf16.mxu1 %v15478_v34  ;;  %5452 = vmatprep.mubr.bf16.mxu0 %v15481_v44  ;;  %v15521_v34 = vld [vmem:[%s19747_s4 + $0x3f0] ss:$8 sps:$4 sm:$0xff]  }
 0x77e   : > { %4937 = vmatmul.mubr.bf16.gmra.mrb[112].mxu1 %v15476_v11  ;;  %5453 = vmatmul.mubr.bf16.gmra.mrb[80].mxu0 %v15479_v45 }
 0x77f   : > { %4944 = vmatprep.mubr.bf16.mxu1 %v15484_v47  ;;  %5460 = vmatprep.mubr.bf16.mxu0 %v15487_v25 }
 0x786   : > { %4945 = vmatmul.mubr.bf16.gmra.mrb[116].mxu1 %v15482_v36  ;;  %5461 = vmatmul.mubr.bf16.gmra.mrb[84].mxu0 %v15485_v16 }
 0x787   : > { %4952 = vmatprep.mubr.bf16.mxu1 %v15490_v8  ;;  %5468 = vmatprep.mubr.bf16.mxu0 %v15493_v33 }
 0x78e   : > { %4953 = vmatmul.mubr.bf16.gmra.mrb[120].mxu1 %v15488_v21  ;;  %5469 = vmatmul.mubr.bf16.gmra.mrb[88].mxu0 %v15491_v7 }
 0x78f   : > { %4960 = vmatprep.mubr.bf16.mxu1 %v15496_v26  ;;  %5476 = vmatprep.mubr.bf16.mxu0 %v15499_v38 }
 0x796   : > { %4961 = vmatmul.mubr.bf16.gmra.mrb[124].mxu1 %v15494_v60  ;;  %5477 = vmatmul.mubr.bf16.gmra.mrb[92].mxu0 %v15497_v19 }
 0x797   : > { %5484 = vmatprep.mubr.bf16.mxu0 %v15502_v27 }
 0x79e   : > { %5485 = vmatmul.mubr.bf16.gmra.mrb[96].mxu0 %v15500_v37 }
 0x79f   : > { %5492 = vmatprep.mubr.bf16.mxu0 %v15505_v52 }
 0x7a6   : > { %5493 = vmatmul.mubr.bf16.gmra.mrb[100].mxu0 %v15503_v24 }
 0x7a7   : > { %5500 = vmatprep.mubr.bf16.mxu0 %v15508_v5 }
 0x7ae   : > { %5501 = vmatmul.mubr.bf16.gmra.mrb[104].mxu0 %v15506_v12 }
 0x7af   : > { %5508 = vmatprep.mubr.bf16.mxu0 %v15511_v42 }
 0x7b6   : > { %5509 = vmatmul.mubr.bf16.gmra.mrb[108].mxu0 %v15509_v40 }
 0x7b7   : > { %5516 = vmatprep.mubr.bf16.mxu0 %v15514_v14 }
 0x7be   : > { %5517 = vmatmul.mubr.bf16.gmra.mrb[112].mxu0 %v15512_v46 }
 0x7bf   : > { %5524 = vmatprep.mubr.bf16.mxu0 %v15517_v9 }
 0x7c6   : > { %5525 = vmatmul.mubr.bf16.gmra.mrb[116].mxu0 %v15515_v32 }
 0x7c7   : > { %5532 = vmatprep.mubr.bf16.mxu0 %v15520_v57 }
 0x7ce   : > { %5533 = vmatmul.mubr.bf16.gmra.mrb[120].mxu0 %v15518_v58 }
 0x7cf   : > { %5540 = vmatprep.mubr.bf16.mxu0 %v15523_v0 }
 0x7d6   : > { %5541 = vmatmul.mubr.bf16.gmra.mrb[124].mxu0 %v15521_v34 }
 0x7f1   : > { %v13212_v44 = vpop.f32.mrb[64].mxu1 }
 0x7f2   : > { %v13213_v11 = vpop.f32.mrb[65].mxu1 }
 0x7f3   : > { %v13214_v45 = vadd.f32 %v13213_v11, %v13212_v44  ;;  %v13215_v47 = vpop.f32.mrb[66].mxu1 }
 0x7f4   : > { %v13216_v25 = vpop.f32.mrb[67].mxu1 }
 0x7f5   : > { %v18490_v36 = vadd.f32 %v13214_v45, %v18136_v61  ;;  %v13217_v16 = vadd.f32 %v13216_v25, %v13215_v47 }
 0x7f7   : > { %v18493_v8 = vadd.f32 %v13217_v16, %v18143_v30 }
 0x7f9   : > { %v13218_v33 = vpop.f32.mrb[68].mxu1 }
 0x7fa   : > { %v13219_v21 = vpop.f32.mrb[69].mxu1 }
 0x7fb   : > { %v13220_v7 = vadd.f32 %v13219_v21, %v13218_v33  ;;  %v13221_v26 = vpop.f32.mrb[70].mxu1 }
 0x7fc   : > { %v13222_v38 = vpop.f32.mrb[71].mxu1 }
 0x7fd   : > { %v18496_v60 = vadd.f32 %v13220_v7, %v18150_v6  ;;  %v13223_v19 = vadd.f32 %v13222_v38, %v13221_v26 }
 0x7ff   : > { %v18499_v27 = vadd.f32 %v13223_v19, %v18157_v4 }
 0x801   : > { %v13224_v37 = vpop.f32.mrb[72].mxu1 }
 0x802   : > { %v13225_v52 = vpop.f32.mrb[73].mxu1 }
 0x803   : > { %v13226_v61 = vadd.f32 %v13225_v52, %v13224_v37  ;;  %v13227_v24 = vpop.f32.mrb[74].mxu1 }
 0x804   : > { %v13228_v5 = vpop.f32.mrb[75].mxu1 }
 0x805   : > { %v18502_v30 = vadd.f32 %v13226_v61, %v18164_v43  ;;  %v13229_v12 = vadd.f32 %v13228_v5, %v13227_v24 }
 0x807   : > { %v18505_v42 = vadd.f32 %v13229_v12, %v18171_v49 }
 0x809   : > { %v13230_v40 = vpop.f32.mrb[76].mxu1 }
 0x80a   : > { %v13231_v14 = vpop.f32.mrb[77].mxu1 }
 0x80b   : > { %v13232_v6 = vadd.f32 %v13231_v14, %v13230_v40  ;;  %v13233_v46 = vpop.f32.mrb[78].mxu1 }
 0x80c   : > { %v13234_v9 = vpop.f32.mrb[79].mxu1 }
 0x80d   : > { %v18508_v4 = vadd.f32 %v13232_v6, %v18178_v59  ;;  %v13235_v32 = vadd.f32 %v13234_v9, %v13233_v46 }
 0x80f   : > { %v18511_v57 = vadd.f32 %v13235_v32, %v18185_v17 }
 0x811   : > { %v13236_v51 = vpop.f32.mrb[80].mxu1 }
 0x812   : > { %v13237_v58 = vpop.f32.mrb[81].mxu1 }
 0x813   : > { %v13238_v43 = vadd.f32 %v13237_v58, %v13236_v51  ;;  %v13239_v0 = vpop.f32.mrb[82].mxu1 }
 0x814   : > { %v13240_v34 = vpop.f32.mrb[83].mxu1 }
 0x815   : > { %v18514_v49 = vadd.f32 %v13238_v43, %v18192_v48  ;;  %v13241_v44 = vadd.f32 %v13240_v34, %v13239_v0 }
 0x817   : > { %v18517_v11 = vadd.f32 %v13241_v44, %v18199_v63 }
 0x819   : > { %v13242_v45 = vpop.f32.mrb[84].mxu1 }
 0x81a   : > { %v13243_v47 = vpop.f32.mrb[85].mxu1 }
 0x81b   : > { %v13244_v59 = vadd.f32 %v13243_v47, %v13242_v45  ;;  %v13245_v25 = vpop.f32.mrb[86].mxu1  ;;  %v5616_v47 = vpop.permute.xlu0 %5615 }
 0x81c   : > { %v13246_v16 = vpop.f32.mrb[87].mxu1 }
 0x81d   : > { %v18520_v17 = vadd.f32 %v13244_v59, %v18204_v54  ;;  %v13247_v33 = vadd.f32 %v13246_v16, %v13245_v25  ;;  %v5621_v16 = vpop.permute.xlu1 %5620 }
 0x81f   : > { %v18523_v21 = vadd.f32 %v13247_v33, %v18209_v29 }
 0x821   : > { %v13248_v7 = vpop.f32.mrb[88].mxu1 }
 0x822   : > { %v13249_v26 = vpop.f32.mrb[89].mxu1 }
 0x823   : > { %v13250_v48 = vadd.f32 %v13249_v26, %v13248_v7  ;;  %v13251_v38 = vpop.f32.mrb[90].mxu1 }
 0x824   : > { %v13252_v19 = vpop.f32.mrb[91].mxu1 }
 0x825   : > { %v18526_v63 = vadd.f32 %v13250_v48, %v18214_v18  ;;  %v13253_v37 = vadd.f32 %v13252_v19, %v13251_v38 }
 0x827   : > { %v18529_v52 = vadd.f32 %v13253_v37, %v18219_v1 }
 0x829   : > { %v13254_v61 = vpop.f32.mrb[92].mxu1 }
 0x82a   : > { %v13255_v24 = vpop.f32.mrb[93].mxu1 }
 0x82b   : > { %v13256_v54 = vadd.f32 %v13255_v24, %v13254_v61  ;;  %v13257_v5 = vpop.f32.mrb[94].mxu1 }
 0x82c   : > { %v13258_v12 = vpop.f32.mrb[95].mxu1 }
 0x82d   : > { %v18532_v29 = vadd.f32 %v13256_v54, %v18224_v13  ;;  %v13259_v40 = vadd.f32 %v13258_v12, %v13257_v5 }
 0x82f   : > { %v18535_v14 = vadd.f32 %v13259_v40, %v18229_v2 }
 0x831   : > { %v13260_v6 = vpop.f32.mrb[96].mxu1  ;;  %v13342_v46 = vpop.f32.mrb[64].mxu0 }
 0x832   : > { %v13261_v18 = vpop.f32.mrb[97].mxu1  ;;  %v13343_v9 = vpop.f32.mrb[65].mxu0 }
 0x833   : > { %v13262_v32 = vadd.f32 %v13261_v18, %v13260_v6  ;;  %v13344_v51 = vadd.f32 %v13343_v9, %v13342_v46  ;;  %v13263_v1 = vpop.f32.mrb[98].mxu1  ;;  %v13345_v58 = vpop.f32.mrb[66].mxu0 }
 0x834   : > { %v13264_v43 = vpop.f32.mrb[99].mxu1  ;;  %v13346_v0 = vpop.f32.mrb[67].mxu0 }
 0x835   : > { %v18538_v34 = vadd.f32 %v13262_v32, %v18232_v20  ;;  %v5549_v13 = vadd.f32 %v13344_v51, %v18490_v36  ;;  %v13265_v44 = vadd.f32 %v13264_v43, %v13263_v1  ;;  %v13347_v45 = vadd.f32 %v13346_v0, %v13345_v58  ;;  %v15525_v20 = vld [vmem:[%s19751_s8 + $0x8] sm:$0xff]   ;;  %v5626_v46 = vpop.permute.xlu0 %5625  ;;  %v5631_v58 = vpop.permute.xlu1 %5630 }
 0x836   : > { %14808 = vmatprep.subr.bf16.mxu1 %v15525_v20 }
 0x837   : > { %v5773_v2 = vadd.f32 %v5616_v47, %v5549_v13  ;;  %v18542_v59 = vadd.f32 %v13265_v44, %v18238_v55  ;;  %v5550_v25 = vadd.f32 %v13347_v45, %v18493_v8 }
 0x839   : > { %v5774_v33 = vadd.f32 %v5621_v16, %v5550_v25  ;;  %v13266_v7 = vpop.f32.mrb[100].mxu1  ;;  %v13348_v26 = vpop.f32.mrb[68].mxu0  ;;  %v5805_v48 = vmul.f32 0.2, %v5773_v2 }
 0x83a   : > { %v13267_v38 = vpop.f32.mrb[101].mxu1  ;;  %v13349_v19 = vpop.f32.mrb[69].mxu0 }
 0x83b   : > { %v5806_v36 = vmul.f32 0.2, %v5774_v33  ;;  %v13268_v37 = vadd.f32 %v13267_v38, %v13266_v7  ;;  %v13350_v61 = vadd.f32 %v13349_v19, %v13348_v26  ;;  %v13269_v24 = vpop.f32.mrb[102].mxu1  ;;  %v13351_v54 = vpop.f32.mrb[70].mxu0  ;;  %v5837_v18 = vmax.f32 %v5773_v2, %v5805_v48 }
 0x83c   : > { %v13270_v55 = vpop.f32.mrb[103].mxu1  ;;  %v13352_v5 = vpop.f32.mrb[71].mxu0 }
 0x83d   : > { %v18549_v8 = vadd.f32 %v13268_v37, %v18241_v23  ;;  %v5551_v12 = vadd.f32 %v13350_v61, %v18496_v60  ;;  %v13271_v40 = vadd.f32 %v13270_v55, %v13269_v24  ;;  %v13353_v6 = vadd.f32 %v13352_v5, %v13351_v54  ;;  %v5641_v55 = vpop.permute.xlu1 %5640 }
 0x83e   : > { %v5838_v9 = vmax.f32 %v5774_v33, %v5806_v36  ;;  %v5636_v36 = vpop.permute.xlu0 %5635 }
 0x83f   : > { %v5775_v32 = vadd.f32 %v5626_v46, %v5551_v12  ;;  %v18553_v51 = vadd.f32 %v13271_v40, %v18244_v56  ;;  %v5552_v1 = vadd.f32 %v13353_v6, %v18499_v27 }
 0x840   : > { %v18556_v43 = vpack.c.bf16 %v5838_v9, %v5837_v18 }
 0x841   : > { %v5807_v0 = vmul.f32 0.2, %v5775_v32  ;;  %v5776_v23 = vadd.f32 %v5631_v58, %v5552_v1  ;;  %v13272_v13 = vpop.f32.mrb[104].mxu1  ;;  %v13354_v44 = vpop.f32.mrb[72].mxu0 }
 0x842   : > { %14776 = vmatprep.mubr.msk.bf16.mxu1 %vm5893_vm2, %v18556_v43  ;;  %v13273_v60 = vpop.f32.mrb[105].mxu1  ;;  %v13355_v45 = vpop.f32.mrb[73].mxu0 }
 0x843   : > { %v5808_v47 = vmul.f32 0.2, %v5776_v23  ;;  %v13274_v2 = vadd.f32 %v13273_v60, %v13272_v13  ;;  %v13356_v25 = vadd.f32 %v13355_v45, %v13354_v44  ;;  %v13275_v56 = vpop.f32.mrb[106].mxu1  ;;  %v13357_v16 = vpop.f32.mrb[74].mxu0  ;;  %v5839_v33 = vmax.f32 %v5775_v32, %v5807_v0 }
 0x844   : > { %v13276_v27 = vpop.f32.mrb[107].mxu1  ;;  %v13358_v7 = vpop.f32.mrb[75].mxu0 }
 0x845   : > { %v5840_v26 = vmax.f32 %v5776_v23, %v5808_v47  ;;  %v18561_v48 = vadd.f32 %v13274_v2, %v18247_v50  ;;  %v5553_v38 = vadd.f32 %v13356_v25, %v18502_v30  ;;  %v13277_v19 = vadd.f32 %v13276_v27, %v13275_v56  ;;  %v5646_v60 = vpop.permute.xlu0 %5645  ;;  %v5651_v56 = vpop.permute.xlu1 %5650 }
 0x846   : > { %v13359_v37 = vadd.f32 %v13358_v7, %v13357_v16 }
 0x847   : > { %v18564_v61 = vpack.c.bf16 %v5840_v26, %v5839_v33  ;;  %v5777_v24 = vadd.f32 %v5636_v36, %v5553_v38  ;;  %v18567_v54 = vadd.f32 %v13277_v19, %v18250_v31 }
 0x848   : > { %v5554_v5 = vadd.f32 %v13359_v37, %v18505_v42 }
 0x849   : > { %v13278_v12 = vpop.f32.mrb[108].mxu1  ;;  %v13360_v40 = vpop.f32.mrb[76].mxu0  ;;  %14777 = vmatmul.mubr.msk.bf16.vlgmr.msra.gmra.mrb[128].mxu1 %vm5893_vm2, %v18564_v61  ;;  %v5809_v50 = vmul.f32 0.2, %v5777_v24 }
 0x84a   : > { %v5778_v6 = vadd.f32 %v5641_v55, %v5554_v5  ;;  %v13279_v30 = vpop.f32.mrb[109].mxu1  ;;  %v13361_v46 = vpop.f32.mrb[77].mxu0  ;;  %14809 = vmatpush3.bf16.msra.mxu1 %v15525_v20 }
 0x84b   : > { %v13280_v18 = vadd.f32 %v13279_v30, %v13278_v12  ;;  %v13362_v9 = vadd.f32 %v13361_v46, %v13360_v40  ;;  %v13281_v32 = vpop.f32.mrb[110].mxu1  ;;  %v13363_v1 = vpop.f32.mrb[78].mxu0  ;;  %v5841_v45 = vmax.f32 %v5777_v24, %v5809_v50 }
 0x84c   : > { %v5810_v58 = vmul.f32 0.2, %v5778_v6  ;;  %v13282_v31 = vpop.f32.mrb[111].mxu1  ;;  %v13364_v0 = vpop.f32.mrb[79].mxu0 }
 0x84d   : > { %v18573_v23 = vadd.f32 %v13280_v18, %v18253_v28  ;;  %v5555_v42 = vadd.f32 %v13362_v9, %v18508_v4  ;;  %v13283_v13 = vadd.f32 %v13282_v31, %v13281_v32  ;;  %v13365_v44 = vadd.f32 %v13364_v0, %v13363_v1  ;;  %v5661_v32 = vpop.permute.xlu1 %5660 }
 0x84e   : > { %v5842_v47 = vmax.f32 %v5778_v6, %v5810_v58  ;;  %v5656_v6 = vpop.permute.xlu0 %5655 }
 0x84f   : > { %v5779_v2 = vadd.f32 %v5646_v60, %v5555_v42  ;;  %v18577_v20 = vadd.f32 %v13283_v13, %v18256_v10  ;;  %v5556_v25 = vadd.f32 %v13365_v44, %v18511_v57 }
 0x850   : > { %v18580_v16 = vpack.c.bf16 %v5842_v47, %v5841_v45 }
 0x851   : > { %v5811_v33 = vmul.f32 0.2, %v5779_v2  ;;  %v5780_v27 = vadd.f32 %v5651_v56, %v5556_v25  ;;  %v13284_v28 = vpop.f32.mrb[112].mxu1  ;;  %v13366_v7 = vpop.f32.mrb[80].mxu0 }
 0x852   : > { %14780 = vmatprep.mubr.msk.bf16.mxu1 %vm5893_vm2, %v18580_v16  ;;  %v13285_v4 = vpop.f32.mrb[113].mxu1  ;;  %v13367_v26 = vpop.f32.mrb[81].mxu0 }
 0x853   : > { %v5812_v38 = vmul.f32 0.2, %v5780_v27  ;;  %v13286_v19 = vadd.f32 %v13285_v4, %v13284_v28  ;;  %v13368_v36 = vadd.f32 %v13367_v26, %v13366_v7  ;;  %v13287_v37 = vpop.f32.mrb[114].mxu1  ;;  %v13369_v10 = vpop.f32.mrb[82].mxu0  ;;  %v5843_v24 = vmax.f32 %v5779_v2, %v5811_v33 }
 0x854   : > { %v13288_v55 = vpop.f32.mrb[115].mxu1  ;;  %v13370_v57 = vpop.f32.mrb[83].mxu0 }
 0x855   : > { %v5844_v5 = vmax.f32 %v5780_v27, %v5812_v38  ;;  %v18585_v12 = vadd.f32 %v13286_v19, %v18259_v62  ;;  %v5557_v40 = vadd.f32 %v13368_v36, %v18514_v49  ;;  %v13289_v50 = vadd.f32 %v13288_v55, %v13287_v37  ;;  %v5666_v27 = vpop.permute.xlu0 %5665  ;;  %v5671_v19 = vpop.permute.xlu1 %5670 }
 0x856   : > { %v13371_v30 = vadd.f32 %v13370_v57, %v13369_v10 }
 0x857   : > { %v18588_v46 = vpack.c.bf16 %v5844_v5, %v5843_v24  ;;  %v5781_v18 = vadd.f32 %v5656_v6, %v5557_v40  ;;  %v18591_v9 = vadd.f32 %v13289_v50, %v18262_v39 }
 0x858   : > { %v5558_v1 = vadd.f32 %v13371_v30, %v18517_v11 }
 0x859   : > { %v13290_v58 = vpop.f32.mrb[116].mxu1  ;;  %v13372_v31 = vpop.f32.mrb[84].mxu0  ;;  %14781 = vmatmul.mubr.msk.bf16.gmra.mrb[132].mxu1 %vm5893_vm2, %v18588_v46  ;;  %v5813_v62 = vmul.f32 0.2, %v5781_v18 }
 0x85a   : > { %v5782_v0 = vadd.f32 %v5661_v32, %v5558_v1  ;;  %v13291_v49 = vpop.f32.mrb[117].mxu1  ;;  %v13373_v42 = vpop.f32.mrb[85].mxu0 }
 0x85b   : > { %v13292_v13 = vadd.f32 %v13291_v49, %v13290_v58  ;;  %v13374_v44 = vadd.f32 %v13373_v42, %v13372_v31  ;;  %v13293_v60 = vpop.f32.mrb[118].mxu1  ;;  %v13375_v45 = vpop.f32.mrb[86].mxu0  ;;  %v5845_v28 = vmax.f32 %v5781_v18, %v5813_v62 }
 0x85c   : > { %v5814_v47 = vmul.f32 0.2, %v5782_v0  ;;  %v13294_v2 = vpop.f32.mrb[119].mxu1  ;;  %v13376_v39 = vpop.f32.mrb[87].mxu0 }
 0x85d   : > { %v18597_v25 = vadd.f32 %v13292_v13, %v18265_v3  ;;  %v5559_v11 = vadd.f32 %v13374_v44, %v18520_v17  ;;  %v13295_v56 = vadd.f32 %v13294_v2, %v13293_v60  ;;  %v13377_v33 = vadd.f32 %v13376_v39, %v13375_v45  ;;  %v5676_v31 = vpop.permute.xlu0 %5675  ;;  %v5681_v13 = vpop.permute.xlu1 %5680 }
 0x85e   : > { %v5846_v7 = vmax.f32 %v5782_v0, %v5814_v47 }
 0x85f   : > { %v5783_v4 = vadd.f32 %v5666_v27, %v5559_v11  ;;  %v18601_v26 = vadd.f32 %v13295_v56, %v18268_v53  ;;  %v5560_v38 = vadd.f32 %v13377_v33, %v18523_v21 }
 0x860   : > { %v18604_v36 = vpack.c.bf16 %v5846_v7, %v5845_v28 }
 0x861   : > { %v5815_v37 = vmul.f32 0.2, %v5783_v4  ;;  %v5784_v10 = vadd.f32 %v5671_v19, %v5560_v38  ;;  %v13296_v3 = vpop.f32.mrb[120].mxu1  ;;  %v13378_v24 = vpop.f32.mrb[88].mxu0 }
 0x862   : > { %14784 = vmatprep.mubr.msk.bf16.mxu1 %vm5893_vm2, %v18604_v36  ;;  %v13297_v17 = vpop.f32.mrb[121].mxu1  ;;  %v13379_v55 = vpop.f32.mrb[89].mxu0 }
 0x863   : > { %v5816_v57 = vmul.f32 0.2, %v5784_v10  ;;  %v13298_v5 = vadd.f32 %v13297_v17, %v13296_v3  ;;  %v13380_v40 = vadd.f32 %v13379_v55, %v13378_v24  ;;  %v13299_v50 = vpop.f32.mrb[122].mxu1  ;;  %v13381_v53 = vpop.f32.mrb[90].mxu0  ;;  %v5847_v6 = vmax.f32 %v5783_v4, %v5815_v37 }
 0x864   : > { %v13300_v30 = vpop.f32.mrb[123].mxu1  ;;  %v13382_v21 = vpop.f32.mrb[91].mxu0 }
 0x865   : > { %v5848_v18 = vmax.f32 %v5784_v10, %v5816_v57  ;;  %v18609_v32 = vadd.f32 %v13298_v5, %v18271_v22  ;;  %v5561_v1 = vadd.f32 %v13380_v40, %v18526_v63  ;;  %v13301_v58 = vadd.f32 %v13300_v30, %v13299_v50  ;;  %v5686_v19 = vpop.permute.xlu0 %5685  ;;  %v5691_v55 = vpop.permute.xlu1 %5690 }
 0x866   : > { %v13383_v62 = vadd.f32 %v13382_v21, %v13381_v53 }
 0x867   : > { %v18612_v0 = vpack.c.bf16 %v5848_v18, %v5847_v6  ;;  %v5785_v49 = vadd.f32 %v5676_v31, %v5561_v1  ;;  %v18615_v42 = vadd.f32 %v13301_v58, %v18274_v41 }
 0x868   : > { %v5562_v44 = vadd.f32 %v13383_v62, %v18529_v52 }
 0x869   : > { %v13302_v60 = vpop.f32.mrb[124].mxu1  ;;  %v13384_v45 = vpop.f32.mrb[92].mxu0  ;;  %14785 = vmatmul.mubr.msk.bf16.gmra.mrb[136].mxu1 %vm5893_vm2, %v18612_v0  ;;  %v5817_v22 = vmul.f32 0.2, %v5785_v49 }
 0x86a   : > { %v5786_v47 = vadd.f32 %v5681_v13, %v5562_v44  ;;  %v13303_v63 = vpop.f32.mrb[125].mxu1  ;;  %v13385_v2 = vpop.f32.mrb[93].mxu0 }
 0x86b   : > { %v13304_v39 = vadd.f32 %v13303_v63, %v13302_v60  ;;  %v13386_v11 = vadd.f32 %v13385_v2, %v13384_v45  ;;  %v13305_v56 = vpop.f32.mrb[126].mxu1  ;;  %v13387_v33 = vpop.f32.mrb[94].mxu0  ;;  %v5849_v37 = vmax.f32 %v5785_v49, %v5817_v22 }
 0x86c   : > { %v5818_v27 = vmul.f32 0.2, %v5786_v47  ;;  %v13306_v28 = vpop.f32.mrb[127].mxu1  ;;  %v13388_v41 = vpop.f32.mrb[95].mxu0 }
 0x86d   : > { %v18621_v7 = vadd.f32 %v13304_v39, %v18277_v15  ;;  %v5563_v52 = vadd.f32 %v13386_v11, %v18532_v29  ;;  %v13307_v4 = vadd.f32 %v13306_v28, %v13305_v56  ;;  %v13389_v38 = vadd.f32 %v13388_v41, %v13387_v33  ;;  %v5701_v49 = vpop.permute.xlu1 %5700 }
 0x86e   : > { %v5850_v10 = vmax.f32 %v5786_v47, %v5818_v27 }
 0x86f   : > { %v5787_v3 = vadd.f32 %v5686_v19, %v5563_v52  ;;  %v18625_v24 = vadd.f32 %v13307_v4, %v18280_v35  ;;  %v5564_v17 = vadd.f32 %v13389_v38, %v18535_v14  ;;  %v5696_v14 = vpop.permute.xlu0 %5695 }
 0x870   : > { %v18628_v57 = vpack.c.bf16 %v5850_v10, %v5849_v37 }
 0x871   : > { %v5819_v5 = vmul.f32 0.2, %v5787_v3  ;;  %v5788_v40 = vadd.f32 %v5691_v55, %v5564_v17  ;;  %v13390_v15 = vpop.f32.mrb[96].mxu0  ;;  %v5711_v41 = vpop.permute.xlu1 %5710 }
 0x872   : > { %14788 = vmatprep.mubr.msk.bf16.mxu1 %vm5893_vm2, %v18628_v57  ;;  %v13391_v29 = vpop.f32.mrb[97].mxu0 }
 0x873   : > { %v5820_v50 = vmul.f32 0.2, %v5788_v40  ;;  %v13392_v53 = vadd.f32 %v13391_v29, %v13390_v15  ;;  %v13393_v6 = vpop.f32.mrb[98].mxu0  ;;  %v5851_v21 = vmax.f32 %v5787_v3, %v5819_v5  ;;  %v5706_v33 = vpop.permute.xlu0 %5705 }
 0x874   : > { %v13394_v30 = vpop.f32.mrb[99].mxu0 }
 0x875   : > { %v5852_v18 = vmax.f32 %v5788_v40, %v5820_v50  ;;  %v5565_v35 = vadd.f32 %v13392_v53, %v18538_v34  ;;  %v13395_v1 = vadd.f32 %v13394_v30, %v13393_v6  ;;  %v5721_v53 = vpop.permute.xlu1 %5720 }
 0x877   : > { %v18633_v58 = vpack.c.bf16 %v5852_v18, %v5851_v21  ;;  %v5789_v31 = vadd.f32 %v5696_v14, %v5565_v35  ;;  %v5566_v62 = vadd.f32 %v13395_v1, %v18542_v59 }
 0x879   : > { %v5821_v13 = vmul.f32 0.2, %v5789_v31  ;;  %v5790_v44 = vadd.f32 %v5701_v49, %v5566_v62  ;;  %v13396_v60 = vpop.f32.mrb[100].mxu0  ;;  %14789 = vmatmul.mubr.msk.bf16.gmra.mrb[140].mxu1 %vm5893_vm2, %v18633_v58 }
 0x87a   : > { %v13397_v45 = vpop.f32.mrb[101].mxu0 }
 0x87b   : > { %v5822_v22 = vmul.f32 0.2, %v5790_v44  ;;  %v13398_v47 = vadd.f32 %v13397_v45, %v13396_v60  ;;  %v13399_v63 = vpop.f32.mrb[102].mxu0  ;;  %v5853_v11 = vmax.f32 %v5789_v31, %v5821_v13 }
 0x87c   : > { %v13400_v2 = vpop.f32.mrb[103].mxu0 }
 0x87d   : > { %v5567_v34 = vadd.f32 %v13398_v47, %v18549_v8  ;;  %v13401_v39 = vadd.f32 %v13400_v2, %v13399_v63  ;;  %v5854_v56 = vmax.f32 %v5790_v44, %v5822_v22  ;;  %v5731_v22 = vpop.permute.xlu1 %5730 }
 0x87f   : > { %v5791_v27 = vadd.f32 %v5706_v33, %v5567_v34  ;;  %v5568_v59 = vadd.f32 %v13401_v39, %v18553_v51  ;;  %v18640_v28 = vpack.c.bf16 %v5854_v56, %v5853_v11  ;;  %v5716_v51 = vpop.permute.xlu0 %5715 }
 0x881   : > { %v5823_v52 = vmul.f32 0.2, %v5791_v27  ;;  %v5792_v4 = vadd.f32 %v5711_v41, %v5568_v59  ;;  %v13402_v38 = vpop.f32.mrb[104].mxu0  ;;  %14792 = vmatprep.mubr.msk.bf16.mxu1 %vm5893_vm2, %v18640_v28 }
 0x882   : > { %v13403_v19 = vpop.f32.mrb[105].mxu0 }
 0x883   : > { %v5824_v37 = vmul.f32 0.2, %v5792_v4  ;;  %v13404_v10 = vadd.f32 %v13403_v19, %v13402_v38  ;;  %v13405_v8 = vpop.f32.mrb[106].mxu0  ;;  %v5855_v17 = vmax.f32 %v5791_v27, %v5823_v52  ;;  %v5726_v44 = vpop.permute.xlu0 %5725 }
 0x884   : > { %v13406_v3 = vpop.f32.mrb[107].mxu0  ;;  %v5741_v19 = vpop.permute.xlu1 %5740 }
 0x885   : > { %v5856_v55 = vmax.f32 %v5792_v4, %v5824_v37  ;;  %v5569_v5 = vadd.f32 %v13404_v10, %v18561_v48  ;;  %v13407_v40 = vadd.f32 %v13406_v3, %v13405_v8 }
 0x887   : > { %v18645_v15 = vpack.c.bf16 %v5856_v55, %v5855_v17  ;;  %v5793_v29 = vadd.f32 %v5716_v51, %v5569_v5  ;;  %v5570_v50 = vadd.f32 %v13407_v40, %v18567_v54 }
 0x889   : > { %v5825_v6 = vmul.f32 0.2, %v5793_v29  ;;  %v5794_v30 = vadd.f32 %v5721_v53, %v5570_v50  ;;  %v13408_v21 = vpop.f32.mrb[108].mxu0  ;;  %14793 = vmatmul.mubr.msk.bf16.gmra.mrb[144].mxu1 %vm5893_vm2, %v18645_v15 }
 0x88a   : > { %v13409_v18 = vpop.f32.mrb[109].mxu0 }
 0x88b   : > { %v5826_v35 = vmul.f32 0.2, %v5794_v30  ;;  %v13410_v1 = vadd.f32 %v13409_v18, %v13408_v21  ;;  %v13411_v14 = vpop.f32.mrb[110].mxu0  ;;  %v5857_v49 = vmax.f32 %v5793_v29, %v5825_v6  ;;  %v5751_v21 = vpop.permute.xlu1 %5750 }
 0x88c   : > { %v13412_v31 = vpop.f32.mrb[111].mxu0 }
 0x88d   : > { %v5571_v48 = vadd.f32 %v13410_v1, %v18573_v23  ;;  %v13413_v62 = vadd.f32 %v13412_v31, %v13411_v14  ;;  %v5858_v13 = vmax.f32 %v5794_v30, %v5826_v35 }
 0x88f   : > { %v5795_v60 = vadd.f32 %v5726_v44, %v5571_v48  ;;  %v5572_v54 = vadd.f32 %v13413_v62, %v18577_v20  ;;  %v18652_v45 = vpack.c.bf16 %v5858_v13, %v5857_v49  ;;  %v5736_v20 = vpop.permute.xlu0 %5735 }
 0x891   : > { %v5827_v47 = vmul.f32 0.2, %v5795_v60  ;;  %v5796_v63 = vadd.f32 %v5731_v22, %v5572_v54  ;;  %v13414_v2 = vpop.f32.mrb[112].mxu0  ;;  %14796 = vmatprep.mubr.msk.bf16.mxu1 %vm5893_vm2, %v18652_v45 }
 0x892   : > { %v13415_v34 = vpop.f32.mrb[113].mxu0 }
 0x893   : > { %v5828_v39 = vmul.f32 0.2, %v5796_v63  ;;  %v13416_v11 = vadd.f32 %v13415_v34, %v13414_v2  ;;  %v13417_v23 = vpop.f32.mrb[114].mxu0  ;;  %v5859_v33 = vmax.f32 %v5795_v60, %v5827_v47  ;;  %v5746_v53 = vpop.permute.xlu0 %5745 }
 0x894   : > { %v13418_v56 = vpop.f32.mrb[115].mxu0 }
 0x895   : > { %v5860_v27 = vmax.f32 %v5796_v63, %v5828_v39  ;;  %v5573_v59 = vadd.f32 %v13416_v11, %v18585_v12  ;;  %v13419_v41 = vadd.f32 %v13418_v56, %v13417_v23  ;;  %v5761_v63 = vpop.permute.xlu1 %5760 }
 0x897   : > { %v18657_v52 = vpack.c.bf16 %v5860_v27, %v5859_v33  ;;  %v5797_v4 = vadd.f32 %v5736_v20, %v5573_v59  ;;  %v5574_v38 = vadd.f32 %v13419_v41, %v18591_v9 }
 0x899   : > { %v5829_v37 = vmul.f32 0.2, %v5797_v4  ;;  %v5798_v10 = vadd.f32 %v5741_v19, %v5574_v38  ;;  %v13420_v8 = vpop.f32.mrb[116].mxu0  ;;  %14797 = vmatmul.mubr.msk.bf16.gmra.mrb[148].mxu1 %vm5893_vm2, %v18657_v52 }
 0x89a   : > { %v13421_v3 = vpop.f32.mrb[117].mxu0 }
 0x89b   : > { %v5830_v17 = vmul.f32 0.2, %v5798_v10  ;;  %v13422_v55 = vadd.f32 %v13421_v3, %v13420_v8  ;;  %v13423_v5 = vpop.f32.mrb[118].mxu0  ;;  %v5861_v29 = vmax.f32 %v5797_v4, %v5829_v37  ;;  %v5771_v37 = vpop.permute.xlu1 %5770 }
 0x89c   : > { %v13424_v40 = vpop.f32.mrb[119].mxu0 }
 0x89d   : > { %v5575_v12 = vadd.f32 %v13422_v55, %v18597_v25  ;;  %v13425_v51 = vadd.f32 %v13424_v40, %v13423_v5  ;;  %v5862_v50 = vmax.f32 %v5798_v10, %v5830_v17 }
 0x89f   : > { %v5799_v6 = vadd.f32 %v5746_v53, %v5575_v12  ;;  %v5576_v9 = vadd.f32 %v13425_v51, %v18601_v26  ;;  %v18664_v30 = vpack.c.bf16 %v5862_v50, %v5861_v29  ;;  %v5756_v26 = vpop.permute.xlu0 %5755 }
 0x8a1   : > { %v5831_v18 = vmul.f32 0.2, %v5799_v6  ;;  %v5800_v35 = vadd.f32 %v5751_v21, %v5576_v9  ;;  %v13426_v1 = vpop.f32.mrb[120].mxu0  ;;  %14800 = vmatprep.mubr.msk.bf16.mxu1 %vm5893_vm2, %v18664_v30 }
 0x8a2   : > { %v13427_v14 = vpop.f32.mrb[121].mxu0 }
 0x8a3   : > { %v5832_v31 = vmul.f32 0.2, %v5800_v35  ;;  %v13428_v48 = vadd.f32 %v13427_v14, %v13426_v1  ;;  %v13429_v25 = vpop.f32.mrb[122].mxu0  ;;  %v5863_v49 = vmax.f32 %v5799_v6, %v5831_v18  ;;  %v5766_v4 = vpop.permute.xlu0 %5765 }
 0x8a4   : > { %v13430_v62 = vpop.f32.mrb[123].mxu0 }
 0x8a5   : > { %v5864_v13 = vmax.f32 %v5800_v35, %v5832_v31  ;;  %v5577_v44 = vadd.f32 %v13428_v48, %v18609_v32  ;;  %v13431_v60 = vadd.f32 %v13430_v62, %v13429_v25 }
 0x8a7   : > { %v18669_v54 = vpack.c.bf16 %v5864_v13, %v5863_v49  ;;  %v5801_v22 = vadd.f32 %v5756_v26, %v5577_v44  ;;  %v5578_v47 = vadd.f32 %v13431_v60, %v18615_v42 }
 0x8a9   : > { %v5833_v2 = vmul.f32 0.2, %v5801_v22  ;;  %v5802_v34 = vadd.f32 %v5761_v63, %v5578_v47  ;;  %v13432_v39 = vpop.f32.mrb[124].mxu0  ;;  %14801 = vmatmul.mubr.msk.bf16.gmra.mrb[152].mxu1 %vm5893_vm2, %v18669_v54  ;;  %v15531_v47 = vld [vmem:[#allocation2 + $0x4] ss:$8 sps:$4 sm:$0xff]  }
 0x8aa   : > { %v13433_v11 = vpop.f32.mrb[125].mxu0 }
 0x8ab   : > { %v5834_v23 = vmul.f32 0.2, %v5802_v34  ;;  %v13434_v56 = vadd.f32 %v13433_v11, %v13432_v39  ;;  %v13435_v33 = vpop.f32.mrb[126].mxu0  ;;  %v5865_v41 = vmax.f32 %v5801_v22, %v5833_v2  ;;  %v15528_v22 = vld [vmem:[#allocation2 + $0x104] ss:$8 sps:$4 sm:$0xff]  }
 0x8ac   : > { %v13436_v27 = vpop.f32.mrb[127].mxu0  ;;  %6562 = vmatprep.mubr.bf16.mxu0 %v15528_v22  ;;  %v15549_v22 = vld [vmem:[#allocation2 + $0x34] ss:$8 sps:$4 sm:$0xff]  }
 0x8ad   : > { %v5579_v32 = vadd.f32 %v13434_v56, %v18621_v7  ;;  %v13437_v59 = vadd.f32 %v13436_v27, %v13435_v33  ;;  %v5866_v20 = vmax.f32 %v5802_v34, %v5834_v23 }
 0x8af   : > { %v5803_v38 = vadd.f32 %v5766_v4, %v5579_v32  ;;  %v5580_v42 = vadd.f32 %v13437_v59, %v18625_v24  ;;  %v18676_v19 = vpack.c.bf16 %v5866_v20, %v5865_v41 }
 0x8b1   : > { %v5835_v10 = vmul.f32 0.2, %v5803_v38  ;;  %v5804_v8 = vadd.f32 %v5771_v37, %v5580_v42  ;;  %14804 = vmatprep.mubr.msk.bf16.mxu1 %vm5893_vm2, %v18676_v19 }
 0x8b3   : > { %v5836_v3 = vmul.f32 0.2, %v5804_v8  ;;  %v5867_v17 = vmax.f32 %v5803_v38, %v5835_v10 }
 0x8b5   : > { %v5868_v55 = vmax.f32 %v5804_v8, %v5836_v3 }
 0x8b7   : > { %v18680_v5 = vpack.c.bf16 %v5868_v55, %v5867_v17 }
 0x8b9   : > { %14805 = vmatmul.mubr.msk.bf16.gmra.mrb[156].mxu1 %vm5893_vm2, %v18680_v5 }
 0x8ba   : > { %14810 = vmatprep.mubr.msk.bf16.mxu1 %vm5893_vm2, %v18556_v43 }
 0x8c1   : > { %14811 = vmatmul.mubr.msk.bf16.vlgmr.msra.gmra.mrb[160].mxu1 %vm5893_vm2, %v18564_v61 }
 0x8c2   : > { %14814 = vmatprep.mubr.msk.bf16.mxu1 %vm5893_vm2, %v18580_v16 }
 0x8c9   : > { %14815 = vmatmul.mubr.msk.bf16.gmra.mrb[164].mxu1 %vm5893_vm2, %v18588_v46 }
 0x8ca   : > { %14818 = vmatprep.mubr.msk.bf16.mxu1 %vm5893_vm2, %v18604_v36 }
 0x8d1   : > { %14819 = vmatmul.mubr.msk.bf16.gmra.mrb[168].mxu1 %vm5893_vm2, %v18612_v0 }
 0x8d2   : > { %14822 = vmatprep.mubr.msk.bf16.mxu1 %vm5893_vm2, %v18628_v57 }
 0x8d9   : > { %14823 = vmatmul.mubr.msk.bf16.gmra.mrb[172].mxu1 %vm5893_vm2, %v18633_v58 }
 0x8da   : > { %14826 = vmatprep.mubr.msk.bf16.mxu1 %vm5893_vm2, %v18640_v28 }
 0x8e1   : > { %14827 = vmatmul.mubr.msk.bf16.gmra.mrb[176].mxu1 %vm5893_vm2, %v18645_v15 }
 0x8e2   : > { %14830 = vmatprep.mubr.msk.bf16.mxu1 %vm5893_vm2, %v18652_v45 }
 0x8e9   : > { %14831 = vmatmul.mubr.msk.bf16.gmra.mrb[180].mxu1 %vm5893_vm2, %v18657_v52 }
 0x8ea   : > { %14834 = vmatprep.mubr.msk.bf16.mxu1 %vm5893_vm2, %v18664_v30 }
 0x8f1   : > { %14835 = vmatmul.mubr.msk.bf16.gmra.mrb[184].mxu1 %vm5893_vm2, %v18669_v54 }
 0x8f2   : > { %14838 = vmatprep.mubr.msk.bf16.mxu1 %vm5893_vm2, %v18676_v19 }
 0x8f9   : > { %14839 = vmatmul.mubr.msk.bf16.gmra.mrb[188].mxu1 %vm5893_vm2, %v18680_v5 }
 0x8fa   : > { %6883 = vmatprep.mubr.bf16.mxu1 %v15531_v47 }
 0x91c   : > { %v14778_v7 = vpop.f32.mrb[128].mxu1 }
 0x91d   : > { %v5976_v24 = vpop.f32.mrb[129].mxu1 }
 0x91e   : > { %v14779_v40 = vpop.f32.mrb[130].mxu1 }
 0x91f   : > { %v6136_v12 = vpack.c.bf16 %v14779_v40, %v14778_v7  ;;  %v5979_v51 = vpop.f32.mrb[131].mxu1 }
 0x920   : > { %v6135_v29 = vpack.c.bf16 %v5979_v51, %v5976_v24 }
 0x92c   : > { %v14782_v50 = vpop.f32.mrb[132].mxu1 }
 0x92d   : > { %v5992_v53 = vpop.f32.mrb[133].mxu1 }
 0x92e   : > { %v14783_v6 = vpop.f32.mrb[134].mxu1 }
 0x92f   : > { %v6138_v9 = vpack.c.bf16 %v14783_v6, %v14782_v50  ;;  %v5995_v21 = vpop.f32.mrb[135].mxu1  ;;  %v15537_v6 = vld [vmem:[#allocation2 + $0x14] ss:$8 sps:$4 sm:$0xff]  }
 0x930   : > { %v6137_v18 = vpack.c.bf16 %v5995_v21, %v5992_v53 }
 0x93c   : > { %v14786_v35 = vpop.f32.mrb[136].mxu1 }
 0x93d   : > { %v6008_v1 = vpop.f32.mrb[137].mxu1 }
 0x93e   : > { %v14787_v14 = vpop.f32.mrb[138].mxu1 }
 0x93f   : > { %v6140_v31 = vpack.c.bf16 %v14787_v14, %v14786_v35  ;;  %v6011_v48 = vpop.f32.mrb[139].mxu1 }
 0x940   : > { %v6139_v25 = vpack.c.bf16 %v6011_v48, %v6008_v1  ;;  %v15535_v1 = vld [vmem:[#allocation2 + $0x10] ss:$8 sps:$4 sm:$0xff]   ;;  %v15543_v48 = vld [vmem:[#allocation2 + $0x24] ss:$8 sps:$4 sm:$0xff]  }
 0x94c   : > { %v14790_v62 = vpop.f32.mrb[140].mxu1 }
 0x94d   : > { %v6024_v49 = vpop.f32.mrb[141].mxu1 }
 0x94e   : > { %v14791_v13 = vpop.f32.mrb[142].mxu1 }
 0x94f   : > { %v6142_v44 = vpack.c.bf16 %v14791_v13, %v14790_v62  ;;  %v6027_v60 = vpop.f32.mrb[143].mxu1 }
 0x950   : > { %v6141_v26 = vpack.c.bf16 %v6027_v60, %v6024_v49 }
 0x95c   : > { %v14794_v63 = vpop.f32.mrb[144].mxu1 }
 0x95d   : > { %v6040_v2 = vpop.f32.mrb[145].mxu1 }
 0x95e   : > { %v14795_v34 = vpop.f32.mrb[146].mxu1 }
 0x95f   : > { %v6144_v39 = vpack.c.bf16 %v14795_v34, %v14794_v63  ;;  %v6043_v11 = vpop.f32.mrb[147].mxu1 }
 0x960   : > { %v6143_v23 = vpack.c.bf16 %v6043_v11, %v6040_v2 }
 0x962   : > { %13584 = vmatprep.subr.bf16.mxu1 %v6143_v23 }
 0x963   : > { %13585 = vmatpush3.bf16.msra.mxu1 %v6135_v29  ;;  %v15529_v29 = vld [vmem:[#allocation2] ss:$8 sps:$4 sm:$0xff]  }
 0x964   : > { %13586 = vmatprep.subr.bf16.mxu1 %v6144_v39  ;;  %v15547_v39 = vld [vmem:[#allocation2 + $0x30] ss:$8 sps:$4 sm:$0xff]  }
 0x967   : > { %13587 = vmatpush3.bf16.msra.mxu1 %v6136_v12 }
 0x96c   : > { %v14798_v56 = vpop.f32.mrb[148].mxu1 }
 0x96d   : > { %v6056_v33 = vpop.f32.mrb[149].mxu1 }
 0x96e   : > { %v14799_v27 = vpop.f32.mrb[150].mxu1 }
 0x96f   : > { %v6146_v32 = vpack.c.bf16 %v14799_v27, %v14798_v56  ;;  %v6059_v59 = vpop.f32.mrb[151].mxu1  ;;  %v15555_v56 = vld [vmem:[#allocation2 + $0x44] ss:$8 sps:$4 sm:$0xff]  }
 0x970   : > { %v6145_v41 = vpack.c.bf16 %v6059_v59, %v6056_v33 }
 0x972   : > { %13588 = vmatprep.subr.bf16.mxu1 %v6145_v41  ;;  %v15553_v41 = vld [vmem:[#allocation2 + $0x40] ss:$8 sps:$4 sm:$0xff]  }
 0x973   : > { %13589 = vmatpush3.bf16.msra.mxu1 %v6137_v18 }
 0x974   : > { %13590 = vmatprep.subr.bf16.mxu1 %v6146_v32 }
 0x977   : > { %13591 = vmatpush3.bf16.msra.mxu1 %v6138_v9 }
 0x97c   : > { %v14802_v20 = vpop.f32.mrb[152].mxu1 }
 0x97d   : > { %v6072_v4 = vpop.f32.mrb[153].mxu1 }
 0x97e   : > { %v14803_v38 = vpop.f32.mrb[154].mxu1 }
 0x97f   : > { %v6148_v42 = vpack.c.bf16 %v14803_v38, %v14802_v20  ;;  %v6075_v37 = vpop.f32.mrb[155].mxu1  ;;  %v15561_v38 = vld [vmem:[#allocation2 + $0x54] ss:$8 sps:$4 sm:$0xff]  }
 0x980   : > { %v6147_v10 = vpack.c.bf16 %v6075_v37, %v6072_v4 }
 0x982   : > { %13592 = vmatprep.subr.bf16.mxu1 %v6147_v10 }
 0x983   : > { %13593 = vmatpush3.bf16.msra.mxu1 %v6139_v25 }
 0x984   : > { %13594 = vmatprep.subr.bf16.mxu1 %v6148_v42 }
 0x987   : > { %13595 = vmatpush3.bf16.msra.mxu1 %v6140_v31 }
 0x98c   : > { %v14806_v8 = vpop.f32.mrb[156].mxu1 }
 0x98d   : > { %v6088_v3 = vpop.f32.mrb[157].mxu1 }
 0x98e   : > { %v14807_v17 = vpop.f32.mrb[158].mxu1 }
 0x98f   : > { %v6150_v55 = vpack.c.bf16 %v14807_v17, %v14806_v8  ;;  %v6091_v7 = vpop.f32.mrb[159].mxu1 }
 0x990   : > { %v6149_v24 = vpack.c.bf16 %v6091_v7, %v6088_v3  ;;  %v15559_v3 = vld [vmem:[#allocation2 + $0x50] ss:$8 sps:$4 sm:$0xff]   ;;  %v15567_v7 = vld [vmem:[#allocation2 + $0x64] ss:$8 sps:$4 sm:$0xff]  }
 0x992   : > { %13596 = vmatprep.subr.bf16.mxu1 %v6149_v24 }
 0x993   : > { %13597 = vmatpush3.bf16.msra.mxu1 %v6141_v26 }
 0x994   : > { %v14812_v40 = vpop.f32.mrb[160].mxu1  ;;  %13598 = vmatprep.subr.bf16.mxu1 %v6150_v55 }
 0x995   : > { %v6194_v12 = vpop.f32.mrb[161].mxu1 }
 0x996   : > { %v14813_v51 = vpop.f32.mrb[162].mxu1 }
 0x997   : > { %v6355_v50 = vpack.c.bf16 %v14813_v51, %v14812_v40  ;;  %v6197_v53 = vpop.f32.mrb[163].mxu1  ;;  %13599 = vmatpush3.bf16.msra.mxu1 %v6142_v44  ;;  %v15541_v44 = vld [vmem:[#allocation2 + $0x20] ss:$8 sps:$4 sm:$0xff]  }
 0x998   : > { %v6354_v9 = vpack.c.bf16 %v6197_v53, %v6194_v12 }
 0x99a   : > { %6884 = vmatmul.mubr.bf16.vlgmr.msra.gmra.mrb[192].mxu1 %v15529_v29  ;;  %v15565_v29 = vld [vmem:[#allocation2 + $0x60] ss:$8 sps:$4 sm:$0xff]  }
 0x99b   : > { %6891 = vmatprep.mubr.bf16.mxu1 %v15537_v6 }
 0x99c   : > { %v18716_v21 = vpop.f32.mrb[164].mxu1 }
 0x99d   : > { %v6210_v18 = vpop.f32.mrb[165].mxu1 }
 0x99e   : > { %v14817_v35 = vpop.f32.mrb[166].mxu1 }
 0x99f   : > { %v6357_v14 = vpack.c.bf16 %v14817_v35, %v18716_v21  ;;  %v6213_v31 = vpop.f32.mrb[167].mxu1 }
 0x9a0   : > { %v6356_v25 = vpack.c.bf16 %v6213_v31, %v6210_v18 }
 0x9a2   : > { %6892 = vmatmul.mubr.bf16.gmra.mrb[196].mxu1 %v15535_v1  ;;  %v15571_v1 = vld [vmem:[#allocation2 + $0x70] ss:$8 sps:$4 sm:$0xff]  }
 0x9a3   : > { %6899 = vmatprep.mubr.bf16.mxu1 %v15543_v48 }
 0x9a4   : > { %v18719_v62 = vpop.f32.mrb[168].mxu1 }
 0x9a5   : > { %v6226_v49 = vpop.f32.mrb[169].mxu1 }
 0x9a6   : > { %v18721_v13 = vpop.f32.mrb[170].mxu1 }
 0x9a7   : > { %v6359_v60 = vpack.c.bf16 %v18721_v13, %v18719_v62  ;;  %v6229_v26 = vpop.f32.mrb[171].mxu1  ;;  %v15577_v13 = vld [vmem:[#allocation2 + $0x80] ss:$8 sps:$4 sm:$0xff]  }
 0x9a8   : > { %v6358_v47 = vpack.c.bf16 %v6229_v26, %v6226_v49  ;;  %v15526_v49 = vld [vmem:[#allocation2 + $0x100] ss:$8 sps:$4 sm:$0xff]   ;;  %v15585_v26 = vld [vmem:[#allocation2 + $0x94] ss:$8 sps:$4 sm:$0xff]  }
 0x9aa   : > { %6900 = vmatmul.mubr.bf16.gmra.mrb[200].mxu1 %v15541_v44  ;;  %v15534_v44 = vld [vmem:[#allocation2 + $0x114] ss:$8 sps:$4 sm:$0xff]  }
 0x9ab   : > { %6907 = vmatprep.mubr.bf16.mxu1 %v15549_v22  ;;  %v15583_v22 = vld [vmem:[#allocation2 + $0x90] ss:$8 sps:$4 sm:$0xff]  }
 0x9ac   : > { %v18725_v63 = vpop.f32.mrb[172].mxu1 }
 0x9ad   : > { %v6242_v2 = vpop.f32.mrb[173].mxu1 }
 0x9ae   : > { %v18727_v34 = vpop.f32.mrb[174].mxu1 }
 0x9af   : > { %v6361_v11 = vpack.c.bf16 %v18727_v34, %v18725_v63  ;;  %v6245_v23 = vpop.f32.mrb[175].mxu1  ;;  %v15546_v63 = vld [vmem:[#allocation2 + $0x134] ss:$8 sps:$4 sm:$0xff]  }
 0x9b0   : > { %v6360_v33 = vpack.c.bf16 %v6245_v23, %v6242_v2  ;;  %v15591_v2 = vld [vmem:[#allocation2 + $0xa4] ss:$8 sps:$4 sm:$0xff]   ;;  %v15589_v23 = vld [vmem:[#allocation2 + $0xa0] ss:$8 sps:$4 sm:$0xff]   ;;  %v15597_v34 = vld [vmem:[#allocation2 + $0xb4] ss:$8 sps:$4 sm:$0xff]  }
 0x9b2   : > { %6908 = vmatmul.mubr.bf16.gmra.mrb[204].mxu1 %v15547_v39  ;;  %v15538_v39 = vld [vmem:[#allocation2 + $0x120] ss:$8 sps:$4 sm:$0xff]  }
 0x9b3   : > { %6915 = vmatprep.mubr.bf16.mxu1 %v15555_v56  ;;  %v15595_v56 = vld [vmem:[#allocation2 + $0xb0] ss:$8 sps:$4 sm:$0xff]  }
 0x9b4   : > { %v14828_v27 = vpop.f32.mrb[176].mxu1 }
 0x9b5   : > { %v6258_v32 = vpop.f32.mrb[177].mxu1 }
 0x9b6   : > { %v14829_v59 = vpop.f32.mrb[178].mxu1 }
 0x9b7   : > { %v6363_v20 = vpack.c.bf16 %v14829_v59, %v14828_v27  ;;  %v6261_v4 = vpop.f32.mrb[179].mxu1  ;;  %v15603_v27 = vld [vmem:[#allocation2 + $0xc4] ss:$8 sps:$4 sm:$0xff]   ;;  %v15601_v59 = vld [vmem:[#allocation2 + $0xc0] ss:$8 sps:$4 sm:$0xff]  }
 0x9b8   : > { %v6362_v42 = vpack.c.bf16 %v6261_v4, %v6258_v32  ;;  %v15550_v32 = vld [vmem:[#allocation2 + $0x140] ss:$8 sps:$4 sm:$0xff]   ;;  %v15556_v4 = vld [vmem:[#allocation2 + $0x150] ss:$8 sps:$4 sm:$0xff]  }
 0x9ba   : > { %13472 = vmatprep.subr.bf16.mxu0 %v6362_v42  ;;  %6916 = vmatmul.mubr.bf16.gmra.mrb[208].mxu1 %v15553_v41  ;;  %v15558_v41 = vld [vmem:[#allocation2 + $0x154] ss:$8 sps:$4 sm:$0xff]   ;;  %v15564_v42 = vld [vmem:[#allocation2 + $0x164] ss:$8 sps:$4 sm:$0xff]  }
 0x9bb   : > { %13473 = vmatpush3.bf16.msra.mxu0 %v6354_v9  ;;  %6923 = vmatprep.mubr.bf16.mxu1 %v15561_v38  ;;  %v15573_v9 = vld [vmem:[#allocation2 + $0x74] ss:$8 sps:$4 sm:$0xff]   ;;  %v15608_v38 = vld [vmem:[#allocation2 + $0xd0] ss:$8 sps:$4 sm:$0xff]  }
 0x9bc   : > { %v14832_v37 = vpop.f32.mrb[180].mxu1  ;;  %13474 = vmatprep.subr.bf16.mxu0 %v6363_v20  ;;  %v15610_v20 = vld [vmem:[#allocation2 + $0xd4] ss:$8 sps:$4 sm:$0xff]  }
 0x9bd   : > { %v6274_v10 = vpop.f32.mrb[181].mxu1 }
 0x9be   : > { %v14833_v8 = vpop.f32.mrb[182].mxu1 }
 0x9bf   : > { %v6365_v17 = vpack.c.bf16 %v14833_v8, %v14832_v37  ;;  %v6277_v55 = vpop.f32.mrb[183].mxu1  ;;  %13475 = vmatpush3.bf16.msra.mxu0 %v6355_v50  ;;  %v15616_v37 = vld [vmem:[#allocation2 + $0xe4] ss:$8 sps:$4 sm:$0xff]   ;;  %v15614_v8 = vld [vmem:[#allocation2 + $0xe0] ss:$8 sps:$4 sm:$0xff]  }
 0x9c0   : > { %v6364_v24 = vpack.c.bf16 %v6277_v55, %v6274_v10  ;;  %v15562_v10 = vld [vmem:[#allocation2 + $0x160] ss:$8 sps:$4 sm:$0xff]   ;;  %v15568_v55 = vld [vmem:[#allocation2 + $0x170] ss:$8 sps:$4 sm:$0xff]  }
 0x9c2   : > { %13476 = vmatprep.subr.bf16.mxu0 %v6364_v24  ;;  %6924 = vmatmul.mubr.bf16.gmra.mrb[212].mxu1 %v15559_v3  ;;  %v15570_v3 = vld [vmem:[#allocation2 + $0x174] ss:$8 sps:$4 sm:$0xff]   ;;  %v15576_v24 = vld [vmem:[#allocation2 + $0x184] ss:$8 sps:$4 sm:$0xff]  }
 0x9c3   : > { %13477 = vmatpush3.bf16.msra.mxu0 %v6356_v25  ;;  %6931 = vmatprep.mubr.bf16.mxu1 %v15567_v7  ;;  %v15579_v25 = vld [vmem:[#allocation2 + $0x84] ss:$8 sps:$4 sm:$0xff]   ;;  %v15620_v7 = vld [vmem:[#allocation2 + $0xf0] ss:$8 sps:$4 sm:$0xff]  }
 0x9c4   : > { %v14836_v40 = vpop.f32.mrb[184].mxu1  ;;  %13478 = vmatprep.subr.bf16.mxu0 %v6365_v17  ;;  %v15622_v17 = vld [vmem:[#allocation2 + $0xf4] ss:$8 sps:$4 sm:$0xff]  }
 0x9c5   : > { %v6290_v12 = vpop.f32.mrb[185].mxu1 }
 0x9c6   : > { %v14837_v51 = vpop.f32.mrb[186].mxu1 }
 0x9c7   : > { %v6367_v53 = vpack.c.bf16 %v14837_v51, %v14836_v40  ;;  %v6293_v6 = vpop.f32.mrb[187].mxu1  ;;  %13479 = vmatpush3.bf16.msra.mxu0 %v6357_v14  ;;  %v15604_v14 = vld [vmem:[%s19751_s8 + $0x10] sm:$0xff]   ;;  %v15623_v40 = vld [vmem:[%s19751_s8 + $0x18] sm:$0xff]  }
 0x9c8   : > { %v6366_v21 = vpack.c.bf16 %v6293_v6, %v6290_v12  ;;  %v15574_v12 = vld [vmem:[#allocation2 + $0x180] ss:$8 sps:$4 sm:$0xff]   ;;  %v15582_v51 = vld [vmem:[#allocation2 + $0x194] ss:$8 sps:$4 sm:$0xff]  }
 0x9c9   : > { %v15586_v6 = vld [vmem:[#allocation2 + $0x1a0] ss:$8 sps:$4 sm:$0xff]  }
 0x9ca   : > { %13480 = vmatprep.subr.bf16.mxu0 %v6366_v21  ;;  %6932 = vmatmul.mubr.bf16.gmra.mrb[216].mxu1 %v15565_v29  ;;  %v15580_v29 = vld [vmem:[#allocation2 + $0x190] ss:$8 sps:$4 sm:$0xff]  }
 0x9cb   : > { %13481 = vmatpush3.bf16.msra.mxu0 %v6358_v47  ;;  %6939 = vmatprep.mubr.bf16.mxu1 %v15573_v9  ;;  %v15540_v47 = vld [vmem:[#allocation2 + $0x124] ss:$8 sps:$4 sm:$0xff]   ;;  %v15594_v9 = vld [vmem:[#allocation2 + $0x1b4] ss:$8 sps:$4 sm:$0xff]   ;;  %v15592_v21 = vld [vmem:[#allocation2 + $0x1b0] ss:$8 sps:$4 sm:$0xff]  }
 0x9cc   : > { %v14840_v50 = vpop.f32.mrb[188].mxu1  ;;  %13482 = vmatprep.subr.bf16.mxu0 %v6367_v53  ;;  %v15588_v53 = vld [vmem:[#allocation2 + $0x1a4] ss:$8 sps:$4 sm:$0xff]  }
 0x9cd   : > { %v6306_v18 = vpop.f32.mrb[189].mxu1 }
 0x9ce   : > { %v14841_v35 = vpop.f32.mrb[190].mxu1 }
 0x9cf   : > { %v6369_v31 = vpack.c.bf16 %v14841_v35, %v14840_v50  ;;  %v6309_v48 = vpop.f32.mrb[191].mxu1  ;;  %13483 = vmatpush3.bf16.msra.mxu0 %v6359_v60  ;;  %v15532_v60 = vld [vmem:[#allocation2 + $0x110] ss:$8 sps:$4 sm:$0xff]   ;;  %v15600_v50 = vld [vmem:[#allocation2 + $0x1c4] ss:$8 sps:$4 sm:$0xff]  }
 0x9d0   : > { %v6368_v62 = vpack.c.bf16 %v6309_v48, %v6306_v18  ;;  %v15598_v18 = vld [vmem:[#allocation2 + $0x1c0] ss:$8 sps:$4 sm:$0xff]   ;;  %v15607_v35 = vld [vmem:[#allocation2 + $0x1d4] ss:$8 sps:$4 sm:$0xff]  }
 0x9d1   : > { %v15611_v48 = vld [vmem:[#allocation2 + $0x1e0] ss:$8 sps:$4 sm:$0xff]  }
 0x9d2   : > { %13484 = vmatprep.subr.bf16.mxu0 %v6368_v62  ;;  %6940 = vmatmul.mubr.bf16.gmra.mrb[220].mxu1 %v15571_v1  ;;  %v15605_v1 = vld [vmem:[#allocation2 + $0x1d0] ss:$8 sps:$4 sm:$0xff]  }
 0x9d3   : > { %13485 = vmatpush3.bf16.msra.mxu0 %v6360_v33  ;;  %6947 = vmatprep.mubr.bf16.mxu1 %v15579_v25  ;;  %v15552_v33 = vld [vmem:[#allocation2 + $0x144] ss:$8 sps:$4 sm:$0xff]   ;;  %v15619_v25 = vld [vmem:[#allocation2 + $0x1f4] ss:$8 sps:$4 sm:$0xff]   ;;  %v15617_v62 = vld [vmem:[#allocation2 + $0x1f0] ss:$8 sps:$4 sm:$0xff]  }
 0x9d4   : > { %13486 = vmatprep.subr.bf16.mxu0 %v6369_v31  ;;  %v15613_v31 = vld [vmem:[#allocation2 + $0x1e4] ss:$8 sps:$4 sm:$0xff]  }
 0x9d7   : > { %13487 = vmatpush3.bf16.msra.mxu0 %v6361_v11  ;;  %v15544_v11 = vld [vmem:[#allocation2 + $0x130] ss:$8 sps:$4 sm:$0xff]  }
 0x9d8   : > { %14842 = vmatprep.subr.bf16.mxu0 %v15604_v14 }
 0x9da   : > { %6563 = vmatmul.mubr.bf16.vlgmr.msra.gmra.mrb[128].mxu0 %v15526_v49  ;;  %6948 = vmatmul.mubr.bf16.gmra.mrb[224].mxu1 %v15577_v13 }
 0x9db   : > { %6570 = vmatprep.mubr.bf16.mxu0 %v15534_v44  ;;  %6955 = vmatprep.mubr.bf16.mxu1 %v15585_v26 }
 0x9dc   : > { %14843 = vmatpush3.bf16.msra.mxu0 %v15604_v14 }
 0x9dd   : > { %14876 = vmatprep.subr.bf16.mxu0 %v15623_v40 }
 0x9e2   : > { %6571 = vmatmul.mubr.bf16.gmra.mrb[132].mxu0 %v15532_v60  ;;  %6956 = vmatmul.mubr.bf16.gmra.mrb[228].mxu1 %v15583_v22 }
 0x9e3   : > { %6578 = vmatprep.mubr.bf16.mxu0 %v15540_v47  ;;  %6963 = vmatprep.mubr.bf16.mxu1 %v15591_v2 }
 0x9ea   : > { %6579 = vmatmul.mubr.bf16.gmra.mrb[136].mxu0 %v15538_v39  ;;  %6964 = vmatmul.mubr.bf16.gmra.mrb[232].mxu1 %v15589_v23 }
 0x9eb   : > { %6586 = vmatprep.mubr.bf16.mxu0 %v15546_v63  ;;  %6971 = vmatprep.mubr.bf16.mxu1 %v15597_v34 }
 0x9f2   : > { %6587 = vmatmul.mubr.bf16.gmra.mrb[140].mxu0 %v15544_v11  ;;  %6972 = vmatmul.mubr.bf16.gmra.mrb[236].mxu1 %v15595_v56 }
 0x9f3   : > { %6594 = vmatprep.mubr.bf16.mxu0 %v15552_v33  ;;  %6979 = vmatprep.mubr.bf16.mxu1 %v15603_v27 }
 0x9fa   : > { %6595 = vmatmul.mubr.bf16.gmra.mrb[144].mxu0 %v15550_v32  ;;  %6980 = vmatmul.mubr.bf16.gmra.mrb[240].mxu1 %v15601_v59 }
 0x9fb   : > { %6602 = vmatprep.mubr.bf16.mxu0 %v15558_v41  ;;  %6987 = vmatprep.mubr.bf16.mxu1 %v15610_v20 }
 0xa02   : > { %6603 = vmatmul.mubr.bf16.gmra.mrb[148].mxu0 %v15556_v4  ;;  %6988 = vmatmul.mubr.bf16.gmra.mrb[244].mxu1 %v15608_v38 }
 0xa03   : > { %6610 = vmatprep.mubr.bf16.mxu0 %v15564_v42  ;;  %6995 = vmatprep.mubr.bf16.mxu1 %v15616_v37 }
 0xa0a   : > { %6611 = vmatmul.mubr.bf16.gmra.mrb[152].mxu0 %v15562_v10  ;;  %6996 = vmatmul.mubr.bf16.gmra.mrb[248].mxu1 %v15614_v8 }
 0xa0b   : > { %6618 = vmatprep.mubr.bf16.mxu0 %v15570_v3  ;;  %7003 = vmatprep.mubr.bf16.mxu1 %v15622_v17 }
 0xa12   : > { %6619 = vmatmul.mubr.bf16.gmra.mrb[156].mxu0 %v15568_v55  ;;  %7004 = vmatmul.mubr.bf16.gmra.mrb[252].mxu1 %v15620_v7 }
 0xa13   : > { %6626 = vmatprep.mubr.bf16.mxu0 %v15576_v24 }
 0xa1a   : > { %6627 = vmatmul.mubr.bf16.gmra.mrb[160].mxu0 %v15574_v12 }
 0xa1b   : > { %6634 = vmatprep.mubr.bf16.mxu0 %v15582_v51 }
 0xa22   : > { %6635 = vmatmul.mubr.bf16.gmra.mrb[164].mxu0 %v15580_v29 }
 0xa23   : > { %6642 = vmatprep.mubr.bf16.mxu0 %v15588_v53 }
 0xa2a   : > { %6643 = vmatmul.mubr.bf16.gmra.mrb[168].mxu0 %v15586_v6 }
 0xa2b   : > { %6650 = vmatprep.mubr.bf16.mxu0 %v15594_v9 }
 0xa32   : > { %6651 = vmatmul.mubr.bf16.gmra.mrb[172].mxu0 %v15592_v21 }
 0xa33   : > { %6658 = vmatprep.mubr.bf16.mxu0 %v15600_v50 }
 0xa3a   : > { %6659 = vmatmul.mubr.bf16.gmra.mrb[176].mxu0 %v15598_v18 }
 0xa3b   : > { %6666 = vmatprep.mubr.bf16.mxu0 %v15607_v35 }
 0xa42   : > { %6667 = vmatmul.mubr.bf16.gmra.mrb[180].mxu0 %v15605_v1 }
 0xa43   : > { %6674 = vmatprep.mubr.bf16.mxu0 %v15613_v31 }
 0xa4a   : > { %6675 = vmatmul.mubr.bf16.gmra.mrb[184].mxu0 %v15611_v48 }
 0xa4b   : > { %6682 = vmatprep.mubr.bf16.mxu0 %v15619_v25 }
 0xa52   : > { %6683 = vmatmul.mubr.bf16.gmra.mrb[188].mxu0 %v15617_v62 }
 0xa53   : > { %14844 = vmatprep.mubr.msk.bf16.mxu0 %vm5893_vm2, %v18556_v43 }
 0xa5a   : > { %14845 = vmatmul.mubr.msk.bf16.vlgmr.msra.gmra.mrb[192].mxu0 %vm5893_vm2, %v18564_v61 }
 0xa5b   : > { %14848 = vmatprep.mubr.msk.bf16.mxu0 %vm5893_vm2, %v18580_v16  ;;  %14877 = vmatpush3.bf16.msra.mxu0 %v15623_v40 }
 0xa62   : > { %14849 = vmatmul.mubr.msk.bf16.gmra.mrb[196].mxu0 %vm5893_vm2, %v18588_v46 }
 0xa63   : > { %14852 = vmatprep.mubr.msk.bf16.mxu0 %vm5893_vm2, %v18604_v36 }
 0xa6a   : > { %14853 = vmatmul.mubr.msk.bf16.gmra.mrb[200].mxu0 %vm5893_vm2, %v18612_v0 }
 0xa6b   : > { %14856 = vmatprep.mubr.msk.bf16.mxu0 %vm5893_vm2, %v18628_v57 }
 0xa6d   : > { %v13600_v14 = vpop.f32.mrb[192].mxu1 }
 0xa6e   : > { %v13601_v49 = vpop.f32.mrb[193].mxu1 }
 0xa6f   : > { %v18754_v13 = vadd.f32 %v13601_v49, %v13600_v14  ;;  %v13603_v44 = vpop.f32.mrb[194].mxu1 }
 0xa70   : > { %v13604_v26 = vpop.f32.mrb[195].mxu1 }
 0xa71   : > { %v18756_v60 = vadd.f32 %v13604_v26, %v13603_v44 }
 0xa72   : > { %14857 = vmatmul.mubr.msk.bf16.gmra.mrb[204].mxu0 %vm5893_vm2, %v18633_v58 }
 0xa73   : > { %14860 = vmatprep.mubr.msk.bf16.mxu0 %vm5893_vm2, %v18640_v28 }
 0xa75   : > { %v13606_v22 = vpop.f32.mrb[196].mxu1 }
 0xa76   : > { %v13607_v47 = vpop.f32.mrb[197].mxu1 }
 0xa77   : > { %v18762_v2 = vadd.f32 %v13607_v47, %v13606_v22  ;;  %v13609_v39 = vpop.f32.mrb[198].mxu1 }
 0xa78   : > { %v13610_v23 = vpop.f32.mrb[199].mxu1 }
 0xa79   : > { %v18764_v63 = vadd.f32 %v13610_v23, %v13609_v39 }
 0xa7a   : > { %14861 = vmatmul.mubr.msk.bf16.gmra.mrb[208].mxu0 %vm5893_vm2, %v18645_v15 }
 0xa7b   : > { %14864 = vmatprep.mubr.msk.bf16.mxu0 %vm5893_vm2, %v18652_v45 }
 0xa7d   : > { %v13612_v34 = vpop.f32.mrb[200].mxu1 }
 0xa7e   : > { %v13613_v11 = vpop.f32.mrb[201].mxu1 }
 0xa7f   : > { %v18770_v56 = vadd.f32 %v13613_v11, %v13612_v34  ;;  %v13615_v33 = vpop.f32.mrb[202].mxu1 }
 0xa80   : > { %v13616_v27 = vpop.f32.mrb[203].mxu1 }
 0xa81   : > { %v18772_v32 = vadd.f32 %v13616_v27, %v13615_v33 }
 0xa82   : > { %14865 = vmatmul.mubr.msk.bf16.gmra.mrb[212].mxu0 %vm5893_vm2, %v18657_v52 }
 0xa83   : > { %14868 = vmatprep.mubr.msk.bf16.mxu0 %vm5893_vm2, %v18664_v30 }
 0xa85   : > { %v13618_v59 = vpop.f32.mrb[204].mxu1 }
 0xa86   : > { %v13619_v41 = vpop.f32.mrb[205].mxu1 }
 0xa87   : > { %v18778_v20 = vadd.f32 %v13619_v41, %v13618_v59  ;;  %v13621_v4 = vpop.f32.mrb[206].mxu1 }
 0xa88   : > { %v13622_v38 = vpop.f32.mrb[207].mxu1 }
 0xa89   : > { %v18780_v42 = vadd.f32 %v13622_v38, %v13621_v4 }
 0xa8a   : > { %14869 = vmatmul.mubr.msk.bf16.gmra.mrb[216].mxu0 %vm5893_vm2, %v18669_v54 }
 0xa8b   : > { %14872 = vmatprep.mubr.msk.bf16.mxu0 %vm5893_vm2, %v18676_v19 }
 0xa8d   : > { %v13624_v37 = vpop.f32.mrb[208].mxu1 }
 0xa8e   : > { %v13625_v10 = vpop.f32.mrb[209].mxu1 }
 0xa8f   : > { %v18786_v8 = vadd.f32 %v13625_v10, %v13624_v37  ;;  %v13627_v3 = vpop.f32.mrb[210].mxu1 }
 0xa90   : > { %v13628_v17 = vpop.f32.mrb[211].mxu1 }
 0xa91   : > { %v18788_v55 = vadd.f32 %v13628_v17, %v13627_v3 }
 0xa92   : > { %14873 = vmatmul.mubr.msk.bf16.gmra.mrb[220].mxu0 %vm5893_vm2, %v18680_v5 }
 0xa93   : > { %14878 = vmatprep.mubr.msk.bf16.mxu0 %vm5893_vm2, %v18556_v43 }
 0xa95   : > { %v13630_v7 = vpop.f32.mrb[212].mxu1 }
 0xa96   : > { %v13631_v24 = vpop.f32.mrb[213].mxu1 }
 0xa97   : > { %v18794_v40 = vadd.f32 %v13631_v24, %v13630_v7  ;;  %v13633_v12 = vpop.f32.mrb[214].mxu1 }
 0xa98   : > { %v13634_v51 = vpop.f32.mrb[215].mxu1 }
 0xa99   : > { %v18796_v29 = vadd.f32 %v13634_v51, %v13633_v12 }
 0xa9a   : > { %14879 = vmatmul.mubr.msk.bf16.vlgmr.msra.gmra.mrb[224].mxu0 %vm5893_vm2, %v18564_v61 }
 0xa9b   : > { %14882 = vmatprep.mubr.msk.bf16.mxu0 %vm5893_vm2, %v18580_v16 }
 0xa9d   : > { %v13636_v53 = vpop.f32.mrb[216].mxu1 }
 0xa9e   : > { %v13637_v6 = vpop.f32.mrb[217].mxu1 }
 0xa9f   : > { %v18802_v9 = vadd.f32 %v13637_v6, %v13636_v53  ;;  %v13639_v21 = vpop.f32.mrb[218].mxu1 }
 0xaa0   : > { %v13640_v43 = vpop.f32.mrb[219].mxu1 }
 0xaa1   : > { %v18804_v50 = vadd.f32 %v13640_v43, %v13639_v21 }
 0xaa2   : > { %14883 = vmatmul.mubr.msk.bf16.gmra.mrb[228].mxu0 %vm5893_vm2, %v18588_v46 }
 0xaa3   : > { %14886 = vmatprep.mubr.msk.bf16.mxu0 %vm5893_vm2, %v18604_v36 }
 0xaa5   : > { %v13642_v18 = vpop.f32.mrb[220].mxu1 }
 0xaa6   : > { %v13643_v35 = vpop.f32.mrb[221].mxu1 }
 0xaa7   : > { %v18810_v61 = vadd.f32 %v13643_v35, %v13642_v18  ;;  %v13645_v1 = vpop.f32.mrb[222].mxu1 }
 0xaa8   : > { %v13646_v16 = vpop.f32.mrb[223].mxu1 }
 0xaa9   : > { %v18812_v31 = vadd.f32 %v13646_v16, %v13645_v1 }
 0xaaa   : > { %14887 = vmatmul.mubr.msk.bf16.gmra.mrb[232].mxu0 %vm5893_vm2, %v18612_v0 }
 0xaab   : > { %14890 = vmatprep.mubr.msk.bf16.mxu0 %vm5893_vm2, %v18628_v57 }
 0xaad   : > { %v13488_v48 = vpop.f32.mrb[128].mxu0  ;;  %v13648_v25 = vpop.f32.mrb[224].mxu1 }
 0xaae   : > { %v13489_v46 = vpop.f32.mrb[129].mxu0  ;;  %v13649_v62 = vpop.f32.mrb[225].mxu1 }
 0xaaf   : > { %v13490_v14 = vadd.f32 %v13489_v46, %v13488_v48  ;;  %v13491_v36 = vpop.f32.mrb[130].mxu0  ;;  %v18818_v49 = vadd.f32 %v13649_v62, %v13648_v25  ;;  %v13651_v44 = vpop.f32.mrb[226].mxu1 }
 0xab0   : > { %v13492_v26 = vpop.f32.mrb[131].mxu0  ;;  %v13652_v22 = vpop.f32.mrb[227].mxu1 }
 0xab1   : > { %v13493_v47 = vadd.f32 %v13492_v26, %v13491_v36  ;;  %v18820_v39 = vadd.f32 %v13652_v22, %v13651_v44  ;;  %v18823_v23 = vadd.f32 %v18754_v13, %v13490_v14 }
 0xab2   : > { %14891 = vmatmul.mubr.msk.bf16.gmra.mrb[236].mxu0 %vm5893_vm2, %v18633_v58 }
 0xab3   : > { %14894 = vmatprep.mubr.msk.bf16.mxu0 %vm5893_vm2, %v18640_v28  ;;  %v18830_v0 = vadd.f32 %v18756_v60, %v13493_v47 }
 0xab5   : > { %v13494_v57 = vpop.f32.mrb[132].mxu0  ;;  %v13654_v34 = vpop.f32.mrb[228].mxu1 }
 0xab6   : > { %v13495_v11 = vpop.f32.mrb[133].mxu0  ;;  %v13655_v33 = vpop.f32.mrb[229].mxu1 }
 0xab7   : > { %v13496_v27 = vadd.f32 %v13495_v11, %v13494_v57  ;;  %v13497_v59 = vpop.f32.mrb[134].mxu0  ;;  %v18832_v41 = vadd.f32 %v13655_v33, %v13654_v34  ;;  %v13657_v4 = vpop.f32.mrb[230].mxu1 }
 0xab8   : > { %v13498_v13 = vpop.f32.mrb[135].mxu0  ;;  %v13658_v38 = vpop.f32.mrb[231].mxu1 }
 0xab9   : > { %v13499_v37 = vadd.f32 %v13498_v13, %v13497_v59  ;;  %v18834_v10 = vadd.f32 %v13658_v38, %v13657_v4  ;;  %v18837_v58 = vadd.f32 %v18762_v2, %v13496_v27 }
 0xaba   : > { %14895 = vmatmul.mubr.msk.bf16.gmra.mrb[240].mxu0 %vm5893_vm2, %v18645_v15 }
 0xabb   : > { %14898 = vmatprep.mubr.msk.bf16.mxu0 %vm5893_vm2, %v18652_v45  ;;  %v18844_v28 = vadd.f32 %v18764_v63, %v13499_v37 }
 0xabd   : > { %v13500_v60 = vpop.f32.mrb[136].mxu0  ;;  %v13660_v3 = vpop.f32.mrb[232].mxu1 }
 0xabe   : > { %v13501_v17 = vpop.f32.mrb[137].mxu0  ;;  %v13661_v7 = vpop.f32.mrb[233].mxu1 }
 0xabf   : > { %v13502_v24 = vadd.f32 %v13501_v17, %v13500_v60  ;;  %v13503_v12 = vpop.f32.mrb[138].mxu0  ;;  %v18846_v51 = vadd.f32 %v13661_v7, %v13660_v3  ;;  %v13663_v53 = vpop.f32.mrb[234].mxu1 }
 0xac0   : > { %v13504_v2 = vpop.f32.mrb[139].mxu0  ;;  %v13664_v6 = vpop.f32.mrb[235].mxu1 }
 0xac1   : > { %v13505_v21 = vadd.f32 %v13504_v2, %v13503_v12  ;;  %v18848_v43 = vadd.f32 %v13664_v6, %v13663_v53  ;;  %v18851_v15 = vadd.f32 %v18770_v56, %v13502_v24 }
 0xac2   : > { %14899 = vmatmul.mubr.msk.bf16.gmra.mrb[244].mxu0 %vm5893_vm2, %v18657_v52 }
 0xac3   : > { %14902 = vmatprep.mubr.msk.bf16.mxu0 %vm5893_vm2, %v18664_v30  ;;  %v18858_v45 = vadd.f32 %v18772_v32, %v13505_v21 }
 0xac5   : > { %v13506_v63 = vpop.f32.mrb[140].mxu0  ;;  %v13666_v18 = vpop.f32.mrb[236].mxu1 }
 0xac6   : > { %v13507_v35 = vpop.f32.mrb[141].mxu0  ;;  %v13667_v1 = vpop.f32.mrb[237].mxu1 }
 0xac7   : > { %v13508_v16 = vadd.f32 %v13507_v35, %v13506_v63  ;;  %v13509_v48 = vpop.f32.mrb[142].mxu0  ;;  %v18860_v25 = vadd.f32 %v13667_v1, %v13666_v18  ;;  %v13669_v46 = vpop.f32.mrb[238].mxu1 }
 0xac8   : > { %v13510_v56 = vpop.f32.mrb[143].mxu0  ;;  %v13670_v62 = vpop.f32.mrb[239].mxu1 }
 0xac9   : > { %v13511_v14 = vadd.f32 %v13510_v56, %v13509_v48  ;;  %v18862_v36 = vadd.f32 %v13670_v62, %v13669_v46  ;;  %v18865_v52 = vadd.f32 %v18778_v20, %v13508_v16 }
 0xaca   : > { %14903 = vmatmul.mubr.msk.bf16.gmra.mrb[248].mxu0 %vm5893_vm2, %v18669_v54 }
 0xacb   : > { %14906 = vmatprep.mubr.msk.bf16.mxu0 %vm5893_vm2, %v18676_v19  ;;  %v18872_v30 = vadd.f32 %v18780_v42, %v13511_v14 }
 0xacd   : > { %v13512_v32 = vpop.f32.mrb[144].mxu0  ;;  %v13672_v44 = vpop.f32.mrb[240].mxu1 }
 0xace   : > { %v13513_v26 = vpop.f32.mrb[145].mxu0  ;;  %v13673_v22 = vpop.f32.mrb[241].mxu1 }
 0xacf   : > { %v13514_v47 = vadd.f32 %v13513_v26, %v13512_v32  ;;  %v13515_v57 = vpop.f32.mrb[146].mxu0  ;;  %v18874_v34 = vadd.f32 %v13673_v22, %v13672_v44  ;;  %v13675_v11 = vpop.f32.mrb[242].mxu1 }
 0xad0   : > { %v13516_v20 = vpop.f32.mrb[147].mxu0  ;;  %v13676_v33 = vpop.f32.mrb[243].mxu1 }
 0xad1   : > { %v13517_v27 = vadd.f32 %v13516_v20, %v13515_v57  ;;  %v18876_v59 = vadd.f32 %v13676_v33, %v13675_v11  ;;  %v18879_v54 = vadd.f32 %v18786_v8, %v13514_v47 }
 0xad2   : > { %14907 = vmatmul.mubr.msk.bf16.gmra.mrb[252].mxu0 %vm5893_vm2, %v18680_v5 }
 0xad3   : > { %v18884_v19 = vadd.f32 %v18788_v55, %v13517_v27 }
 0xad5   : > { %v13518_v42 = vpop.f32.mrb[148].mxu0  ;;  %v13678_v4 = vpop.f32.mrb[244].mxu1 }
 0xad6   : > { %v13519_v13 = vpop.f32.mrb[149].mxu0  ;;  %v13679_v38 = vpop.f32.mrb[245].mxu1 }
 0xad7   : > { %v13520_v37 = vadd.f32 %v13519_v13, %v13518_v42  ;;  %v13521_v60 = vpop.f32.mrb[150].mxu0  ;;  %v18886_v3 = vadd.f32 %v13679_v38, %v13678_v4  ;;  %v13681_v17 = vpop.f32.mrb[246].mxu1 }
 0xad8   : > { %v13522_v7 = vpop.f32.mrb[151].mxu0  ;;  %v13682_v24 = vpop.f32.mrb[247].mxu1 }
 0xad9   : > { %v13523_v12 = vadd.f32 %v13522_v7, %v13521_v60  ;;  %v18888_v8 = vadd.f32 %v13682_v24, %v13681_v17  ;;  %v18891_v53 = vadd.f32 %v18794_v40, %v13520_v37  ;;  %v15626_v17 = vld [vmem:[#allocation2 + $0x204] ss:$8 sps:$4 sm:$0xff]  }
 0xada   : > { %7423 = vmatprep.mubr.bf16.mxu1 %v15626_v17 }
 0xadb   : > { %v18894_v5 = vadd.f32 %v18796_v29, %v13523_v12 }
 0xadd   : > { %v13524_v55 = vpop.f32.mrb[152].mxu0  ;;  %v13684_v2 = vpop.f32.mrb[248].mxu1 }
 0xade   : > { %v13525_v6 = vpop.f32.mrb[153].mxu0  ;;  %v13685_v21 = vpop.f32.mrb[249].mxu1 }
 0xadf   : > { %v13526_v63 = vadd.f32 %v13525_v6, %v13524_v55  ;;  %v13527_v18 = vpop.f32.mrb[154].mxu0  ;;  %v18896_v35 = vadd.f32 %v13685_v21, %v13684_v2  ;;  %v13687_v1 = vpop.f32.mrb[250].mxu1 }
 0xae0   : > { %v13528_v16 = vpop.f32.mrb[155].mxu0  ;;  %v13688_v48 = vpop.f32.mrb[251].mxu1 }
 0xae1   : > { %v13529_v46 = vadd.f32 %v13528_v16, %v13527_v18  ;;  %v18898_v56 = vadd.f32 %v13688_v48, %v13687_v1  ;;  %v18901_v40 = vadd.f32 %v18802_v9, %v13526_v63 }
 0xae3   : > { %v18904_v29 = vadd.f32 %v18804_v50, %v13529_v46 }
 0xae5   : > { %v13530_v62 = vpop.f32.mrb[156].mxu0  ;;  %v13690_v14 = vpop.f32.mrb[252].mxu1 }
 0xae6   : > { %v13531_v32 = vpop.f32.mrb[157].mxu0  ;;  %v13691_v44 = vpop.f32.mrb[253].mxu1 }
 0xae7   : > { %v13532_v26 = vadd.f32 %v13531_v32, %v13530_v62  ;;  %v13533_v22 = vpop.f32.mrb[158].mxu0  ;;  %v18906_v47 = vadd.f32 %v13691_v44, %v13690_v14  ;;  %v13693_v57 = vpop.f32.mrb[254].mxu1 }
 0xae8   : > { %v13534_v11 = vpop.f32.mrb[159].mxu0  ;;  %v13694_v20 = vpop.f32.mrb[255].mxu1 }
 0xae9   : > { %v13535_v33 = vadd.f32 %v13534_v11, %v13533_v22  ;;  %v18908_v27 = vadd.f32 %v13694_v20, %v13693_v57  ;;  %v18911_v9 = vadd.f32 %v18810_v61, %v13532_v26 }
 0xaeb   : > { %v18914_v50 = vadd.f32 %v18812_v31, %v13535_v33 }
 0xaed   : > { %v13536_v42 = vpop.f32.mrb[160].mxu0 }
 0xaee   : > { %v13537_v4 = vpop.f32.mrb[161].mxu0 }
 0xaef   : > { %v13538_v13 = vadd.f32 %v13537_v4, %v13536_v42  ;;  %v13539_v38 = vpop.f32.mrb[162].mxu0 }
 0xaf0   : > { %v13540_v37 = vpop.f32.mrb[163].mxu0 }
 0xaf1   : > { %v13541_v60 = vadd.f32 %v13540_v37, %v13539_v38  ;;  %v18917_v7 = vadd.f32 %v18818_v49, %v13538_v13 }
 0xaf3   : > { %v18920_v24 = vadd.f32 %v18820_v39, %v13541_v60 }
 0xaf5   : > { %v13542_v12 = vpop.f32.mrb[164].mxu0 }
 0xaf6   : > { %v13543_v61 = vpop.f32.mrb[165].mxu0 }
 0xaf7   : > { %v13544_v55 = vadd.f32 %v13543_v61, %v13542_v12  ;;  %v13545_v2 = vpop.f32.mrb[166].mxu0 }
 0xaf8   : > { %v13546_v31 = vpop.f32.mrb[167].mxu0 }
 0xaf9   : > { %v13547_v6 = vadd.f32 %v13546_v31, %v13545_v2  ;;  %v18923_v21 = vadd.f32 %v18832_v41, %v13544_v55 }
 0xafb   : > { %v18926_v63 = vadd.f32 %v18834_v10, %v13547_v6 }
 0xafd   : > { %v13548_v18 = vpop.f32.mrb[168].mxu0 }
 0xafe   : > { %v13549_v1 = vpop.f32.mrb[169].mxu0 }
 0xaff   : > { %v13550_v49 = vadd.f32 %v13549_v1, %v13548_v18  ;;  %v13551_v16 = vpop.f32.mrb[170].mxu0 }
 0xb00   : > { %v13552_v48 = vpop.f32.mrb[171].mxu0 }
 0xb01   : > { %v13553_v46 = vadd.f32 %v13552_v48, %v13551_v16  ;;  %v18929_v39 = vadd.f32 %v18846_v51, %v13550_v49 }
 0xb03   : > { %v18932_v62 = vadd.f32 %v18848_v43, %v13553_v46 }
 0xb05   : > { %v13554_v14 = vpop.f32.mrb[172].mxu0 }
 0xb06   : > { %v13555_v32 = vpop.f32.mrb[173].mxu0 }
 0xb07   : > { %v13556_v44 = vadd.f32 %v13555_v32, %v13554_v14  ;;  %v13557_v41 = vpop.f32.mrb[174].mxu0 }
 0xb08   : > { %v13558_v26 = vpop.f32.mrb[175].mxu0 }
 0xb09   : > { %v13559_v22 = vadd.f32 %v13558_v26, %v13557_v41  ;;  %v18935_v10 = vadd.f32 %v18860_v25, %v13556_v44 }
 0xb0b   : > { %v18938_v57 = vadd.f32 %v18862_v36, %v13559_v22 }
 0xb0d   : > { %v13560_v11 = vpop.f32.mrb[176].mxu0 }
 0xb0e   : > { %v13561_v20 = vpop.f32.mrb[177].mxu0 }
 0xb0f   : > { %v13562_v33 = vadd.f32 %v13561_v20, %v13560_v11  ;;  %v13563_v51 = vpop.f32.mrb[178].mxu0 }
 0xb10   : > { %v13564_v42 = vpop.f32.mrb[179].mxu0 }
 0xb11   : > { %v13565_v4 = vadd.f32 %v13564_v42, %v13563_v51  ;;  %v18941_v43 = vadd.f32 %v18874_v34, %v13562_v33 }
 0xb13   : > { %v18944_v13 = vadd.f32 %v18876_v59, %v13565_v4 }
 0xb15   : > { %v13566_v38 = vpop.f32.mrb[180].mxu0 }
 0xb16   : > { %v13567_v37 = vpop.f32.mrb[181].mxu0 }
 0xb17   : > { %v13568_v60 = vadd.f32 %v13567_v37, %v13566_v38  ;;  %v13569_v25 = vpop.f32.mrb[182].mxu0 }
 0xb18   : > { %v13570_v17 = vpop.f32.mrb[183].mxu0 }
 0xb19   : > { %v13571_v12 = vadd.f32 %v13570_v17, %v13569_v25  ;;  %v18947_v36 = vadd.f32 %v18886_v3, %v13568_v60 }
 0xb1b   : > { %v18950_v61 = vadd.f32 %v18888_v8, %v13571_v12 }
 0xb1d   : > { %v13572_v55 = vpop.f32.mrb[184].mxu0 }
 0xb1e   : > { %v13573_v2 = vpop.f32.mrb[185].mxu0 }
 0xb1f   : > { %v13574_v31 = vadd.f32 %v13573_v2, %v13572_v55  ;;  %v13575_v34 = vpop.f32.mrb[186].mxu0 }
 0xb20   : > { %v13576_v6 = vpop.f32.mrb[187].mxu0 }
 0xb21   : > { %v13577_v18 = vadd.f32 %v13576_v6, %v13575_v34  ;;  %v18953_v59 = vadd.f32 %v18896_v35, %v13574_v31 }
 0xb23   : > { %v18956_v1 = vadd.f32 %v18898_v56, %v13577_v18  ;;  %v15653_v56 = vld [vmem:[#allocation2 + $0x304] ss:$8 sps:$4 sm:$0xff]  }
 0xb24   : > { %7995 = vmatprep.mubr.bf16.mxu0 %v15653_v56 }
 0xb25   : > { %v13578_v49 = vpop.f32.mrb[188].mxu0 }
 0xb26   : > { %v13579_v16 = vpop.f32.mrb[189].mxu0 }
 0xb27   : > { %v13580_v48 = vadd.f32 %v13579_v16, %v13578_v49  ;;  %v13581_v3 = vpop.f32.mrb[190].mxu0 }
 0xb28   : > { %v13582_v46 = vpop.f32.mrb[191].mxu0 }
 0xb29   : > { %v13583_v14 = vadd.f32 %v13582_v46, %v13581_v3  ;;  %v18959_v8 = vadd.f32 %v18906_v47, %v13580_v48 }
 0xb2b   : > { %v18962_v32 = vadd.f32 %v18908_v27, %v13583_v14 }
 0xb2d   : > { %v14846_v44 = vpop.f32.mrb[192].mxu0 }
 0xb2e   : > { %v7055_v41 = vpop.f32.mrb[193].mxu0 }
 0xb2f   : > { %v14847_v26 = vpop.f32.mrb[194].mxu0 }
 0xb30   : > { %v7216_v35 = vpack.c.bf16 %v14847_v26, %v14846_v44  ;;  %v7058_v22 = vpop.f32.mrb[195].mxu0 }
 0xb31   : > { %v7215_v11 = vpack.c.bf16 %v7058_v22, %v7055_v41 }
 0xb35   : > { %v14850_v20 = vpop.f32.mrb[196].mxu0 }
 0xb36   : > { %v7071_v33 = vpop.f32.mrb[197].mxu0 }
 0xb37   : > { %v14851_v51 = vpop.f32.mrb[198].mxu0 }
 0xb38   : > { %v7218_v42 = vpack.c.bf16 %v14851_v51, %v14850_v20  ;;  %v7074_v4 = vpop.f32.mrb[199].mxu0 }
 0xb39   : > { %v7217_v38 = vpack.c.bf16 %v7074_v4, %v7071_v33 }
 0xb3d   : > { %v14854_v37 = vpop.f32.mrb[200].mxu0 }
 0xb3e   : > { %v7087_v47 = vpop.f32.mrb[201].mxu0 }
 0xb3f   : > { %v14855_v60 = vpop.f32.mrb[202].mxu0 }
 0xb40   : > { %v7220_v25 = vpack.c.bf16 %v14855_v60, %v14854_v37  ;;  %v7090_v27 = vpop.f32.mrb[203].mxu0 }
 0xb41   : > { %v7219_v17 = vpack.c.bf16 %v7090_v27, %v7087_v47 }
 0xb45   : > { %v14858_v12 = vpop.f32.mrb[204].mxu0 }
 0xb46   : > { %v7103_v55 = vpop.f32.mrb[205].mxu0 }
 0xb47   : > { %v14859_v2 = vpop.f32.mrb[206].mxu0 }
 0xb48   : > { %v7222_v31 = vpack.c.bf16 %v14859_v2, %v14858_v12  ;;  %v7106_v34 = vpop.f32.mrb[207].mxu0 }
 0xb49   : > { %v7221_v6 = vpack.c.bf16 %v7106_v34, %v7103_v55 }
 0xb4d   : > { %v14862_v18 = vpop.f32.mrb[208].mxu0 }
 0xb4e   : > { %v7119_v49 = vpop.f32.mrb[209].mxu0 }
 0xb4f   : > { %v14863_v16 = vpop.f32.mrb[210].mxu0 }
 0xb50   : > { %v7224_v48 = vpack.c.bf16 %v14863_v16, %v14862_v18  ;;  %v7122_v3 = vpop.f32.mrb[211].mxu0  ;;  %v15624_v18 = vld [vmem:[#allocation2 + $0x200] ss:$8 sps:$4 sm:$0xff]   ;;  %v15629_v16 = vld [vmem:[#allocation2 + $0x214] ss:$8 sps:$4 sm:$0xff]  }
 0xb51   : > { %v7223_v46 = vpack.c.bf16 %v7122_v3, %v7119_v49 }
 0xb53   : > { %13713 = vmatprep.subr.bf16.mxu1 %v7223_v46 }
 0xb54   : > { %13714 = vmatpush3.bf16.msra.mxu1 %v7215_v11 }
 0xb55   : > { %v14866_v14 = vpop.f32.mrb[212].mxu0  ;;  %13715 = vmatprep.subr.bf16.mxu1 %v7224_v48 }
 0xb56   : > { %v7135_v44 = vpop.f32.mrb[213].mxu0 }
 0xb57   : > { %v14867_v41 = vpop.f32.mrb[214].mxu0 }
 0xb58   : > { %v7226_v26 = vpack.c.bf16 %v14867_v41, %v14866_v14  ;;  %v7138_v22 = vpop.f32.mrb[215].mxu0  ;;  %13716 = vmatpush3.bf16.msra.mxu1 %v7216_v35 }
 0xb59   : > { %v7225_v56 = vpack.c.bf16 %v7138_v22, %v7135_v44  ;;  %v15632_v44 = vld [vmem:[#allocation2 + $0x224] ss:$8 sps:$4 sm:$0xff]  }
 0xb5b   : > { %13717 = vmatprep.subr.bf16.mxu1 %v7225_v56  ;;  %v15630_v56 = vld [vmem:[#allocation2 + $0x220] ss:$8 sps:$4 sm:$0xff]  }
 0xb5c   : > { %13718 = vmatpush3.bf16.msra.mxu1 %v7217_v38 }
 0xb5d   : > { %v14870_v20 = vpop.f32.mrb[216].mxu0  ;;  %13719 = vmatprep.subr.bf16.mxu1 %v7226_v26 }
 0xb5e   : > { %v7151_v33 = vpop.f32.mrb[217].mxu0 }
 0xb5f   : > { %v14871_v51 = vpop.f32.mrb[218].mxu0 }
 0xb60   : > { %v7228_v4 = vpack.c.bf16 %v14871_v51, %v14870_v20  ;;  %v7154_v37 = vpop.f32.mrb[219].mxu0  ;;  %13720 = vmatpush3.bf16.msra.mxu1 %v7218_v42  ;;  %v15635_v51 = vld [vmem:[#allocation2 + $0x234] ss:$8 sps:$4 sm:$0xff]  }
 0xb61   : > { %v7227_v47 = vpack.c.bf16 %v7154_v37, %v7151_v33 }
 0xb63   : > { %13721 = vmatprep.subr.bf16.mxu1 %v7227_v47 }
 0xb64   : > { %13722 = vmatpush3.bf16.msra.mxu1 %v7219_v17 }
 0xb65   : > { %v14874_v11 = vpop.f32.mrb[220].mxu0  ;;  %13723 = vmatprep.subr.bf16.mxu1 %v7228_v4 }
 0xb66   : > { %v7167_v60 = vpop.f32.mrb[221].mxu0 }
 0xb67   : > { %v14875_v27 = vpop.f32.mrb[222].mxu0 }
 0xb68   : > { %v7230_v12 = vpack.c.bf16 %v14875_v27, %v14874_v11  ;;  %v7170_v55 = vpop.f32.mrb[223].mxu0  ;;  %13724 = vmatpush3.bf16.msra.mxu1 %v7220_v25  ;;  %v15627_v25 = vld [vmem:[#allocation2 + $0x210] ss:$8 sps:$4 sm:$0xff]  }
 0xb69   : > { %v7229_v35 = vpack.c.bf16 %v7170_v55, %v7167_v60  ;;  %v15633_v60 = vld [vmem:[#allocation2 + $0x230] ss:$8 sps:$4 sm:$0xff]   ;;  %v15638_v55 = vld [vmem:[#allocation2 + $0x244] ss:$8 sps:$4 sm:$0xff]  }
 0xb6b   : > { %13725 = vmatprep.subr.bf16.mxu1 %v7229_v35 }
 0xb6c   : > { %13726 = vmatpush3.bf16.msra.mxu1 %v7221_v6 }
 0xb6d   : > { %13727 = vmatprep.subr.bf16.mxu1 %v7230_v12  ;;  %v14880_v38 = vpop.f32.mrb[224].mxu0 }
 0xb6e   : > { %v7627_v2 = vpop.f32.mrb[225].mxu0 }
 0xb6f   : > { %v14881_v34 = vpop.f32.mrb[226].mxu0 }
 0xb70   : > { %v7788_v49 = vpack.c.bf16 %v14881_v34, %v14880_v38  ;;  %13728 = vmatpush3.bf16.msra.mxu1 %v7222_v31  ;;  %v7630_v42 = vpop.f32.mrb[227].mxu0 }
 0xb71   : > { %v7787_v17 = vpack.c.bf16 %v7630_v42, %v7627_v2 }
 0xb73   : > { %7424 = vmatmul.mubr.bf16.vlgmr.msra.gmra.mrb[0].mxu1 %v15624_v18  ;;  %v15636_v18 = vld [vmem:[#allocation2 + $0x240] ss:$8 sps:$4 sm:$0xff]  }
 0xb74   : > { %7431 = vmatprep.mubr.bf16.mxu1 %v15629_v16 }
 0xb75   : > { %v18964_v48 = vpop.f32.mrb[228].mxu0 }
 0xb76   : > { %v7643_v3 = vpop.f32.mrb[229].mxu0 }
 0xb77   : > { %v14885_v46 = vpop.f32.mrb[230].mxu0 }
 0xb78   : > { %v7790_v14 = vpack.c.bf16 %v14885_v46, %v18964_v48  ;;  %v7646_v6 = vpop.f32.mrb[231].mxu0  ;;  %v15641_v48 = vld [vmem:[#allocation2 + $0x254] ss:$8 sps:$4 sm:$0xff]  }
 0xb79   : > { %v7789_v41 = vpack.c.bf16 %v7646_v6, %v7643_v3 }
 0xb7b   : > { %7432 = vmatmul.mubr.bf16.gmra.mrb[4].mxu1 %v15627_v25 }
 0xb7c   : > { %7439 = vmatprep.mubr.bf16.mxu1 %v15632_v44  ;;  %v15639_v44 = vld [vmem:[#allocation2 + $0x250] ss:$8 sps:$4 sm:$0xff]  }
 0xb7d   : > { %v18967_v26 = vpop.f32.mrb[232].mxu0 }
 0xb7e   : > { %v7659_v31 = vpop.f32.mrb[233].mxu0 }
 0xb7f   : > { %v18969_v22 = vpop.f32.mrb[234].mxu0 }
 0xb80   : > { %v7792_v20 = vpack.c.bf16 %v18969_v22, %v18967_v26  ;;  %v7662_v33 = vpop.f32.mrb[235].mxu0  ;;  %v15644_v22 = vld [vmem:[#allocation2 + $0x264] ss:$8 sps:$4 sm:$0xff]  }
 0xb81   : > { %v7791_v4 = vpack.c.bf16 %v7662_v33, %v7659_v31 }
 0xb83   : > { %7440 = vmatmul.mubr.bf16.gmra.mrb[8].mxu1 %v15630_v56 }
 0xb84   : > { %7447 = vmatprep.mubr.bf16.mxu1 %v15635_v51 }
 0xb85   : > { %v18973_v37 = vpop.f32.mrb[236].mxu0 }
 0xb86   : > { %v7675_v47 = vpop.f32.mrb[237].mxu0 }
 0xb87   : > { %v18975_v11 = vpop.f32.mrb[238].mxu0 }
 0xb88   : > { %v7794_v27 = vpack.c.bf16 %v18975_v11, %v18973_v37  ;;  %v7678_v12 = vpop.f32.mrb[239].mxu0 }
 0xb89   : > { %v7793_v35 = vpack.c.bf16 %v7678_v12, %v7675_v47 }
 0xb8b   : > { %7448 = vmatmul.mubr.bf16.gmra.mrb[12].mxu1 %v15633_v60  ;;  %v15647_v60 = vld [vmem:[#allocation2 + $0x274] ss:$8 sps:$4 sm:$0xff]  }
 0xb8c   : > { %7455 = vmatprep.mubr.bf16.mxu1 %v15638_v55 }
 0xb8d   : > { %v14896_v38 = vpop.f32.mrb[240].mxu0 }
 0xb8e   : > { %v7691_v2 = vpop.f32.mrb[241].mxu0 }
 0xb8f   : > { %v14897_v34 = vpop.f32.mrb[242].mxu0 }
 0xb90   : > { %v7796_v42 = vpack.c.bf16 %v14897_v34, %v14896_v38  ;;  %v7694_v16 = vpop.f32.mrb[243].mxu0 }
 0xb91   : > { %v7795_v3 = vpack.c.bf16 %v7694_v16, %v7691_v2  ;;  %v15651_v16 = vld [vmem:[#allocation2 + $0x300] ss:$8 sps:$4 sm:$0xff]  }
 0xb93   : > { %7456 = vmatmul.mubr.bf16.gmra.mrb[16].mxu1 %v15636_v18  ;;  %13842 = vmatprep.subr.bf16.mxu0 %v7795_v3  ;;  %v15650_v18 = vld [vmem:[#allocation2 + $0x284] ss:$8 sps:$4 sm:$0xff]   ;;  %v15654_v3 = vld [vmem:[#allocation2 + $0x290] ss:$8 sps:$4 sm:$0xff]  }
 0xb94   : > { %13843 = vmatpush3.bf16.msra.mxu0 %v7787_v17  ;;  %7463 = vmatprep.mubr.bf16.mxu1 %v15641_v48  ;;  %v15642_v17 = vld [vmem:[#allocation2 + $0x260] ss:$8 sps:$4 sm:$0xff]   ;;  %v15659_v48 = vld [vmem:[#allocation2 + $0x314] ss:$8 sps:$4 sm:$0xff]  }
 0xb95   : > { %v14900_v46 = vpop.f32.mrb[244].mxu0  ;;  %13844 = vmatprep.subr.bf16.mxu0 %v7796_v42 }
 0xb96   : > { %v7707_v25 = vpop.f32.mrb[245].mxu0 }
 0xb97   : > { %v14901_v6 = vpop.f32.mrb[246].mxu0 }
 0xb98   : > { %v7798_v26 = vpack.c.bf16 %v14901_v6, %v14900_v46  ;;  %v7710_v31 = vpop.f32.mrb[247].mxu0  ;;  %13845 = vmatpush3.bf16.msra.mxu0 %v7788_v49  ;;  %v15657_v46 = vld [vmem:[#allocation2 + $0x310] ss:$8 sps:$4 sm:$0xff]   ;;  %v15663_v6 = vld [vmem:[#allocation2 + $0x320] ss:$8 sps:$4 sm:$0xff]  }
 0xb99   : > { %v7797_v56 = vpack.c.bf16 %v7710_v31, %v7707_v25  ;;  %v15662_v25 = vld [vmem:[#allocation2 + $0x2a4] ss:$8 sps:$4 sm:$0xff]   ;;  %v15669_v31 = vld [vmem:[#allocation2 + $0x330] ss:$8 sps:$4 sm:$0xff]  }
 0xb9b   : > { %7464 = vmatmul.mubr.bf16.gmra.mrb[20].mxu1 %v15639_v44  ;;  %13846 = vmatprep.subr.bf16.mxu0 %v7797_v56  ;;  %v15668_v44 = vld [vmem:[#allocation2 + $0x2b4] ss:$8 sps:$4 sm:$0xff]   ;;  %v15677_v56 = vld [vmem:[#allocation2 + $0x344] ss:$8 sps:$4 sm:$0xff]  }
 0xb9c   : > { %13847 = vmatpush3.bf16.msra.mxu0 %v7789_v41  ;;  %7471 = vmatprep.mubr.bf16.mxu1 %v15644_v22  ;;  %v15645_v41 = vld [vmem:[#allocation2 + $0x270] ss:$8 sps:$4 sm:$0xff]   ;;  %v15674_v22 = vld [vmem:[#allocation2 + $0x2c4] ss:$8 sps:$4 sm:$0xff]  }
 0xb9d   : > { %v14904_v33 = vpop.f32.mrb[248].mxu0  ;;  %13848 = vmatprep.subr.bf16.mxu0 %v7798_v26  ;;  %v15671_v26 = vld [vmem:[#allocation2 + $0x334] ss:$8 sps:$4 sm:$0xff]  }
 0xb9e   : > { %v7723_v51 = vpop.f32.mrb[249].mxu0 }
 0xb9f   : > { %v14905_v37 = vpop.f32.mrb[250].mxu0 }
 0xba0   : > { %v7800_v47 = vpack.c.bf16 %v14905_v37, %v14904_v33  ;;  %v7726_v11 = vpop.f32.mrb[251].mxu0  ;;  %13849 = vmatpush3.bf16.msra.mxu0 %v7790_v14  ;;  %v15648_v14 = vld [vmem:[#allocation2 + $0x280] ss:$8 sps:$4 sm:$0xff]   ;;  %v15680_v37 = vld [vmem:[#allocation2 + $0x2d4] ss:$8 sps:$4 sm:$0xff]  }
 0xba1   : > { %v7799_v12 = vpack.c.bf16 %v7726_v11, %v7723_v51  ;;  %v15672_v33 = vld [vmem:[#allocation2 + $0x2c0] ss:$8 sps:$4 sm:$0xff]   ;;  %v15681_v11 = vld [vmem:[#allocation2 + $0x350] ss:$8 sps:$4 sm:$0xff]  }
 0xba2   : > { %v15675_v51 = vld [vmem:[#allocation2 + $0x340] ss:$8 sps:$4 sm:$0xff]  }
 0xba3   : > { %7472 = vmatmul.mubr.bf16.gmra.mrb[24].mxu1 %v15642_v17  ;;  %13850 = vmatprep.subr.bf16.mxu0 %v7799_v12  ;;  %v15683_v17 = vld [vmem:[#allocation2 + $0x354] ss:$8 sps:$4 sm:$0xff]   ;;  %v15689_v12 = vld [vmem:[#allocation2 + $0x364] ss:$8 sps:$4 sm:$0xff]  }
 0xba4   : > { %13851 = vmatpush3.bf16.msra.mxu0 %v7791_v4  ;;  %7479 = vmatprep.mubr.bf16.mxu1 %v15647_v60  ;;  %v15656_v4 = vld [vmem:[#allocation2 + $0x294] ss:$8 sps:$4 sm:$0xff]   ;;  %v15686_v60 = vld [vmem:[#allocation2 + $0x2e4] ss:$8 sps:$4 sm:$0xff]  }
 0xba5   : > { %v14908_v49 = vpop.f32.mrb[252].mxu0  ;;  %13852 = vmatprep.subr.bf16.mxu0 %v7800_v47  ;;  %v15678_v47 = vld [vmem:[#allocation2 + $0x2d0] ss:$8 sps:$4 sm:$0xff]  }
 0xba6   : > { %v7739_v55 = vpop.f32.mrb[253].mxu0 }
 0xba7   : > { %v14909_v38 = vpop.f32.mrb[254].mxu0 }
 0xba8   : > { %v7802_v2 = vpack.c.bf16 %v14909_v38, %v14908_v49  ;;  %v7742_v34 = vpop.f32.mrb[255].mxu0  ;;  %13853 = vmatpush3.bf16.msra.mxu0 %v7792_v20  ;;  %v15665_v20 = vld [vmem:[#allocation2 + $0x324] ss:$8 sps:$4 sm:$0xff]   ;;  %v15684_v49 = vld [vmem:[#allocation2 + $0x2e0] ss:$8 sps:$4 sm:$0xff]  }
 0xba9   : > { %v7801_v42 = vpack.c.bf16 %v7742_v34, %v7739_v55  ;;  %v15687_v55 = vld [vmem:[#allocation2 + $0x360] ss:$8 sps:$4 sm:$0xff]   ;;  %v15692_v38 = vld [vmem:[#allocation2 + $0x2f4] ss:$8 sps:$4 sm:$0xff]   ;;  %v15693_v34 = vld [vmem:[#allocation2 + $0x370] ss:$8 sps:$4 sm:$0xff]  }
 0xbab   : > { %7480 = vmatmul.mubr.bf16.gmra.mrb[28].mxu1 %v15645_v41  ;;  %13854 = vmatprep.subr.bf16.mxu0 %v7801_v42  ;;  %v15695_v41 = vld [vmem:[#allocation2 + $0x374] ss:$8 sps:$4 sm:$0xff]   ;;  %v15696_v42 = vld [vmem:[#allocation2 + $0x380] ss:$8 sps:$4 sm:$0xff]  }
 0xbac   : > { %13855 = vmatpush3.bf16.msra.mxu0 %v7793_v35  ;;  %7487 = vmatprep.mubr.bf16.mxu1 %v15650_v18  ;;  %v15660_v35 = vld [vmem:[#allocation2 + $0x2a0] ss:$8 sps:$4 sm:$0xff]   ;;  %v15698_v18 = vld [vmem:[#allocation2 + $0x384] ss:$8 sps:$4 sm:$0xff]  }
 0xbad   : > { %13856 = vmatprep.subr.bf16.mxu0 %v7802_v2  ;;  %v15690_v2 = vld [vmem:[#allocation2 + $0x2f0] ss:$8 sps:$4 sm:$0xff]  }
 0xbb0   : > { %13857 = vmatpush3.bf16.msra.mxu0 %v7794_v27  ;;  %v15666_v27 = vld [vmem:[#allocation2 + $0x2b0] ss:$8 sps:$4 sm:$0xff]  }
 0xbb3   : > { %7488 = vmatmul.mubr.bf16.gmra.mrb[32].mxu1 %v15648_v14  ;;  %7996 = vmatmul.mubr.bf16.vlgmr.msra.gmra.mrb[0].mxu0 %v15651_v16  ;;  %v15701_v14 = vld [vmem:[#allocation2 + $0x394] ss:$8 sps:$4 sm:$0xff]   ;;  %v15699_v16 = vld [vmem:[#allocation2 + $0x390] ss:$8 sps:$4 sm:$0xff]  }
 0xbb4   : > { %7495 = vmatprep.mubr.bf16.mxu1 %v15656_v4  ;;  %8003 = vmatprep.mubr.bf16.mxu0 %v15659_v48  ;;  %v15704_v4 = vld [vmem:[#allocation2 + $0x3a4] ss:$8 sps:$4 sm:$0xff]   ;;  %v15702_v48 = vld [vmem:[#allocation2 + $0x3a0] ss:$8 sps:$4 sm:$0xff]  }
 0xbbb   : > { %7496 = vmatmul.mubr.bf16.gmra.mrb[36].mxu1 %v15654_v3  ;;  %8004 = vmatmul.mubr.bf16.gmra.mrb[4].mxu0 %v15657_v46  ;;  %v15707_v3 = vld [vmem:[#allocation2 + $0x3b4] ss:$8 sps:$4 sm:$0xff]   ;;  %v15705_v46 = vld [vmem:[#allocation2 + $0x3b0] ss:$8 sps:$4 sm:$0xff]  }
 0xbbc   : > { %7503 = vmatprep.mubr.bf16.mxu1 %v15662_v25  ;;  %8011 = vmatprep.mubr.bf16.mxu0 %v15665_v20  ;;  %v15710_v25 = vld [vmem:[#allocation2 + $0x3c4] ss:$8 sps:$4 sm:$0xff]   ;;  %v15708_v20 = vld [vmem:[#allocation2 + $0x3c0] ss:$8 sps:$4 sm:$0xff]  }
 0xbc3   : > { %7504 = vmatmul.mubr.bf16.gmra.mrb[40].mxu1 %v15660_v35  ;;  %8012 = vmatmul.mubr.bf16.gmra.mrb[8].mxu0 %v15663_v6  ;;  %v15713_v35 = vld [vmem:[#allocation2 + $0x3d4] ss:$8 sps:$4 sm:$0xff]   ;;  %v15711_v6 = vld [vmem:[#allocation2 + $0x3d0] ss:$8 sps:$4 sm:$0xff]  }
 0xbc4   : > { %7511 = vmatprep.mubr.bf16.mxu1 %v15668_v44  ;;  %8019 = vmatprep.mubr.bf16.mxu0 %v15671_v26  ;;  %v15716_v44 = vld [vmem:[#allocation2 + $0x3e4] ss:$8 sps:$4 sm:$0xff]   ;;  %v8460_v26 = vld [vmem:[%s19754_s11] sm:$0xf] }
 0xbc5   : > { %15062 = vmatprep.subr.msk.bf16.mxu1 %vm8510_vm3, %v8460_v26 }
 0xbcb   : > { %7512 = vmatmul.mubr.bf16.gmra.mrb[44].mxu1 %v15666_v27  ;;  %8020 = vmatmul.mubr.bf16.gmra.mrb[12].mxu0 %v15669_v31  ;;  %v8512_v27 = vsel %vm8510_vm3, %v8460_v26, 0  ;;  %v15714_v31 = vld [vmem:[#allocation2 + $0x3e0] ss:$8 sps:$4 sm:$0xff]  }
 0xbcc   : > { %7519 = vmatprep.mubr.bf16.mxu1 %v15674_v22  ;;  %8027 = vmatprep.mubr.bf16.mxu0 %v15677_v56  ;;  %v15719_v22 = vld [vmem:[#allocation2 + $0x3f4] ss:$8 sps:$4 sm:$0xff]   ;;  %v15717_v56 = vld [vmem:[#allocation2 + $0x3f0] ss:$8 sps:$4 sm:$0xff]  }
 0xbcd   : > { %14911 = vmatpush3.bf16.msra.mxu1 %v8512_v27 }
 0xbd3   : > { %7520 = vmatmul.mubr.bf16.gmra.mrb[48].mxu1 %v15672_v33  ;;  %8028 = vmatmul.mubr.bf16.gmra.mrb[16].mxu0 %v15675_v51 }
 0xbd4   : > { %7527 = vmatprep.mubr.bf16.mxu1 %v15680_v37  ;;  %8035 = vmatprep.mubr.bf16.mxu0 %v15683_v17 }
 0xbdb   : > { %7528 = vmatmul.mubr.bf16.gmra.mrb[52].mxu1 %v15678_v47  ;;  %8036 = vmatmul.mubr.bf16.gmra.mrb[20].mxu0 %v15681_v11 }
 0xbdc   : > { %7535 = vmatprep.mubr.bf16.mxu1 %v15686_v60  ;;  %8043 = vmatprep.mubr.bf16.mxu0 %v15689_v12 }
 0xbe3   : > { %7536 = vmatmul.mubr.bf16.gmra.mrb[56].mxu1 %v15684_v49  ;;  %8044 = vmatmul.mubr.bf16.gmra.mrb[24].mxu0 %v15687_v55 }
 0xbe4   : > { %7543 = vmatprep.mubr.bf16.mxu1 %v15692_v38  ;;  %8051 = vmatprep.mubr.bf16.mxu0 %v15695_v41 }
 0xbeb   : > { %7544 = vmatmul.mubr.bf16.gmra.mrb[60].mxu1 %v15690_v2  ;;  %8052 = vmatmul.mubr.bf16.gmra.mrb[28].mxu0 %v15693_v34 }
 0xbec   : > { %8059 = vmatprep.mubr.bf16.mxu0 %v15698_v18 }
 0xbf3   : > { %8060 = vmatmul.mubr.bf16.gmra.mrb[32].mxu0 %v15696_v42 }
 0xbf4   : > { %8067 = vmatprep.mubr.bf16.mxu0 %v15701_v14 }
 0xbfb   : > { %8068 = vmatmul.mubr.bf16.gmra.mrb[36].mxu0 %v15699_v16 }
 0xbfc   : > { %8075 = vmatprep.mubr.bf16.mxu0 %v15704_v4 }
 0xc03   : > { %8076 = vmatmul.mubr.bf16.gmra.mrb[40].mxu0 %v15702_v48 }
 0xc04   : > { %8083 = vmatprep.mubr.bf16.mxu0 %v15707_v3 }
 0xc0b   : > { %8084 = vmatmul.mubr.bf16.gmra.mrb[44].mxu0 %v15705_v46 }
 0xc0c   : > { %8091 = vmatprep.mubr.bf16.mxu0 %v15710_v25 }
 0xc13   : > { %8092 = vmatmul.mubr.bf16.gmra.mrb[48].mxu0 %v15708_v20 }
 0xc14   : > { %8099 = vmatprep.mubr.bf16.mxu0 %v15713_v35 }
 0xc1b   : > { %8100 = vmatmul.mubr.bf16.gmra.mrb[52].mxu0 %v15711_v6 }
 0xc1c   : > { %8107 = vmatprep.mubr.bf16.mxu0 %v15716_v44 }
 0xc23   : > { %8108 = vmatmul.mubr.bf16.gmra.mrb[56].mxu0 %v15714_v31 }
 0xc24   : > { %8115 = vmatprep.mubr.bf16.mxu0 %v15719_v22 }
 0xc2b   : > { %8116 = vmatmul.mubr.bf16.gmra.mrb[60].mxu0 %v15717_v56 }
 0xc46   : > { %v13729_v33 = vpop.f32.mrb[0].mxu1 }
 0xc47   : > { %v13730_v51 = vpop.f32.mrb[1].mxu1 }
 0xc48   : > { %v13731_v37 = vadd.f32 %v13730_v51, %v13729_v33  ;;  %v13732_v17 = vpop.f32.mrb[2].mxu1 }
 0xc49   : > { %v13733_v47 = vpop.f32.mrb[3].mxu1 }
 0xc4a   : > { %v18985_v11 = vadd.f32 %v13731_v37, %v18823_v23  ;;  %v13734_v60 = vadd.f32 %v13733_v47, %v13732_v17 }
 0xc4c   : > { %v18988_v12 = vadd.f32 %v13734_v60, %v18830_v0 }
 0xc4e   : > { %v13735_v49 = vpop.f32.mrb[4].mxu1 }
 0xc4f   : > { %v13736_v55 = vpop.f32.mrb[5].mxu1 }
 0xc50   : > { %v13737_v38 = vadd.f32 %v13736_v55, %v13735_v49  ;;  %v13738_v41 = vpop.f32.mrb[6].mxu1 }
 0xc51   : > { %v13739_v2 = vpop.f32.mrb[7].mxu1 }
 0xc52   : > { %v18991_v34 = vadd.f32 %v13737_v38, %v18837_v58  ;;  %v13740_v18 = vadd.f32 %v13739_v2, %v13738_v41 }
 0xc54   : > { %v18994_v42 = vadd.f32 %v13740_v18, %v18844_v28 }
 0xc56   : > { %v13741_v14 = vpop.f32.mrb[8].mxu1 }
 0xc57   : > { %v13742_v16 = vpop.f32.mrb[9].mxu1 }
 0xc58   : > { %v13743_v23 = vadd.f32 %v13742_v16, %v13741_v14  ;;  %v13744_v4 = vpop.f32.mrb[10].mxu1 }
 0xc59   : > { %v13745_v48 = vpop.f32.mrb[11].mxu1 }
 0xc5a   : > { %v18997_v0 = vadd.f32 %v13743_v23, %v18851_v15  ;;  %v13746_v3 = vadd.f32 %v13745_v48, %v13744_v4 }
 0xc5c   : > { %v19000_v46 = vadd.f32 %v13746_v3, %v18858_v45 }
 0xc5e   : > { %v13747_v25 = vpop.f32.mrb[12].mxu1 }
 0xc5f   : > { %v13748_v20 = vpop.f32.mrb[13].mxu1 }
 0xc60   : > { %v13749_v58 = vadd.f32 %v13748_v20, %v13747_v25  ;;  %v13750_v35 = vpop.f32.mrb[14].mxu1 }
 0xc61   : > { %v13751_v6 = vpop.f32.mrb[15].mxu1 }
 0xc62   : > { %v19003_v28 = vadd.f32 %v13749_v58, %v18865_v52  ;;  %v13752_v44 = vadd.f32 %v13751_v6, %v13750_v35 }
 0xc64   : > { %v19006_v26 = vadd.f32 %v13752_v44, %v18872_v30 }
 0xc66   : > { %v13753_v27 = vpop.f32.mrb[16].mxu1 }
 0xc67   : > { %v13754_v31 = vpop.f32.mrb[17].mxu1 }
 0xc68   : > { %v13755_v15 = vadd.f32 %v13754_v31, %v13753_v27  ;;  %v13756_v22 = vpop.f32.mrb[18].mxu1 }
 0xc69   : > { %v13757_v56 = vpop.f32.mrb[19].mxu1 }
 0xc6a   : > { %v19009_v45 = vadd.f32 %v13755_v15, %v18879_v54  ;;  %v13758_v33 = vadd.f32 %v13757_v56, %v13756_v22 }
 0xc6c   : > { %v19012_v51 = vadd.f32 %v13758_v33, %v18884_v19 }
 0xc6e   : > { %v13759_v37 = vpop.f32.mrb[20].mxu1 }
 0xc6f   : > { %v13760_v17 = vpop.f32.mrb[21].mxu1 }
 0xc70   : > { %v13761_v52 = vadd.f32 %v13760_v17, %v13759_v37  ;;  %v13762_v47 = vpop.f32.mrb[22].mxu1  ;;  %v8191_v17 = vpop.permute.xlu0 %8190 }
 0xc71   : > { %v13763_v60 = vpop.f32.mrb[23].mxu1 }
 0xc72   : > { %v19015_v30 = vadd.f32 %v13761_v52, %v18891_v53  ;;  %v13764_v49 = vadd.f32 %v13763_v60, %v13762_v47  ;;  %v8196_v60 = vpop.permute.xlu1 %8195 }
 0xc74   : > { %v19018_v55 = vadd.f32 %v13764_v49, %v18894_v5 }
 0xc76   : > { %v13765_v38 = vpop.f32.mrb[24].mxu1 }
 0xc77   : > { %v13766_v41 = vpop.f32.mrb[25].mxu1 }
 0xc78   : > { %v13767_v54 = vadd.f32 %v13766_v41, %v13765_v38  ;;  %v13768_v2 = vpop.f32.mrb[26].mxu1 }
 0xc79   : > { %v13769_v18 = vpop.f32.mrb[27].mxu1 }
 0xc7a   : > { %v19021_v19 = vadd.f32 %v13767_v54, %v18901_v40  ;;  %v13770_v14 = vadd.f32 %v13769_v18, %v13768_v2 }
 0xc7c   : > { %v19024_v16 = vadd.f32 %v13770_v14, %v18904_v29 }
 0xc7e   : > { %v13771_v23 = vpop.f32.mrb[28].mxu1 }
 0xc7f   : > { %v13772_v4 = vpop.f32.mrb[29].mxu1 }
 0xc80   : > { %v13773_v53 = vadd.f32 %v13772_v4, %v13771_v23  ;;  %v13774_v48 = vpop.f32.mrb[30].mxu1 }
 0xc81   : > { %v13775_v3 = vpop.f32.mrb[31].mxu1 }
 0xc82   : > { %v19027_v5 = vadd.f32 %v13773_v53, %v18911_v9  ;;  %v13776_v25 = vadd.f32 %v13775_v3, %v13774_v48 }
 0xc84   : > { %v19030_v20 = vadd.f32 %v13776_v25, %v18914_v50 }
 0xc86   : > { %v13777_v58 = vpop.f32.mrb[32].mxu1  ;;  %v13858_v35 = vpop.f32.mrb[0].mxu0 }
 0xc87   : > { %v13778_v40 = vpop.f32.mrb[33].mxu1  ;;  %v13859_v6 = vpop.f32.mrb[1].mxu0 }
 0xc88   : > { %v13779_v44 = vadd.f32 %v13778_v40, %v13777_v58  ;;  %v13860_v27 = vadd.f32 %v13859_v6, %v13858_v35  ;;  %v13780_v29 = vpop.f32.mrb[34].mxu1  ;;  %v13861_v31 = vpop.f32.mrb[2].mxu0 }
 0xc89   : > { %v13781_v15 = vpop.f32.mrb[35].mxu1  ;;  %v13862_v22 = vpop.f32.mrb[3].mxu0 }
 0xc8a   : > { %v19033_v56 = vadd.f32 %v13779_v44, %v18917_v7  ;;  %v8124_v9 = vadd.f32 %v13860_v27, %v18985_v11  ;;  %v13782_v33 = vadd.f32 %v13781_v15, %v13780_v29  ;;  %v13863_v37 = vadd.f32 %v13862_v22, %v13861_v31  ;;  %v12208_v7 = vld [vmem:[%s19754_s11 + $0x4] sm:$0xf]  ;;  %v8201_v40 = vpop.permute.xlu0 %8200  ;;  %v8206_v31 = vpop.permute.xlu1 %8205 }
 0xc8b   : > { %15063 = vmatprep.subr.msk.bf16.mxu1 %vm8510_vm3, %v12208_v7 }
 0xc8c   : > { %v8348_v50 = vadd.f32 %v8191_v17, %v8124_v9  ;;  %v19037_v52 = vadd.f32 %v13782_v33, %v18920_v24  ;;  %v8125_v47 = vadd.f32 %v13863_v37, %v18988_v12 }
 0xc8e   : > { %v8380_v49 = vmul.f32 0.2, %v8348_v50  ;;  %v8349_v38 = vadd.f32 %v8196_v60, %v8125_v47  ;;  %v13783_v41 = vpop.f32.mrb[36].mxu1  ;;  %v13864_v54 = vpop.f32.mrb[4].mxu0 }
 0xc8f   : > { %v13784_v2 = vpop.f32.mrb[37].mxu1  ;;  %v13865_v18 = vpop.f32.mrb[5].mxu0 }
 0xc90   : > { %v8381_v11 = vmul.f32 0.2, %v8349_v38  ;;  %v13785_v14 = vadd.f32 %v13784_v2, %v13783_v41  ;;  %v13866_v23 = vadd.f32 %v13865_v18, %v13864_v54  ;;  %v13786_v4 = vpop.f32.mrb[38].mxu1  ;;  %v13867_v53 = vpop.f32.mrb[6].mxu0  ;;  %v8412_v24 = vmax.f32 %v8348_v50, %v8380_v49 }
 0xc91   : > { %v13787_v12 = vpop.f32.mrb[39].mxu1  ;;  %v13868_v48 = vpop.f32.mrb[7].mxu0 }
 0xc92   : > { %v8413_v3 = vmax.f32 %v8349_v38, %v8381_v11  ;;  %v19045_v25 = vadd.f32 %v13785_v14, %v18923_v21  ;;  %v8126_v58 = vadd.f32 %v13866_v23, %v18991_v34  ;;  %v13788_v35 = vadd.f32 %v13787_v12, %v13786_v4  ;;  %v8211_v18 = vpop.permute.xlu0 %8210 }
 0xc93   : > { %v13869_v6 = vadd.f32 %v13868_v48, %v13867_v53  ;;  %v8726_v48 = vsel %vm8510_vm3, %v12208_v7, 0 }
 0xc94   : > { %v8350_v44 = vadd.f32 %v8201_v40, %v8126_v58  ;;  %v19049_v27 = vadd.f32 %v13788_v35, %v18926_v63  ;;  %v19051_v29 = vpack.c.bf16 %v8413_v3, %v8412_v24  ;;  %v8216_v24 = vpop.permute.xlu1 %8215 }
 0xc95   : > { %v8127_v15 = vadd.f32 %v13869_v6, %v18994_v42 }
 0xc96   : > { %v13789_v22 = vpop.f32.mrb[40].mxu1  ;;  %v13870_v9 = vpop.f32.mrb[8].mxu0  ;;  %14912 = vmatprep.mubr.msk.bf16.mxu1 %vm8461_vm4, %v19051_v29  ;;  %v8382_v21 = vmul.f32 0.2, %v8350_v44 }
 0xc97   : > { %v8351_v34 = vadd.f32 %v8206_v31, %v8127_v15  ;;  %v13790_v33 = vpop.f32.mrb[41].mxu1  ;;  %v13871_v37 = vpop.f32.mrb[9].mxu0 }
 0xc98   : > { %v13791_v17 = vadd.f32 %v13790_v33, %v13789_v22  ;;  %v13872_v50 = vadd.f32 %v13871_v37, %v13870_v9  ;;  %v13792_v47 = vpop.f32.mrb[42].mxu1  ;;  %v13873_v60 = vpop.f32.mrb[10].mxu0  ;;  %v8414_v11 = vmax.f32 %v8350_v44, %v8382_v21 }
 0xc99   : > { %v8383_v63 = vmul.f32 0.2, %v8351_v34  ;;  %v13793_v49 = vpop.f32.mrb[43].mxu1  ;;  %v13874_v38 = vpop.f32.mrb[11].mxu0 }
 0xc9a   : > { %v19057_v41 = vadd.f32 %v13791_v17, %v18929_v39  ;;  %v8128_v42 = vadd.f32 %v13872_v50, %v18997_v0  ;;  %v13794_v54 = vadd.f32 %v13793_v49, %v13792_v47  ;;  %v13875_v2 = vadd.f32 %v13874_v38, %v13873_v60  ;;  %v8221_v37 = vpop.permute.xlu0 %8220 }
 0xc9b   : > { %v8415_v14 = vmax.f32 %v8351_v34, %v8383_v63  ;;  %v8226_v63 = vpop.permute.xlu1 %8225 }
 0xc9c   : > { %v8352_v23 = vadd.f32 %v8211_v18, %v8128_v42  ;;  %v19061_v4 = vadd.f32 %v13794_v54, %v18932_v62  ;;  %v8129_v53 = vadd.f32 %v13875_v2, %v19000_v46 }
 0xc9d   : > { %v19064_v12 = vpack.c.bf16 %v8415_v14, %v8414_v11 }
 0xc9e   : > { %v8384_v39 = vmul.f32 0.2, %v8352_v23  ;;  %v8353_v3 = vadd.f32 %v8216_v24, %v8129_v53  ;;  %v13795_v58 = vpop.f32.mrb[44].mxu1  ;;  %v13876_v0 = vpop.f32.mrb[12].mxu0 }
 0xc9f   : > { %14913 = vmatmul.mubr.msk.bf16.vlgmr.msra.gmra.mrb[64].mxu1 %vm8461_vm4, %v19064_v12  ;;  %v13796_v35 = vpop.f32.mrb[45].mxu1  ;;  %v13877_v40 = vpop.f32.mrb[13].mxu0 }
 0xca0   : > { %v8385_v6 = vmul.f32 0.2, %v8353_v3  ;;  %v13797_v44 = vadd.f32 %v13796_v35, %v13795_v58  ;;  %v13878_v62 = vadd.f32 %v13877_v40, %v13876_v0  ;;  %v13798_v31 = vpop.f32.mrb[46].mxu1  ;;  %v13879_v15 = vpop.f32.mrb[14].mxu0  ;;  %14945 = vmatpush3.bf16.msra.mxu1 %v8726_v48  ;;  %v8416_v46 = vmax.f32 %v8352_v23, %v8384_v39 }
 0xca1   : > { %v13799_v22 = vpop.f32.mrb[47].mxu1  ;;  %v13880_v9 = vpop.f32.mrb[15].mxu0 }
 0xca2   : > { %v8417_v21 = vmax.f32 %v8353_v3, %v8385_v6  ;;  %v19070_v7 = vadd.f32 %v13797_v44, %v18935_v10  ;;  %v8130_v34 = vadd.f32 %v13878_v62, %v19003_v28  ;;  %v13800_v33 = vadd.f32 %v13799_v22, %v13798_v31  ;;  %v8231_v58 = vpop.permute.xlu0 %8230  ;;  %v8236_v62 = vpop.permute.xlu1 %8235 }
 0xca3   : > { %v13881_v17 = vadd.f32 %v13880_v9, %v13879_v15 }
 0xca4   : > { %v8354_v50 = vadd.f32 %v8221_v37, %v8130_v34  ;;  %v19074_v47 = vadd.f32 %v13800_v33, %v18938_v57  ;;  %v19076_v60 = vpack.c.bf16 %v8417_v21, %v8416_v46 }
 0xca5   : > { %v8131_v49 = vadd.f32 %v13881_v17, %v19006_v26 }
 0xca6   : > { %v13801_v38 = vpop.f32.mrb[48].mxu1  ;;  %v13882_v42 = vpop.f32.mrb[16].mxu0  ;;  %14916 = vmatprep.mubr.msk.bf16.mxu1 %vm8461_vm4, %v19076_v60  ;;  %v8386_v10 = vmul.f32 0.2, %v8354_v50 }
 0xca7   : > { %v8355_v54 = vadd.f32 %v8226_v63, %v8131_v49  ;;  %v13802_v28 = vpop.f32.mrb[49].mxu1  ;;  %v13883_v2 = vpop.f32.mrb[17].mxu0 }
 0xca8   : > { %v13803_v18 = vadd.f32 %v13802_v28, %v13801_v38  ;;  %v13884_v11 = vadd.f32 %v13883_v2, %v13882_v42  ;;  %v13804_v14 = vpop.f32.mrb[50].mxu1  ;;  %v13885_v23 = vpop.f32.mrb[18].mxu0  ;;  %v8418_v0 = vmax.f32 %v8354_v50, %v8386_v10 }
 0xca9   : > { %v8387_v57 = vmul.f32 0.2, %v8355_v54  ;;  %v13805_v53 = vpop.f32.mrb[51].mxu1  ;;  %v13886_v24 = vpop.f32.mrb[19].mxu0 }
 0xcaa   : > { %v19082_v48 = vadd.f32 %v13803_v18, %v18941_v43  ;;  %v8132_v26 = vadd.f32 %v13884_v11, %v19009_v45  ;;  %v13806_v39 = vadd.f32 %v13805_v53, %v13804_v14  ;;  %v13887_v3 = vadd.f32 %v13886_v24, %v13885_v23  ;;  %v8241_v10 = vpop.permute.xlu0 %8240  ;;  %v8246_v11 = vpop.permute.xlu1 %8245 }
 0xcab   : > { %v8419_v35 = vmax.f32 %v8355_v54, %v8387_v57 }
 0xcac   : > { %v8356_v40 = vadd.f32 %v8231_v58, %v8132_v26  ;;  %v19086_v6 = vadd.f32 %v13806_v39, %v18944_v13  ;;  %v8133_v44 = vadd.f32 %v13887_v3, %v19012_v51 }
 0xcad   : > { %v19089_v31 = vpack.c.bf16 %v8419_v35, %v8418_v0 }
 0xcae   : > { %v8388_v15 = vmul.f32 0.2, %v8356_v40  ;;  %v8357_v46 = vadd.f32 %v8236_v62, %v8133_v44  ;;  %v13807_v43 = vpop.f32.mrb[52].mxu1  ;;  %v13888_v22 = vpop.f32.mrb[20].mxu0 }
 0xcaf   : > { %14917 = vmatmul.mubr.msk.bf16.gmra.mrb[68].mxu1 %vm8461_vm4, %v19089_v31  ;;  %v13808_v45 = vpop.f32.mrb[53].mxu1  ;;  %v13889_v9 = vpop.f32.mrb[21].mxu0 }
 0xcb0   : > { %v8389_v21 = vmul.f32 0.2, %v8357_v46  ;;  %v13809_v34 = vadd.f32 %v13808_v45, %v13807_v43  ;;  %v13890_v33 = vadd.f32 %v13889_v9, %v13888_v22  ;;  %v13810_v37 = vpop.f32.mrb[54].mxu1  ;;  %v13891_v13 = vpop.f32.mrb[22].mxu0  ;;  %v8420_v17 = vmax.f32 %v8356_v40, %v8388_v15 }
 0xcb1   : > { %v13811_v50 = vpop.f32.mrb[55].mxu1  ;;  %v13892_v51 = vpop.f32.mrb[23].mxu0 }
 0xcb2   : > { %v8421_v63 = vmax.f32 %v8357_v46, %v8389_v21  ;;  %v19094_v49 = vadd.f32 %v13809_v34, %v18947_v36  ;;  %v8134_v38 = vadd.f32 %v13890_v33, %v19015_v30  ;;  %v13812_v42 = vadd.f32 %v13811_v50, %v13810_v37  ;;  %v8251_v15 = vpop.permute.xlu0 %8250  ;;  %v8256_v21 = vpop.permute.xlu1 %8255 }
 0xcb3   : > { %v13893_v54 = vadd.f32 %v13892_v51, %v13891_v13 }
 0xcb4   : > { %v8358_v28 = vadd.f32 %v8241_v10, %v8134_v38  ;;  %v19098_v2 = vadd.f32 %v13812_v42, %v18950_v61  ;;  %v19100_v18 = vpack.c.bf16 %v8421_v63, %v8420_v17 }
 0xcb5   : > { %v8135_v14 = vadd.f32 %v13893_v54, %v19018_v55 }
 0xcb6   : > { %v13813_v23 = vpop.f32.mrb[56].mxu1  ;;  %v13894_v57 = vpop.f32.mrb[24].mxu0  ;;  %14920 = vmatprep.mubr.msk.bf16.mxu1 %vm8461_vm4, %v19100_v18  ;;  %v8390_v36 = vmul.f32 0.2, %v8358_v28 }
 0xcb7   : > { %v8359_v53 = vadd.f32 %v8246_v11, %v8135_v14  ;;  %v13814_v30 = vpop.f32.mrb[57].mxu1  ;;  %v13895_v24 = vpop.f32.mrb[25].mxu0 }
 0xcb8   : > { %v13815_v26 = vadd.f32 %v13814_v30, %v13813_v23  ;;  %v13896_v39 = vadd.f32 %v13895_v24, %v13894_v57  ;;  %v13816_v3 = vpop.f32.mrb[58].mxu1  ;;  %v13897_v58 = vpop.f32.mrb[26].mxu0  ;;  %v8422_v46 = vmax.f32 %v8358_v28, %v8390_v36 }
 0xcb9   : > { %v8391_v61 = vmul.f32 0.2, %v8359_v53  ;;  %v13817_v0 = vpop.f32.mrb[59].mxu1  ;;  %v13898_v35 = vpop.f32.mrb[27].mxu0 }
 0xcba   : > { %v19106_v40 = vadd.f32 %v13815_v26, %v18953_v59  ;;  %v8136_v55 = vadd.f32 %v13896_v39, %v19021_v19  ;;  %v13818_v44 = vadd.f32 %v13817_v0, %v13816_v3  ;;  %v13899_v62 = vadd.f32 %v13898_v35, %v13897_v58  ;;  %v8261_v23 = vpop.permute.xlu0 %8260  ;;  %v8266_v26 = vpop.permute.xlu1 %8265 }
 0xcbb   : > { %v8423_v43 = vmax.f32 %v8359_v53, %v8391_v61 }
 0xcbc   : > { %v8360_v22 = vadd.f32 %v8251_v15, %v8136_v55  ;;  %v19110_v45 = vadd.f32 %v13818_v44, %v18956_v1  ;;  %v8137_v9 = vadd.f32 %v13899_v62, %v19024_v16 }
 0xcbd   : > { %v19113_v34 = vpack.c.bf16 %v8423_v43, %v8422_v46 }
 0xcbe   : > { %v8392_v33 = vmul.f32 0.2, %v8360_v22  ;;  %v8361_v37 = vadd.f32 %v8256_v21, %v8137_v9  ;;  %v13819_v59 = vpop.f32.mrb[60].mxu1  ;;  %v13900_v13 = vpop.f32.mrb[28].mxu0 }
 0xcbf   : > { %14921 = vmatmul.mubr.msk.bf16.gmra.mrb[72].mxu1 %vm8461_vm4, %v19113_v34  ;;  %v13820_v19 = vpop.f32.mrb[61].mxu1  ;;  %v13901_v17 = vpop.f32.mrb[29].mxu0 }
 0xcc0   : > { %v8393_v50 = vmul.f32 0.2, %v8361_v37  ;;  %v13821_v51 = vadd.f32 %v13820_v19, %v13819_v59  ;;  %v13902_v63 = vadd.f32 %v13901_v17, %v13900_v13  ;;  %v13822_v38 = vpop.f32.mrb[62].mxu1  ;;  %v13903_v1 = vpop.f32.mrb[30].mxu0  ;;  %v8424_v42 = vmax.f32 %v8360_v22, %v8392_v33 }
 0xcc1   : > { %v13823_v10 = vpop.f32.mrb[63].mxu1  ;;  %v13904_v16 = vpop.f32.mrb[31].mxu0 }
 0xcc2   : > { %v8425_v54 = vmax.f32 %v8361_v37, %v8393_v50  ;;  %v19118_v28 = vadd.f32 %v13821_v51, %v18959_v8  ;;  %v8138_v11 = vadd.f32 %v13902_v63, %v19027_v5  ;;  %v13824_v14 = vadd.f32 %v13823_v10, %v13822_v38  ;;  %v8271_v44 = vpop.permute.xlu0 %8270  ;;  %v8276_v43 = vpop.permute.xlu1 %8275 }
 0xcc3   : > { %v13905_v57 = vadd.f32 %v13904_v16, %v13903_v1 }
 0xcc4   : > { %v8362_v36 = vadd.f32 %v8261_v23, %v8138_v11  ;;  %v19122_v53 = vadd.f32 %v13824_v14, %v18962_v32  ;;  %v19124_v30 = vpack.c.bf16 %v8425_v54, %v8424_v42 }
 0xcc5   : > { %v8139_v24 = vadd.f32 %v13905_v57, %v19030_v20 }
 0xcc6   : > { %v13906_v39 = vpop.f32.mrb[32].mxu0  ;;  %14924 = vmatprep.mubr.msk.bf16.mxu1 %vm8461_vm4, %v19124_v30  ;;  %v8394_v8 = vmul.f32 0.2, %v8362_v36  ;;  %v8286_v10 = vpop.permute.xlu1 %8285 }
 0xcc7   : > { %v8363_v3 = vadd.f32 %v8266_v26, %v8139_v24  ;;  %v13907_v58 = vpop.f32.mrb[33].mxu0 }
 0xcc8   : > { %v13908_v5 = vadd.f32 %v13907_v58, %v13906_v39  ;;  %v13909_v61 = vpop.f32.mrb[34].mxu0  ;;  %v8426_v62 = vmax.f32 %v8362_v36, %v8394_v8 }
 0xcc9   : > { %v8395_v0 = vmul.f32 0.2, %v8363_v3  ;;  %v13910_v35 = vpop.f32.mrb[35].mxu0 }
 0xcca   : > { %v8140_v55 = vadd.f32 %v13908_v5, %v19033_v56  ;;  %v13911_v32 = vadd.f32 %v13910_v35, %v13909_v61  ;;  %v8296_v61 = vpop.permute.xlu1 %8295 }
 0xccb   : > { %v8427_v15 = vmax.f32 %v8363_v3, %v8395_v0 }
 0xccc   : > { %v8364_v46 = vadd.f32 %v8271_v44, %v8140_v55  ;;  %v8141_v20 = vadd.f32 %v13911_v32, %v19037_v52  ;;  %v8281_v52 = vpop.permute.xlu0 %8280 }
 0xccd   : > { %v19131_v22 = vpack.c.bf16 %v8427_v15, %v8426_v62 }
 0xcce   : > { %v8396_v9 = vmul.f32 0.2, %v8364_v46  ;;  %v8365_v21 = vadd.f32 %v8276_v43, %v8141_v20  ;;  %v13912_v33 = vpop.f32.mrb[36].mxu0 }
 0xccf   : > { %14925 = vmatmul.mubr.msk.bf16.gmra.mrb[76].mxu1 %vm8461_vm4, %v19131_v22  ;;  %v13913_v37 = vpop.f32.mrb[37].mxu0 }
 0xcd0   : > { %v8397_v59 = vmul.f32 0.2, %v8365_v21  ;;  %v13914_v13 = vadd.f32 %v13913_v37, %v13912_v33  ;;  %v13915_v56 = vpop.f32.mrb[38].mxu0  ;;  %v8428_v17 = vmax.f32 %v8364_v46, %v8396_v9 }
 0xcd1   : > { %v13916_v19 = vpop.f32.mrb[39].mxu0 }
 0xcd2   : > { %v8429_v50 = vmax.f32 %v8365_v21, %v8397_v59  ;;  %v8142_v51 = vadd.f32 %v13914_v13, %v19045_v25  ;;  %v13917_v63 = vadd.f32 %v13916_v19, %v13915_v56  ;;  %v8306_v59 = vpop.permute.xlu1 %8305 }
 0xcd4   : > { %v8366_v38 = vadd.f32 %v8281_v52, %v8142_v51  ;;  %v8143_v1 = vadd.f32 %v13917_v63, %v19049_v27  ;;  %v19137_v42 = vpack.c.bf16 %v8429_v50, %v8428_v17  ;;  %v8291_v27 = vpop.permute.xlu0 %8290 }
 0xcd6   : > { %v8398_v16 = vmul.f32 0.2, %v8366_v38  ;;  %v8367_v54 = vadd.f32 %v8286_v10, %v8143_v1  ;;  %v13918_v11 = vpop.f32.mrb[40].mxu0  ;;  %14928 = vmatprep.mubr.msk.bf16.mxu1 %vm8461_vm4, %v19137_v42 }
 0xcd7   : > { %v13919_v14 = vpop.f32.mrb[41].mxu0 }
 0xcd8   : > { %v8399_v23 = vmul.f32 0.2, %v8367_v54  ;;  %v13920_v57 = vadd.f32 %v13919_v14, %v13918_v11  ;;  %v13921_v36 = vpop.f32.mrb[42].mxu0  ;;  %v8430_v25 = vmax.f32 %v8366_v38, %v8398_v16  ;;  %v8301_v21 = vpop.permute.xlu0 %8300 }
 0xcd9   : > { %v13922_v24 = vpop.f32.mrb[43].mxu0  ;;  %v8316_v14 = vpop.permute.xlu1 %8315 }
 0xcda   : > { %v8431_v26 = vmax.f32 %v8367_v54, %v8399_v23  ;;  %v8144_v39 = vadd.f32 %v13920_v57, %v19057_v41  ;;  %v13923_v8 = vadd.f32 %v13922_v24, %v13921_v36 }
 0xcdc   : > { %v19142_v3 = vpack.c.bf16 %v8431_v26, %v8430_v25  ;;  %v8368_v58 = vadd.f32 %v8291_v27, %v8144_v39  ;;  %v8145_v5 = vadd.f32 %v13923_v8, %v19061_v4 }
 0xcde   : > { %v8400_v0 = vmul.f32 0.2, %v8368_v58  ;;  %v8369_v35 = vadd.f32 %v8296_v61, %v8145_v5  ;;  %v13924_v55 = vpop.f32.mrb[44].mxu0  ;;  %14929 = vmatmul.mubr.msk.bf16.gmra.mrb[80].mxu1 %vm8461_vm4, %v19142_v3 }
 0xcdf   : > { %v13925_v32 = vpop.f32.mrb[45].mxu0 }
 0xce0   : > { %v8401_v44 = vmul.f32 0.2, %v8369_v35  ;;  %v13926_v62 = vadd.f32 %v13925_v32, %v13924_v55  ;;  %v13927_v15 = vpop.f32.mrb[46].mxu0  ;;  %v8432_v41 = vmax.f32 %v8368_v58, %v8400_v0  ;;  %v8326_v55 = vpop.permute.xlu1 %8325 }
 0xce1   : > { %v13928_v46 = vpop.f32.mrb[47].mxu0 }
 0xce2   : > { %v8433_v20 = vmax.f32 %v8369_v35, %v8401_v44  ;;  %v8146_v43 = vadd.f32 %v13926_v62, %v19070_v7  ;;  %v13929_v9 = vadd.f32 %v13928_v46, %v13927_v15 }
 0xce4   : > { %v8370_v33 = vadd.f32 %v8301_v21, %v8146_v43  ;;  %v8147_v4 = vadd.f32 %v13929_v9, %v19074_v47  ;;  %v19149_v37 = vpack.c.bf16 %v8433_v20, %v8432_v41  ;;  %v8311_v47 = vpop.permute.xlu0 %8310 }
 0xce6   : > { %v8402_v13 = vmul.f32 0.2, %v8370_v33  ;;  %v8371_v56 = vadd.f32 %v8306_v59, %v8147_v4  ;;  %v13930_v19 = vpop.f32.mrb[48].mxu0  ;;  %14932 = vmatprep.mubr.msk.bf16.mxu1 %vm8461_vm4, %v19149_v37 }
 0xce7   : > { %v13931_v17 = vpop.f32.mrb[49].mxu0 }
 0xce8   : > { %v8403_v50 = vmul.f32 0.2, %v8371_v56  ;;  %v13932_v51 = vadd.f32 %v13931_v17, %v13930_v19  ;;  %v13933_v63 = vpop.f32.mrb[50].mxu0  ;;  %v8434_v7 = vmax.f32 %v8370_v33, %v8402_v13  ;;  %v8321_v61 = vpop.permute.xlu0 %8320 }
 0xce9   : > { %v13934_v52 = vpop.f32.mrb[51].mxu0 }
 0xcea   : > { %v8435_v38 = vmax.f32 %v8371_v56, %v8403_v50  ;;  %v8148_v1 = vadd.f32 %v13932_v51, %v19082_v48  ;;  %v13935_v10 = vadd.f32 %v13934_v52, %v13933_v63  ;;  %v8336_v56 = vpop.permute.xlu1 %8335 }
 0xcec   : > { %v19154_v16 = vpack.c.bf16 %v8435_v38, %v8434_v7  ;;  %v8372_v54 = vadd.f32 %v8311_v47, %v8148_v1  ;;  %v8149_v11 = vadd.f32 %v13935_v10, %v19086_v6 }
 0xcee   : > { %v8404_v23 = vmul.f32 0.2, %v8372_v54  ;;  %v8373_v57 = vadd.f32 %v8316_v14, %v8149_v11  ;;  %v13936_v36 = vpop.f32.mrb[52].mxu0  ;;  %14933 = vmatmul.mubr.msk.bf16.gmra.mrb[84].mxu1 %vm8461_vm4, %v19154_v16 }
 0xcef   : > { %v13937_v24 = vpop.f32.mrb[53].mxu0 }
 0xcf0   : > { %v8405_v25 = vmul.f32 0.2, %v8373_v57  ;;  %v13938_v26 = vadd.f32 %v13937_v24, %v13936_v36  ;;  %v13939_v39 = vpop.f32.mrb[54].mxu0  ;;  %v8436_v48 = vmax.f32 %v8372_v54, %v8404_v23  ;;  %v8346_v23 = vpop.permute.xlu1 %8345 }
 0xcf1   : > { %v13940_v8 = vpop.f32.mrb[55].mxu0 }
 0xcf2   : > { %v8437_v27 = vmax.f32 %v8373_v57, %v8405_v25  ;;  %v8150_v58 = vadd.f32 %v13938_v26, %v19094_v49  ;;  %v13941_v5 = vadd.f32 %v13940_v8, %v13939_v39 }
 0xcf4   : > { %v8374_v0 = vadd.f32 %v8321_v61, %v8150_v58  ;;  %v8151_v6 = vadd.f32 %v13941_v5, %v19098_v2  ;;  %v19161_v35 = vpack.c.bf16 %v8437_v27, %v8436_v48  ;;  %v8331_v2 = vpop.permute.xlu0 %8330 }
 0xcf6   : > { %v8406_v32 = vmul.f32 0.2, %v8374_v0  ;;  %v8375_v44 = vadd.f32 %v8326_v55, %v8151_v6  ;;  %v13942_v62 = vpop.f32.mrb[56].mxu0  ;;  %14936 = vmatprep.mubr.msk.bf16.mxu1 %vm8461_vm4, %v19161_v35 }
 0xcf7   : > { %v13943_v15 = vpop.f32.mrb[57].mxu0 }
 0xcf8   : > { %v8407_v46 = vmul.f32 0.2, %v8375_v44  ;;  %v13944_v41 = vadd.f32 %v13943_v15, %v13942_v62  ;;  %v13945_v20 = vpop.f32.mrb[58].mxu0  ;;  %v8438_v49 = vmax.f32 %v8374_v0, %v8406_v32  ;;  %v8341_v54 = vpop.permute.xlu0 %8340 }
 0xcf9   : > { %v13946_v43 = vpop.f32.mrb[59].mxu0 }
 0xcfa   : > { %v8439_v9 = vmax.f32 %v8375_v44, %v8407_v46  ;;  %v8152_v21 = vadd.f32 %v13944_v41, %v19106_v40  ;;  %v13947_v33 = vadd.f32 %v13946_v43, %v13945_v20 }
 0xcfc   : > { %v19166_v4 = vpack.c.bf16 %v8439_v9, %v8438_v49  ;;  %v8376_v59 = vadd.f32 %v8331_v2, %v8152_v21  ;;  %v8153_v13 = vadd.f32 %v13947_v33, %v19110_v45 }
 0xcfe   : > { %v8408_v19 = vmul.f32 0.2, %v8376_v59  ;;  %v8377_v17 = vadd.f32 %v8336_v56, %v8153_v13  ;;  %v13948_v50 = vpop.f32.mrb[60].mxu0  ;;  %14937 = vmatmul.mubr.msk.bf16.gmra.mrb[88].mxu1 %vm8461_vm4, %v19166_v4  ;;  %v15746_v13 = vld [vmem:[#allocation4 + $0x4] ss:$8 sps:$4 sm:$0xff]  }
 0xcff   : > { %v13949_v51 = vpop.f32.mrb[61].mxu0 }
 0xd00   : > { %v8409_v63 = vmul.f32 0.2, %v8377_v17  ;;  %v13950_v52 = vadd.f32 %v13949_v51, %v13948_v50  ;;  %v13951_v7 = vpop.f32.mrb[62].mxu0  ;;  %v8440_v40 = vmax.f32 %v8376_v59, %v8408_v19  ;;  %v15722_v59 = vld [vmem:[#allocation4 + $0x104] ss:$8 sps:$4 sm:$0xff]  }
 0xd01   : > { %v13952_v38 = vpop.f32.mrb[63].mxu0  ;;  %9130 = vmatprep.mubr.bf16.mxu0 %v15722_v59  ;;  %v15764_v59 = vld [vmem:[#allocation4 + $0x34] ss:$8 sps:$4 sm:$0xff]  }
 0xd02   : > { %v8441_v1 = vmax.f32 %v8377_v17, %v8409_v63  ;;  %v8154_v10 = vadd.f32 %v13950_v52, %v19118_v28  ;;  %v13953_v47 = vadd.f32 %v13952_v38, %v13951_v7 }
 0xd04   : > { %v8378_v11 = vadd.f32 %v8341_v54, %v8154_v10  ;;  %v8155_v45 = vadd.f32 %v13953_v47, %v19122_v53  ;;  %v19173_v14 = vpack.c.bf16 %v8441_v1, %v8440_v40 }
 0xd06   : > { %v8410_v57 = vmul.f32 0.2, %v8378_v11  ;;  %v8379_v36 = vadd.f32 %v8346_v23, %v8155_v45  ;;  %14940 = vmatprep.mubr.msk.bf16.mxu1 %vm8461_vm4, %v19173_v14 }
 0xd08   : > { %v8411_v24 = vmul.f32 0.2, %v8379_v36  ;;  %v8442_v25 = vmax.f32 %v8378_v11, %v8410_v57 }
 0xd0a   : > { %v8443_v26 = vmax.f32 %v8379_v36, %v8411_v24 }
 0xd0c   : > { %v19177_v39 = vpack.c.bf16 %v8443_v26, %v8442_v25 }
 0xd0e   : > { %14941 = vmatmul.mubr.msk.bf16.gmra.mrb[92].mxu1 %vm8461_vm4, %v19177_v39 }
 0xd0f   : > { %14946 = vmatprep.mubr.msk.bf16.mxu1 %vm8461_vm4, %v19051_v29 }
 0xd16   : > { %14947 = vmatmul.mubr.msk.bf16.vlgmr.msra.gmra.mrb[96].mxu1 %vm8461_vm4, %v19064_v12 }
 0xd17   : > { %14950 = vmatprep.mubr.msk.bf16.mxu1 %vm8461_vm4, %v19076_v60 }
 0xd1e   : > { %14951 = vmatmul.mubr.msk.bf16.gmra.mrb[100].mxu1 %vm8461_vm4, %v19089_v31 }
 0xd1f   : > { %14954 = vmatprep.mubr.msk.bf16.mxu1 %vm8461_vm4, %v19100_v18 }
 0xd26   : > { %14955 = vmatmul.mubr.msk.bf16.gmra.mrb[104].mxu1 %vm8461_vm4, %v19113_v34 }
 0xd27   : > { %14958 = vmatprep.mubr.msk.bf16.mxu1 %vm8461_vm4, %v19124_v30 }
 0xd2e   : > { %14959 = vmatmul.mubr.msk.bf16.gmra.mrb[108].mxu1 %vm8461_vm4, %v19131_v22 }
 0xd2f   : > { %14962 = vmatprep.mubr.msk.bf16.mxu1 %vm8461_vm4, %v19137_v42 }
 0xd36   : > { %14963 = vmatmul.mubr.msk.bf16.gmra.mrb[112].mxu1 %vm8461_vm4, %v19142_v3 }
 0xd37   : > { %14966 = vmatprep.mubr.msk.bf16.mxu1 %vm8461_vm4, %v19149_v37 }
 0xd3e   : > { %14967 = vmatmul.mubr.msk.bf16.gmra.mrb[116].mxu1 %vm8461_vm4, %v19154_v16 }
 0xd3f   : > { %14970 = vmatprep.mubr.msk.bf16.mxu1 %vm8461_vm4, %v19161_v35 }
 0xd46   : > { %14971 = vmatmul.mubr.msk.bf16.gmra.mrb[120].mxu1 %vm8461_vm4, %v19166_v4 }
 0xd47   : > { %14974 = vmatprep.mubr.msk.bf16.mxu1 %vm8461_vm4, %v19173_v14 }
 0xd4e   : > { %14975 = vmatmul.mubr.msk.bf16.gmra.mrb[124].mxu1 %vm8461_vm4, %v19177_v39 }
 0xd4f   : > { %9451 = vmatprep.mubr.bf16.mxu1 %v15746_v13 }
 0xd72   : > { %v14914_v28 = vpop.f32.mrb[64].mxu1 }
 0xd73   : > { %v8548_v53 = vpop.f32.mrb[65].mxu1 }
 0xd74   : > { %v14915_v8 = vpop.f32.mrb[66].mxu1 }
 0xd75   : > { %v8708_v48 = vpack.c.bf16 %v14915_v8, %v14914_v28  ;;  %v8551_v27 = vpop.f32.mrb[67].mxu1 }
 0xd76   : > { %v8707_v58 = vpack.c.bf16 %v8551_v27, %v8548_v53 }
 0xd82   : > { %v14918_v5 = vpop.f32.mrb[68].mxu1 }
 0xd83   : > { %v8564_v61 = vpop.f32.mrb[69].mxu1 }
 0xd84   : > { %v14919_v0 = vpop.f32.mrb[70].mxu1 }
 0xd85   : > { %v8710_v6 = vpack.c.bf16 %v14919_v0, %v14918_v5  ;;  %v8567_v55 = vpop.f32.mrb[71].mxu1  ;;  %v15752_v0 = vld [vmem:[#allocation4 + $0x14] ss:$8 sps:$4 sm:$0xff]  }
 0xd86   : > { %v8709_v32 = vpack.c.bf16 %v8567_v55, %v8564_v61 }
 0xd92   : > { %v14922_v44 = vpop.f32.mrb[72].mxu1 }
 0xd93   : > { %v8580_v62 = vpop.f32.mrb[73].mxu1 }
 0xd94   : > { %v14923_v15 = vpop.f32.mrb[74].mxu1 }
 0xd95   : > { %v8712_v46 = vpack.c.bf16 %v14923_v15, %v14922_v44  ;;  %v8583_v41 = vpop.f32.mrb[75].mxu1 }
 0xd96   : > { %v8711_v20 = vpack.c.bf16 %v8583_v41, %v8580_v62  ;;  %v15750_v62 = vld [vmem:[#allocation4 + $0x10] ss:$8 sps:$4 sm:$0xff]   ;;  %v15758_v41 = vld [vmem:[#allocation4 + $0x24] ss:$8 sps:$4 sm:$0xff]  }
 0xda2   : > { %v14926_v43 = vpop.f32.mrb[76].mxu1 }
 0xda3   : > { %v8596_v49 = vpop.f32.mrb[77].mxu1 }
 0xda4   : > { %v14927_v9 = vpop.f32.mrb[78].mxu1 }
 0xda5   : > { %v8714_v21 = vpack.c.bf16 %v14927_v9, %v14926_v43  ;;  %v8599_v33 = vpop.f32.mrb[79].mxu1 }
 0xda6   : > { %v8713_v2 = vpack.c.bf16 %v8599_v33, %v8596_v49 }
 0xdb1   : > { %v14930_v56 = vpop.f32.mrb[80].mxu1 }
 0xdb2   : > { %v8612_v19 = vpop.f32.mrb[81].mxu1 }
 0xdb3   : > { %v14931_v17 = vpop.f32.mrb[82].mxu1 }
 0xdb4   : > { %v8716_v50 = vpack.c.bf16 %v14931_v17, %v14930_v56  ;;  %v8615_v51 = vpop.f32.mrb[83].mxu1 }
 0xdb5   : > { %v8715_v63 = vpack.c.bf16 %v8615_v51, %v8612_v19 }
 0xdb7   : > { %14100 = vmatprep.subr.bf16.mxu1 %v8715_v63 }
 0xdb8   : > { %14101 = vmatpush3.bf16.msra.mxu1 %v8707_v58  ;;  %v15744_v58 = vld [vmem:[#allocation4] ss:$8 sps:$4 sm:$0xff]  }
 0xdb9   : > { %14102 = vmatprep.subr.bf16.mxu1 %v8716_v50  ;;  %v15762_v50 = vld [vmem:[#allocation4 + $0x30] ss:$8 sps:$4 sm:$0xff]  }
 0xdbc   : > { %14103 = vmatpush3.bf16.msra.mxu1 %v8708_v48 }
 0xdc1   : > { %v14934_v52 = vpop.f32.mrb[84].mxu1 }
 0xdc2   : > { %v8628_v7 = vpop.f32.mrb[85].mxu1 }
 0xdc3   : > { %v14935_v38 = vpop.f32.mrb[86].mxu1 }
 0xdc4   : > { %v8718_v40 = vpack.c.bf16 %v14935_v38, %v14934_v52  ;;  %v8631_v1 = vpop.f32.mrb[87].mxu1  ;;  %v15770_v52 = vld [vmem:[#allocation4 + $0x44] ss:$8 sps:$4 sm:$0xff]  }
 0xdc5   : > { %v8717_v10 = vpack.c.bf16 %v8631_v1, %v8628_v7 }
 0xdc7   : > { %14104 = vmatprep.subr.bf16.mxu1 %v8717_v10  ;;  %v15768_v10 = vld [vmem:[#allocation4 + $0x40] ss:$8 sps:$4 sm:$0xff]  }
 0xdc8   : > { %14105 = vmatpush3.bf16.msra.mxu1 %v8709_v32 }
 0xdc9   : > { %14106 = vmatprep.subr.bf16.mxu1 %v8718_v40 }
 0xdcc   : > { %14107 = vmatpush3.bf16.msra.mxu1 %v8710_v6 }
 0xdd1   : > { %v14938_v47 = vpop.f32.mrb[88].mxu1 }
 0xdd2   : > { %v8644_v54 = vpop.f32.mrb[89].mxu1 }
 0xdd3   : > { %v14939_v11 = vpop.f32.mrb[90].mxu1 }
 0xdd4   : > { %v8720_v45 = vpack.c.bf16 %v14939_v11, %v14938_v47  ;;  %v8647_v23 = vpop.f32.mrb[91].mxu1  ;;  %v15776_v11 = vld [vmem:[#allocation4 + $0x54] ss:$8 sps:$4 sm:$0xff]  }
 0xdd5   : > { %v8719_v57 = vpack.c.bf16 %v8647_v23, %v8644_v54 }
 0xdd7   : > { %14108 = vmatprep.subr.bf16.mxu1 %v8719_v57 }
 0xdd8   : > { %14109 = vmatpush3.bf16.msra.mxu1 %v8711_v20 }
 0xdd9   : > { %14110 = vmatprep.subr.bf16.mxu1 %v8720_v45 }
 0xddc   : > { %14111 = vmatpush3.bf16.msra.mxu1 %v8712_v46 }
 0xde1   : > { %v14942_v36 = vpop.f32.mrb[92].mxu1 }
 0xde2   : > { %v8660_v24 = vpop.f32.mrb[93].mxu1 }
 0xde3   : > { %v14943_v25 = vpop.f32.mrb[94].mxu1 }
 0xde4   : > { %v8722_v26 = vpack.c.bf16 %v14943_v25, %v14942_v36  ;;  %v8663_v28 = vpop.f32.mrb[95].mxu1 }
 0xde5   : > { %v8721_v53 = vpack.c.bf16 %v8663_v28, %v8660_v24  ;;  %v15774_v24 = vld [vmem:[#allocation4 + $0x50] ss:$8 sps:$4 sm:$0xff]   ;;  %v15782_v28 = vld [vmem:[#allocation4 + $0x64] ss:$8 sps:$4 sm:$0xff]  }
 0xde7   : > { %14112 = vmatprep.subr.bf16.mxu1 %v8721_v53 }
 0xde8   : > { %14113 = vmatpush3.bf16.msra.mxu1 %v8713_v2 }
 0xde9   : > { %v14948_v8 = vpop.f32.mrb[96].mxu1  ;;  %14114 = vmatprep.subr.bf16.mxu1 %v8722_v26 }
 0xdea   : > { %v8762_v48 = vpop.f32.mrb[97].mxu1 }
 0xdeb   : > { %v14949_v27 = vpop.f32.mrb[98].mxu1 }
 0xdec   : > { %v8923_v5 = vpack.c.bf16 %v14949_v27, %v14948_v8  ;;  %v8765_v61 = vpop.f32.mrb[99].mxu1  ;;  %14115 = vmatpush3.bf16.msra.mxu1 %v8714_v21  ;;  %v15756_v21 = vld [vmem:[#allocation4 + $0x20] ss:$8 sps:$4 sm:$0xff]  }
 0xded   : > { %v8922_v6 = vpack.c.bf16 %v8765_v61, %v8762_v48 }
 0xdef   : > { %9452 = vmatmul.mubr.bf16.vlgmr.msra.gmra.mrb[128].mxu1 %v15744_v58  ;;  %v15780_v58 = vld [vmem:[#allocation4 + $0x60] ss:$8 sps:$4 sm:$0xff]  }
 0xdf0   : > { %9459 = vmatprep.mubr.bf16.mxu1 %v15752_v0 }
 0xdf1   : > { %v19213_v55 = vpop.f32.mrb[100].mxu1 }
 0xdf2   : > { %v8778_v32 = vpop.f32.mrb[101].mxu1 }
 0xdf3   : > { %v14953_v44 = vpop.f32.mrb[102].mxu1 }
 0xdf4   : > { %v8925_v15 = vpack.c.bf16 %v14953_v44, %v19213_v55  ;;  %v8781_v46 = vpop.f32.mrb[103].mxu1 }
 0xdf5   : > { %v8924_v20 = vpack.c.bf16 %v8781_v46, %v8778_v32 }
 0xdf7   : > { %9460 = vmatmul.mubr.bf16.gmra.mrb[132].mxu1 %v15750_v62  ;;  %v15786_v62 = vld [vmem:[#allocation4 + $0x70] ss:$8 sps:$4 sm:$0xff]  }
 0xdf8   : > { %9467 = vmatprep.mubr.bf16.mxu1 %v15758_v41 }
 0xdf9   : > { %v19216_v43 = vpop.f32.mrb[104].mxu1 }
 0xdfa   : > { %v8794_v49 = vpop.f32.mrb[105].mxu1 }
 0xdfb   : > { %v19218_v9 = vpop.f32.mrb[106].mxu1 }
 0xdfc   : > { %v8927_v33 = vpack.c.bf16 %v19218_v9, %v19216_v43  ;;  %v8797_v2 = vpop.f32.mrb[107].mxu1  ;;  %v15792_v9 = vld [vmem:[#allocation4 + $0x80] ss:$8 sps:$4 sm:$0xff]  }
 0xdfd   : > { %v8926_v13 = vpack.c.bf16 %v8797_v2, %v8794_v49  ;;  %v15720_v49 = vld [vmem:[#allocation4 + $0x100] ss:$8 sps:$4 sm:$0xff]   ;;  %v15797_v2 = vld [vmem:[#allocation4 + $0x94] ss:$8 sps:$4 sm:$0xff]  }
 0xdff   : > { %9468 = vmatmul.mubr.bf16.gmra.mrb[136].mxu1 %v15756_v21  ;;  %v15725_v21 = vld [vmem:[#allocation4 + $0x114] ss:$8 sps:$4 sm:$0xff]  }
 0xe00   : > { %9475 = vmatprep.mubr.bf16.mxu1 %v15764_v59  ;;  %v15723_v59 = vld [vmem:[#allocation4 + $0x110] ss:$8 sps:$4 sm:$0xff]  }
 0xe01   : > { %v19222_v56 = vpop.f32.mrb[108].mxu1 }
 0xe02   : > { %v8810_v19 = vpop.f32.mrb[109].mxu1 }
 0xe03   : > { %v19224_v17 = vpop.f32.mrb[110].mxu1 }
 0xe04   : > { %v8929_v51 = vpack.c.bf16 %v19224_v17, %v19222_v56  ;;  %v8813_v63 = vpop.f32.mrb[111].mxu1  ;;  %v15726_v56 = vld [vmem:[#allocation4 + $0x120] ss:$8 sps:$4 sm:$0xff]  }
 0xe05   : > { %v8928_v7 = vpack.c.bf16 %v8813_v63, %v8810_v19  ;;  %v15728_v19 = vld [vmem:[#allocation4 + $0x124] ss:$8 sps:$4 sm:$0xff]   ;;  %v15798_v17 = vld [vmem:[#allocation4 + $0xa0] ss:$8 sps:$4 sm:$0xff]   ;;  %v15803_v63 = vld [vmem:[#allocation4 + $0xb4] ss:$8 sps:$4 sm:$0xff]  }
 0xe07   : > { %9476 = vmatmul.mubr.bf16.gmra.mrb[140].mxu1 %v15762_v50  ;;  %v15800_v50 = vld [vmem:[#allocation4 + $0xa4] ss:$8 sps:$4 sm:$0xff]  }
 0xe08   : > { %9483 = vmatprep.mubr.bf16.mxu1 %v15770_v52  ;;  %v15729_v52 = vld [vmem:[#allocation4 + $0x130] ss:$8 sps:$4 sm:$0xff]  }
 0xe09   : > { %v14964_v38 = vpop.f32.mrb[112].mxu1 }
 0xe0a   : > { %v8826_v40 = vpop.f32.mrb[113].mxu1 }
 0xe0b   : > { %v14965_v1 = vpop.f32.mrb[114].mxu1 }
 0xe0c   : > { %v8931_v47 = vpack.c.bf16 %v14965_v1, %v14964_v38  ;;  %v8829_v54 = vpop.f32.mrb[115].mxu1  ;;  %v15734_v38 = vld [vmem:[#allocation4 + $0x144] ss:$8 sps:$4 sm:$0xff]   ;;  %v15732_v1 = vld [vmem:[#allocation4 + $0x140] ss:$8 sps:$4 sm:$0xff]  }
 0xe0d   : > { %v8930_v45 = vpack.c.bf16 %v8829_v54, %v8826_v40  ;;  %v15806_v40 = vld [vmem:[#allocation4 + $0xc4] ss:$8 sps:$4 sm:$0xff]   ;;  %v15809_v54 = vld [vmem:[#allocation4 + $0xd4] ss:$8 sps:$4 sm:$0xff]  }
 0xe0f   : > { %13988 = vmatprep.subr.bf16.mxu0 %v8930_v45  ;;  %9484 = vmatmul.mubr.bf16.gmra.mrb[144].mxu1 %v15768_v10  ;;  %v15804_v10 = vld [vmem:[#allocation4 + $0xc0] ss:$8 sps:$4 sm:$0xff]   ;;  %v15807_v45 = vld [vmem:[#allocation4 + $0xd0] ss:$8 sps:$4 sm:$0xff]  }
 0xe10   : > { %13989 = vmatpush3.bf16.msra.mxu0 %v8922_v6  ;;  %9491 = vmatprep.mubr.bf16.mxu1 %v15776_v11  ;;  %v15788_v6 = vld [vmem:[#allocation4 + $0x74] ss:$8 sps:$4 sm:$0xff]   ;;  %v15735_v11 = vld [vmem:[#allocation4 + $0x150] ss:$8 sps:$4 sm:$0xff]  }
 0xe11   : > { %v14968_v23 = vpop.f32.mrb[116].mxu1  ;;  %13990 = vmatprep.subr.bf16.mxu0 %v8931_v47  ;;  %v15737_v47 = vld [vmem:[#allocation4 + $0x154] ss:$8 sps:$4 sm:$0xff]  }
 0xe12   : > { %v8842_v57 = vpop.f32.mrb[117].mxu1 }
 0xe13   : > { %v14969_v36 = vpop.f32.mrb[118].mxu1 }
 0xe14   : > { %v8933_v25 = vpack.c.bf16 %v14969_v36, %v14968_v23  ;;  %v8845_v26 = vpop.f32.mrb[119].mxu1  ;;  %13991 = vmatpush3.bf16.msra.mxu0 %v8923_v5  ;;  %v15740_v23 = vld [vmem:[#allocation4 + $0x164] ss:$8 sps:$4 sm:$0xff]   ;;  %v15738_v36 = vld [vmem:[#allocation4 + $0x160] ss:$8 sps:$4 sm:$0xff]  }
 0xe15   : > { %v8932_v53 = vpack.c.bf16 %v8845_v26, %v8842_v57  ;;  %v15812_v57 = vld [vmem:[#allocation4 + $0xe4] ss:$8 sps:$4 sm:$0xff]   ;;  %v15815_v26 = vld [vmem:[#allocation4 + $0xf4] ss:$8 sps:$4 sm:$0xff]  }
 0xe17   : > { %13992 = vmatprep.subr.bf16.mxu0 %v8932_v53  ;;  %9492 = vmatmul.mubr.bf16.gmra.mrb[148].mxu1 %v15774_v24  ;;  %v15810_v24 = vld [vmem:[#allocation4 + $0xe0] ss:$8 sps:$4 sm:$0xff]   ;;  %v15813_v53 = vld [vmem:[#allocation4 + $0xf0] ss:$8 sps:$4 sm:$0xff]  }
 0xe18   : > { %13993 = vmatpush3.bf16.msra.mxu0 %v8924_v20  ;;  %9499 = vmatprep.mubr.bf16.mxu1 %v15782_v28  ;;  %v15794_v20 = vld [vmem:[#allocation4 + $0x84] ss:$8 sps:$4 sm:$0xff]   ;;  %v15741_v28 = vld [vmem:[#allocation4 + $0x170] ss:$8 sps:$4 sm:$0xff]  }
 0xe19   : > { %v14972_v8 = vpop.f32.mrb[120].mxu1  ;;  %13994 = vmatprep.subr.bf16.mxu0 %v8933_v25  ;;  %v15743_v25 = vld [vmem:[#allocation4 + $0x174] ss:$8 sps:$4 sm:$0xff]  }
 0xe1a   : > { %v8858_v48 = vpop.f32.mrb[121].mxu1 }
 0xe1b   : > { %v14973_v27 = vpop.f32.mrb[122].mxu1 }
 0xe1c   : > { %v8935_v61 = vpack.c.bf16 %v14973_v27, %v14972_v8  ;;  %v8861_v0 = vpop.f32.mrb[123].mxu1  ;;  %13995 = vmatpush3.bf16.msra.mxu0 %v8925_v15  ;;  %v12289_v15 = vld [vmem:[%s19754_s11 + $0x8] sm:$0xf]  ;;  %v15749_v8 = vld [vmem:[#allocation4 + $0x184] ss:$8 sps:$4 sm:$0xff]  }
 0xe1d   : > { %v8934_v55 = vpack.c.bf16 %v8861_v0, %v8858_v48  ;;  %v12338_v48 = vld [vmem:[%s19754_s11 + $0xc] sm:$0xf]  ;;  %v15747_v27 = vld [vmem:[#allocation4 + $0x180] ss:$8 sps:$4 sm:$0xff]  }
 0xe1e   : > { %v15761_v0 = vld [vmem:[#allocation4 + $0x1a4] ss:$8 sps:$4 sm:$0xff]  }
 0xe1f   : > { %13996 = vmatprep.subr.bf16.mxu0 %v8934_v55  ;;  %9500 = vmatmul.mubr.bf16.gmra.mrb[152].mxu1 %v15780_v58  ;;  %v15755_v58 = vld [vmem:[#allocation4 + $0x194] ss:$8 sps:$4 sm:$0xff]  }
 0xe20   : > { %13997 = vmatpush3.bf16.msra.mxu0 %v8926_v13  ;;  %9507 = vmatprep.mubr.bf16.mxu1 %v15788_v6  ;;  %v15795_v13 = vld [vmem:[#allocation4 + $0x90] ss:$8 sps:$4 sm:$0xff]   ;;  %v15759_v6 = vld [vmem:[#allocation4 + $0x1a0] ss:$8 sps:$4 sm:$0xff]   ;;  %v15767_v55 = vld [vmem:[#allocation4 + $0x1b4] ss:$8 sps:$4 sm:$0xff]  }
 0xe21   : > { %v14976_v5 = vpop.f32.mrb[124].mxu1  ;;  %13998 = vmatprep.subr.bf16.mxu0 %v8935_v61  ;;  %v15753_v61 = vld [vmem:[#allocation4 + $0x190] ss:$8 sps:$4 sm:$0xff]  }
 0xe22   : > { %v8874_v32 = vpop.f32.mrb[125].mxu1 }
 0xe23   : > { %v14977_v44 = vpop.f32.mrb[126].mxu1 }
 0xe24   : > { %v8937_v46 = vpack.c.bf16 %v14977_v44, %v14976_v5  ;;  %v8877_v41 = vpop.f32.mrb[127].mxu1  ;;  %13999 = vmatpush3.bf16.msra.mxu0 %v8927_v33  ;;  %v9583_v33 = vsel %vm8510_vm3, %v12289_v15, 0  ;;  %v15765_v5 = vld [vmem:[#allocation4 + $0x1b0] ss:$8 sps:$4 sm:$0xff]   ;;  %v15771_v44 = vld [vmem:[#allocation4 + $0x1c0] ss:$8 sps:$4 sm:$0xff]  }
 0xe25   : > { %v8936_v43 = vpack.c.bf16 %v8877_v41, %v8874_v32  ;;  %v15773_v32 = vld [vmem:[#allocation4 + $0x1c4] ss:$8 sps:$4 sm:$0xff]  }
 0xe26   : > { %v15785_v41 = vld [vmem:[#allocation4 + $0x1e4] ss:$8 sps:$4 sm:$0xff]  }
 0xe27   : > { %14000 = vmatprep.subr.bf16.mxu0 %v8936_v43  ;;  %9508 = vmatmul.mubr.bf16.gmra.mrb[156].mxu1 %v15786_v62  ;;  %v15779_v62 = vld [vmem:[#allocation4 + $0x1d4] ss:$8 sps:$4 sm:$0xff]  }
 0xe28   : > { %14001 = vmatpush3.bf16.msra.mxu0 %v8928_v7  ;;  %9515 = vmatprep.mubr.bf16.mxu1 %v15794_v20  ;;  %v15801_v7 = vld [vmem:[#allocation4 + $0xb0] ss:$8 sps:$4 sm:$0xff]   ;;  %v15783_v20 = vld [vmem:[#allocation4 + $0x1e0] ss:$8 sps:$4 sm:$0xff]   ;;  %v15791_v43 = vld [vmem:[#allocation4 + $0x1f4] ss:$8 sps:$4 sm:$0xff]  }
 0xe29   : > { %14002 = vmatprep.subr.bf16.mxu0 %v8937_v46  ;;  %v15777_v46 = vld [vmem:[#allocation4 + $0x1d0] ss:$8 sps:$4 sm:$0xff]  }
 0xe2c   : > { %14003 = vmatpush3.bf16.msra.mxu0 %v8929_v51  ;;  %v15731_v51 = vld [vmem:[#allocation4 + $0x134] ss:$8 sps:$4 sm:$0xff]  }
 0xe2d   : > { %15064 = vmatprep.subr.msk.bf16.mxu0 %vm8510_vm3, %v12289_v15  ;;  %v15789_v15 = vld [vmem:[#allocation4 + $0x1f0] ss:$8 sps:$4 sm:$0xff]  }
 0xe2f   : > { %9131 = vmatmul.mubr.bf16.vlgmr.msra.gmra.mrb[64].mxu0 %v15720_v49  ;;  %9516 = vmatmul.mubr.bf16.gmra.mrb[160].mxu1 %v15792_v9  ;;  %v10151_v49 = vsel %vm8510_vm3, %v12338_v48, 0 }
 0xe30   : > { %9138 = vmatprep.mubr.bf16.mxu0 %v15725_v21  ;;  %14979 = vmatpush3.bf16.msra.mxu0 %v9583_v33 }
 0xe31   : > { %9523 = vmatprep.mubr.bf16.mxu1 %v15797_v2  ;;  %15065 = vmatprep.subr.msk.bf16.mxu0 %vm8510_vm3, %v12338_v48 }
 0xe37   : > { %9139 = vmatmul.mubr.bf16.gmra.mrb[68].mxu0 %v15723_v59  ;;  %9524 = vmatmul.mubr.bf16.gmra.mrb[164].mxu1 %v15795_v13 }
 0xe38   : > { %9146 = vmatprep.mubr.bf16.mxu0 %v15728_v19  ;;  %9531 = vmatprep.mubr.bf16.mxu1 %v15800_v50 }
 0xe3f   : > { %9147 = vmatmul.mubr.bf16.gmra.mrb[72].mxu0 %v15726_v56  ;;  %9532 = vmatmul.mubr.bf16.gmra.mrb[168].mxu1 %v15798_v17 }
 0xe40   : > { %9154 = vmatprep.mubr.bf16.mxu0 %v15731_v51  ;;  %9539 = vmatprep.mubr.bf16.mxu1 %v15803_v63 }
 0xe47   : > { %9155 = vmatmul.mubr.bf16.gmra.mrb[76].mxu0 %v15729_v52  ;;  %9540 = vmatmul.mubr.bf16.gmra.mrb[172].mxu1 %v15801_v7 }
 0xe48   : > { %9162 = vmatprep.mubr.bf16.mxu0 %v15734_v38  ;;  %9547 = vmatprep.mubr.bf16.mxu1 %v15806_v40 }
 0xe4f   : > { %9163 = vmatmul.mubr.bf16.gmra.mrb[80].mxu0 %v15732_v1  ;;  %9548 = vmatmul.mubr.bf16.gmra.mrb[176].mxu1 %v15804_v10 }
 0xe50   : > { %9170 = vmatprep.mubr.bf16.mxu0 %v15737_v47  ;;  %9555 = vmatprep.mubr.bf16.mxu1 %v15809_v54 }
 0xe57   : > { %9171 = vmatmul.mubr.bf16.gmra.mrb[84].mxu0 %v15735_v11  ;;  %9556 = vmatmul.mubr.bf16.gmra.mrb[180].mxu1 %v15807_v45 }
 0xe58   : > { %9178 = vmatprep.mubr.bf16.mxu0 %v15740_v23  ;;  %9563 = vmatprep.mubr.bf16.mxu1 %v15812_v57 }
 0xe5f   : > { %9179 = vmatmul.mubr.bf16.gmra.mrb[88].mxu0 %v15738_v36  ;;  %9564 = vmatmul.mubr.bf16.gmra.mrb[184].mxu1 %v15810_v24 }
 0xe60   : > { %9186 = vmatprep.mubr.bf16.mxu0 %v15743_v25  ;;  %9571 = vmatprep.mubr.bf16.mxu1 %v15815_v26 }
 0xe67   : > { %9187 = vmatmul.mubr.bf16.gmra.mrb[92].mxu0 %v15741_v28  ;;  %9572 = vmatmul.mubr.bf16.gmra.mrb[188].mxu1 %v15813_v53 }
 0xe68   : > { %9194 = vmatprep.mubr.bf16.mxu0 %v15749_v8 }
 0xe6f   : > { %9195 = vmatmul.mubr.bf16.gmra.mrb[96].mxu0 %v15747_v27 }
 0xe70   : > { %9202 = vmatprep.mubr.bf16.mxu0 %v15755_v58 }
 0xe77   : > { %9203 = vmatmul.mubr.bf16.gmra.mrb[100].mxu0 %v15753_v61 }
 0xe78   : > { %9210 = vmatprep.mubr.bf16.mxu0 %v15761_v0 }
 0xe7f   : > { %9211 = vmatmul.mubr.bf16.gmra.mrb[104].mxu0 %v15759_v6 }
 0xe80   : > { %9218 = vmatprep.mubr.bf16.mxu0 %v15767_v55 }
 0xe87   : > { %9219 = vmatmul.mubr.bf16.gmra.mrb[108].mxu0 %v15765_v5 }
 0xe88   : > { %9226 = vmatprep.mubr.bf16.mxu0 %v15773_v32 }
 0xe8f   : > { %9227 = vmatmul.mubr.bf16.gmra.mrb[112].mxu0 %v15771_v44 }
 0xe90   : > { %9234 = vmatprep.mubr.bf16.mxu0 %v15779_v62 }
 0xe97   : > { %9235 = vmatmul.mubr.bf16.gmra.mrb[116].mxu0 %v15777_v46 }
 0xe98   : > { %9242 = vmatprep.mubr.bf16.mxu0 %v15785_v41 }
 0xe9f   : > { %9243 = vmatmul.mubr.bf16.gmra.mrb[120].mxu0 %v15783_v20 }
 0xea0   : > { %9250 = vmatprep.mubr.bf16.mxu0 %v15791_v43 }
 0xea7   : > { %9251 = vmatmul.mubr.bf16.gmra.mrb[124].mxu0 %v15789_v15 }
 0xea8   : > { %14980 = vmatprep.mubr.msk.bf16.mxu0 %vm8461_vm4, %v19051_v29 }
 0xeaf   : > { %14981 = vmatmul.mubr.msk.bf16.vlgmr.msra.gmra.mrb[128].mxu0 %vm8461_vm4, %v19064_v12 }
 0xeb0   : > { %14984 = vmatprep.mubr.msk.bf16.mxu0 %vm8461_vm4, %v19076_v60  ;;  %15013 = vmatpush3.bf16.msra.mxu0 %v10151_v49 }
 0xeb7   : > { %14985 = vmatmul.mubr.msk.bf16.gmra.mrb[132].mxu0 %vm8461_vm4, %v19089_v31 }
 0xeb8   : > { %14988 = vmatprep.mubr.msk.bf16.mxu0 %vm8461_vm4, %v19100_v18 }
 0xebf   : > { %14989 = vmatmul.mubr.msk.bf16.gmra.mrb[136].mxu0 %vm8461_vm4, %v19113_v34 }
 0xec0   : > { %14992 = vmatprep.mubr.msk.bf16.mxu0 %vm8461_vm4, %v19124_v30 }
 0xec2   : > { %v14116_v9 = vpop.f32.mrb[128].mxu1 }
 0xec3   : > { %v14117_v21 = vpop.f32.mrb[129].mxu1 }
 0xec4   : > { %v19255_v33 = vadd.f32 %v14117_v21, %v14116_v9  ;;  %v14119_v2 = vpop.f32.mrb[130].mxu1 }
 0xec5   : > { %v14120_v59 = vpop.f32.mrb[131].mxu1 }
 0xec6   : > { %v19257_v13 = vadd.f32 %v14120_v59, %v14119_v2 }
 0xec7   : > { %14993 = vmatmul.mubr.msk.bf16.gmra.mrb[140].mxu0 %vm8461_vm4, %v19131_v22 }
 0xec8   : > { %14996 = vmatprep.mubr.msk.bf16.mxu0 %vm8461_vm4, %v19137_v42 }
 0xeca   : > { %v14122_v19 = vpop.f32.mrb[132].mxu1 }
 0xecb   : > { %v14123_v50 = vpop.f32.mrb[133].mxu1 }
 0xecc   : > { %v19263_v56 = vadd.f32 %v14123_v50, %v14122_v19  ;;  %v14125_v17 = vpop.f32.mrb[134].mxu1 }
 0xecd   : > { %v14126_v51 = vpop.f32.mrb[135].mxu1 }
 0xece   : > { %v19265_v63 = vadd.f32 %v14126_v51, %v14125_v17 }
 0xecf   : > { %14997 = vmatmul.mubr.msk.bf16.gmra.mrb[144].mxu0 %vm8461_vm4, %v19142_v3 }
 0xed0   : > { %15000 = vmatprep.mubr.msk.bf16.mxu0 %vm8461_vm4, %v19149_v37 }
 0xed2   : > { %v14128_v52 = vpop.f32.mrb[136].mxu1 }
 0xed3   : > { %v14129_v7 = vpop.f32.mrb[137].mxu1 }
 0xed4   : > { %v19271_v38 = vadd.f32 %v14129_v7, %v14128_v52  ;;  %v14131_v40 = vpop.f32.mrb[138].mxu1 }
 0xed5   : > { %v14132_v1 = vpop.f32.mrb[139].mxu1 }
 0xed6   : > { %v19273_v10 = vadd.f32 %v14132_v1, %v14131_v40 }
 0xed7   : > { %15001 = vmatmul.mubr.msk.bf16.gmra.mrb[148].mxu0 %vm8461_vm4, %v19154_v16 }
 0xed8   : > { %15004 = vmatprep.mubr.msk.bf16.mxu0 %vm8461_vm4, %v19161_v35 }
 0xeda   : > { %v14134_v47 = vpop.f32.mrb[140].mxu1 }
 0xedb   : > { %v14135_v54 = vpop.f32.mrb[141].mxu1 }
 0xedc   : > { %v19279_v11 = vadd.f32 %v14135_v54, %v14134_v47  ;;  %v14137_v45 = vpop.f32.mrb[142].mxu1 }
 0xedd   : > { %v14138_v23 = vpop.f32.mrb[143].mxu1 }
 0xede   : > { %v19281_v57 = vadd.f32 %v14138_v23, %v14137_v45 }
 0xedf   : > { %15005 = vmatmul.mubr.msk.bf16.gmra.mrb[152].mxu0 %vm8461_vm4, %v19166_v4 }
 0xee0   : > { %15008 = vmatprep.mubr.msk.bf16.mxu0 %vm8461_vm4, %v19173_v14 }
 0xee2   : > { %v14140_v36 = vpop.f32.mrb[144].mxu1 }
 0xee3   : > { %v14141_v24 = vpop.f32.mrb[145].mxu1 }
 0xee4   : > { %v19287_v25 = vadd.f32 %v14141_v24, %v14140_v36  ;;  %v14143_v26 = vpop.f32.mrb[146].mxu1 }
 0xee5   : > { %v14144_v28 = vpop.f32.mrb[147].mxu1 }
 0xee6   : > { %v19289_v53 = vadd.f32 %v14144_v28, %v14143_v26 }
 0xee7   : > { %15009 = vmatmul.mubr.msk.bf16.gmra.mrb[156].mxu0 %vm8461_vm4, %v19177_v39 }
 0xee8   : > { %15014 = vmatprep.mubr.msk.bf16.mxu0 %vm8461_vm4, %v19051_v29 }
 0xeea   : > { %v14146_v8 = vpop.f32.mrb[148].mxu1 }
 0xeeb   : > { %v14147_v48 = vpop.f32.mrb[149].mxu1 }
 0xeec   : > { %v19295_v27 = vadd.f32 %v14147_v48, %v14146_v8  ;;  %v14149_v58 = vpop.f32.mrb[150].mxu1 }
 0xeed   : > { %v14150_v61 = vpop.f32.mrb[151].mxu1 }
 0xeee   : > { %v19297_v0 = vadd.f32 %v14150_v61, %v14149_v58 }
 0xeef   : > { %15015 = vmatmul.mubr.msk.bf16.vlgmr.msra.gmra.mrb[160].mxu0 %vm8461_vm4, %v19064_v12 }
 0xef0   : > { %15018 = vmatprep.mubr.msk.bf16.mxu0 %vm8461_vm4, %v19076_v60 }
 0xef2   : > { %v14152_v6 = vpop.f32.mrb[152].mxu1 }
 0xef3   : > { %v14153_v55 = vpop.f32.mrb[153].mxu1 }
 0xef4   : > { %v19303_v5 = vadd.f32 %v14153_v55, %v14152_v6  ;;  %v14155_v32 = vpop.f32.mrb[154].mxu1 }
 0xef5   : > { %v14156_v29 = vpop.f32.mrb[155].mxu1 }
 0xef6   : > { %v19305_v44 = vadd.f32 %v14156_v29, %v14155_v32 }
 0xef7   : > { %15019 = vmatmul.mubr.msk.bf16.gmra.mrb[164].mxu0 %vm8461_vm4, %v19089_v31 }
 0xef8   : > { %15022 = vmatprep.mubr.msk.bf16.mxu0 %vm8461_vm4, %v19100_v18 }
 0xefa   : > { %v14158_v62 = vpop.f32.mrb[156].mxu1 }
 0xefb   : > { %v14159_v46 = vpop.f32.mrb[157].mxu1 }
 0xefc   : > { %v19311_v12 = vadd.f32 %v14159_v46, %v14158_v62  ;;  %v14161_v41 = vpop.f32.mrb[158].mxu1 }
 0xefd   : > { %v14162_v60 = vpop.f32.mrb[159].mxu1 }
 0xefe   : > { %v19313_v20 = vadd.f32 %v14162_v60, %v14161_v41 }
 0xeff   : > { %15023 = vmatmul.mubr.msk.bf16.gmra.mrb[168].mxu0 %vm8461_vm4, %v19113_v34 }
 0xf00   : > { %15026 = vmatprep.mubr.msk.bf16.mxu0 %vm8461_vm4, %v19124_v30 }
 0xf02   : > { %v14004_v43 = vpop.f32.mrb[64].mxu0  ;;  %v14164_v15 = vpop.f32.mrb[160].mxu1 }
 0xf03   : > { %v14005_v31 = vpop.f32.mrb[65].mxu0  ;;  %v14165_v49 = vpop.f32.mrb[161].mxu1 }
 0xf04   : > { %v14006_v9 = vadd.f32 %v14005_v31, %v14004_v43  ;;  %v14007_v18 = vpop.f32.mrb[66].mxu0  ;;  %v19319_v21 = vadd.f32 %v14165_v49, %v14164_v15  ;;  %v14167_v2 = vpop.f32.mrb[162].mxu1 }
 0xf05   : > { %v14008_v59 = vpop.f32.mrb[67].mxu0  ;;  %v14168_v19 = vpop.f32.mrb[163].mxu1 }
 0xf06   : > { %v19322_v50 = vadd.f32 %v19255_v33, %v14006_v9  ;;  %v14009_v17 = vadd.f32 %v14008_v59, %v14007_v18  ;;  %v19324_v51 = vadd.f32 %v14168_v19, %v14167_v2 }
 0xf07   : > { %15027 = vmatmul.mubr.msk.bf16.gmra.mrb[172].mxu0 %vm8461_vm4, %v19131_v22 }
 0xf08   : > { %15030 = vmatprep.mubr.msk.bf16.mxu0 %vm8461_vm4, %v19137_v42  ;;  %v19331_v34 = vadd.f32 %v19257_v13, %v14009_v17 }
 0xf0a   : > { %v14010_v30 = vpop.f32.mrb[68].mxu0  ;;  %v14170_v52 = vpop.f32.mrb[164].mxu1 }
 0xf0b   : > { %v14011_v7 = vpop.f32.mrb[69].mxu0  ;;  %v14171_v40 = vpop.f32.mrb[165].mxu1 }
 0xf0c   : > { %v14012_v1 = vadd.f32 %v14011_v7, %v14010_v30  ;;  %v14013_v47 = vpop.f32.mrb[70].mxu0  ;;  %v19333_v33 = vadd.f32 %v14171_v40, %v14170_v52  ;;  %v14173_v54 = vpop.f32.mrb[166].mxu1 }
 0xf0d   : > { %v14014_v45 = vpop.f32.mrb[71].mxu0  ;;  %v14174_v23 = vpop.f32.mrb[167].mxu1 }
 0xf0e   : > { %v19336_v36 = vadd.f32 %v19263_v56, %v14012_v1  ;;  %v14015_v22 = vadd.f32 %v14014_v45, %v14013_v47  ;;  %v19338_v24 = vadd.f32 %v14174_v23, %v14173_v54 }
 0xf0f   : > { %15031 = vmatmul.mubr.msk.bf16.gmra.mrb[176].mxu0 %vm8461_vm4, %v19142_v3 }
 0xf10   : > { %15034 = vmatprep.mubr.msk.bf16.mxu0 %vm8461_vm4, %v19149_v37  ;;  %v19345_v42 = vadd.f32 %v19265_v63, %v14015_v22 }
 0xf12   : > { %v14016_v13 = vpop.f32.mrb[72].mxu0  ;;  %v14176_v26 = vpop.f32.mrb[168].mxu1 }
 0xf13   : > { %v14017_v28 = vpop.f32.mrb[73].mxu0  ;;  %v14177_v8 = vpop.f32.mrb[169].mxu1 }
 0xf14   : > { %v14018_v48 = vadd.f32 %v14017_v28, %v14016_v13  ;;  %v14019_v58 = vpop.f32.mrb[74].mxu0  ;;  %v19347_v56 = vadd.f32 %v14177_v8, %v14176_v26  ;;  %v14179_v61 = vpop.f32.mrb[170].mxu1 }
 0xf15   : > { %v14020_v6 = vpop.f32.mrb[75].mxu0  ;;  %v14180_v55 = vpop.f32.mrb[171].mxu1 }
 0xf16   : > { %v14021_v32 = vadd.f32 %v14020_v6, %v14019_v58  ;;  %v19350_v3 = vadd.f32 %v19271_v38, %v14018_v48  ;;  %v19352_v29 = vadd.f32 %v14180_v55, %v14179_v61 }
 0xf17   : > { %15035 = vmatmul.mubr.msk.bf16.gmra.mrb[180].mxu0 %vm8461_vm4, %v19154_v16 }
 0xf18   : > { %15038 = vmatprep.mubr.msk.bf16.mxu0 %vm8461_vm4, %v19161_v35  ;;  %v19359_v37 = vadd.f32 %v19273_v10, %v14021_v32 }
 0xf1a   : > { %v14022_v63 = vpop.f32.mrb[76].mxu0  ;;  %v14182_v62 = vpop.f32.mrb[172].mxu1 }
 0xf1b   : > { %v14023_v46 = vpop.f32.mrb[77].mxu0  ;;  %v14183_v41 = vpop.f32.mrb[173].mxu1 }
 0xf1c   : > { %v14024_v60 = vadd.f32 %v14023_v46, %v14022_v63  ;;  %v14025_v43 = vpop.f32.mrb[78].mxu0  ;;  %v19361_v15 = vadd.f32 %v14183_v41, %v14182_v62  ;;  %v14185_v38 = vpop.f32.mrb[174].mxu1 }
 0xf1d   : > { %v14026_v31 = vpop.f32.mrb[79].mxu0  ;;  %v14186_v49 = vpop.f32.mrb[175].mxu1 }
 0xf1e   : > { %v14027_v9 = vadd.f32 %v14026_v31, %v14025_v43  ;;  %v19364_v16 = vadd.f32 %v19279_v11, %v14024_v60  ;;  %v19366_v18 = vadd.f32 %v14186_v49, %v14185_v38 }
 0xf1f   : > { %15039 = vmatmul.mubr.msk.bf16.gmra.mrb[184].mxu0 %vm8461_vm4, %v19166_v4 }
 0xf20   : > { %15042 = vmatprep.mubr.msk.bf16.mxu0 %vm8461_vm4, %v19173_v14  ;;  %v19373_v35 = vadd.f32 %v19281_v57, %v14027_v9 }
 0xf22   : > { %v14028_v10 = vpop.f32.mrb[80].mxu0  ;;  %v14188_v2 = vpop.f32.mrb[176].mxu1 }
 0xf23   : > { %v14029_v59 = vpop.f32.mrb[81].mxu0  ;;  %v14189_v19 = vpop.f32.mrb[177].mxu1 }
 0xf24   : > { %v14030_v17 = vadd.f32 %v14029_v59, %v14028_v10  ;;  %v14031_v30 = vpop.f32.mrb[82].mxu0  ;;  %v19375_v52 = vadd.f32 %v14189_v19, %v14188_v2  ;;  %v14191_v11 = vpop.f32.mrb[178].mxu1 }
 0xf25   : > { %v14032_v7 = vpop.f32.mrb[83].mxu0  ;;  %v14192_v40 = vpop.f32.mrb[179].mxu1 }
 0xf26   : > { %v14033_v1 = vadd.f32 %v14032_v7, %v14031_v30  ;;  %v19378_v4 = vadd.f32 %v19287_v25, %v14030_v17  ;;  %v19380_v47 = vadd.f32 %v14192_v40, %v14191_v11 }
 0xf27   : > { %15043 = vmatmul.mubr.msk.bf16.gmra.mrb[188].mxu0 %vm8461_vm4, %v19177_v39 }
 0xf28   : > { %v19385_v14 = vadd.f32 %v19289_v53, %v14033_v1 }
 0xf2a   : > { %v14034_v57 = vpop.f32.mrb[84].mxu0  ;;  %v14194_v54 = vpop.f32.mrb[180].mxu1 }
 0xf2b   : > { %v14035_v45 = vpop.f32.mrb[85].mxu0  ;;  %v14195_v23 = vpop.f32.mrb[181].mxu1 }
 0xf2c   : > { %v14036_v22 = vadd.f32 %v14035_v45, %v14034_v57  ;;  %v14037_v13 = vpop.f32.mrb[86].mxu0  ;;  %v19387_v26 = vadd.f32 %v14195_v23, %v14194_v54  ;;  %v14197_v28 = vpop.f32.mrb[182].mxu1 }
 0xf2d   : > { %v14038_v8 = vpop.f32.mrb[87].mxu0  ;;  %v14198_v25 = vpop.f32.mrb[183].mxu1 }
 0xf2e   : > { %v14039_v48 = vadd.f32 %v14038_v8, %v14037_v13  ;;  %v19390_v58 = vadd.f32 %v19295_v27, %v14036_v22  ;;  %v19392_v61 = vadd.f32 %v14198_v25, %v14197_v28  ;;  %v15818_v8 = vld [vmem:[#allocation4 + $0x204] ss:$8 sps:$4 sm:$0xff]  }
 0xf2f   : > { %9987 = vmatprep.mubr.bf16.mxu1 %v15818_v8 }
 0xf30   : > { %v19395_v39 = vadd.f32 %v19297_v0, %v14039_v48 }
 0xf32   : > { %v14040_v53 = vpop.f32.mrb[88].mxu0  ;;  %v14200_v6 = vpop.f32.mrb[184].mxu1 }
 0xf33   : > { %v14041_v55 = vpop.f32.mrb[89].mxu0  ;;  %v14201_v32 = vpop.f32.mrb[185].mxu1 }
 0xf34   : > { %v14042_v63 = vadd.f32 %v14041_v55, %v14040_v53  ;;  %v14043_v62 = vpop.f32.mrb[90].mxu0  ;;  %v19397_v46 = vadd.f32 %v14201_v32, %v14200_v6  ;;  %v14203_v41 = vpop.f32.mrb[186].mxu1 }
 0xf35   : > { %v14044_v60 = vpop.f32.mrb[91].mxu0  ;;  %v14204_v43 = vpop.f32.mrb[187].mxu1 }
 0xf36   : > { %v14045_v38 = vadd.f32 %v14044_v60, %v14043_v62  ;;  %v19400_v27 = vadd.f32 %v19303_v5, %v14042_v63  ;;  %v19402_v31 = vadd.f32 %v14204_v43, %v14203_v41 }
 0xf38   : > { %v19405_v0 = vadd.f32 %v19305_v44, %v14045_v38 }
 0xf3a   : > { %v14046_v49 = vpop.f32.mrb[92].mxu0  ;;  %v14206_v9 = vpop.f32.mrb[188].mxu1 }
 0xf3b   : > { %v14047_v10 = vpop.f32.mrb[93].mxu0  ;;  %v14207_v2 = vpop.f32.mrb[189].mxu1 }
 0xf3c   : > { %v14048_v59 = vadd.f32 %v14047_v10, %v14046_v49  ;;  %v14049_v19 = vpop.f32.mrb[94].mxu0  ;;  %v19407_v17 = vadd.f32 %v14207_v2, %v14206_v9  ;;  %v14209_v30 = vpop.f32.mrb[190].mxu1 }
 0xf3d   : > { %v14050_v11 = vpop.f32.mrb[95].mxu0  ;;  %v14210_v7 = vpop.f32.mrb[191].mxu1 }
 0xf3e   : > { %v14051_v40 = vadd.f32 %v14050_v11, %v14049_v19  ;;  %v19410_v5 = vadd.f32 %v19311_v12, %v14048_v59  ;;  %v19412_v1 = vadd.f32 %v14210_v7, %v14209_v30 }
 0xf40   : > { %v19415_v44 = vadd.f32 %v19313_v20, %v14051_v40 }
 0xf42   : > { %v14052_v57 = vpop.f32.mrb[96].mxu0 }
 0xf43   : > { %v14053_v54 = vpop.f32.mrb[97].mxu0 }
 0xf44   : > { %v14054_v45 = vadd.f32 %v14053_v54, %v14052_v57  ;;  %v14055_v23 = vpop.f32.mrb[98].mxu0 }
 0xf45   : > { %v14056_v22 = vpop.f32.mrb[99].mxu0 }
 0xf46   : > { %v14057_v13 = vadd.f32 %v14056_v22, %v14055_v23  ;;  %v19418_v28 = vadd.f32 %v19319_v21, %v14054_v45 }
 0xf48   : > { %v19421_v25 = vadd.f32 %v19324_v51, %v14057_v13 }
 0xf4a   : > { %v14058_v12 = vpop.f32.mrb[100].mxu0 }
 0xf4b   : > { %v14059_v48 = vpop.f32.mrb[101].mxu0 }
 0xf4c   : > { %v14060_v53 = vadd.f32 %v14059_v48, %v14058_v12  ;;  %v14061_v6 = vpop.f32.mrb[102].mxu0 }
 0xf4d   : > { %v14062_v20 = vpop.f32.mrb[103].mxu0 }
 0xf4e   : > { %v14063_v55 = vadd.f32 %v14062_v20, %v14061_v6  ;;  %v19424_v32 = vadd.f32 %v19333_v33, %v14060_v53 }
 0xf50   : > { %v19427_v63 = vadd.f32 %v19338_v24, %v14063_v55 }
 0xf52   : > { %v14064_v62 = vpop.f32.mrb[104].mxu0 }
 0xf53   : > { %v14065_v21 = vpop.f32.mrb[105].mxu0 }
 0xf54   : > { %v14066_v41 = vadd.f32 %v14065_v21, %v14064_v62  ;;  %v14067_v60 = vpop.f32.mrb[106].mxu0 }
 0xf55   : > { %v14068_v43 = vpop.f32.mrb[107].mxu0 }
 0xf56   : > { %v14069_v51 = vadd.f32 %v14068_v43, %v14067_v60  ;;  %v19430_v38 = vadd.f32 %v19347_v56, %v14066_v41 }
 0xf58   : > { %v19433_v49 = vadd.f32 %v19352_v29, %v14069_v51 }
 0xf5a   : > { %v14070_v9 = vpop.f32.mrb[108].mxu0 }
 0xf5b   : > { %v14071_v10 = vpop.f32.mrb[109].mxu0 }
 0xf5c   : > { %v14072_v2 = vadd.f32 %v14071_v10, %v14070_v9  ;;  %v14073_v33 = vpop.f32.mrb[110].mxu0 }
 0xf5d   : > { %v14074_v59 = vpop.f32.mrb[111].mxu0 }
 0xf5e   : > { %v14075_v19 = vadd.f32 %v14074_v59, %v14073_v33  ;;  %v19436_v24 = vadd.f32 %v19361_v15, %v14072_v2 }
 0xf60   : > { %v19439_v30 = vadd.f32 %v19366_v18, %v14075_v19 }
 0xf62   : > { %v14076_v11 = vpop.f32.mrb[112].mxu0 }
 0xf63   : > { %v14077_v7 = vpop.f32.mrb[113].mxu0 }
 0xf64   : > { %v14078_v40 = vadd.f32 %v14077_v7, %v14076_v11  ;;  %v14079_v56 = vpop.f32.mrb[114].mxu0 }
 0xf65   : > { %v14080_v57 = vpop.f32.mrb[115].mxu0 }
 0xf66   : > { %v14081_v54 = vadd.f32 %v14080_v57, %v14079_v56  ;;  %v19442_v29 = vadd.f32 %v19375_v52, %v14078_v40 }
 0xf68   : > { %v19445_v45 = vadd.f32 %v19380_v47, %v14081_v54 }
 0xf6a   : > { %v14082_v23 = vpop.f32.mrb[116].mxu0 }
 0xf6b   : > { %v14083_v22 = vpop.f32.mrb[117].mxu0 }
 0xf6c   : > { %v14084_v13 = vadd.f32 %v14083_v22, %v14082_v23  ;;  %v14085_v15 = vpop.f32.mrb[118].mxu0 }
 0xf6d   : > { %v14086_v8 = vpop.f32.mrb[119].mxu0 }
 0xf6e   : > { %v14087_v12 = vadd.f32 %v14086_v8, %v14085_v15  ;;  %v19448_v18 = vadd.f32 %v19387_v26, %v14084_v13 }
 0xf70   : > { %v19451_v48 = vadd.f32 %v19392_v61, %v14087_v12 }
 0xf72   : > { %v14088_v53 = vpop.f32.mrb[120].mxu0 }
 0xf73   : > { %v14089_v6 = vpop.f32.mrb[121].mxu0 }
 0xf74   : > { %v14090_v20 = vadd.f32 %v14089_v6, %v14088_v53  ;;  %v14091_v52 = vpop.f32.mrb[122].mxu0 }
 0xf75   : > { %v14092_v55 = vpop.f32.mrb[123].mxu0 }
 0xf76   : > { %v14093_v62 = vadd.f32 %v14092_v55, %v14091_v52  ;;  %v19454_v47 = vadd.f32 %v19397_v46, %v14090_v20 }
 0xf78   : > { %v19457_v21 = vadd.f32 %v19402_v31, %v14093_v62  ;;  %v15845_v31 = vld [vmem:[#allocation4 + $0x304] ss:$8 sps:$4 sm:$0xff]  }
 0xf79   : > { %10555 = vmatprep.mubr.bf16.mxu0 %v15845_v31 }
 0xf7a   : > { %v14094_v41 = vpop.f32.mrb[124].mxu0 }
 0xf7b   : > { %v14095_v60 = vpop.f32.mrb[125].mxu0 }
 0xf7c   : > { %v14096_v43 = vadd.f32 %v14095_v60, %v14094_v41  ;;  %v14097_v26 = vpop.f32.mrb[126].mxu0 }
 0xf7d   : > { %v14098_v51 = vpop.f32.mrb[127].mxu0 }
 0xf7e   : > { %v14099_v9 = vadd.f32 %v14098_v51, %v14097_v26  ;;  %v19460_v61 = vadd.f32 %v19407_v17, %v14096_v43 }
 0xf80   : > { %v19463_v10 = vadd.f32 %v19412_v1, %v14099_v9 }
 0xf82   : > { %v14982_v2 = vpop.f32.mrb[128].mxu0 }
 0xf83   : > { %v9619_v33 = vpop.f32.mrb[129].mxu0 }
 0xf84   : > { %v14983_v59 = vpop.f32.mrb[130].mxu0 }
 0xf85   : > { %v9780_v46 = vpack.c.bf16 %v14983_v59, %v14982_v2  ;;  %v9622_v19 = vpop.f32.mrb[131].mxu0 }
 0xf86   : > { %v9779_v11 = vpack.c.bf16 %v9622_v19, %v9619_v33 }
 0xf8a   : > { %v14986_v7 = vpop.f32.mrb[132].mxu0 }
 0xf8b   : > { %v9635_v40 = vpop.f32.mrb[133].mxu0 }
 0xf8c   : > { %v14987_v56 = vpop.f32.mrb[134].mxu0 }
 0xf8d   : > { %v9782_v57 = vpack.c.bf16 %v14987_v56, %v14986_v7  ;;  %v9638_v54 = vpop.f32.mrb[135].mxu0 }
 0xf8e   : > { %v9781_v23 = vpack.c.bf16 %v9638_v54, %v9635_v40 }
 0xf92   : > { %v14990_v22 = vpop.f32.mrb[136].mxu0 }
 0xf93   : > { %v9651_v17 = vpop.f32.mrb[137].mxu0 }
 0xf94   : > { %v14991_v13 = vpop.f32.mrb[138].mxu0 }
 0xf95   : > { %v9784_v15 = vpack.c.bf16 %v14991_v13, %v14990_v22  ;;  %v9654_v1 = vpop.f32.mrb[139].mxu0 }
 0xf96   : > { %v9783_v8 = vpack.c.bf16 %v9654_v1, %v9651_v17 }
 0xf9a   : > { %v14994_v12 = vpop.f32.mrb[140].mxu0 }
 0xf9b   : > { %v9667_v53 = vpop.f32.mrb[141].mxu0 }
 0xf9c   : > { %v14995_v6 = vpop.f32.mrb[142].mxu0 }
 0xf9d   : > { %v9786_v20 = vpack.c.bf16 %v14995_v6, %v14994_v12  ;;  %v9670_v52 = vpop.f32.mrb[143].mxu0 }
 0xf9e   : > { %v9785_v55 = vpack.c.bf16 %v9670_v52, %v9667_v53 }
 0xfa2   : > { %v14998_v62 = vpop.f32.mrb[144].mxu0 }
 0xfa3   : > { %v9683_v41 = vpop.f32.mrb[145].mxu0 }
 0xfa4   : > { %v14999_v60 = vpop.f32.mrb[146].mxu0 }
 0xfa5   : > { %v9788_v43 = vpack.c.bf16 %v14999_v60, %v14998_v62  ;;  %v9686_v26 = vpop.f32.mrb[147].mxu0  ;;  %v15816_v62 = vld [vmem:[#allocation4 + $0x200] ss:$8 sps:$4 sm:$0xff]   ;;  %v15821_v60 = vld [vmem:[#allocation4 + $0x214] ss:$8 sps:$4 sm:$0xff]  }
 0xfa6   : > { %v9787_v51 = vpack.c.bf16 %v9686_v26, %v9683_v41 }
 0xfa8   : > { %14229 = vmatprep.subr.bf16.mxu1 %v9787_v51 }
 0xfa9   : > { %14230 = vmatpush3.bf16.msra.mxu1 %v9779_v11 }
 0xfaa   : > { %v15002_v9 = vpop.f32.mrb[148].mxu0  ;;  %14231 = vmatprep.subr.bf16.mxu1 %v9788_v43 }
 0xfab   : > { %v9699_v2 = vpop.f32.mrb[149].mxu0 }
 0xfac   : > { %v15003_v33 = vpop.f32.mrb[150].mxu0 }
 0xfad   : > { %v9790_v59 = vpack.c.bf16 %v15003_v33, %v15002_v9  ;;  %v9702_v19 = vpop.f32.mrb[151].mxu0  ;;  %14232 = vmatpush3.bf16.msra.mxu1 %v9780_v46 }
 0xfae   : > { %v9789_v31 = vpack.c.bf16 %v9702_v19, %v9699_v2  ;;  %v15824_v2 = vld [vmem:[#allocation4 + $0x224] ss:$8 sps:$4 sm:$0xff]  }
 0xfb0   : > { %14233 = vmatprep.subr.bf16.mxu1 %v9789_v31  ;;  %v15822_v31 = vld [vmem:[#allocation4 + $0x220] ss:$8 sps:$4 sm:$0xff]  }
 0xfb1   : > { %14234 = vmatpush3.bf16.msra.mxu1 %v9781_v23 }
 0xfb2   : > { %v15006_v7 = vpop.f32.mrb[152].mxu0  ;;  %14235 = vmatprep.subr.bf16.mxu1 %v9790_v59 }
 0xfb3   : > { %v9715_v40 = vpop.f32.mrb[153].mxu0 }
 0xfb4   : > { %v15007_v56 = vpop.f32.mrb[154].mxu0 }
 0xfb5   : > { %v9792_v54 = vpack.c.bf16 %v15007_v56, %v15006_v7  ;;  %v9718_v22 = vpop.f32.mrb[155].mxu0  ;;  %14236 = vmatpush3.bf16.msra.mxu1 %v9782_v57  ;;  %v15827_v56 = vld [vmem:[#allocation4 + $0x234] ss:$8 sps:$4 sm:$0xff]  }
 0xfb6   : > { %v9791_v17 = vpack.c.bf16 %v9718_v22, %v9715_v40 }
 0xfb8   : > { %14237 = vmatprep.subr.bf16.mxu1 %v9791_v17 }
 0xfb9   : > { %14238 = vmatpush3.bf16.msra.mxu1 %v9783_v8 }
 0xfba   : > { %v15010_v11 = vpop.f32.mrb[156].mxu0  ;;  %14239 = vmatprep.subr.bf16.mxu1 %v9792_v54 }
 0xfbb   : > { %v9731_v13 = vpop.f32.mrb[157].mxu0 }
 0xfbc   : > { %v15011_v1 = vpop.f32.mrb[158].mxu0 }
 0xfbd   : > { %v9794_v12 = vpack.c.bf16 %v15011_v1, %v15010_v11  ;;  %v9734_v53 = vpop.f32.mrb[159].mxu0  ;;  %14240 = vmatpush3.bf16.msra.mxu1 %v9784_v15  ;;  %v15819_v15 = vld [vmem:[#allocation4 + $0x210] ss:$8 sps:$4 sm:$0xff]  }
 0xfbe   : > { %v9793_v46 = vpack.c.bf16 %v9734_v53, %v9731_v13  ;;  %v15825_v13 = vld [vmem:[#allocation4 + $0x230] ss:$8 sps:$4 sm:$0xff]   ;;  %v15830_v53 = vld [vmem:[#allocation4 + $0x244] ss:$8 sps:$4 sm:$0xff]  }
 0xfc0   : > { %14241 = vmatprep.subr.bf16.mxu1 %v9793_v46 }
 0xfc1   : > { %14242 = vmatpush3.bf16.msra.mxu1 %v9785_v55 }
 0xfc2   : > { %14243 = vmatprep.subr.bf16.mxu1 %v9794_v12  ;;  %v15016_v23 = vpop.f32.mrb[160].mxu0 }
 0xfc3   : > { %v10187_v6 = vpop.f32.mrb[161].mxu0 }
 0xfc4   : > { %v15017_v52 = vpop.f32.mrb[162].mxu0 }
 0xfc5   : > { %v10348_v41 = vpack.c.bf16 %v15017_v52, %v15016_v23  ;;  %14244 = vmatpush3.bf16.msra.mxu1 %v9786_v20  ;;  %v10190_v57 = vpop.f32.mrb[163].mxu0 }
 0xfc6   : > { %v10347_v8 = vpack.c.bf16 %v10190_v57, %v10187_v6 }
 0xfc8   : > { %9988 = vmatmul.mubr.bf16.vlgmr.msra.gmra.mrb[192].mxu1 %v15816_v62  ;;  %v15828_v62 = vld [vmem:[#allocation4 + $0x240] ss:$8 sps:$4 sm:$0xff]  }
 0xfc9   : > { %9995 = vmatprep.mubr.bf16.mxu1 %v15821_v60 }
 0xfca   : > { %v19465_v43 = vpop.f32.mrb[164].mxu0 }
 0xfcb   : > { %v10203_v26 = vpop.f32.mrb[165].mxu0 }
 0xfcc   : > { %v15021_v51 = vpop.f32.mrb[166].mxu0 }
 0xfcd   : > { %v10350_v9 = vpack.c.bf16 %v15021_v51, %v19465_v43  ;;  %v10206_v55 = vpop.f32.mrb[167].mxu0  ;;  %v15833_v43 = vld [vmem:[#allocation4 + $0x254] ss:$8 sps:$4 sm:$0xff]  }
 0xfce   : > { %v10349_v33 = vpack.c.bf16 %v10206_v55, %v10203_v26 }
 0xfd0   : > { %9996 = vmatmul.mubr.bf16.gmra.mrb[196].mxu1 %v15819_v15 }
 0xfd1   : > { %10003 = vmatprep.mubr.bf16.mxu1 %v15824_v2  ;;  %v15831_v2 = vld [vmem:[#allocation4 + $0x250] ss:$8 sps:$4 sm:$0xff]  }
 0xfd2   : > { %v19468_v59 = vpop.f32.mrb[168].mxu0 }
 0xfd3   : > { %v10219_v20 = vpop.f32.mrb[169].mxu0 }
 0xfd4   : > { %v19470_v19 = vpop.f32.mrb[170].mxu0 }
 0xfd5   : > { %v10352_v7 = vpack.c.bf16 %v19470_v19, %v19468_v59  ;;  %v10222_v40 = vpop.f32.mrb[171].mxu0  ;;  %v15836_v19 = vld [vmem:[#allocation4 + $0x264] ss:$8 sps:$4 sm:$0xff]  }
 0xfd6   : > { %v10351_v54 = vpack.c.bf16 %v10222_v40, %v10219_v20 }
 0xfd8   : > { %10004 = vmatmul.mubr.bf16.gmra.mrb[200].mxu1 %v15822_v31 }
 0xfd9   : > { %10011 = vmatprep.mubr.bf16.mxu1 %v15827_v56 }
 0xfda   : > { %v19474_v22 = vpop.f32.mrb[172].mxu0 }
 0xfdb   : > { %v10235_v17 = vpop.f32.mrb[173].mxu0 }
 0xfdc   : > { %v19476_v11 = vpop.f32.mrb[174].mxu0 }
 0xfdd   : > { %v10354_v1 = vpack.c.bf16 %v19476_v11, %v19474_v22  ;;  %v10238_v12 = vpop.f32.mrb[175].mxu0 }
 0xfde   : > { %v10353_v46 = vpack.c.bf16 %v10238_v12, %v10235_v17 }
 0xfe0   : > { %10012 = vmatmul.mubr.bf16.gmra.mrb[204].mxu1 %v15825_v13  ;;  %v15839_v13 = vld [vmem:[#allocation4 + $0x274] ss:$8 sps:$4 sm:$0xff]  }
 0xfe1   : > { %10019 = vmatprep.mubr.bf16.mxu1 %v15830_v53 }
 0xfe2   : > { %v15032_v23 = vpop.f32.mrb[176].mxu0 }
 0xfe3   : > { %v10251_v6 = vpop.f32.mrb[177].mxu0 }
 0xfe4   : > { %v15033_v52 = vpop.f32.mrb[178].mxu0 }
 0xfe5   : > { %v10356_v57 = vpack.c.bf16 %v15033_v52, %v15032_v23  ;;  %v10254_v60 = vpop.f32.mrb[179].mxu0 }
 0xfe6   : > { %v10355_v26 = vpack.c.bf16 %v10254_v60, %v10251_v6  ;;  %v15843_v60 = vld [vmem:[#allocation4 + $0x300] ss:$8 sps:$4 sm:$0xff]  }
 0xfe8   : > { %10020 = vmatmul.mubr.bf16.gmra.mrb[208].mxu1 %v15828_v62  ;;  %14358 = vmatprep.subr.bf16.mxu0 %v10355_v26  ;;  %v15842_v62 = vld [vmem:[#allocation4 + $0x284] ss:$8 sps:$4 sm:$0xff]   ;;  %v15846_v26 = vld [vmem:[#allocation4 + $0x290] ss:$8 sps:$4 sm:$0xff]  }
 0xfe9   : > { %14359 = vmatpush3.bf16.msra.mxu0 %v10347_v8  ;;  %10027 = vmatprep.mubr.bf16.mxu1 %v15833_v43  ;;  %v15834_v8 = vld [vmem:[#allocation4 + $0x260] ss:$8 sps:$4 sm:$0xff]   ;;  %v15851_v43 = vld [vmem:[#allocation4 + $0x314] ss:$8 sps:$4 sm:$0xff]  }
 0xfea   : > { %v15036_v51 = vpop.f32.mrb[180].mxu0  ;;  %14360 = vmatprep.subr.bf16.mxu0 %v10356_v57 }
 0xfeb   : > { %v10267_v15 = vpop.f32.mrb[181].mxu0 }
 0xfec   : > { %v15037_v55 = vpop.f32.mrb[182].mxu0 }
 0xfed   : > { %v10358_v59 = vpack.c.bf16 %v15037_v55, %v15036_v51  ;;  %v10270_v20 = vpop.f32.mrb[183].mxu0  ;;  %14361 = vmatpush3.bf16.msra.mxu0 %v10348_v41  ;;  %v15849_v51 = vld [vmem:[#allocation4 + $0x310] ss:$8 sps:$4 sm:$0xff]   ;;  %v15855_v55 = vld [vmem:[#allocation4 + $0x320] ss:$8 sps:$4 sm:$0xff]  }
 0xfee   : > { %v10357_v31 = vpack.c.bf16 %v10270_v20, %v10267_v15  ;;  %v15854_v15 = vld [vmem:[#allocation4 + $0x2a4] ss:$8 sps:$4 sm:$0xff]   ;;  %v15861_v20 = vld [vmem:[#allocation4 + $0x330] ss:$8 sps:$4 sm:$0xff]  }
 0xff0   : > { %10028 = vmatmul.mubr.bf16.gmra.mrb[212].mxu1 %v15831_v2  ;;  %14362 = vmatprep.subr.bf16.mxu0 %v10357_v31  ;;  %v15860_v2 = vld [vmem:[#allocation4 + $0x2b4] ss:$8 sps:$4 sm:$0xff]   ;;  %v15869_v31 = vld [vmem:[#allocation4 + $0x344] ss:$8 sps:$4 sm:$0xff]  }
 0xff1   : > { %14363 = vmatpush3.bf16.msra.mxu0 %v10349_v33  ;;  %10035 = vmatprep.mubr.bf16.mxu1 %v15836_v19  ;;  %v15837_v33 = vld [vmem:[#allocation4 + $0x270] ss:$8 sps:$4 sm:$0xff]   ;;  %v15866_v19 = vld [vmem:[#allocation4 + $0x2c4] ss:$8 sps:$4 sm:$0xff]  }
 0xff2   : > { %v15040_v40 = vpop.f32.mrb[184].mxu0  ;;  %14364 = vmatprep.subr.bf16.mxu0 %v10358_v59  ;;  %v15863_v59 = vld [vmem:[#allocation4 + $0x334] ss:$8 sps:$4 sm:$0xff]  }
 0xff3   : > { %v10283_v56 = vpop.f32.mrb[185].mxu0 }
 0xff4   : > { %v15041_v22 = vpop.f32.mrb[186].mxu0 }
 0xff5   : > { %v10360_v17 = vpack.c.bf16 %v15041_v22, %v15040_v40  ;;  %v10286_v11 = vpop.f32.mrb[187].mxu0  ;;  %14365 = vmatpush3.bf16.msra.mxu0 %v10350_v9  ;;  %v15840_v9 = vld [vmem:[#allocation4 + $0x280] ss:$8 sps:$4 sm:$0xff]   ;;  %v15872_v22 = vld [vmem:[#allocation4 + $0x2d4] ss:$8 sps:$4 sm:$0xff]  }
 0xff6   : > { %v10359_v12 = vpack.c.bf16 %v10286_v11, %v10283_v56  ;;  %v15864_v40 = vld [vmem:[#allocation4 + $0x2c0] ss:$8 sps:$4 sm:$0xff]   ;;  %v15873_v11 = vld [vmem:[#allocation4 + $0x350] ss:$8 sps:$4 sm:$0xff]  }
 0xff7   : > { %v15867_v56 = vld [vmem:[#allocation4 + $0x340] ss:$8 sps:$4 sm:$0xff]  }
 0xff8   : > { %10036 = vmatmul.mubr.bf16.gmra.mrb[216].mxu1 %v15834_v8  ;;  %14366 = vmatprep.subr.bf16.mxu0 %v10359_v12  ;;  %v15875_v8 = vld [vmem:[#allocation4 + $0x354] ss:$8 sps:$4 sm:$0xff]   ;;  %v15881_v12 = vld [vmem:[#allocation4 + $0x364] ss:$8 sps:$4 sm:$0xff]  }
 0xff9   : > { %14367 = vmatpush3.bf16.msra.mxu0 %v10351_v54  ;;  %10043 = vmatprep.mubr.bf16.mxu1 %v15839_v13  ;;  %v15848_v54 = vld [vmem:[#allocation4 + $0x294] ss:$8 sps:$4 sm:$0xff]   ;;  %v15878_v13 = vld [vmem:[#allocation4 + $0x2e4] ss:$8 sps:$4 sm:$0xff]  }
 0xffa   : > { %v15044_v41 = vpop.f32.mrb[188].mxu0  ;;  %14368 = vmatprep.subr.bf16.mxu0 %v10360_v17  ;;  %v15870_v17 = vld [vmem:[#allocation4 + $0x2d0] ss:$8 sps:$4 sm:$0xff]  }
 0xffb   : > { %v10299_v53 = vpop.f32.mrb[189].mxu0 }
 0xffc   : > { %v15045_v23 = vpop.f32.mrb[190].mxu0 }
 0xffd   : > { %v10362_v6 = vpack.c.bf16 %v15045_v23, %v15044_v41  ;;  %v10302_v52 = vpop.f32.mrb[191].mxu0  ;;  %14369 = vmatpush3.bf16.msra.mxu0 %v10352_v7  ;;  %v15857_v7 = vld [vmem:[#allocation4 + $0x324] ss:$8 sps:$4 sm:$0xff]   ;;  %v15876_v41 = vld [vmem:[#allocation4 + $0x2e0] ss:$8 sps:$4 sm:$0xff]  }
 0xffe   : > { %v10361_v57 = vpack.c.bf16 %v10302_v52, %v10299_v53  ;;  %v15879_v53 = vld [vmem:[#allocation4 + $0x360] ss:$8 sps:$4 sm:$0xff]   ;;  %v15884_v23 = vld [vmem:[#allocation4 + $0x2f4] ss:$8 sps:$4 sm:$0xff]   ;;  %v15885_v52 = vld [vmem:[#allocation4 + $0x370] ss:$8 sps:$4 sm:$0xff]  }
0x1000   : > { %10044 = vmatmul.mubr.bf16.gmra.mrb[220].mxu1 %v15837_v33  ;;  %14370 = vmatprep.subr.bf16.mxu0 %v10361_v57  ;;  %v15887_v33 = vld [vmem:[#allocation4 + $0x374] ss:$8 sps:$4 sm:$0xff]   ;;  %v15888_v57 = vld [vmem:[#allocation4 + $0x380] ss:$8 sps:$4 sm:$0xff]  }
0x1001   : > { %14371 = vmatpush3.bf16.msra.mxu0 %v10353_v46  ;;  %10051 = vmatprep.mubr.bf16.mxu1 %v15842_v62  ;;  %v15852_v46 = vld [vmem:[#allocation4 + $0x2a0] ss:$8 sps:$4 sm:$0xff]   ;;  %v15890_v62 = vld [vmem:[#allocation4 + $0x384] ss:$8 sps:$4 sm:$0xff]  }
0x1002   : > { %14372 = vmatprep.subr.bf16.mxu0 %v10362_v6  ;;  %v15882_v6 = vld [vmem:[#allocation4 + $0x2f0] ss:$8 sps:$4 sm:$0xff]  }
0x1005   : > { %14373 = vmatpush3.bf16.msra.mxu0 %v10354_v1  ;;  %v15858_v1 = vld [vmem:[#allocation4 + $0x2b0] ss:$8 sps:$4 sm:$0xff]  }
0x1008   : > { %10052 = vmatmul.mubr.bf16.gmra.mrb[224].mxu1 %v15840_v9  ;;  %10556 = vmatmul.mubr.bf16.vlgmr.msra.gmra.mrb[192].mxu0 %v15843_v60  ;;  %v15893_v9 = vld [vmem:[#allocation4 + $0x394] ss:$8 sps:$4 sm:$0xff]   ;;  %v15891_v60 = vld [vmem:[#allocation4 + $0x390] ss:$8 sps:$4 sm:$0xff]  }
0x1009   : > { %10059 = vmatprep.mubr.bf16.mxu1 %v15848_v54  ;;  %10563 = vmatprep.mubr.bf16.mxu0 %v15851_v43  ;;  %v15896_v54 = vld [vmem:[#allocation4 + $0x3a4] ss:$8 sps:$4 sm:$0xff]   ;;  %v15894_v43 = vld [vmem:[#allocation4 + $0x3a0] ss:$8 sps:$4 sm:$0xff]  }
0x1010   : > { %10060 = vmatmul.mubr.bf16.gmra.mrb[228].mxu1 %v15846_v26  ;;  %10564 = vmatmul.mubr.bf16.gmra.mrb[196].mxu0 %v15849_v51  ;;  %v15899_v26 = vld [vmem:[#allocation4 + $0x3b4] ss:$8 sps:$4 sm:$0xff]   ;;  %v15897_v51 = vld [vmem:[#allocation4 + $0x3b0] ss:$8 sps:$4 sm:$0xff]  }
0x1011   : > { %10067 = vmatprep.mubr.bf16.mxu1 %v15854_v15  ;;  %10571 = vmatprep.mubr.bf16.mxu0 %v15857_v7  ;;  %v15902_v15 = vld [vmem:[#allocation4 + $0x3c4] ss:$8 sps:$4 sm:$0xff]   ;;  %v15900_v7 = vld [vmem:[#allocation4 + $0x3c0] ss:$8 sps:$4 sm:$0xff]  }
0x1018   : > { %10068 = vmatmul.mubr.bf16.gmra.mrb[232].mxu1 %v15852_v46  ;;  %10572 = vmatmul.mubr.bf16.gmra.mrb[200].mxu0 %v15855_v55  ;;  %v15905_v46 = vld [vmem:[#allocation4 + $0x3d4] ss:$8 sps:$4 sm:$0xff]   ;;  %v15903_v55 = vld [vmem:[#allocation4 + $0x3d0] ss:$8 sps:$4 sm:$0xff]  }
0x1019   : > { %10075 = vmatprep.mubr.bf16.mxu1 %v15860_v2  ;;  %10579 = vmatprep.mubr.bf16.mxu0 %v15863_v59  ;;  %v15908_v2 = vld [vmem:[#allocation4 + $0x3e4] ss:$8 sps:$4 sm:$0xff]   ;;  %v15906_v59 = vld [vmem:[#allocation4 + $0x3e0] ss:$8 sps:$4 sm:$0xff]  }
0x1020   : > { %10076 = vmatmul.mubr.bf16.gmra.mrb[236].mxu1 %v15858_v1  ;;  %10580 = vmatmul.mubr.bf16.gmra.mrb[204].mxu0 %v15861_v20  ;;  %v15911_v1 = vld [vmem:[#allocation4 + $0x3f4] ss:$8 sps:$4 sm:$0xff]   ;;  %v15909_v20 = vld [vmem:[#allocation4 + $0x3f0] ss:$8 sps:$4 sm:$0xff]  }
0x1021   : > { %10083 = vmatprep.mubr.bf16.mxu1 %v15866_v19  ;;  %10587 = vmatprep.mubr.bf16.mxu0 %v15869_v31 }
0x1028   : > { %10084 = vmatmul.mubr.bf16.gmra.mrb[240].mxu1 %v15864_v40  ;;  %10588 = vmatmul.mubr.bf16.gmra.mrb[208].mxu0 %v15867_v56 }
0x1029   : > { %10091 = vmatprep.mubr.bf16.mxu1 %v15872_v22  ;;  %10595 = vmatprep.mubr.bf16.mxu0 %v15875_v8 }
0x1030   : > { %10092 = vmatmul.mubr.bf16.gmra.mrb[244].mxu1 %v15870_v17  ;;  %10596 = vmatmul.mubr.bf16.gmra.mrb[212].mxu0 %v15873_v11 }
0x1031   : > { %10099 = vmatprep.mubr.bf16.mxu1 %v15878_v13  ;;  %10603 = vmatprep.mubr.bf16.mxu0 %v15881_v12 }
0x1038   : > { %10100 = vmatmul.mubr.bf16.gmra.mrb[248].mxu1 %v15876_v41  ;;  %10604 = vmatmul.mubr.bf16.gmra.mrb[216].mxu0 %v15879_v53 }
0x1039   : > { %10107 = vmatprep.mubr.bf16.mxu1 %v15884_v23  ;;  %10611 = vmatprep.mubr.bf16.mxu0 %v15887_v33 }
0x1040   : > { %10108 = vmatmul.mubr.bf16.gmra.mrb[252].mxu1 %v15882_v6  ;;  %10612 = vmatmul.mubr.bf16.gmra.mrb[220].mxu0 %v15885_v52 }
0x1041   : > { %10619 = vmatprep.mubr.bf16.mxu0 %v15890_v62 }
0x1048   : > { %10620 = vmatmul.mubr.bf16.gmra.mrb[224].mxu0 %v15888_v57 }
0x1049   : > { %10627 = vmatprep.mubr.bf16.mxu0 %v15893_v9 }
0x1050   : > { %10628 = vmatmul.mubr.bf16.gmra.mrb[228].mxu0 %v15891_v60 }
0x1051   : > { %10635 = vmatprep.mubr.bf16.mxu0 %v15896_v54 }
0x1058   : > { %10636 = vmatmul.mubr.bf16.gmra.mrb[232].mxu0 %v15894_v43 }
0x1059   : > { %10643 = vmatprep.mubr.bf16.mxu0 %v15899_v26 }
0x1060   : > { %10644 = vmatmul.mubr.bf16.gmra.mrb[236].mxu0 %v15897_v51 }
0x1061   : > { %10651 = vmatprep.mubr.bf16.mxu0 %v15902_v15 }
0x1068   : > { %10652 = vmatmul.mubr.bf16.gmra.mrb[240].mxu0 %v15900_v7 }
0x1069   : > { %10659 = vmatprep.mubr.bf16.mxu0 %v15905_v46 }
0x1070   : > { %10660 = vmatmul.mubr.bf16.gmra.mrb[244].mxu0 %v15903_v55 }
0x1071   : > { %10667 = vmatprep.mubr.bf16.mxu0 %v15908_v2 }
0x1078   : > { %10668 = vmatmul.mubr.bf16.gmra.mrb[248].mxu0 %v15906_v59 }
0x1079   : > { %10675 = vmatprep.mubr.bf16.mxu0 %v15911_v1 }
0x1080   : > { %10676 = vmatmul.mubr.bf16.gmra.mrb[252].mxu0 %v15909_v20 }
0x109b   : > { %v14245_v19 = vpop.f32.mrb[192].mxu1 }
0x109c   : > { %v14246_v31 = vpop.f32.mrb[193].mxu1 }
0x109d   : > { %v14247_v40 = vadd.f32 %v14246_v31, %v14245_v19  ;;  %v14248_v56 = vpop.f32.mrb[194].mxu1 }
0x109e   : > { %v14249_v22 = vpop.f32.mrb[195].mxu1 }
0x109f   : > { %v19481_v8 = vadd.f32 %v14247_v40, %v19322_v50  ;;  %v14250_v17 = vadd.f32 %v14249_v22, %v14248_v56 }
0x10a1   : > { %v19484_v11 = vadd.f32 %v14250_v17, %v19331_v34 }
0x10a3   : > { %v14251_v13 = vpop.f32.mrb[196].mxu1 }
0x10a4   : > { %v14252_v12 = vpop.f32.mrb[197].mxu1 }
0x10a5   : > { %v14253_v41 = vadd.f32 %v14252_v12, %v14251_v13  ;;  %v14254_v53 = vpop.f32.mrb[198].mxu1 }
0x10a6   : > { %v14255_v23 = vpop.f32.mrb[199].mxu1 }
0x10a7   : > { %v19487_v33 = vadd.f32 %v14253_v41, %v19336_v36  ;;  %v14256_v6 = vadd.f32 %v14255_v23, %v14254_v53 }
0x10a9   : > { %v19490_v52 = vadd.f32 %v14256_v6, %v19345_v42 }
0x10ab   : > { %v14257_v62 = vpop.f32.mrb[200].mxu1 }
0x10ac   : > { %v14258_v57 = vpop.f32.mrb[201].mxu1 }
0x10ad   : > { %v14259_v50 = vadd.f32 %v14258_v57, %v14257_v62  ;;  %v14260_v9 = vpop.f32.mrb[202].mxu1 }
0x10ae   : > { %v14261_v60 = vpop.f32.mrb[203].mxu1 }
0x10af   : > { %v19493_v34 = vadd.f32 %v14259_v50, %v19350_v3  ;;  %v14262_v54 = vadd.f32 %v14261_v60, %v14260_v9 }
0x10b1   : > { %v19496_v43 = vadd.f32 %v14262_v54, %v19359_v37 }
0x10b3   : > { %v14263_v26 = vpop.f32.mrb[204].mxu1 }
0x10b4   : > { %v14264_v51 = vpop.f32.mrb[205].mxu1 }
0x10b5   : > { %v14265_v36 = vadd.f32 %v14264_v51, %v14263_v26  ;;  %v14266_v15 = vpop.f32.mrb[206].mxu1 }
0x10b6   : > { %v14267_v7 = vpop.f32.mrb[207].mxu1 }
0x10b7   : > { %v19499_v42 = vadd.f32 %v14265_v36, %v19364_v16  ;;  %v14268_v46 = vadd.f32 %v14267_v7, %v14266_v15 }
0x10b9   : > { %v19502_v55 = vadd.f32 %v14268_v46, %v19373_v35 }
0x10bb   : > { %v14269_v2 = vpop.f32.mrb[208].mxu1 }
0x10bc   : > { %v14270_v59 = vpop.f32.mrb[209].mxu1 }
0x10bd   : > { %v14271_v3 = vadd.f32 %v14270_v59, %v14269_v2  ;;  %v14272_v1 = vpop.f32.mrb[210].mxu1 }
0x10be   : > { %v14273_v20 = vpop.f32.mrb[211].mxu1 }
0x10bf   : > { %v19505_v37 = vadd.f32 %v14271_v3, %v19378_v4  ;;  %v14274_v19 = vadd.f32 %v14273_v20, %v14272_v1 }
0x10c1   : > { %v19508_v31 = vadd.f32 %v14274_v19, %v19385_v14 }
0x10c3   : > { %v14275_v40 = vpop.f32.mrb[212].mxu1 }
0x10c4   : > { %v14276_v56 = vpop.f32.mrb[213].mxu1 }
0x10c5   : > { %v14277_v16 = vadd.f32 %v14276_v56, %v14275_v40  ;;  %v14278_v22 = vpop.f32.mrb[214].mxu1  ;;  %v10751_v56 = vpop.permute.xlu0 %10750 }
0x10c6   : > { %v14279_v17 = vpop.f32.mrb[215].mxu1 }
0x10c7   : > { %v19511_v35 = vadd.f32 %v14277_v16, %v19390_v58  ;;  %v14280_v13 = vadd.f32 %v14279_v17, %v14278_v22  ;;  %v10756_v17 = vpop.permute.xlu1 %10755 }
0x10c9   : > { %v19514_v12 = vadd.f32 %v14280_v13, %v19395_v39 }
0x10cb   : > { %v14281_v41 = vpop.f32.mrb[216].mxu1 }
0x10cc   : > { %v14282_v53 = vpop.f32.mrb[217].mxu1 }
0x10cd   : > { %v14283_v4 = vadd.f32 %v14282_v53, %v14281_v41  ;;  %v14284_v23 = vpop.f32.mrb[218].mxu1 }
0x10ce   : > { %v14285_v6 = vpop.f32.mrb[219].mxu1 }
0x10cf   : > { %v19517_v14 = vadd.f32 %v14283_v4, %v19400_v27  ;;  %v14286_v62 = vadd.f32 %v14285_v6, %v14284_v23 }
0x10d1   : > { %v19520_v57 = vadd.f32 %v14286_v62, %v19405_v0 }
0x10d3   : > { %v14287_v50 = vpop.f32.mrb[220].mxu1 }
0x10d4   : > { %v14288_v9 = vpop.f32.mrb[221].mxu1 }
0x10d5   : > { %v14289_v58 = vadd.f32 %v14288_v9, %v14287_v50  ;;  %v14290_v60 = vpop.f32.mrb[222].mxu1 }
0x10d6   : > { %v14291_v54 = vpop.f32.mrb[223].mxu1 }
0x10d7   : > { %v19523_v39 = vadd.f32 %v14289_v58, %v19410_v5  ;;  %v14292_v26 = vadd.f32 %v14291_v54, %v14290_v60 }
0x10d9   : > { %v19526_v51 = vadd.f32 %v14292_v26, %v19415_v44 }
0x10db   : > { %v14293_v36 = vpop.f32.mrb[224].mxu1  ;;  %v14374_v15 = vpop.f32.mrb[192].mxu0 }
0x10dc   : > { %v14294_v27 = vpop.f32.mrb[225].mxu1  ;;  %v14375_v7 = vpop.f32.mrb[193].mxu0 }
0x10dd   : > { %v14295_v46 = vadd.f32 %v14294_v27, %v14293_v36  ;;  %v14376_v2 = vadd.f32 %v14375_v7, %v14374_v15  ;;  %v14296_v0 = vpop.f32.mrb[226].mxu1  ;;  %v14377_v59 = vpop.f32.mrb[194].mxu0 }
0x10de   : > { %v14297_v3 = vpop.f32.mrb[227].mxu1  ;;  %v14378_v1 = vpop.f32.mrb[195].mxu0 }
0x10df   : > { %v19529_v20 = vadd.f32 %v14295_v46, %v19418_v28  ;;  %v10684_v5 = vadd.f32 %v14376_v2, %v19481_v8  ;;  %v14298_v19 = vadd.f32 %v14297_v3, %v14296_v0  ;;  %v14379_v40 = vadd.f32 %v14378_v1, %v14377_v59  ;;  %v10761_v15 = vpop.permute.xlu0 %10760  ;;  %v10766_v0 = vpop.permute.xlu1 %10765  ;;  %v11053_v3 = vld [vmem:[%s19756_s13 + $0x8] sm:$0xff] }
0x10e1   : > { %v10908_v44 = vadd.f32 %v10751_v56, %v10684_v5  ;;  %v19533_v16 = vadd.f32 %v14298_v19, %v19421_v25  ;;  %v10685_v22 = vadd.f32 %v14379_v40, %v19484_v11 }
0x10e3   : > { %v10940_v13 = vmul.f32 0.2, %v10908_v44  ;;  %v10909_v41 = vadd.f32 %v10756_v17, %v10685_v22  ;;  %v14299_v53 = vpop.f32.mrb[228].mxu1  ;;  %v14380_v4 = vpop.f32.mrb[196].mxu0 }
0x10e4   : > { %v14300_v23 = vpop.f32.mrb[229].mxu1  ;;  %v14381_v6 = vpop.f32.mrb[197].mxu0 }
0x10e5   : > { %v10941_v28 = vmul.f32 0.2, %v10909_v41  ;;  %v14301_v62 = vadd.f32 %v14300_v23, %v14299_v53  ;;  %v14382_v50 = vadd.f32 %v14381_v6, %v14380_v4  ;;  %v14302_v8 = vpop.f32.mrb[230].mxu1  ;;  %v14383_v9 = vpop.f32.mrb[198].mxu0  ;;  %v10972_v58 = vmax.f32 %v10908_v44, %v10940_v13 }
0x10e6   : > { %v14303_v60 = vpop.f32.mrb[231].mxu1  ;;  %v14384_v54 = vpop.f32.mrb[199].mxu0 }
0x10e7   : > { %v10973_v26 = vmax.f32 %v10909_v41, %v10941_v28  ;;  %v19537_v25 = vadd.f32 %v14301_v62, %v19424_v32  ;;  %v10686_v11 = vadd.f32 %v14382_v50, %v19487_v33  ;;  %v14304_v36 = vadd.f32 %v14303_v60, %v14302_v8  ;;  %v11052_v33 = vld [vmem:[%s19756_s13] sm:$0xff] }
0x10e8   : > { %v14385_v27 = vadd.f32 %v14384_v54, %v14383_v9  ;;  %v10771_v9 = vpop.permute.xlu0 %10770 }
0x10e9   : > { %v10910_v7 = vadd.f32 %v10761_v15, %v10686_v11  ;;  %v19541_v46 = vadd.f32 %v14304_v36, %v19427_v63  ;;  %v11004_v2 = vpack.c.bf16 %v10973_v26, %v10972_v58 }
0x10ea   : > { %v10687_v59 = vadd.f32 %v14385_v27, %v19490_v52 }
0x10eb   : > { %v14305_v1 = vpop.f32.mrb[232].mxu1  ;;  %v14386_v32 = vpop.f32.mrb[200].mxu0  ;;  %v11021_v5 = vunpack.c.h.bf16 %v11004_v2  ;;  %v11020_v19 = vunpack.c.l.bf16 %v11004_v2  ;;  %v10942_v40 = vmul.f32 0.2, %v10910_v7 }
0x10ec   : > { %v10911_v56 = vadd.f32 %v10766_v0, %v10687_v59  ;;  %v14306_v63 = vpop.f32.mrb[233].mxu1  ;;  %v14387_v44 = vpop.f32.mrb[201].mxu0 }
0x10ed   : > { %v14307_v22 = vadd.f32 %v14306_v63, %v14305_v1  ;;  %v14388_v17 = vadd.f32 %v14387_v44, %v14386_v32  ;;  %v14308_v13 = vpop.f32.mrb[234].mxu1  ;;  %v14389_v52 = vpop.f32.mrb[202].mxu0  ;;  %v11085_v41 = vmul.f32 %v11053_v3, %v11021_v5  ;;  %v11084_v6 = vmul.f32 %v11052_v33, %v11020_v19 }
0x10ee   : > { %v10943_v53 = vmul.f32 0.2, %v10911_v56  ;;  %v14309_v4 = vpop.f32.mrb[235].mxu1  ;;  %v14390_v23 = vpop.f32.mrb[203].mxu0  ;;  %v10974_v58 = vmax.f32 %v10910_v7, %v10942_v40  ;;  %v11054_v7 = vld [vmem:[%s19756_s13 + $0x10] sm:$0xff] }
0x10ef   : > { %v19551_v28 = vadd.f32 %v14307_v22, %v19430_v38  ;;  %v10688_v62 = vadd.f32 %v14388_v17, %v19493_v34  ;;  %v14310_v50 = vadd.f32 %v14309_v4, %v14308_v13  ;;  %v14391_v8 = vadd.f32 %v14390_v23, %v14389_v52  ;;  %v10776_v38 = vpop.permute.xlu1 %10775  ;;  %v10781_v4 = vpop.permute.xlu0 %10780 }
0x10f0   : > { %v10975_v60 = vmax.f32 %v10911_v56, %v10943_v53  ;;  %v11120_v54 = vsel %vm11116_vm5, %v11085_v41, 0.0  ;;  %v11117_v26 = vsel %vm11116_vm5, %v11084_v6, 0.0  ;;  %v11055_v56 = vld [vmem:[%s19756_s13 + $0x18] sm:$0xff] }
0x10f1   : > { %v10912_v11 = vadd.f32 %v10771_v9, %v10688_v62  ;;  %v19557_v36 = vadd.f32 %v14310_v50, %v19433_v49  ;;  %v10689_v15 = vadd.f32 %v14391_v8, %v19496_v43  ;;  %11121 = vadd.xlane.f32.xlu1 %v11120_v54  ;;  %11118 = vadd.xlane.f32.xlu0 %v11117_v26 }
0x10f2   : > { %v11005_v27 = vpack.c.bf16 %v10975_v60, %v10974_v58 }
0x10f3   : > { %v10944_v34 = vmul.f32 0.2, %v10912_v11  ;;  %v10913_v2 = vadd.f32 %v10776_v38, %v10689_v15  ;;  %v14311_v0 = vpop.f32.mrb[236].mxu1  ;;  %v14392_v59 = vpop.f32.mrb[204].mxu0  ;;  %v11057_v15 = vld [vmem:[%s19756_s13 + $0x28] sm:$0xff] }
0x10f4   : > { %v14312_v3 = vpop.f32.mrb[237].mxu1  ;;  %v14393_v1 = vpop.f32.mrb[205].mxu0  ;;  %v11022_v32 = vunpack.c.l.bf16 %v11005_v27  ;;  %v11023_v5 = vunpack.c.h.bf16 %v11005_v27 }
0x10f5   : > { %v10945_v49 = vmul.f32 0.2, %v10913_v2  ;;  %v14313_v19 = vadd.f32 %v14312_v3, %v14311_v0  ;;  %v14394_v33 = vadd.f32 %v14393_v1, %v14392_v59  ;;  %v14314_v43 = vpop.f32.mrb[238].mxu1  ;;  %v14395_v40 = vpop.f32.mrb[206].mxu0  ;;  %v10976_v63 = vmax.f32 %v10912_v11, %v10944_v34 }
0x10f6   : > { %v14315_v44 = vpop.f32.mrb[239].mxu1  ;;  %v14396_v22 = vpop.f32.mrb[207].mxu0  ;;  %v11086_v17 = vmul.f32 %v11054_v7, %v11022_v32  ;;  %v11087_v62 = vmul.f32 %v11055_v56, %v11023_v5 }
0x10f7   : > { %v10977_v13 = vmax.f32 %v10913_v2, %v10945_v49  ;;  %v19567_v52 = vadd.f32 %v14313_v19, %v19436_v24  ;;  %v10690_v41 = vadd.f32 %v14394_v33, %v19499_v42  ;;  %v14316_v53 = vadd.f32 %v14315_v44, %v14314_v43  ;;  %v10786_v58 = vpop.permute.xlu1 %10785  ;;  %v11056_v24 = vld [vmem:[%s19756_s13 + $0x20] sm:$0xff]  ;;  %v10791_v56 = vpop.permute.xlu0 %10790 }
0x10f8   : > { %v14397_v23 = vadd.f32 %v14396_v22, %v14395_v40  ;;  %v11123_v6 = vsel %vm11116_vm5, %v11086_v17, 0.0  ;;  %v11126_v2 = vsel %vm11116_vm5, %v11087_v62, 0.0 }
0x10f9   : > { %v10914_v50 = vadd.f32 %v10781_v4, %v10690_v41  ;;  %v19572_v8 = vadd.f32 %v14316_v53, %v19439_v30  ;;  %11124 = vadd.xlane.f32.xlu0 %v11123_v6  ;;  %v11006_v9 = vpack.c.bf16 %v10977_v13, %v10976_v63 }
0x10fa   : > { %v10691_v60 = vadd.f32 %v14397_v23, %v19502_v55 }
0x10fb   : > { %v14317_v42 = vpop.f32.mrb[240].mxu1  ;;  %v14398_v54 = vpop.f32.mrb[208].mxu0  ;;  %v11024_v26 = vunpack.c.l.bf16 %v11006_v9  ;;  %v11025_v11 = vunpack.c.h.bf16 %v11006_v9  ;;  %v10946_v38 = vmul.f32 0.2, %v10914_v50  ;;  %v11059_v9 = vld [vmem:[%s19756_s13 + $0x38] sm:$0xff] }
0x10fc   : > { %v10915_v30 = vadd.f32 %v10786_v58, %v10691_v60  ;;  %v14318_v27 = vpop.f32.mrb[241].mxu1  ;;  %v14399_v34 = vpop.f32.mrb[209].mxu0 }
0x10fd   : > { %v14319_v0 = vadd.f32 %v14318_v27, %v14317_v42  ;;  %v14400_v55 = vadd.f32 %v14399_v34, %v14398_v54  ;;  %11127 = vadd.xlane.f32.xlu0 %v11126_v2  ;;  %v14320_v59 = vpop.f32.mrb[242].mxu1  ;;  %v14401_v7 = vpop.f32.mrb[210].mxu0  ;;  %v11088_v3 = vmul.f32 %v11056_v24, %v11024_v26  ;;  %v11089_v49 = vmul.f32 %v11057_v15, %v11025_v11 }
0x10fe   : > { %v10947_v1 = vmul.f32 0.2, %v10915_v30  ;;  %v14321_v32 = vpop.f32.mrb[243].mxu1  ;;  %v14402_v5 = vpop.f32.mrb[211].mxu0  ;;  %v10978_v63 = vmax.f32 %v10914_v50, %v10946_v38  ;;  %v11058_v50 = vld [vmem:[%s19756_s13 + $0x30] sm:$0xff] }
0x10ff   : > { %v19583_v19 = vadd.f32 %v14319_v0, %v19442_v29  ;;  %v10692_v33 = vadd.f32 %v14400_v55, %v19505_v37  ;;  %v14322_v43 = vadd.f32 %v14321_v32, %v14320_v59  ;;  %v14403_v40 = vadd.f32 %v14402_v5, %v14401_v7  ;;  %v10796_v29 = vpop.permute.xlu1 %10795  ;;  %v10801_v7 = vpop.permute.xlu0 %10800 }
0x1100   : > { %v10979_v44 = vmax.f32 %v10915_v30, %v10947_v1  ;;  %v11129_v22 = vsel %vm11116_vm5, %v11088_v3, 0.0  ;;  %v11132_v17 = vsel %vm11116_vm5, %v11089_v49, 0.0 }
0x1101   : > { %v10916_v13 = vadd.f32 %v10791_v56, %v10692_v33  ;;  %v19589_v41 = vadd.f32 %v14322_v43, %v19445_v45  ;;  %v10693_v53 = vadd.f32 %v14403_v40, %v19508_v31  ;;  %11130 = vadd.xlane.f32.xlu1 %v11129_v22  ;;  %11133 = vadd.xlane.f32.xlu0 %v11132_v17  ;;  %v11061_v22 = vld [vmem:[%s19756_s13 + $0x48] sm:$0xff] }
0x1102   : > { %v11007_v4 = vpack.c.bf16 %v10979_v44, %v10978_v63 }
0x1103   : > { %v10948_v37 = vmul.f32 0.2, %v10916_v13  ;;  %v10917_v23 = vadd.f32 %v10796_v29, %v10693_v53  ;;  %v14323_v6 = vpop.f32.mrb[244].mxu1  ;;  %v14404_v62 = vpop.f32.mrb[212].mxu0 }
0x1104   : > { %v14324_v45 = vpop.f32.mrb[245].mxu1  ;;  %v14405_v58 = vpop.f32.mrb[213].mxu0  ;;  %v11026_v60 = vunpack.c.l.bf16 %v11007_v4  ;;  %v11027_v31 = vunpack.c.h.bf16 %v11007_v4 }
0x1105   : > { %v10949_v24 = vmul.f32 0.2, %v10917_v23  ;;  %v14325_v42 = vadd.f32 %v14324_v45, %v14323_v6  ;;  %v14406_v54 = vadd.f32 %v14405_v58, %v14404_v62  ;;  %v14326_v26 = vpop.f32.mrb[246].mxu1  ;;  %v14407_v11 = vpop.f32.mrb[214].mxu0  ;;  %v10980_v15 = vmax.f32 %v10916_v13, %v10948_v37 }
0x1106   : > { %v14327_v38 = vpop.f32.mrb[247].mxu1  ;;  %v14408_v30 = vpop.f32.mrb[215].mxu0  ;;  %v11090_v27 = vmul.f32 %v11058_v50, %v11026_v60  ;;  %v11091_v34 = vmul.f32 %v11059_v9, %v11027_v31 }
0x1107   : > { %v10981_v2 = vmax.f32 %v10917_v23, %v10949_v24  ;;  %v19599_v0 = vadd.f32 %v14325_v42, %v19448_v18  ;;  %v10694_v55 = vadd.f32 %v14406_v54, %v19511_v35  ;;  %v14328_v59 = vadd.f32 %v14327_v38, %v14326_v26  ;;  %v10806_v43 = vpop.permute.xlu1 %10805  ;;  %v11060_v35 = vld [vmem:[%s19756_s13 + $0x40] sm:$0xff]  ;;  %v10811_v24 = vpop.permute.xlu0 %10810 }
0x1108   : > { %v14409_v3 = vadd.f32 %v14408_v30, %v14407_v11  ;;  %v11135_v1 = vsel %vm11116_vm5, %v11090_v27, 0.0  ;;  %v11138_v32 = vsel %vm11116_vm5, %v11091_v34, 0.0 }
0x1109   : > { %v10918_v5 = vadd.f32 %v10801_v7, %v10694_v55  ;;  %v19605_v49 = vadd.f32 %v14328_v59, %v19451_v48  ;;  %11136 = vadd.xlane.f32.xlu1 %v11135_v1  ;;  %11139 = vadd.xlane.f32.xlu0 %v11138_v32  ;;  %v11008_v33 = vpack.c.bf16 %v10981_v2, %v10980_v15  ;;  %v11062_v59 = vld [vmem:[%s19756_s13 + $0x50] sm:$0xff]  ;;  %v11063_v7 = vld [vmem:[%s19756_s13 + $0x58] sm:$0xff] }
0x110a   : > { %v10695_v18 = vadd.f32 %v14409_v3, %v19514_v12 }
0x110b   : > { %v14329_v40 = vpop.f32.mrb[248].mxu1  ;;  %v14410_v56 = vpop.f32.mrb[216].mxu0  ;;  %v11028_v63 = vunpack.c.l.bf16 %v11008_v33  ;;  %v11029_v44 = vunpack.c.h.bf16 %v11008_v33  ;;  %v10950_v48 = vmul.f32 0.2, %v10918_v5 }
0x110c   : > { %v10919_v17 = vadd.f32 %v10806_v43, %v10695_v18  ;;  %v14330_v13 = vpop.f32.mrb[249].mxu1  ;;  %v14411_v53 = vpop.f32.mrb[217].mxu0 }
0x110d   : > { %v14331_v29 = vadd.f32 %v14330_v13, %v14329_v40  ;;  %v14412_v4 = vadd.f32 %v14411_v53, %v14410_v56  ;;  %v14332_v37 = vpop.f32.mrb[250].mxu1  ;;  %v14413_v12 = vpop.f32.mrb[218].mxu0  ;;  %v11092_v23 = vmul.f32 %v11060_v35, %v11028_v63  ;;  %v11093_v9 = vmul.f32 %v11061_v22, %v11029_v44 }
0x110e   : > { %v10951_v6 = vmul.f32 0.2, %v10919_v17  ;;  %v14333_v62 = vpop.f32.mrb[251].mxu1  ;;  %v14414_v50 = vpop.f32.mrb[219].mxu0  ;;  %v10982_v42 = vmax.f32 %v10918_v5, %v10950_v48 }
0x110f   : > { %v19615_v45 = vadd.f32 %v14331_v29, %v19454_v47  ;;  %v10696_v58 = vadd.f32 %v14412_v4, %v19517_v14  ;;  %v14334_v60 = vadd.f32 %v14333_v62, %v14332_v37  ;;  %v14415_v31 = vadd.f32 %v14414_v50, %v14413_v12  ;;  %v10816_v47 = vpop.permute.xlu1 %10815  ;;  %v10821_v53 = vpop.permute.xlu0 %10820 }
0x1110   : > { %v10983_v54 = vmax.f32 %v10919_v17, %v10951_v6  ;;  %v11141_v26 = vsel %vm11116_vm5, %v11092_v23, 0.0  ;;  %v11144_v11 = vsel %vm11116_vm5, %v11093_v9, 0.0 }
0x1111   : > { %v10920_v15 = vadd.f32 %v10811_v24, %v10696_v58  ;;  %v19621_v38 = vadd.f32 %v14334_v60, %v19457_v21  ;;  %v10697_v30 = vadd.f32 %v14415_v31, %v19520_v57  ;;  %11142 = vadd.xlane.f32.xlu1 %v11141_v26  ;;  %11145 = vadd.xlane.f32.xlu0 %v11144_v11 }
0x1112   : > { %v11009_v27 = vpack.c.bf16 %v10983_v54, %v10982_v42 }
0x1113   : > { %v10952_v14 = vmul.f32 0.2, %v10920_v15  ;;  %v10921_v34 = vadd.f32 %v10816_v47, %v10697_v30  ;;  %v14335_v2 = vpop.f32.mrb[252].mxu1  ;;  %v14416_v55 = vpop.f32.mrb[220].mxu0 }
0x1114   : > { %v14336_v21 = vpop.f32.mrb[253].mxu1  ;;  %v14417_v3 = vpop.f32.mrb[221].mxu0  ;;  %v11030_v1 = vunpack.c.l.bf16 %v11009_v27  ;;  %v11031_v57 = vunpack.c.h.bf16 %v11009_v27 }
0x1115   : > { %v10953_v32 = vmul.f32 0.2, %v10921_v34  ;;  %v14337_v5 = vadd.f32 %v14336_v21, %v14335_v2  ;;  %v14418_v33 = vadd.f32 %v14417_v3, %v14416_v55  ;;  %v14338_v43 = vpop.f32.mrb[254].mxu1  ;;  %v14419_v18 = vpop.f32.mrb[222].mxu0  ;;  %v10984_v35 = vmax.f32 %v10920_v15, %v10952_v14 }
0x1116   : > { %v14339_v40 = vpop.f32.mrb[255].mxu1  ;;  %v14420_v56 = vpop.f32.mrb[223].mxu0  ;;  %v11094_v63 = vmul.f32 %v11062_v59, %v11030_v1  ;;  %v11095_v44 = vmul.f32 %v11063_v7, %v11031_v57 }
0x1117   : > { %v10985_v22 = vmax.f32 %v10921_v34, %v10953_v32  ;;  %v19631_v48 = vadd.f32 %v14337_v5, %v19460_v61  ;;  %v10698_v17 = vadd.f32 %v14418_v33, %v19523_v39  ;;  %v14340_v13 = vadd.f32 %v14339_v40, %v14338_v43  ;;  %v11064_v61 = vld [vmem:[%s19756_s13 + $0x60] sm:$0xff]  ;;  %v11065_v39 = vld [vmem:[%s19756_s13 + $0x68] sm:$0xff]  ;;  %v10826_v50 = vpop.permute.xlu1 %10825  ;;  %v10831_v34 = vpop.permute.xlu0 %10830  ;;  %v11067_v5 = vld [vmem:[%s19756_s13 + $0x78] sm:$0xff] }
0x1118   : > { %v14421_v29 = vadd.f32 %v14420_v56, %v14419_v18  ;;  %v11147_v4 = vsel %vm11116_vm5, %v11094_v63, 0.0  ;;  %v11150_v37 = vsel %vm11116_vm5, %v11095_v44, 0.0 }
0x1119   : > { %v10922_v12 = vadd.f32 %v10821_v53, %v10698_v17  ;;  %v19637_v23 = vadd.f32 %v14340_v13, %v19463_v10  ;;  %11148 = vadd.xlane.f32.xlu1 %v11147_v4  ;;  %11151 = vadd.xlane.f32.xlu0 %v11150_v37  ;;  %v11010_v6 = vpack.c.bf16 %v10985_v22, %v10984_v35 }
0x111a   : > { %v10699_v62 = vadd.f32 %v14421_v29, %v19526_v51 }
0x111b   : > { %v14422_v9 = vpop.f32.mrb[224].mxu0  ;;  %v11032_v58 = vunpack.c.l.bf16 %v11010_v6  ;;  %v11033_v60 = vunpack.c.h.bf16 %v11010_v6  ;;  %v10954_v31 = vmul.f32 0.2, %v10922_v12  ;;  %v10836_v21 = vpop.permute.xlu1 %10835 }
0x111c   : > { %v10923_v10 = vadd.f32 %v10826_v50, %v10699_v62  ;;  %v14423_v24 = vpop.f32.mrb[225].mxu0  ;;  %v10841_v29 = vpop.permute.xlu0 %10840 }
0x111d   : > { %v14424_v42 = vadd.f32 %v14423_v24, %v14422_v9  ;;  %v14425_v54 = vpop.f32.mrb[226].mxu0  ;;  %v11096_v26 = vmul.f32 %v11064_v61, %v11032_v58  ;;  %v11097_v11 = vmul.f32 %v11065_v39, %v11033_v60  ;;  %v10986_v2 = vmax.f32 %v10922_v12, %v10954_v31  ;;  %v11068_v39 = vld [vmem:[%s19756_s13 + $0x80] sm:$0xff]  ;;  %v11069_v31 = vld [vmem:[%s19756_s13 + $0x88] sm:$0xff] }
0x111e   : > { %v10955_v51 = vmul.f32 0.2, %v10923_v10  ;;  %v14426_v15 = vpop.f32.mrb[227].mxu0 }
0x111f   : > { %v10700_v30 = vadd.f32 %v14424_v42, %v19529_v20  ;;  %v14427_v47 = vadd.f32 %v14426_v15, %v14425_v54  ;;  %v11153_v27 = vsel %vm11116_vm5, %v11096_v26, 0.0  ;;  %v11156_v14 = vsel %vm11116_vm5, %v11097_v11, 0.0  ;;  %v11066_v20 = vld [vmem:[%s19756_s13 + $0x70] sm:$0xff]  ;;  %v10846_v61 = vpop.permute.xlu1 %10845 }
0x1120   : > { %v10987_v55 = vmax.f32 %v10923_v10, %v10955_v51  ;;  %11154 = vadd.xlane.f32.xlu1 %v11153_v27  ;;  %11157 = vadd.xlane.f32.xlu0 %v11156_v14  ;;  %v10851_v14 = vpop.permute.xlu0 %10850 }
0x1121   : > { %v10924_v59 = vadd.f32 %v10831_v34, %v10700_v30  ;;  %v10701_v7 = vadd.f32 %v14427_v47, %v19533_v16 }
0x1122   : > { %v11011_v3 = vpack.c.bf16 %v10987_v55, %v10986_v2 }
0x1123   : > { %v10956_v1 = vmul.f32 0.2, %v10924_v59  ;;  %v10925_v57 = vadd.f32 %v10836_v21, %v10701_v7  ;;  %v14428_v32 = vpop.f32.mrb[228].mxu0  ;;  %v10856_v7 = vpop.permute.xlu1 %10855  ;;  %v11070_v21 = vld [vmem:[%s19756_s13 + $0x90] sm:$0xff] }
0x1124   : > { %v14429_v33 = vpop.f32.mrb[229].mxu0  ;;  %v11034_v43 = vunpack.c.l.bf16 %v11011_v3  ;;  %v11035_v18 = vunpack.c.h.bf16 %v11011_v3 }
0x1125   : > { %v10957_v35 = vmul.f32 0.2, %v10925_v57  ;;  %v14430_v40 = vadd.f32 %v14429_v33, %v14428_v32  ;;  %v14431_v56 = vpop.f32.mrb[230].mxu0  ;;  %v10988_v22 = vmax.f32 %v10924_v59, %v10956_v1 }
0x1126   : > { %v14432_v16 = vpop.f32.mrb[231].mxu0  ;;  %v11098_v63 = vmul.f32 %v11066_v20, %v11034_v43  ;;  %v11099_v44 = vmul.f32 %v11067_v5, %v11035_v18  ;;  %v11071_v20 = vld [vmem:[%s19756_s13 + $0x98] sm:$0xff] }
0x1127   : > { %v10989_v17 = vmax.f32 %v10925_v57, %v10957_v35  ;;  %v10702_v13 = vadd.f32 %v14430_v40, %v19537_v25  ;;  %v14433_v53 = vadd.f32 %v14432_v16, %v14431_v56 }
0x1128   : > { %v11159_v4 = vsel %vm11116_vm5, %v11098_v63, 0.0  ;;  %v11162_v37 = vsel %vm11116_vm5, %v11099_v44, 0.0 }
0x1129   : > { %v10926_v12 = vadd.f32 %v10841_v29, %v10702_v13  ;;  %v10703_v6 = vadd.f32 %v14433_v53, %v19541_v46  ;;  %11160 = vadd.xlane.f32.xlu1 %v11159_v4  ;;  %11163 = vadd.xlane.f32.xlu0 %v11162_v37  ;;  %v11012_v62 = vpack.c.bf16 %v10989_v17, %v10988_v22  ;;  %v10861_v17 = vpop.permute.xlu0 %10860  ;;  %v10866_v37 = vpop.permute.xlu1 %10865 }
0x112b   : > { %v10958_v50 = vmul.f32 0.2, %v10926_v12  ;;  %v10927_v9 = vadd.f32 %v10846_v61, %v10703_v6  ;;  %v14434_v25 = vpop.f32.mrb[232].mxu0  ;;  %v11036_v58 = vunpack.c.l.bf16 %v11012_v62  ;;  %v11037_v60 = vunpack.c.h.bf16 %v11012_v62 }
0x112c   : > { %v14435_v10 = vpop.f32.mrb[233].mxu0 }
0x112d   : > { %v10959_v24 = vmul.f32 0.2, %v10927_v9  ;;  %v14436_v46 = vadd.f32 %v14435_v10, %v14434_v25  ;;  %v14437_v42 = vpop.f32.mrb[234].mxu0  ;;  %v11100_v54 = vmul.f32 %v11068_v39, %v11036_v58  ;;  %v10990_v26 = vmax.f32 %v10926_v12, %v10958_v50  ;;  %v11072_v12 = vld [vmem:[%s19756_s13 + $0xa0] sm:$0xff]  ;;  %v11073_v50 = vld [vmem:[%s19756_s13 + $0xa8] sm:$0xff] }
0x112e   : > { %v14438_v11 = vpop.f32.mrb[235].mxu0  ;;  %v11101_v51 = vmul.f32 %v11069_v31, %v11037_v60 }
0x112f   : > { %v10991_v15 = vmax.f32 %v10927_v9, %v10959_v24  ;;  %v10704_v30 = vadd.f32 %v14436_v46, %v19551_v28  ;;  %v14439_v47 = vadd.f32 %v14438_v11, %v14437_v42  ;;  %v11165_v27 = vsel %vm11116_vm5, %v11100_v54, 0.0  ;;  %v10871_v11 = vpop.permute.xlu0 %10870 }
0x1130   : > { %11166 = vadd.xlane.f32.xlu1 %v11165_v27  ;;  %v11168_v34 = vsel %vm11116_vm5, %v11101_v51, 0.0  ;;  %v10876_v27 = vpop.permute.xlu1 %10875 }
0x1131   : > { %v10928_v2 = vadd.f32 %v10851_v14, %v10704_v30  ;;  %v10705_v55 = vadd.f32 %v14439_v47, %v19557_v36  ;;  %11169 = vadd.xlane.f32.xlu0 %v11168_v34  ;;  %v11013_v59 = vpack.c.bf16 %v10991_v15, %v10990_v26  ;;  %v11074_v14 = vld [vmem:[%s19756_s13 + $0xb0] sm:$0xff] }
0x1133   : > { %v10960_v3 = vmul.f32 0.2, %v10928_v2  ;;  %v10929_v1 = vadd.f32 %v10856_v7, %v10705_v55  ;;  %v14440_v28 = vpop.f32.mrb[236].mxu0  ;;  %v11038_v57 = vunpack.c.l.bf16 %v11013_v59  ;;  %v11039_v32 = vunpack.c.h.bf16 %v11013_v59  ;;  %v11075_v7 = vld [vmem:[%s19756_s13 + $0xb8] sm:$0xff] }
0x1134   : > { %v14441_v5 = vpop.f32.mrb[237].mxu0 }
0x1135   : > { %v10961_v33 = vmul.f32 0.2, %v10929_v1  ;;  %v14442_v43 = vadd.f32 %v14441_v5, %v14440_v28  ;;  %v14443_v36 = vpop.f32.mrb[238].mxu0  ;;  %v11102_v18 = vmul.f32 %v11070_v21, %v11038_v57  ;;  %v10992_v35 = vmax.f32 %v10928_v2, %v10960_v3 }
0x1136   : > { %v14444_v40 = vpop.f32.mrb[239].mxu0  ;;  %v11103_v56 = vmul.f32 %v11071_v20, %v11039_v32 }
0x1137   : > { %v10993_v16 = vmax.f32 %v10929_v1, %v10961_v33  ;;  %v10706_v63 = vadd.f32 %v14442_v43, %v19567_v52  ;;  %v14445_v44 = vadd.f32 %v14444_v40, %v14443_v36  ;;  %v11171_v22 = vsel %vm11116_vm5, %v11102_v18, 0.0  ;;  %v10881_v18 = vpop.permute.xlu0 %10880 }
0x1138   : > { %11172 = vadd.xlane.f32.xlu1 %v11171_v22  ;;  %v11174_v13 = vsel %vm11116_vm5, %v11103_v56, 0.0 }
0x1139   : > { %v10930_v53 = vadd.f32 %v10861_v17, %v10706_v63  ;;  %v10707_v29 = vadd.f32 %v14445_v44, %v19572_v8  ;;  %11175 = vadd.xlane.f32.xlu0 %v11174_v13  ;;  %v11014_v4 = vpack.c.bf16 %v10993_v16, %v10992_v35  ;;  %v10886_v63 = vpop.permute.xlu1 %10885  ;;  %v11076_v44 = vld [vmem:[%s19756_s13 + $0xc0] sm:$0xff] }
0x113b   : > { %v10962_v6 = vmul.f32 0.2, %v10930_v53  ;;  %v10931_v62 = vadd.f32 %v10866_v37, %v10707_v29  ;;  %v14446_v52 = vpop.f32.mrb[240].mxu0  ;;  %v11040_v61 = vunpack.c.l.bf16 %v11014_v4  ;;  %v11041_v39 = vunpack.c.h.bf16 %v11014_v4  ;;  %v11077_v29 = vld [vmem:[%s19756_s13 + $0xc8] sm:$0xff] }
0x113c   : > { %v14447_v9 = vpop.f32.mrb[241].mxu0 }
0x113d   : > { %v10963_v25 = vmul.f32 0.2, %v10931_v62  ;;  %v14448_v58 = vadd.f32 %v14447_v9, %v14446_v52  ;;  %v14449_v8 = vpop.f32.mrb[242].mxu0  ;;  %v11104_v60 = vmul.f32 %v11072_v12, %v11040_v61  ;;  %v10994_v31 = vmax.f32 %v10930_v53, %v10962_v6 }
0x113e   : > { %v14450_v10 = vpop.f32.mrb[243].mxu0  ;;  %v11105_v24 = vmul.f32 %v11073_v50, %v11041_v39 }
0x113f   : > { %v10995_v46 = vmax.f32 %v10931_v62, %v10963_v25  ;;  %v10708_v42 = vadd.f32 %v14448_v58, %v19583_v19  ;;  %v14451_v54 = vadd.f32 %v14450_v10, %v14449_v8  ;;  %v11177_v26 = vsel %vm11116_vm5, %v11104_v60, 0.0  ;;  %v10891_v58 = vpop.permute.xlu0 %10890 }
0x1140   : > { %11178 = vadd.xlane.f32.xlu1 %v11177_v26  ;;  %v11180_v51 = vsel %vm11116_vm5, %v11105_v24, 0.0  ;;  %v10896_v24 = vpop.permute.xlu1 %10895 }
0x1141   : > { %v10932_v15 = vadd.f32 %v10871_v11, %v10708_v42  ;;  %v10709_v30 = vadd.f32 %v14451_v54, %v19589_v41  ;;  %11181 = vadd.xlane.f32.xlu0 %v11180_v51  ;;  %v11015_v47 = vpack.c.bf16 %v10995_v46, %v10994_v31  ;;  %v11078_v46 = vld [vmem:[%s19756_s13 + $0xd0] sm:$0xff]  ;;  %v11079_v51 = vld [vmem:[%s19756_s13 + $0xd8] sm:$0xff] }
0x1143   : > { %v10964_v34 = vmul.f32 0.2, %v10932_v15  ;;  %v10933_v2 = vadd.f32 %v10876_v27, %v10709_v30  ;;  %v14452_v19 = vpop.f32.mrb[244].mxu0  ;;  %v11042_v55 = vunpack.c.l.bf16 %v11015_v47  ;;  %v11043_v59 = vunpack.c.h.bf16 %v11015_v47 }
0x1144   : > { %v14453_v21 = vpop.f32.mrb[245].mxu0 }
0x1145   : > { %v10965_v3 = vmul.f32 0.2, %v10933_v2  ;;  %v14454_v1 = vadd.f32 %v14453_v21, %v14452_v19  ;;  %v14455_v41 = vpop.f32.mrb[246].mxu0  ;;  %v11106_v28 = vmul.f32 %v11074_v14, %v11042_v55  ;;  %v10996_v57 = vmax.f32 %v10932_v15, %v10964_v34  ;;  %v10901_v21 = vpop.permute.xlu0 %10900 }
0x1146   : > { %v14456_v32 = vpop.f32.mrb[247].mxu0  ;;  %v11107_v20 = vmul.f32 %v11075_v7, %v11043_v59 }
0x1147   : > { %v10997_v5 = vmax.f32 %v10933_v2, %v10965_v3  ;;  %v10710_v33 = vadd.f32 %v14454_v1, %v19599_v0  ;;  %v14457_v43 = vadd.f32 %v14456_v32, %v14455_v41  ;;  %v11183_v36 = vsel %vm11116_vm5, %v11106_v28, 0.0  ;;  %v11080_v32 = vld [vmem:[%s19756_s13 + $0xe0] sm:$0xff] }
0x1148   : > { %11184 = vadd.xlane.f32.xlu1 %v11183_v36  ;;  %v11186_v35 = vsel %vm11116_vm5, %v11107_v20, 0.0 }
0x1149   : > { %v10934_v40 = vadd.f32 %v10881_v18, %v10710_v33  ;;  %v10711_v56 = vadd.f32 %v14457_v43, %v19605_v49  ;;  %11187 = vadd.xlane.f32.xlu0 %v11186_v35  ;;  %v11016_v16 = vpack.c.bf16 %v10997_v5, %v10996_v57  ;;  %v10906_v57 = vpop.permute.xlu1 %10905 }
0x114b   : > { %v10966_v22 = vmul.f32 0.2, %v10934_v40  ;;  %v10935_v17 = vadd.f32 %v10886_v63, %v10711_v56  ;;  %v14458_v0 = vpop.f32.mrb[248].mxu0  ;;  %v11044_v13 = vunpack.c.l.bf16 %v11016_v16  ;;  %v11045_v53 = vunpack.c.h.bf16 %v11016_v16 }
0x114c   : > { %v14459_v4 = vpop.f32.mrb[249].mxu0 }
0x114d   : > { %v10967_v37 = vmul.f32 0.2, %v10935_v17  ;;  %v14460_v12 = vadd.f32 %v14459_v4, %v14458_v0  ;;  %v14461_v49 = vpop.f32.mrb[250].mxu0  ;;  %v11108_v6 = vmul.f32 %v11076_v44, %v11044_v13  ;;  %v10998_v62 = vmax.f32 %v10934_v40, %v10966_v22  ;;  %v11082_v44 = vld [vmem:[%s19756_s13 + $0xf0] sm:$0xff]  ;;  %v11083_v22 = vld [vmem:[%s19756_s13 + $0xf8] sm:$0xff] }
0x114e   : > { %v14462_v52 = vpop.f32.mrb[251].mxu0  ;;  %v11109_v61 = vmul.f32 %v11077_v29, %v11045_v53 }
0x114f   : > { %v10999_v39 = vmax.f32 %v10935_v17, %v10967_v37  ;;  %v10712_v50 = vadd.f32 %v14460_v12, %v19615_v45  ;;  %v14463_v9 = vadd.f32 %v14462_v52, %v14461_v49  ;;  %v11189_v25 = vsel %vm11116_vm5, %v11108_v6, 0.0 }
0x1150   : > { %11190 = vadd.xlane.f32.xlu1 %v11189_v25  ;;  %v11192_v8 = vsel %vm11116_vm5, %v11109_v61, 0.0 }
0x1151   : > { %v10936_v60 = vadd.f32 %v10891_v58, %v10712_v50  ;;  %v10713_v31 = vadd.f32 %v14463_v9, %v19621_v38  ;;  %11193 = vadd.xlane.f32.xlu0 %v11192_v8  ;;  %v11017_v10 = vpack.c.bf16 %v10999_v39, %v10998_v62 }
0x1153   : > { %v10968_v42 = vmul.f32 0.2, %v10936_v60  ;;  %v10937_v54 = vadd.f32 %v10896_v24, %v10713_v31  ;;  %v14464_v45 = vpop.f32.mrb[252].mxu0  ;;  %v11046_v26 = vunpack.c.l.bf16 %v11017_v10  ;;  %v11047_v11 = vunpack.c.h.bf16 %v11017_v10 }
0x1154   : > { %v14465_v15 = vpop.f32.mrb[253].mxu0 }
0x1155   : > { %v10969_v30 = vmul.f32 0.2, %v10937_v54  ;;  %v14466_v47 = vadd.f32 %v14465_v15, %v14464_v45  ;;  %v14467_v38 = vpop.f32.mrb[254].mxu0  ;;  %v11110_v27 = vmul.f32 %v11078_v46, %v11046_v26  ;;  %v11000_v14 = vmax.f32 %v10936_v60, %v10968_v42 }
0x1156   : > { %v14468_v34 = vpop.f32.mrb[255].mxu0  ;;  %v11111_v2 = vmul.f32 %v11079_v51, %v11047_v11 }
0x1157   : > { %v11001_v19 = vmax.f32 %v10937_v54, %v10969_v30  ;;  %v10714_v55 = vadd.f32 %v14466_v47, %v19631_v48  ;;  %v14469_v59 = vadd.f32 %v14468_v34, %v14467_v38  ;;  %v11195_v7 = vsel %vm11116_vm5, %v11110_v27, 0.0  ;;  %v11081_v48 = vld [vmem:[%s19756_s13 + $0xe8] sm:$0xff] }
0x1158   : > { %11196 = vadd.xlane.f32.xlu1 %v11195_v7  ;;  %v11198_v3 = vsel %vm11116_vm5, %v11111_v2, 0.0 }
0x1159   : > { %v10938_v1 = vadd.f32 %v10901_v21, %v10714_v55  ;;  %v10715_v41 = vadd.f32 %v14469_v59, %v19637_v23  ;;  %11199 = vadd.xlane.f32.xlu0 %v11198_v3  ;;  %v11018_v28 = vpack.c.bf16 %v11001_v19, %v11000_v14 }
0x115b   : > { %v10970_v20 = vmul.f32 0.2, %v10938_v1  ;;  %v10939_v5 = vadd.f32 %v10906_v57, %v10715_v41  ;;  %v11048_v33 = vunpack.c.l.bf16 %v11018_v28  ;;  %v11049_v43 = vunpack.c.h.bf16 %v11018_v28 }
0x115d   : > { %v10971_v36 = vmul.f32 0.2, %v10939_v5  ;;  %v11112_v18 = vmul.f32 %v11080_v32, %v11048_v33  ;;  %v11113_v35 = vmul.f32 %v11081_v48, %v11049_v43  ;;  %v11002_v40 = vmax.f32 %v10938_v1, %v10970_v20 }
0x115f   : > { %v11003_v23 = vmax.f32 %v10939_v5, %v10971_v36  ;;  %v11201_v56 = vsel %vm11116_vm5, %v11112_v18, 0.0  ;;  %v11204_v16 = vsel %vm11116_vm5, %v11113_v35, 0.0 }
0x1160   : > { %11202 = vadd.xlane.f32.xlu1 %v11201_v56  ;;  %11205 = vadd.xlane.f32.xlu0 %v11204_v16 }
0x1161   : > { %v11019_v63 = vpack.c.bf16 %v11003_v23, %v11002_v40 }
0x1163   : > { %v11050_v17 = vunpack.c.l.bf16 %v11019_v63  ;;  %v11051_v0 = vunpack.c.h.bf16 %v11019_v63 }
0x1165   : > { %v11114_v13 = vmul.f32 %v11082_v44, %v11050_v17  ;;  %v11115_v53 = vmul.f32 %v11083_v22, %v11051_v0 }
0x1167   : > { %v11207_v29 = vsel %vm11116_vm5, %v11114_v13, 0.0  ;;  %v11210_v4 = vsel %vm11116_vm5, %v11115_v53, 0.0 }
0x1168   : > { %11208 = vadd.xlane.f32.xlu1 %v11207_v29  ;;  %11211 = vadd.xlane.f32.xlu0 %v11210_v4 }
0x117e   : > { %v11119_v37 = vpop.xlane.xlu0 %11118  ;;  %v11122_v49 = vpop.xlane.xlu1 %11121 }
0x117f   : > { %v11213_v6 = vadd.f32 %v11122_v49, %v11119_v37 }
0x1186   : > { %v11125_v12 = vpop.xlane.xlu0 %11124 }
0x1187   : > { %v11214_v52 = vadd.f32 %v11213_v6, %v11125_v12 }
0x118a   : > { %v11128_v62 = vpop.xlane.xlu0 %11127 }
0x118b   : > { %v11215_v39 = vadd.f32 %v11214_v52, %v11128_v62 }
0x118e   : > { %v11131_v61 = vpop.xlane.xlu1 %11130  ;;  %v11134_v9 = vpop.xlane.xlu0 %11133 }
0x118f   : > { %v11216_v50 = vadd.f32 %v11215_v39, %v11131_v61 }
0x1191   : > { %v11217_v58 = vadd.f32 %v11216_v50, %v11134_v9 }
0x1196   : > { %v11137_v25 = vpop.xlane.xlu1 %11136  ;;  %v11140_v60 = vpop.xlane.xlu0 %11139 }
0x1197   : > { %v11218_v8 = vadd.f32 %v11217_v58, %v11137_v25 }
0x1199   : > { %v11219_v10 = vadd.f32 %v11218_v8, %v11140_v60 }
0x119e   : > { %v11143_v31 = vpop.xlane.xlu1 %11142  ;;  %v11146_v46 = vpop.xlane.xlu0 %11145 }
0x119f   : > { %v11220_v24 = vadd.f32 %v11219_v10, %v11143_v31 }
0x11a1   : > { %v11221_v54 = vadd.f32 %v11220_v24, %v11146_v46 }
0x11a6   : > { %v11149_v42 = vpop.xlane.xlu1 %11148  ;;  %v11152_v26 = vpop.xlane.xlu0 %11151 }
0x11a7   : > { %v11222_v45 = vadd.f32 %v11221_v54, %v11149_v42 }
0x11a9   : > { %v11223_v51 = vadd.f32 %v11222_v45, %v11152_v26 }
0x11ad   : > { %v11155_v11 = vpop.xlane.xlu1 %11154  ;;  %v11158_v30 = vpop.xlane.xlu0 %11157 }
0x11ae   : > { %v11224_v15 = vadd.f32 %v11223_v51, %v11155_v11 }
0x11b0   : > { %v11225_v38 = vadd.f32 %v11224_v15, %v11158_v30 }
0x11b6   : > { %v11161_v47 = vpop.xlane.xlu1 %11160  ;;  %v11164_v14 = vpop.xlane.xlu0 %11163 }
0x11b7   : > { %v11226_v27 = vadd.f32 %v11225_v38, %v11161_v47 }
0x11b9   : > { %v11227_v2 = vadd.f32 %v11226_v27, %v11164_v14 }
0x11bd   : > { %v11167_v34 = vpop.xlane.xlu1 %11166 }
0x11be   : > { %v11228_v19 = vadd.f32 %v11227_v2, %v11167_v34  ;;  %v11170_v55 = vpop.xlane.xlu0 %11169 }
0x11c0   : > { %v11229_v7 = vadd.f32 %v11228_v19, %v11170_v55 }
0x11c5   : > { %v11173_v59 = vpop.xlane.xlu1 %11172 }
0x11c6   : > { %v11230_v21 = vadd.f32 %v11229_v7, %v11173_v59  ;;  %v11176_v3 = vpop.xlane.xlu0 %11175 }
0x11c8   : > { %v11231_v41 = vadd.f32 %v11230_v21, %v11176_v3 }
0x11cd   : > { %v11179_v1 = vpop.xlane.xlu1 %11178 }
0x11ce   : > { %v11232_v28 = vadd.f32 %v11231_v41, %v11179_v1  ;;  %v11182_v57 = vpop.xlane.xlu0 %11181 }
0x11d0   : > { %v11233_v48 = vadd.f32 %v11232_v28, %v11182_v57 }
0x11d5   : > { %v11185_v32 = vpop.xlane.xlu1 %11184 }
0x11d6   : > { %v11234_v20 = vadd.f32 %v11233_v48, %v11185_v32  ;;  %v11188_v5 = vpop.xlane.xlu0 %11187 }
0x11d8   : > { %v11235_v43 = vadd.f32 %v11234_v20, %v11188_v5 }
0x11dd   : > { %v11191_v33 = vpop.xlane.xlu1 %11190 }
0x11de   : > { %v11236_v36 = vadd.f32 %v11235_v43, %v11191_v33  ;;  %v11194_v18 = vpop.xlane.xlu0 %11193 }
0x11e0   : > { %v11237_v40 = vadd.f32 %v11236_v36, %v11194_v18 }
0x11e5   : > { %v11197_v35 = vpop.xlane.xlu1 %11196 }
0x11e6   : > { %v11238_v23 = vadd.f32 %v11237_v40, %v11197_v35  ;;  %v11200_v56 = vpop.xlane.xlu0 %11199 }
0x11e8   : > { %v11239_v63 = vadd.f32 %v11238_v23, %v11200_v56 }
0x11ed   : > { %v11203_v16 = vpop.xlane.xlu1 %11202  ;;  %v11206_v22 = vpop.xlane.xlu0 %11205 }
0x11ee   : > { %v11240_v44 = vadd.f32 %v11239_v63, %v11203_v16 }
0x11f0   : > { %v11241_v17 = vadd.f32 %v11240_v44, %v11206_v22 }
0x11f5   : > { %v11209_v0 = vpop.xlane.xlu1 %11208  ;;  %v11212_v53 = vpop.xlane.xlu0 %11211 }
0x11f6   : > { %v11242_v13 = vadd.f32 %v11241_v17, %v11209_v0 }
0x11f8   : > { %v11243_v29 = vadd.f32 %v11242_v13, %v11212_v53 }
0x11fa   : > { %v11244_v4 = vrot.slane %v11243_v29, 4 }
0x11fc   : > { %v11245_v37 = vadd.f32 %v11244_v4, %v11243_v29 }
0x11fe   : > { %v11246_v12 = vrot.slane %v11245_v37, 2 }
0x1200   : > { %v11247_v49 = vadd.f32 %v11246_v12, %v11245_v37 }
0x1202   : > { %v11248_v6 = vrot.slane %v11247_v49, 1 }
0x1204   : > { %v11249_v62 = vadd.f32 %v11248_v6, %v11247_v49 }
0x1206   : > { %v11250_v52 = vsub.f32 0.0, %v11249_v62 }
0x1208   : > { %v11251_v61 = vmul.f32 1.442695, %v11250_v52 }
0x120a   : > { %15912 = vpow2.f32 %v11251_v61 }
0x1214   : > { %v15913_v39 = vpop.eup %15912 }
0x1215   : > { %v11253_v50 = vadd.f32 1.0, %v15913_v39 }
0x1217   : > { %15914 = vrcp.f32 %v11253_v50 }
0x1221   : > { %v15915_v9 = vpop.eup %15914 }
0x1222   : > { %11257 = vst.msk [vmem:[%s493_s28] sm:$0x1] %vm11256_vm6, %v15915_v9 }
0x1223 PF: > { %s19831_s24 = sld [smem:[#allocation8_spill]] }
0x1229   : > { %s26_s29 = sadd.s32 1, %s19831_s24  }
0x122a   : > { %p23_p5 = scmp.ge.s32.totalorder %s26_s29, 4  }
0x122c   :  { %25 = sbr.rel (!%p23_p5) target bundleno = 2 (0x2), region = 139 }
0x1233   :  { %11275 = vsyncpa [#allocation3], 1 }
0x1234   :  { %11277 = vsyncpa [#allocation3 + $0x1], 1 }
0x1235   :  { %11278 = vsyncpa [#allocation5], 1 }

</bundles_post_ra>
